<compile_context>
chip_gen: v7x
topology: tpu7x:2x2x1
jax: 0.10.0
libtpu: 0.0.40
codegen_flags: <defaults>
</compile_context>

<pallas_src>
import functools

import jax
import jax.numpy as jnp
from jax.experimental import pallas as pl
from jax.experimental.pallas import tpu as pltpu


# --------------------------------------------------------------------------
# Pallas kernels
# --------------------------------------------------------------------------
def _mm_bias_kernel(a_ref, b_ref, bias_ref, o_ref, *, relu):
    acc = jnp.dot(a_ref[...], b_ref[...], preferred_element_type=jnp.float32)
    acc = acc + bias_ref[...]
    if relu:
        acc = jnp.maximum(acc, 0.0)
    o_ref[...] = acc


def _mm_bias_res_relu_kernel(a_ref, b_ref, bias_ref, res_ref, o_ref):
    acc = jnp.dot(a_ref[...], b_ref[...], preferred_element_type=jnp.float32)
    o_ref[...] = jnp.maximum(acc + bias_ref[...] + res_ref[...], 0.0)


def _max_tree_kernel(*refs):
    *in_refs, o_ref = refs
    m = in_refs[0][...]
    for r in in_refs[1:]:
        m = jnp.maximum(m, r[...])
    o_ref[...] = m


def _head_kernel(spp_ref, w1_ref, b1_ref, w2_ref, b2_ref, o_ref):
    # Linear(1344,128) + ReLU -> Linear(128,2) -> Softmax(dim=1), all fused.
    h = jnp.dot(spp_ref[...], w1_ref[...], preferred_element_type=jnp.float32)
    h = jnp.maximum(h + b1_ref[...], 0.0)
    logits = jnp.dot(h.astype(w2_ref.dtype), w2_ref[...],
                     preferred_element_type=jnp.float32) + b2_ref[...]
    m = jnp.max(logits, axis=-1, keepdims=True)
    e = jnp.exp(logits - m)
    # Exact division (not approx reciprocal) so rows sum to 1 within ~1e-7.
    o_ref[...] = e / jnp.sum(e, axis=-1, keepdims=True)


# --------------------------------------------------------------------------
# Pallas wrappers
# --------------------------------------------------------------------------
def _round_up(v, m):
    return (v + m - 1) // m * m


def matmul_bias(a, b, bias, *, relu, residual=None):
    """(M,K) @ (K,N) + bias[N] (+ optional fused residual), optional ReLU.

    Operands are cast to bf16, K is zero-padded to a multiple of 128 (exact),
    accumulation and the epilogue stay f32.  M is split into two 'parallel'
    grid blocks when large enough so both v7x TensorCores get work while the
    per-step overhead stays negligible on v5e/v6e.
    """
    M, K = a.shape
    K2, N = b.shape
    assert K == K2
    a = a.astype(jnp.bfloat16)
    b = b.astype(jnp.bfloat16)
    Kp = _round_up(K, 128)
    if Kp != K:
        a = jnp.pad(a, ((0, 0), (0, Kp - K)))
        b = jnp.pad(b, ((0, Kp - K), (0, 0)))
    bias2d = bias.reshape(1, N).astype(jnp.float32)

    if M >= 512 and M % 16 == 0:
        tm = M // 2            # two parallel blocks (megacore friendly)
    else:
        tm = M                 # tiny problem: single block
    grid = (M // tm,)

    in_arrays = [a, b, bias2d]
    in_specs = [
        pl.BlockSpec((tm, Kp), lambda i: (i, 0)),
        pl.BlockSpec((Kp, N), lambda i: (0, 0)),   # weights stay resident
        pl.BlockSpec((1, N), lambda i: (0, 0)),
    ]
    if residual is not None:
        kern = _mm_bias_res_relu_kernel
        in_arrays.append(residual.astype(jnp.float32))
        in_specs.append(pl.BlockSpec((tm, N), lambda i: (i, 0)))
    else:
        kern = functools.partial(_mm_bias_kernel, relu=relu)

    return pl.pallas_call(
        kern,
        out_shape=jax.ShapeDtypeStruct((M, N), jnp.float32),
        grid=grid,
        in_specs=in_specs,
        out_specs=pl.BlockSpec((tm, N), lambda i: (i, 0)),
        compiler_params=pltpu.CompilerParams(
            dimension_semantics=("parallel",)),
    )(*in_arrays)


def maxpool2d(x, k, stride, pad):
    """PyTorch MaxPool2d semantics (pad behaves like -inf).  One Pallas kernel
    max-reduces the k*k shifted windows passed as lane-dense (R,128) inputs —
    no (k*k, M, C) stack materialized in HBM, no masked 64-lane stores."""
    N, H, W, C = x.shape
    neg = jnp.float32(-1e30)
    xp = jnp.pad(x, ((0, 0), (pad, pad), (pad, pad), (0, 0)),
                 constant_values=neg) if pad else x
    OH = (H + 2 * pad - k) // stride + 1
    OW = (W + 2 * pad - k) // stride + 1
    total = N * OH * OW * C
    assert total % 128 == 0
    R = total // 128
    wins = []
    for di in range(k):
        for dj in range(k):
            w = xp[:, di:di + stride * (OH - 1) + 1:stride,
                   dj:dj + stride * (OW - 1) + 1:stride, :]
            wins.append(w.reshape(R, 128))
    out = pl.pallas_call(
        _max_tree_kernel,
        out_shape=jax.ShapeDtypeStruct((R, 128), jnp.float32),
    )(*wins)
    return out.reshape(N, OH, OW, C)


def fused_head(spp, w1, b1, w2, b2):
    """SPP features -> Linear+ReLU -> Linear -> Softmax in one Pallas call."""
    bt = spp.shape[0]
    return pl.pallas_call(
        _head_kernel,
        out_shape=jax.ShapeDtypeStruct((bt, w2.shape[1]), jnp.float32),
    )(spp.astype(jnp.bfloat16), w1.astype(jnp.bfloat16),
      b1.reshape(1, -1).astype(jnp.float32),
      w2.astype(jnp.bfloat16), b2.reshape(1, -1).astype(jnp.float32))


# --------------------------------------------------------------------------
# Glue: im2col, BN folding, SPP (plain JAX / XLA)
# --------------------------------------------------------------------------
def _im2col(x, kh, kw, stride, pad):
    # x: (N, H, W, C) -> (N*OH*OW, kh*kw*C), feature order (kh, kw, c)
    N, H, W, C = x.shape
    xp = jnp.pad(x, ((0, 0), (pad, pad), (pad, pad), (0, 0)))
    OH = (H + 2 * pad - kh) // stride + 1
    OW = (W + 2 * pad - kw) // stride + 1
    patches = []
    for di in range(kh):
        for dj in range(kw):
            patches.append(
                xp[:, di:di + stride * (OH - 1) + 1:stride,
                   dj:dj + stride * (OW - 1) + 1:stride, :])
    col = jnp.concatenate(patches, axis=-1)
    return col.reshape(N * OH * OW, kh * kw * C), OH, OW


def conv2d_bias_act(x, w_mat, bias, kh, kw, stride, pad, relu, residual=None):
    # x: (N,H,W,Cin);  w_mat: (kh*kw*Cin, Cout);  bias: (Cout,)
    N, H, W, C = x.shape
    col, OH, OW = _im2col(x.astype(jnp.bfloat16), kh, kw, stride, pad)
    res = None
    if residual is not None:
        res = residual.reshape(N * OH * OW, w_mat.shape[1])
    out = matmul_bias(col, w_mat, bias, relu=relu, residual=res)
    return out.reshape(N, OH, OW, w_mat.shape[1])


def fold_bn(w_mat, conv_bias, bn, eps=1e-5):
    scale = bn["g"] / jnp.sqrt(bn["v"] + eps)
    w = w_mat * scale[None, :]
    b = (conv_bias - bn["m"]) * scale + bn["b"]
    return w, b


def spatial_pyramid_pool(x, bt, out_pool_size):
    # x: (N,H,W,C); equals the standard PyTorch SPP when H,W are multiples of
    # each output size (pad = 0, kernel == stride).  Pooling is a reshaped
    # XLA max-reduce (fuses, no HBM window stack).  Flatten order matches the
    # PyTorch NCHW .view(bt, -1).
    N, H, W, C = x.shape
    feats = []
    for o in out_pool_size:
        assert H % o == 0 and W % o == 0
        kh, kw = H // o, W // o
        pooled = x.reshape(N, o, kh, o, kw, C).max(axis=(2, 4))   # (N,o,o,C)
        feats.append(jnp.transpose(pooled, (0, 3, 1, 2)).reshape(bt, -1))
    return jnp.concatenate(feats, axis=1)


# --------------------------------------------------------------------------
# Model: truncated ResNet-18 feature extractor + CIS heads
# --------------------------------------------------------------------------
def resnet18_features(x, p):
    # stem: conv7x7/2 -> BN -> ReLU -> maxpool3x3/2
    w, b = fold_bn(p["conv1_w"], jnp.zeros((64,), jnp.float32), p["bn1"])
    h = conv2d_bias_act(x, w, b, 7, 7, 2, 3, relu=True)
    h = maxpool2d(h, 3, 2, 1)
    # layer1: 2 basic blocks (64 -> 64), stride 1, identity shortcut; the
    # residual add+ReLU is fused into the second conv's matmul epilogue.
    for blk in p["layer1"]:
        w1, b1 = fold_bn(blk["c1_w"], jnp.zeros((64,), jnp.float32), blk["bn1"])
        t = conv2d_bias_act(h, w1, b1, 3, 3, 1, 1, relu=True)
        w2, b2 = fold_bn(blk["c2_w"], jnp.zeros((64,), jnp.float32), blk["bn2"])
        h = conv2d_bias_act(t, w2, b2, 3, 3, 1, 1, relu=True, residual=h)
    return h


def cis_resnet_forward(params, x_nchw, y_nchw, bt):
    # Batch x and y through the shared extractor in ONE pass (dec1 weights
    # are shared), then split — halves the extractor's kernel launches.
    xy = jnp.transpose(jnp.concatenate([x_nchw, y_nchw], axis=0),
                       (0, 2, 3, 1))                      # NCHW -> NHWC
    feats = resnet18_features(xy, params["dec1"])
    x_f1, y_f1 = feats[:bt], feats[bt:]
    enc = jnp.concatenate([x_f1, y_f1], axis=-1)          # channel concat
    # cis1: Conv2d(128,64,3,p=1) + BN + ReLU  (BN folded)
    p1 = params["cis1"]
    w, b = fold_bn(p1["w"], p1["b"], p1["bn"])
    clc1 = conv2d_bias_act(enc, w, b, 3, 3, 1, 1, relu=True)
    # SPP -> (bt, 1344) -> fused Linear(1344,128)+ReLU -> Linear(128,2)
    # -> Softmax(dim=1), all in ONE Pallas kernel.
    spp = spatial_pyramid_pool(clc1, bt, [4, 2, 1])
    p2 = params["cis2"]
    return fused_head(spp, p2["w1"], p2["b1"], p2["w2"], p2["b2"])


# --------------------------------------------------------------------------
# Deterministic parameter initialization
# --------------------------------------------------------------------------
def init_params(key):
    keys = iter(jax.random.split(key, 64))

    def nrm(shape, s=0.05):
        return s * jax.random.normal(next(keys), shape, jnp.float32)

    def bn(c):
        return dict(g=1.0 + nrm((c,), 0.02), b=nrm((c,), 0.02),
                    m=nrm((c,), 0.02),
                    v=jax.random.uniform(next(keys), (c,), jnp.float32,
                                         0.5, 1.5))

    dec1 = dict(
        conv1_w=nrm((7 * 7 * 3, 64)),
        bn1=bn(64),
        layer1=[dict(c1_w=nrm((3 * 3 * 64, 64)), bn1=bn(64),
                     c2_w=nrm((3 * 3 * 64, 64)), bn2=bn(64))
                for _ in range(2)],
    )
    cis1 = dict(w=nrm((3 * 3 * 128, 64)), b=nrm((64,)), bn=bn(64))
    cis2 = dict(w1=nrm((1344, 128)), b1=nrm((128,)),
                w2=nrm((128, 2)), b2=nrm((2,)))
    return dict(dec1=dec1, cis1=cis1, cis2=cis2)


# --------------------------------------------------------------------------
if __name__ == "__main__":
    key = jax.random.PRNGKey(0)
    kp, kx, ky = jax.random.split(key, 3)
    params = init_params(kp)

    bt = 2
    x = jax.random.normal(kx, (bt, 3, 64, 64), jnp.float32)  # NCHW like PyTorch
    y = jax.random.normal(ky, (bt, 3, 64, 64), jnp.float32)

    fwd = jax.jit(cis_resnet_forward, static_argnums=(3,))
    out = fwd(params, x, y, bt)
    out = jax.block_until_ready(out)

    assert out.shape == (bt, 2), out.shape
    assert bool(jnp.all(jnp.isfinite(out)))
    assert bool(jnp.allclose(jnp.sum(out, axis=1), 1.0, atol=1e-5))
    print("KERNEL_OK")
</pallas_src>

<mosaic_0001>
module attributes {stable_mosaic.version = 11 : i64} {
  func.func @_mm_bias_kernel(%arg0: i32, %arg1: memref<2048x256xbf16, #tpu.memory_space<vmem>>, %arg2: memref<256x64xbf16, #tpu.memory_space<vmem>>, %arg3: memref<1x64xf32, #tpu.memory_space<vmem>>, %arg4: memref<2048x64xf32, #tpu.memory_space<vmem>>) attributes {dimension_semantics = [#tpu.dimension_semantics<parallel>], iteration_bounds = array<i64: 2>, scalar_prefetch = 0 : i64, scratch_operands = 0 : i64, tpu.core_type = #tpu.core_type<tc>, window_params = [{transform_indices = @transform_0, window_bounds = array<i64: 2048, 256>}, {pipeline_mode = #tpu.pipeline_mode<synchronous>, transform_indices = @transform_1, window_bounds = array<i64: 256, 64>}, {pipeline_mode = #tpu.pipeline_mode<synchronous>, transform_indices = @transform_2, window_bounds = array<i64: 1, 64>}, {transform_indices = @transform_3, window_bounds = array<i64: 2048, 64>}]} {
    %c0 = arith.constant 0 : index
    %c0_0 = arith.constant 0 : index
    %0 = vector.load %arg1[%c0, %c0_0] : memref<2048x256xbf16, #tpu.memory_space<vmem>>, vector<2048x256xbf16>
    %c0_1 = arith.constant 0 : index
    %c0_2 = arith.constant 0 : index
    %1 = vector.load %arg2[%c0_1, %c0_2] : memref<256x64xbf16, #tpu.memory_space<vmem>>, vector<256x64xbf16>
    %cst = arith.constant dense<0.000000e+00> : vector<2048x64xf32>
    %2 = tpu.matmul %0, %1, %cst {dimension_numbers = #tpu.dot_dimension_numbers<[1], [0], [0], [1], [0, 0, 1, 1], [], []>} : vector<2048x256xbf16>, vector<256x64xbf16>, vector<2048x64xf32> -> vector<2048x64xf32>
    %c0_3 = arith.constant 0 : index
    %c0_4 = arith.constant 0 : index
    %3 = vector.load %arg3[%c0_3, %c0_4] : memref<1x64xf32, #tpu.memory_space<vmem>>, vector<1x64xf32>
    %4 = vector.broadcast %3 : vector<1x64xf32> to vector<2048x64xf32>
    %5 = arith.addf %2, %4 : vector<2048x64xf32>
    %cst_5 = arith.constant 0.000000e+00 : f32
    %6 = vector.broadcast %cst_5 : f32 to vector<2048x64xf32>
    %7 = arith.maximumf %5, %6 : vector<2048x64xf32>
    %c0_6 = arith.constant 0 : index
    %c0_7 = arith.constant 0 : index
    %8 = vector.load %arg4[%c0_6, %c0_7] : memref<2048x64xf32, #tpu.memory_space<vmem>>, vector<2048x64xf32>
    tpu.vector_store %arg4[%c0_6, %c0_7], %7 {strides = array<i32>} : memref<2048x64xf32, #tpu.memory_space<vmem>>, vector<2048x64xf32>,
    return
  }
  func.func @transform_0(%arg0: i32) -> (i32, i32) {
    %c0_i32 = arith.constant 0 : i32
    %c0_i32_0 = arith.constant 0 : i32
    return %arg0, %c0_i32 : i32, i32
  }
  func.func @transform_1(%arg0: i32) -> (i32, i32) {
    %c0_i32 = arith.constant 0 : i32
    %c0_i32_0 = arith.constant 0 : i32
    %c0_i32_1 = arith.constant 0 : i32
    return %c0_i32, %c0_i32_0 : i32, i32
  }
  func.func @transform_2(%arg0: i32) -> (i32, i32) {
    %c0_i32 = arith.constant 0 : i32
    %c0_i32_0 = arith.constant 0 : i32
    %c0_i32_1 = arith.constant 0 : i32
    return %c0_i32, %c0_i32_0 : i32, i32
  }
  func.func @transform_3(%arg0: i32) -> (i32, i32) {
    %c0_i32 = arith.constant 0 : i32
    %c0_i32_0 = arith.constant 0 : i32
    return %arg0, %c0_i32 : i32, i32
  }
}

module attributes {stable_mosaic.version = 11 : i64} {
  func.func @_max_tree_kernel(%arg0: memref<512x128xf32, #tpu.memory_space<vmem>>, %arg1: memref<512x128xf32, #tpu.memory_space<vmem>>, %arg2: memref<512x128xf32, #tpu.memory_space<vmem>>, %arg3: memref<512x128xf32, #tpu.memory_space<vmem>>, %arg4: memref<512x128xf32, #tpu.memory_space<vmem>>, %arg5: memref<512x128xf32, #tpu.memory_space<vmem>>, %arg6: memref<512x128xf32, #tpu.memory_space<vmem>>, %arg7: memref<512x128xf32, #tpu.memory_space<vmem>>, %arg8: memref<512x128xf32, #tpu.memory_space<vmem>>, %arg9: memref<512x128xf32, #tpu.memory_space<vmem>>) attributes {dimension_semantics = [], scalar_prefetch = 0 : i64, scratch_operands = 0 : i64, tpu.core_type = #tpu.core_type<tc>} {
    %c0 = arith.constant 0 : index
    %c0_0 = arith.constant 0 : index
    %0 = vector.load %arg0[%c0, %c0_0] : memref<512x128xf32, #tpu.memory_space<vmem>>, vector<512x128xf32>
    %c0_1 = arith.constant 0 : index
    %c0_2 = arith.constant 0 : index
    %1 = vector.load %arg1[%c0_1, %c0_2] : memref<512x128xf32, #tpu.memory_space<vmem>>, vector<512x128xf32>
    %2 = arith.maximumf %0, %1 : vector<512x128xf32>
    %c0_3 = arith.constant 0 : index
    %c0_4 = arith.constant 0 : index
    %3 = vector.load %arg2[%c0_3, %c0_4] : memref<512x128xf32, #tpu.memory_space<vmem>>, vector<512x128xf32>
    %4 = arith.maximumf %2, %3 : vector<512x128xf32>
    %c0_5 = arith.constant 0 : index
    %c0_6 = arith.constant 0 : index
    %5 = vector.load %arg3[%c0_5, %c0_6] : memref<512x128xf32, #tpu.memory_space<vmem>>, vector<512x128xf32>
    %6 = arith.maximumf %4, %5 : vector<512x128xf32>
    %c0_7 = arith.constant 0 : index
    %c0_8 = arith.constant 0 : index
    %7 = vector.load %arg4[%c0_7, %c0_8] : memref<512x128xf32, #tpu.memory_space<vmem>>, vector<512x128xf32>
    %8 = arith.maximumf %6, %7 : vector<512x128xf32>
    %c0_9 = arith.constant 0 : index
    %c0_10 = arith.constant 0 : index
    %9 = vector.load %arg5[%c0_9, %c0_10] : memref<512x128xf32, #tpu.memory_space<vmem>>, vector<512x128xf32>
    %10 = arith.maximumf %8, %9 : vector<512x128xf32>
    %c0_11 = arith.constant 0 : index
    %c0_12 = arith.constant 0 : index
    %11 = vector.load %arg6[%c0_11, %c0_12] : memref<512x128xf32, #tpu.memory_space<vmem>>, vector<512x128xf32>
    %12 = arith.maximumf %10, %11 : vector<512x128xf32>
    %c0_13 = arith.constant 0 : index
    %c0_14 = arith.constant 0 : index
    %13 = vector.load %arg7[%c0_13, %c0_14] : memref<512x128xf32, #tpu.memory_space<vmem>>, vector<512x128xf32>
    %14 = arith.maximumf %12, %13 : vector<512x128xf32>
    %c0_15 = arith.constant 0 : index
    %c0_16 = arith.constant 0 : index
    %15 = vector.load %arg8[%c0_15, %c0_16] : memref<512x128xf32, #tpu.memory_space<vmem>>, vector<512x128xf32>
    %16 = arith.maximumf %14, %15 : vector<512x128xf32>
    %c0_17 = arith.constant 0 : index
    %c0_18 = arith.constant 0 : index
    %17 = vector.load %arg9[%c0_17, %c0_18] : memref<512x128xf32, #tpu.memory_space<vmem>>, vector<512x128xf32>
    tpu.vector_store %arg9[%c0_17, %c0_18], %16 {strides = array<i32>} : memref<512x128xf32, #tpu.memory_space<vmem>>, vector<512x128xf32>,
    return
  }
}

module attributes {stable_mosaic.version = 11 : i64} {
  func.func @_mm_bias_kernel(%arg0: i32, %arg1: memref<512x640xbf16, #tpu.memory_space<vmem>>, %arg2: memref<640x64xbf16, #tpu.memory_space<vmem>>, %arg3: memref<1x64xf32, #tpu.memory_space<vmem>>, %arg4: memref<512x64xf32, #tpu.memory_space<vmem>>) attributes {dimension_semantics = [#tpu.dimension_semantics<parallel>], iteration_bounds = array<i64: 2>, scalar_prefetch = 0 : i64, scratch_operands = 0 : i64, tpu.core_type = #tpu.core_type<tc>, window_params = [{transform_indices = @transform_0, window_bounds = array<i64: 512, 640>}, {pipeline_mode = #tpu.pipeline_mode<synchronous>, transform_indices = @transform_1, window_bounds = array<i64: 640, 64>}, {pipeline_mode = #tpu.pipeline_mode<synchronous>, transform_indices = @transform_2, window_bounds = array<i64: 1, 64>}, {transform_indices = @transform_3, window_bounds = array<i64: 512, 64>}]} {
    %c0 = arith.constant 0 : index
    %c0_0 = arith.constant 0 : index
    %0 = vector.load %arg1[%c0, %c0_0] : memref<512x640xbf16, #tpu.memory_space<vmem>>, vector<512x640xbf16>
    %c0_1 = arith.constant 0 : index
    %c0_2 = arith.constant 0 : index
    %1 = vector.load %arg2[%c0_1, %c0_2] : memref<640x64xbf16, #tpu.memory_space<vmem>>, vector<640x64xbf16>
    %cst = arith.constant dense<0.000000e+00> : vector<512x64xf32>
    %2 = tpu.matmul %0, %1, %cst {dimension_numbers = #tpu.dot_dimension_numbers<[1], [0], [0], [1], [0, 0, 1, 1], [], []>} : vector<512x640xbf16>, vector<640x64xbf16>, vector<512x64xf32> -> vector<512x64xf32>
    %c0_3 = arith.constant 0 : index
    %c0_4 = arith.constant 0 : index
    %3 = vector.load %arg3[%c0_3, %c0_4] : memref<1x64xf32, #tpu.memory_space<vmem>>, vector<1x64xf32>
    %4 = vector.broadcast %3 : vector<1x64xf32> to vector<512x64xf32>
    %5 = arith.addf %2, %4 : vector<512x64xf32>
    %cst_5 = arith.constant 0.000000e+00 : f32
    %6 = vector.broadcast %cst_5 : f32 to vector<512x64xf32>
    %7 = arith.maximumf %5, %6 : vector<512x64xf32>
    %c0_6 = arith.constant 0 : index
    %c0_7 = arith.constant 0 : index
    %8 = vector.load %arg4[%c0_6, %c0_7] : memref<512x64xf32, #tpu.memory_space<vmem>>, vector<512x64xf32>
    tpu.vector_store %arg4[%c0_6, %c0_7], %7 {strides = array<i32>} : memref<512x64xf32, #tpu.memory_space<vmem>>, vector<512x64xf32>,
    return
  }
  func.func @transform_0(%arg0: i32) -> (i32, i32) {
    %c0_i32 = arith.constant 0 : i32
    %c0_i32_0 = arith.constant 0 : i32
    return %arg0, %c0_i32 : i32, i32
  }
  func.func @transform_1(%arg0: i32) -> (i32, i32) {
    %c0_i32 = arith.constant 0 : i32
    %c0_i32_0 = arith.constant 0 : i32
    %c0_i32_1 = arith.constant 0 : i32
    return %c0_i32, %c0_i32_0 : i32, i32
  }
  func.func @transform_2(%arg0: i32) -> (i32, i32) {
    %c0_i32 = arith.constant 0 : i32
    %c0_i32_0 = arith.constant 0 : i32
    %c0_i32_1 = arith.constant 0 : i32
    return %c0_i32, %c0_i32_0 : i32, i32
  }
  func.func @transform_3(%arg0: i32) -> (i32, i32) {
    %c0_i32 = arith.constant 0 : i32
    %c0_i32_0 = arith.constant 0 : i32
    return %arg0, %c0_i32 : i32, i32
  }
}

module attributes {stable_mosaic.version = 11 : i64} {
  func.func @_mm_bias_res_relu_kernel(%arg0: i32, %arg1: memref<512x640xbf16, #tpu.memory_space<vmem>>, %arg2: memref<640x64xbf16, #tpu.memory_space<vmem>>, %arg3: memref<1x64xf32, #tpu.memory_space<vmem>>, %arg4: memref<512x64xf32, #tpu.memory_space<vmem>>, %arg5: memref<512x64xf32, #tpu.memory_space<vmem>>) attributes {dimension_semantics = [#tpu.dimension_semantics<parallel>], iteration_bounds = array<i64: 2>, scalar_prefetch = 0 : i64, scratch_operands = 0 : i64, tpu.core_type = #tpu.core_type<tc>, window_params = [{transform_indices = @transform_0, window_bounds = array<i64: 512, 640>}, {pipeline_mode = #tpu.pipeline_mode<synchronous>, transform_indices = @transform_1, window_bounds = array<i64: 640, 64>}, {pipeline_mode = #tpu.pipeline_mode<synchronous>, transform_indices = @transform_2, window_bounds = array<i64: 1, 64>}, {transform_indices = @transform_3, window_bounds = array<i64: 512, 64>}, {transform_indices = @transform_4, window_bounds = array<i64: 512, 64>}]} {
    %c0 = arith.constant 0 : index
    %c0_0 = arith.constant 0 : index
    %0 = vector.load %arg1[%c0, %c0_0] : memref<512x640xbf16, #tpu.memory_space<vmem>>, vector<512x640xbf16>
    %c0_1 = arith.constant 0 : index
    %c0_2 = arith.constant 0 : index
    %1 = vector.load %arg2[%c0_1, %c0_2] : memref<640x64xbf16, #tpu.memory_space<vmem>>, vector<640x64xbf16>
    %cst = arith.constant dense<0.000000e+00> : vector<512x64xf32>
    %2 = tpu.matmul %0, %1, %cst {dimension_numbers = #tpu.dot_dimension_numbers<[1], [0], [0], [1], [0, 0, 1, 1], [], []>} : vector<512x640xbf16>, vector<640x64xbf16>, vector<512x64xf32> -> vector<512x64xf32>
    %c0_3 = arith.constant 0 : index
    %c0_4 = arith.constant 0 : index
    %3 = vector.load %arg3[%c0_3, %c0_4] : memref<1x64xf32, #tpu.memory_space<vmem>>, vector<1x64xf32>
    %4 = vector.broadcast %3 : vector<1x64xf32> to vector<512x64xf32>
    %5 = arith.addf %2, %4 : vector<512x64xf32>
    %c0_5 = arith.constant 0 : index
    %c0_6 = arith.constant 0 : index
    %6 = vector.load %arg4[%c0_5, %c0_6] : memref<512x64xf32, #tpu.memory_space<vmem>>, vector<512x64xf32>
    %7 = arith.addf %5, %6 : vector<512x64xf32>
    %cst_7 = arith.constant 0.000000e+00 : f32
    %8 = vector.broadcast %cst_7 : f32 to vector<512x64xf32>
    %9 = arith.maximumf %7, %8 : vector<512x64xf32>
    %c0_8 = arith.constant 0 : index
    %c0_9 = arith.constant 0 : index
    %10 = vector.load %arg5[%c0_8, %c0_9] : memref<512x64xf32, #tpu.memory_space<vmem>>, vector<512x64xf32>
    tpu.vector_store %arg5[%c0_8, %c0_9], %9 {strides = array<i32>} : memref<512x64xf32, #tpu.memory_space<vmem>>, vector<512x64xf32>,
    return
  }
  func.func @transform_0(%arg0: i32) -> (i32, i32) {
    %c0_i32 = arith.constant 0 : i32
    %c0_i32_0 = arith.constant 0 : i32
    return %arg0, %c0_i32 : i32, i32
  }
  func.func @transform_1(%arg0: i32) -> (i32, i32) {
    %c0_i32 = arith.constant 0 : i32
    %c0_i32_0 = arith.constant 0 : i32
    %c0_i32_1 = arith.constant 0 : i32
    return %c0_i32, %c0_i32_0 : i32, i32
  }
  func.func @transform_2(%arg0: i32) -> (i32, i32) {
    %c0_i32 = arith.constant 0 : i32
    %c0_i32_0 = arith.constant 0 : i32
    %c0_i32_1 = arith.constant 0 : i32
    return %c0_i32, %c0_i32_0 : i32, i32
  }
  func.func @transform_3(%arg0: i32) -> (i32, i32) {
    %c0_i32 = arith.constant 0 : i32
    %c0_i32_0 = arith.constant 0 : i32
    return %arg0, %c0_i32 : i32, i32
  }
  func.func @transform_4(%arg0: i32) -> (i32, i32) {
    %c0_i32 = arith.constant 0 : i32
    %c0_i32_0 = arith.constant 0 : i32
    return %arg0, %c0_i32 : i32, i32
  }
}

module attributes {stable_mosaic.version = 11 : i64} {
  func.func @_mm_bias_kernel(%arg0: i32, %arg1: memref<256x1152xbf16, #tpu.memory_space<vmem>>, %arg2: memref<1152x64xbf16, #tpu.memory_space<vmem>>, %arg3: memref<1x64xf32, #tpu.memory_space<vmem>>, %arg4: memref<256x64xf32, #tpu.memory_space<vmem>>) attributes {dimension_semantics = [#tpu.dimension_semantics<parallel>], iteration_bounds = array<i64: 2>, scalar_prefetch = 0 : i64, scratch_operands = 0 : i64, tpu.core_type = #tpu.core_type<tc>, window_params = [{transform_indices = @transform_0, window_bounds = array<i64: 256, 1152>}, {pipeline_mode = #tpu.pipeline_mode<synchronous>, transform_indices = @transform_1, window_bounds = array<i64: 1152, 64>}, {pipeline_mode = #tpu.pipeline_mode<synchronous>, transform_indices = @transform_2, window_bounds = array<i64: 1, 64>}, {transform_indices = @transform_3, window_bounds = array<i64: 256, 64>}]} {
    %c0 = arith.constant 0 : index
    %c0_0 = arith.constant 0 : index
    %0 = vector.load %arg1[%c0, %c0_0] : memref<256x1152xbf16, #tpu.memory_space<vmem>>, vector<256x1152xbf16>
    %c0_1 = arith.constant 0 : index
    %c0_2 = arith.constant 0 : index
    %1 = vector.load %arg2[%c0_1, %c0_2] : memref<1152x64xbf16, #tpu.memory_space<vmem>>, vector<1152x64xbf16>
    %cst = arith.constant dense<0.000000e+00> : vector<256x64xf32>
    %2 = tpu.matmul %0, %1, %cst {dimension_numbers = #tpu.dot_dimension_numbers<[1], [0], [0], [1], [0, 0, 1, 1], [], []>} : vector<256x1152xbf16>, vector<1152x64xbf16>, vector<256x64xf32> -> vector<256x64xf32>
    %c0_3 = arith.constant 0 : index
    %c0_4 = arith.constant 0 : index
    %3 = vector.load %arg3[%c0_3, %c0_4] : memref<1x64xf32, #tpu.memory_space<vmem>>, vector<1x64xf32>
    %4 = vector.broadcast %3 : vector<1x64xf32> to vector<256x64xf32>
    %5 = arith.addf %2, %4 : vector<256x64xf32>
    %cst_5 = arith.constant 0.000000e+00 : f32
    %6 = vector.broadcast %cst_5 : f32 to vector<256x64xf32>
    %7 = arith.maximumf %5, %6 : vector<256x64xf32>
    %c0_6 = arith.constant 0 : index
    %c0_7 = arith.constant 0 : index
    %8 = vector.load %arg4[%c0_6, %c0_7] : memref<256x64xf32, #tpu.memory_space<vmem>>, vector<256x64xf32>
    tpu.vector_store %arg4[%c0_6, %c0_7], %7 {strides = array<i32>} : memref<256x64xf32, #tpu.memory_space<vmem>>, vector<256x64xf32>,
    return
  }
  func.func @transform_0(%arg0: i32) -> (i32, i32) {
    %c0_i32 = arith.constant 0 : i32
    %c0_i32_0 = arith.constant 0 : i32
    return %arg0, %c0_i32 : i32, i32
  }
  func.func @transform_1(%arg0: i32) -> (i32, i32) {
    %c0_i32 = arith.constant 0 : i32
    %c0_i32_0 = arith.constant 0 : i32
    %c0_i32_1 = arith.constant 0 : i32
    return %c0_i32, %c0_i32_0 : i32, i32
  }
  func.func @transform_2(%arg0: i32) -> (i32, i32) {
    %c0_i32 = arith.constant 0 : i32
    %c0_i32_0 = arith.constant 0 : i32
    %c0_i32_1 = arith.constant 0 : i32
    return %c0_i32, %c0_i32_0 : i32, i32
  }
  func.func @transform_3(%arg0: i32) -> (i32, i32) {
    %c0_i32 = arith.constant 0 : i32
    %c0_i32_0 = arith.constant 0 : i32
    return %arg0, %c0_i32 : i32, i32
  }
}

module attributes {stable_mosaic.version = 11 : i64} {
  func.func @_head_kernel(%arg0: memref<2x1344xbf16, #tpu.memory_space<vmem>>, %arg1: memref<1344x128xbf16, #tpu.memory_space<vmem>>, %arg2: memref<1x128xf32, #tpu.memory_space<vmem>>, %arg3: memref<128x2xbf16, #tpu.memory_space<vmem>>, %arg4: memref<1x2xf32, #tpu.memory_space<vmem>>, %arg5: memref<2x2xf32, #tpu.memory_space<vmem>>) attributes {dimension_semantics = [], scalar_prefetch = 0 : i64, scratch_operands = 0 : i64, tpu.core_type = #tpu.core_type<tc>} {
    %c0 = arith.constant 0 : index
    %c0_0 = arith.constant 0 : index
    %0 = vector.load %arg0[%c0, %c0_0] : memref<2x1344xbf16, #tpu.memory_space<vmem>>, vector<2x1344xbf16>
    %c0_1 = arith.constant 0 : index
    %c0_2 = arith.constant 0 : index
    %1 = vector.load %arg1[%c0_1, %c0_2] : memref<1344x128xbf16, #tpu.memory_space<vmem>>, vector<1344x128xbf16>
    %cst = arith.constant dense<0.000000e+00> : vector<2x128xf32>
    %2 = tpu.matmul %0, %1, %cst {dimension_numbers = #tpu.dot_dimension_numbers<[1], [0], [0], [1], [0, 0, 1, 1], [], []>} : vector<2x1344xbf16>, vector<1344x128xbf16>, vector<2x128xf32> -> vector<2x128xf32>
    %c0_3 = arith.constant 0 : index
    %c0_4 = arith.constant 0 : index
    %3 = vector.load %arg2[%c0_3, %c0_4] : memref<1x128xf32, #tpu.memory_space<vmem>>, vector<1x128xf32>
    %4 = vector.broadcast %3 : vector<1x128xf32> to vector<2x128xf32>
    %5 = arith.addf %2, %4 : vector<2x128xf32>
    %cst_5 = arith.constant 0.000000e+00 : f32
    %6 = vector.broadcast %cst_5 : f32 to vector<2x128xf32>
    %7 = arith.maximumf %5, %6 : vector<2x128xf32>
    %8 = arith.truncf %7 : vector<2x128xf32> to vector<2x128xbf16>
    %c0_6 = arith.constant 0 : index
    %c0_7 = arith.constant 0 : index
    %9 = vector.load %arg3[%c0_6, %c0_7] : memref<128x2xbf16, #tpu.memory_space<vmem>>, vector<128x2xbf16>
    %cst_8 = arith.constant dense<0.000000e+00> : vector<2x2xf32>
    %10 = tpu.matmul %8, %9, %cst_8 {dimension_numbers = #tpu.dot_dimension_numbers<[1], [0], [0], [1], [0, 0, 1, 1], [], []>} : vector<2x128xbf16>, vector<128x2xbf16>, vector<2x2xf32> -> vector<2x2xf32>
    %c0_9 = arith.constant 0 : index
    %c0_10 = arith.constant 0 : index
    %11 = vector.load %arg4[%c0_9, %c0_10] : memref<1x2xf32, #tpu.memory_space<vmem>>, vector<1x2xf32>
    %12 = vector.broadcast %11 : vector<1x2xf32> to vector<2x2xf32>
    %13 = arith.addf %10, %12 : vector<2x2xf32>
    %cst_11 = arith.constant dense<0xFF800000> : vector<2xf32>
    %14 = vector.multi_reduction <maximumf>, %13, %cst_11 [1] : vector<2x2xf32> to vector<2xf32>
    %15 = vector.shape_cast %14 : vector<2xf32> to vector<2x1xf32>
    %16 = vector.broadcast %15 : vector<2x1xf32> to vector<2x2xf32>
    %17 = arith.subf %13, %16 : vector<2x2xf32>
    %18 = math.exp %17 : vector<2x2xf32>
    %cst_12 = arith.constant dense<0.000000e+00> : vector<2xf32>
    %19 = vector.multi_reduction <add>, %18, %cst_12 [1] : vector<2x2xf32> to vector<2xf32>
    %20 = vector.shape_cast %19 : vector<2xf32> to vector<2x1xf32>
    %21 = vector.broadcast %20 : vector<2x1xf32> to vector<2x2xf32>
    %22 = arith.divf %18, %21 : vector<2x2xf32>
    %c0_13 = arith.constant 0 : index
    %c0_14 = arith.constant 0 : index
    %23 = vector.load %arg5[%c0_13, %c0_14] : memref<2x2xf32, #tpu.memory_space<vmem>>, vector<2x2xf32>
    tpu.vector_store %arg5[%c0_13, %c0_14], %22 {strides = array<i32>} : memref<2x2xf32, #tpu.memory_space<vmem>>, vector<2x2xf32>,
    return
  }
}

</mosaic_0001>

<bundles_post_ra>
// kernel: cis_resnet_forward.8
= control target key start
LH: loop header
LB: loop body
LE: loop exit
PB: predicated region body
PF: predicated region fallthrough
CT: control target
= control target key end

     0   :  { %s4234_s12 = smov 0   ;;  %s5376_s0 = inlined_call_operand.vmem [shape: bf16[4096,256], index: 0, kind: input, shape index: {}]   ;;  %s5377_s1 = inlined_call_operand.vmem [shape: bf16[256,64], index: 1, kind: input, shape index: {}]   ;;  %s5378_s2 = inlined_call_operand.vmem [shape: f32[1,64], index: 2, kind: input, shape index: {}]   ;;  %s5379_s3 = inlined_call_operand.vmem [shape: f32[4096,64], index: 3, kind: output, shape index: {}]  }
   0x1 LB: > { %s3475_s13 = sadd.s32 4294967295, %s4211_s12   ;;  %p3479_p0 = scmp.ge.s32.totalorder %s4211_s12, 1  ;;  %s4211_s12 = sphi %s4234_s12, %s13_s12  }
   0x2   : > { %p139_p1 = scmp.lt.s32.totalorder %s4211_s12, 3 }
   0x4   : > { %p140_p2 = pnand %p3479_p0, %p139_p1 }
   0x5   : > { %v3802_v0 = vld [vmem:[%s5377_s1] sm:$0xff] (!%p140_p2)   ;;  %v4213_v1 = vmov (!%p140_p2), 0   ;;  %s3480_s16 = sshll.u32 (!%p140_p2), %s3475_s13, 8  ;;  %v3803_v2 = vld [vmem:[%s5377_s1 + $0x8] sm:$0xff] (!%p140_p2)   ;;  %v3804_v3 = vld [vmem:[%s5377_s1 + $0x10] sm:$0xff] (!%p140_p2)   ;;  %vm3162_vm0 = vcmask (!%p140_p2), 523264  }
   0x6   : > { %143 = sbr.rel (%p140_p2) target bundleno = 793 (0x319), region = 32  ;;  %1849 = vmatprep.subr.bf16.mxu0 (!%p140_p2), %v4213_v1  ;;  %3761 = vmatprep.subr.bf16.mxu1 (!%p140_p2), %v4213_v1  ;;  %p165_p3 = scmp.lt.s32.totalorder (!%p140_p2), %s3480_s16, 511  ;;  %v3805_v4 = vld [vmem:[%s5377_s1 + $0x18] sm:$0xff] (!%p140_p2)   ;;  %v3806_v5 = vld [vmem:[%s5377_s1 + $0x20] sm:$0xff] (!%p140_p2)   ;;  %v3807_v7 = vld [vmem:[%s5377_s1 + $0x28] sm:$0xff] (!%p140_p2)  }
   0x7   : > { %1850 = vmatpush1.bf16.msra.mxu0 (!%p140_p2), %v3802_v0  ;;  %3777 = vmatpush1.bf16.msra.mxu1 (!%p140_p2), %v3802_v0  ;;  %v3808_v9 = vld [vmem:[%s5377_s1 + $0x30] sm:$0xff] (!%p140_p2)   ;;  %v3809_v10 = vld [vmem:[%s5377_s1 + $0x38] sm:$0xff] (!%p140_p2)   ;;  %v3810_v11 = vld [vmem:[%s5377_s1 + $0x40] sm:$0xff] (!%p140_p2)  }
   0x8   : > { %1851 = vmatprep.subr.bf16.mxu0 (!%p140_p2), %v4213_v1  ;;  %3762 = vmatprep.subr.bf16.mxu1 (!%p140_p2), %v4213_v1  ;;  %v3811_v12 = vld [vmem:[%s5377_s1 + $0x48] sm:$0xff] (!%p140_p2)   ;;  %v3812_v13 = vld [vmem:[%s5377_s1 + $0x50] sm:$0xff] (!%p140_p2)   ;;  %v3813_v14 = vld [vmem:[%s5377_s1 + $0x58] sm:$0xff] (!%p140_p2)  }
   0x9   : > { %v3814_v15 = vld [vmem:[%s5377_s1 + $0x60] sm:$0xff] (!%p140_p2)   ;;  %v3815_v16 = vld [vmem:[%s5377_s1 + $0x68] sm:$0xff] (!%p140_p2)   ;;  %v3816_v17 = vld [vmem:[%s5377_s1 + $0x70] sm:$0xff] (!%p140_p2)  }
   0xa   : > { %v3817_v18 = vld [vmem:[%s5377_s1 + $0x78] sm:$0xff] (!%p140_p2)  }
   0xb   : > { %1852 = vmatpush1.bf16.msra.mxu0 (!%p140_p2), %v3803_v2  ;;  %3778 = vmatpush1.bf16.msra.mxu1 (!%p140_p2), %v3803_v2 }
   0xc   : > { %1853 = vmatprep.subr.bf16.mxu0 (!%p140_p2), %v4213_v1  ;;  %3763 = vmatprep.subr.bf16.mxu1 (!%p140_p2), %v4213_v1 }
   0xd   : > { %s5381_s16 = smov (!%p165_p3, %s3480_s16), 511 }
   0xe   : > { %s3760_s23 = sshll.u32 %s5381_s16, 3 }
   0xf   : > { %1854 = vmatpush1.bf16.msra.mxu0 %v3804_v3  ;;  %3779 = vmatpush1.bf16.msra.mxu1 %v3804_v3  ;;  %s4273_s28 = scalar_lea.vmem %s5376_s0, %s3760_s23  ;;  %s4456_s5 = scalar_lea.vmem %s5379_s3, %s3760_s23 }
  0x10   : > { %1855 = vmatprep.subr.bf16.mxu0 %v4213_v1  ;;  %3764 = vmatprep.subr.bf16.mxu1 %v4213_v1  ;;  %v3820_v6 = vld [vmem:[%s4273_s28 + $0x4] ss:$8 sps:$4 sm:$0xff]   ;;  %v3818_v19 = vld [vmem:[%s4273_s28] ss:$8 sps:$4 sm:$0xff]   ;;  %v3824_v21 = vld [vmem:[%s4273_s28 + $0x14] ss:$8 sps:$4 sm:$0xff]  }
  0x11   : > { %v3823_v8 = vld [vmem:[%s4273_s28 + $0x404] ss:$8 sps:$4 sm:$0xff]   ;;  %1881 = vmatprep.mubr.bf16.mxu0 %v3820_v6  ;;  %v3821_v20 = vld [vmem:[%s4273_s28 + $0x400] ss:$8 sps:$4 sm:$0xff]   ;;  %v3826_v22 = vld [vmem:[%s4273_s28 + $0x414] ss:$8 sps:$4 sm:$0xff]  }
  0x12   : > { %2393 = vmatprep.mubr.bf16.mxu1 %v3823_v8  ;;  %v3828_v23 = vld [vmem:[%s4273_s28 + $0x10] ss:$8 sps:$4 sm:$0xff]   ;;  %v3830_v25 = vld [vmem:[%s4273_s28 + $0x24] ss:$8 sps:$4 sm:$0xff]   ;;  %v3834_v27 = vld [vmem:[%s4273_s28 + $0x20] ss:$8 sps:$4 sm:$0xff]  }
  0x13   : > { %1856 = vmatpush1.bf16.msra.mxu0 %v3805_v4  ;;  %3780 = vmatpush1.bf16.msra.mxu1 %v3805_v4  ;;  %v3829_v24 = vld [vmem:[%s4273_s28 + $0x410] ss:$8 sps:$4 sm:$0xff]   ;;  %v3832_v26 = vld [vmem:[%s4273_s28 + $0x424] ss:$8 sps:$4 sm:$0xff]   ;;  %v3835_v28 = vld [vmem:[%s4273_s28 + $0x420] ss:$8 sps:$4 sm:$0xff]  }
  0x14   : > { %1857 = vmatprep.subr.bf16.mxu0 %v4213_v1  ;;  %3765 = vmatprep.subr.bf16.mxu1 %v4213_v1  ;;  %v3836_v29 = vld [vmem:[%s4273_s28 + $0x34] ss:$8 sps:$4 sm:$0xff]   ;;  %v3840_v31 = vld [vmem:[%s4273_s28 + $0x30] ss:$8 sps:$4 sm:$0xff]   ;;  %v3842_v33 = vld [vmem:[%s4273_s28 + $0x44] ss:$8 sps:$4 sm:$0xff]  }
  0x15   : > { %v3838_v30 = vld [vmem:[%s4273_s28 + $0x434] ss:$8 sps:$4 sm:$0xff]   ;;  %v3841_v32 = vld [vmem:[%s4273_s28 + $0x430] ss:$8 sps:$4 sm:$0xff]   ;;  %v3844_v34 = vld [vmem:[%s4273_s28 + $0x444] ss:$8 sps:$4 sm:$0xff]  }
  0x16   : > { %v3846_v35 = vld [vmem:[%s4273_s28 + $0x40] ss:$8 sps:$4 sm:$0xff]   ;;  %v3848_v37 = vld [vmem:[%s4273_s28 + $0x54] ss:$8 sps:$4 sm:$0xff]   ;;  %v3852_v39 = vld [vmem:[%s4273_s28 + $0x50] ss:$8 sps:$4 sm:$0xff]  }
  0x17   : > { %1858 = vmatpush1.bf16.msra.mxu0 %v3806_v5  ;;  %3781 = vmatpush1.bf16.msra.mxu1 %v3806_v5  ;;  %v3847_v36 = vld [vmem:[%s4273_s28 + $0x440] ss:$8 sps:$4 sm:$0xff]   ;;  %v3850_v38 = vld [vmem:[%s4273_s28 + $0x454] ss:$8 sps:$4 sm:$0xff]   ;;  %v3853_v40 = vld [vmem:[%s4273_s28 + $0x450] ss:$8 sps:$4 sm:$0xff]  }
  0x18   : > { %1859 = vmatprep.subr.bf16.mxu0 %v4213_v1  ;;  %3766 = vmatprep.subr.bf16.mxu1 %v4213_v1  ;;  %v3854_v41 = vld [vmem:[%s4273_s28 + $0x64] ss:$8 sps:$4 sm:$0xff]   ;;  %v3858_v43 = vld [vmem:[%s4273_s28 + $0x60] ss:$8 sps:$4 sm:$0xff]   ;;  %v3860_v45 = vld [vmem:[%s4273_s28 + $0x74] ss:$8 sps:$4 sm:$0xff]  }
  0x19   : > { %v3856_v42 = vld [vmem:[%s4273_s28 + $0x464] ss:$8 sps:$4 sm:$0xff]   ;;  %v3859_v44 = vld [vmem:[%s4273_s28 + $0x460] ss:$8 sps:$4 sm:$0xff]   ;;  %v3862_v46 = vld [vmem:[%s4273_s28 + $0x474] ss:$8 sps:$4 sm:$0xff]  }
  0x1a   : > { %v3864_v47 = vld [vmem:[%s4273_s28 + $0x70] ss:$8 sps:$4 sm:$0xff]   ;;  %v3866_v49 = vld [vmem:[%s4273_s28 + $0x84] ss:$8 sps:$4 sm:$0xff]   ;;  %v3870_v51 = vld [vmem:[%s4273_s28 + $0x80] ss:$8 sps:$4 sm:$0xff]  }
  0x1b   : > { %1860 = vmatpush1.bf16.msra.mxu0 %v3807_v7  ;;  %3782 = vmatpush1.bf16.msra.mxu1 %v3807_v7  ;;  %v3865_v48 = vld [vmem:[%s4273_s28 + $0x470] ss:$8 sps:$4 sm:$0xff]   ;;  %v3868_v50 = vld [vmem:[%s4273_s28 + $0x484] ss:$8 sps:$4 sm:$0xff]   ;;  %v3871_v52 = vld [vmem:[%s4273_s28 + $0x480] ss:$8 sps:$4 sm:$0xff]  }
  0x1c   : > { %1861 = vmatprep.subr.bf16.mxu0 %v4213_v1  ;;  %3767 = vmatprep.subr.bf16.mxu1 %v4213_v1  ;;  %v3872_v53 = vld [vmem:[%s4273_s28 + $0x94] ss:$8 sps:$4 sm:$0xff]   ;;  %v3876_v55 = vld [vmem:[%s4273_s28 + $0x90] ss:$8 sps:$4 sm:$0xff]   ;;  %v3878_v57 = vld [vmem:[%s4273_s28 + $0xa4] ss:$8 sps:$4 sm:$0xff]  }
  0x1d   : > { %v3874_v54 = vld [vmem:[%s4273_s28 + $0x494] ss:$8 sps:$4 sm:$0xff]   ;;  %v3877_v56 = vld [vmem:[%s4273_s28 + $0x490] ss:$8 sps:$4 sm:$0xff]   ;;  %v3880_v58 = vld [vmem:[%s4273_s28 + $0x4a4] ss:$8 sps:$4 sm:$0xff]  }
  0x1e   : > { %v3882_v59 = vld [vmem:[%s4273_s28 + $0xa0] ss:$8 sps:$4 sm:$0xff]   ;;  %v3884_v61 = vld [vmem:[%s4273_s28 + $0xb4] ss:$8 sps:$4 sm:$0xff]   ;;  %v3888_v63 = vld [vmem:[%s4273_s28 + $0xb0] ss:$8 sps:$4 sm:$0xff]  }
  0x1f   : > { %1862 = vmatpush1.bf16.msra.mxu0 %v3808_v9  ;;  %3783 = vmatpush1.bf16.msra.mxu1 %v3808_v9  ;;  %v3883_v60 = vld [vmem:[%s4273_s28 + $0x4a0] ss:$8 sps:$4 sm:$0xff]   ;;  %v3886_v62 = vld [vmem:[%s4273_s28 + $0x4b4] ss:$8 sps:$4 sm:$0xff]   ;;  %v3889_v0 = vld [vmem:[%s4273_s28 + $0x4b0] ss:$8 sps:$4 sm:$0xff]  }
  0x20   : > { %1863 = vmatprep.subr.bf16.mxu0 %v4213_v1  ;;  %3768 = vmatprep.subr.bf16.mxu1 %v4213_v1  ;;  %v3892_v2 = vld [vmem:[%s4273_s28 + $0x4c4] ss:$8 sps:$4 sm:$0xff]   ;;  %v3894_v3 = vld [vmem:[%s4273_s28 + $0xc0] ss:$8 sps:$4 sm:$0xff]   ;;  %v3896_v5 = vld [vmem:[%s4273_s28 + $0xd4] ss:$8 sps:$4 sm:$0xff]  }
  0x21   : > { %v3895_v4 = vld [vmem:[%s4273_s28 + $0x4c0] ss:$8 sps:$4 sm:$0xff]   ;;  %v3898_v6 = vld [vmem:[%s4273_s28 + $0x4d4] ss:$8 sps:$4 sm:$0xff]   ;;  %v3900_v7 = vld [vmem:[%s4273_s28 + $0xd0] ss:$8 sps:$4 sm:$0xff]  }
  0x22   : > { %v3901_v8 = vld [vmem:[%s4273_s28 + $0x4d0] ss:$8 sps:$4 sm:$0xff]   ;;  %v3902_v9 = vld [vmem:[%s4273_s28 + $0xe4] ss:$8 sps:$4 sm:$0xff]  }
  0x23   : > { %1864 = vmatpush1.bf16.msra.mxu0 %v3809_v10  ;;  %3784 = vmatpush1.bf16.msra.mxu1 %v3809_v10  ;;  %v3904_v10 = vld [vmem:[%s4273_s28 + $0x4e4] ss:$8 sps:$4 sm:$0xff]  }
  0x24   : > { %1865 = vmatprep.subr.bf16.mxu0 %v4213_v1  ;;  %3769 = vmatprep.subr.bf16.mxu1 %v4213_v1 }
  0x27   : > { %1866 = vmatpush1.bf16.msra.mxu0 %v3810_v11  ;;  %3785 = vmatpush1.bf16.msra.mxu1 %v3810_v11  ;;  %v3906_v11 = vld [vmem:[%s4273_s28 + $0xe0] ss:$8 sps:$4 sm:$0xff]  }
  0x28   : > { %1867 = vmatprep.subr.bf16.mxu0 %v4213_v1  ;;  %3770 = vmatprep.subr.bf16.mxu1 %v4213_v1 }
  0x2b   : > { %1868 = vmatpush1.bf16.msra.mxu0 %v3811_v12  ;;  %3786 = vmatpush1.bf16.msra.mxu1 %v3811_v12  ;;  %v3907_v12 = vld [vmem:[%s4273_s28 + $0x4e0] ss:$8 sps:$4 sm:$0xff]  }
  0x2c   : > { %1869 = vmatprep.subr.bf16.mxu0 %v4213_v1  ;;  %3771 = vmatprep.subr.bf16.mxu1 %v4213_v1 }
  0x2f   : > { %1870 = vmatpush1.bf16.msra.mxu0 %v3812_v13  ;;  %3787 = vmatpush1.bf16.msra.mxu1 %v3812_v13  ;;  %v3908_v13 = vld [vmem:[%s4273_s28 + $0xf4] ss:$8 sps:$4 sm:$0xff]  }
  0x30   : > { %1871 = vmatprep.subr.bf16.mxu0 %v4213_v1  ;;  %3772 = vmatprep.subr.bf16.mxu1 %v4213_v1 }
  0x33   : > { %1872 = vmatpush1.bf16.msra.mxu0 %v3813_v14  ;;  %3788 = vmatpush1.bf16.msra.mxu1 %v3813_v14  ;;  %v3910_v14 = vld [vmem:[%s4273_s28 + $0x4f4] ss:$8 sps:$4 sm:$0xff]  }
  0x34   : > { %1873 = vmatprep.subr.bf16.mxu0 %v4213_v1  ;;  %3773 = vmatprep.subr.bf16.mxu1 %v4213_v1 }
  0x37   : > { %1874 = vmatpush1.bf16.msra.mxu0 %v3814_v15  ;;  %3789 = vmatpush1.bf16.msra.mxu1 %v3814_v15  ;;  %v3912_v15 = vld [vmem:[%s4273_s28 + $0xf0] ss:$8 sps:$4 sm:$0xff]  }
  0x38   : > { %1875 = vmatprep.subr.bf16.mxu0 %v4213_v1  ;;  %3774 = vmatprep.subr.bf16.mxu1 %v4213_v1 }
  0x3b   : > { %1876 = vmatpush1.bf16.msra.mxu0 %v3815_v16  ;;  %3790 = vmatpush1.bf16.msra.mxu1 %v3815_v16  ;;  %v3913_v16 = vld [vmem:[%s4273_s28 + $0x4f0] ss:$8 sps:$4 sm:$0xff]  }
  0x3c   : > { %1877 = vmatprep.subr.bf16.mxu0 %v4213_v1  ;;  %3775 = vmatprep.subr.bf16.mxu1 %v4213_v1 }
  0x3f   : > { %1878 = vmatpush1.bf16.msra.mxu0 %v3816_v17  ;;  %3791 = vmatpush1.bf16.msra.mxu1 %v3816_v17  ;;  %v3914_v17 = vld [vmem:[%s4273_s28 + $0x104] ss:$8 sps:$4 sm:$0xff]  }
  0x40   : > { %1879 = vmatprep.subr.bf16.mxu0 %v4213_v1  ;;  %3776 = vmatprep.subr.bf16.mxu1 %v4213_v1  ;;  %v3890_v1 = vld [vmem:[%s4273_s28 + $0xc4] ss:$8 sps:$4 sm:$0xff]  }
  0x43   : > { %1880 = vmatpush1.bf16.msra.mxu0 %v3817_v18  ;;  %3792 = vmatpush1.bf16.msra.mxu1 %v3817_v18  ;;  %v3916_v18 = vld [vmem:[%s4273_s28 + $0x504] ss:$8 sps:$4 sm:$0xff]  }
  0x46   : > { %1882 = vmatmul.mubr.bf16.vlgmr.msra.gmra.mrb[0].mxu0 %v3818_v19  ;;  %2394 = vmatmul.mubr.bf16.vlgmr.msra.gmra.mrb[0].mxu1 %v3821_v20  ;;  %v3918_v19 = vld [vmem:[%s4273_s28 + $0x100] ss:$8 sps:$4 sm:$0xff]  }
  0x47   : > { %1889 = vmatprep.mubr.bf16.mxu0 %v3824_v21  ;;  %2401 = vmatprep.mubr.bf16.mxu1 %v3826_v22  ;;  %v3919_v20 = vld [vmem:[%s4273_s28 + $0x500] ss:$8 sps:$4 sm:$0xff]   ;;  %v3920_v21 = vld [vmem:[%s4273_s28 + $0x114] ss:$8 sps:$4 sm:$0xff]  }
  0x48   : > { %v3922_v22 = vld [vmem:[%s4273_s28 + $0x514] ss:$8 sps:$4 sm:$0xff]  }
  0x4e   : > { %1890 = vmatmul.mubr.bf16.gmra.mrb[4].mxu0 %v3828_v23  ;;  %2402 = vmatmul.mubr.bf16.gmra.mrb[4].mxu1 %v3829_v24  ;;  %v3924_v23 = vld [vmem:[%s4273_s28 + $0x110] ss:$8 sps:$4 sm:$0xff]  }
  0x4f   : > { %1897 = vmatprep.mubr.bf16.mxu0 %v3830_v25  ;;  %2409 = vmatprep.mubr.bf16.mxu1 %v3832_v26  ;;  %v3925_v24 = vld [vmem:[%s4273_s28 + $0x510] ss:$8 sps:$4 sm:$0xff]   ;;  %v3926_v25 = vld [vmem:[%s4273_s28 + $0x124] ss:$8 sps:$4 sm:$0xff]  }
  0x50   : > { %v3928_v26 = vld [vmem:[%s4273_s28 + $0x524] ss:$8 sps:$4 sm:$0xff]  }
  0x56   : > { %1898 = vmatmul.mubr.bf16.gmra.mrb[8].mxu0 %v3834_v27  ;;  %2410 = vmatmul.mubr.bf16.gmra.mrb[8].mxu1 %v3835_v28  ;;  %v3930_v27 = vld [vmem:[%s4273_s28 + $0x120] ss:$8 sps:$4 sm:$0xff]  }
  0x57   : > { %1905 = vmatprep.mubr.bf16.mxu0 %v3836_v29  ;;  %2417 = vmatprep.mubr.bf16.mxu1 %v3838_v30  ;;  %v3931_v28 = vld [vmem:[%s4273_s28 + $0x520] ss:$8 sps:$4 sm:$0xff]   ;;  %v3932_v29 = vld [vmem:[%s4273_s28 + $0x134] ss:$8 sps:$4 sm:$0xff]  }
  0x58   : > { %v3934_v30 = vld [vmem:[%s4273_s28 + $0x534] ss:$8 sps:$4 sm:$0xff]  }
  0x5e   : > { %1906 = vmatmul.mubr.bf16.gmra.mrb[12].mxu0 %v3840_v31  ;;  %2418 = vmatmul.mubr.bf16.gmra.mrb[12].mxu1 %v3841_v32  ;;  %v3936_v31 = vld [vmem:[%s4273_s28 + $0x130] ss:$8 sps:$4 sm:$0xff]  }
  0x5f   : > { %1913 = vmatprep.mubr.bf16.mxu0 %v3842_v33  ;;  %2425 = vmatprep.mubr.bf16.mxu1 %v3844_v34  ;;  %v3937_v32 = vld [vmem:[%s4273_s28 + $0x530] ss:$8 sps:$4 sm:$0xff]   ;;  %v3938_v33 = vld [vmem:[%s4273_s28 + $0x144] ss:$8 sps:$4 sm:$0xff]  }
  0x60   : > { %v3940_v34 = vld [vmem:[%s4273_s28 + $0x544] ss:$8 sps:$4 sm:$0xff]  }
  0x66   : > { %1914 = vmatmul.mubr.bf16.gmra.mrb[16].mxu0 %v3846_v35  ;;  %2426 = vmatmul.mubr.bf16.gmra.mrb[16].mxu1 %v3847_v36  ;;  %v3942_v35 = vld [vmem:[%s4273_s28 + $0x140] ss:$8 sps:$4 sm:$0xff]  }
  0x67   : > { %1921 = vmatprep.mubr.bf16.mxu0 %v3848_v37  ;;  %2433 = vmatprep.mubr.bf16.mxu1 %v3850_v38  ;;  %v3943_v36 = vld [vmem:[%s4273_s28 + $0x540] ss:$8 sps:$4 sm:$0xff]   ;;  %v3944_v37 = vld [vmem:[%s4273_s28 + $0x154] ss:$8 sps:$4 sm:$0xff]  }
  0x68   : > { %v3946_v38 = vld [vmem:[%s4273_s28 + $0x554] ss:$8 sps:$4 sm:$0xff]  }
  0x6e   : > { %1922 = vmatmul.mubr.bf16.gmra.mrb[20].mxu0 %v3852_v39  ;;  %2434 = vmatmul.mubr.bf16.gmra.mrb[20].mxu1 %v3853_v40  ;;  %v3948_v39 = vld [vmem:[%s4273_s28 + $0x150] ss:$8 sps:$4 sm:$0xff]  }
  0x6f   : > { %1929 = vmatprep.mubr.bf16.mxu0 %v3854_v41  ;;  %2441 = vmatprep.mubr.bf16.mxu1 %v3856_v42  ;;  %v3949_v40 = vld [vmem:[%s4273_s28 + $0x550] ss:$8 sps:$4 sm:$0xff]   ;;  %v3950_v41 = vld [vmem:[%s4273_s28 + $0x164] ss:$8 sps:$4 sm:$0xff]  }
  0x70   : > { %v3952_v42 = vld [vmem:[%s4273_s28 + $0x564] ss:$8 sps:$4 sm:$0xff]  }
  0x76   : > { %1930 = vmatmul.mubr.bf16.gmra.mrb[24].mxu0 %v3858_v43  ;;  %2442 = vmatmul.mubr.bf16.gmra.mrb[24].mxu1 %v3859_v44  ;;  %v3954_v43 = vld [vmem:[%s4273_s28 + $0x160] ss:$8 sps:$4 sm:$0xff]  }
  0x77   : > { %1937 = vmatprep.mubr.bf16.mxu0 %v3860_v45  ;;  %2449 = vmatprep.mubr.bf16.mxu1 %v3862_v46  ;;  %v3955_v44 = vld [vmem:[%s4273_s28 + $0x560] ss:$8 sps:$4 sm:$0xff]   ;;  %v3956_v45 = vld [vmem:[%s4273_s28 + $0x174] ss:$8 sps:$4 sm:$0xff]  }
  0x78   : > { %v3958_v46 = vld [vmem:[%s4273_s28 + $0x574] ss:$8 sps:$4 sm:$0xff]  }
  0x7e   : > { %1938 = vmatmul.mubr.bf16.gmra.mrb[28].mxu0 %v3864_v47  ;;  %2450 = vmatmul.mubr.bf16.gmra.mrb[28].mxu1 %v3865_v48  ;;  %v3960_v47 = vld [vmem:[%s4273_s28 + $0x170] ss:$8 sps:$4 sm:$0xff]  }
  0x7f   : > { %1945 = vmatprep.mubr.bf16.mxu0 %v3866_v49  ;;  %2457 = vmatprep.mubr.bf16.mxu1 %v3868_v50  ;;  %v3961_v48 = vld [vmem:[%s4273_s28 + $0x570] ss:$8 sps:$4 sm:$0xff]   ;;  %v3962_v49 = vld [vmem:[%s4273_s28 + $0x184] ss:$8 sps:$4 sm:$0xff]  }
  0x80   : > { %v3964_v50 = vld [vmem:[%s4273_s28 + $0x584] ss:$8 sps:$4 sm:$0xff]  }
  0x86   : > { %1946 = vmatmul.mubr.bf16.gmra.mrb[32].mxu0 %v3870_v51  ;;  %2458 = vmatmul.mubr.bf16.gmra.mrb[32].mxu1 %v3871_v52  ;;  %v3966_v51 = vld [vmem:[%s4273_s28 + $0x180] ss:$8 sps:$4 sm:$0xff]  }
  0x87   : > { %1953 = vmatprep.mubr.bf16.mxu0 %v3872_v53  ;;  %2465 = vmatprep.mubr.bf16.mxu1 %v3874_v54  ;;  %v3967_v52 = vld [vmem:[%s4273_s28 + $0x580] ss:$8 sps:$4 sm:$0xff]   ;;  %v3968_v53 = vld [vmem:[%s4273_s28 + $0x194] ss:$8 sps:$4 sm:$0xff]  }
  0x88   : > { %v3970_v54 = vld [vmem:[%s4273_s28 + $0x594] ss:$8 sps:$4 sm:$0xff]  }
  0x8e   : > { %1954 = vmatmul.mubr.bf16.gmra.mrb[36].mxu0 %v3876_v55  ;;  %2466 = vmatmul.mubr.bf16.gmra.mrb[36].mxu1 %v3877_v56  ;;  %v3972_v55 = vld [vmem:[%s4273_s28 + $0x190] ss:$8 sps:$4 sm:$0xff]  }
  0x8f   : > { %1961 = vmatprep.mubr.bf16.mxu0 %v3878_v57  ;;  %2473 = vmatprep.mubr.bf16.mxu1 %v3880_v58  ;;  %v3973_v56 = vld [vmem:[%s4273_s28 + $0x590] ss:$8 sps:$4 sm:$0xff]   ;;  %v3974_v57 = vld [vmem:[%s4273_s28 + $0x1a4] ss:$8 sps:$4 sm:$0xff]  }
  0x90   : > { %v3976_v58 = vld [vmem:[%s4273_s28 + $0x5a4] ss:$8 sps:$4 sm:$0xff]  }
  0x96   : > { %1962 = vmatmul.mubr.bf16.gmra.mrb[40].mxu0 %v3882_v59  ;;  %2474 = vmatmul.mubr.bf16.gmra.mrb[40].mxu1 %v3883_v60  ;;  %v3978_v59 = vld [vmem:[%s4273_s28 + $0x1a0] ss:$8 sps:$4 sm:$0xff]  }
  0x97   : > { %1969 = vmatprep.mubr.bf16.mxu0 %v3884_v61  ;;  %2481 = vmatprep.mubr.bf16.mxu1 %v3886_v62  ;;  %v3979_v60 = vld [vmem:[%s4273_s28 + $0x5a0] ss:$8 sps:$4 sm:$0xff]   ;;  %v3980_v61 = vld [vmem:[%s4273_s28 + $0x1b4] ss:$8 sps:$4 sm:$0xff]  }
  0x98   : > { %v3982_v62 = vld [vmem:[%s4273_s28 + $0x5b4] ss:$8 sps:$4 sm:$0xff]  }
  0x9e   : > { %1970 = vmatmul.mubr.bf16.gmra.mrb[44].mxu0 %v3888_v63  ;;  %2482 = vmatmul.mubr.bf16.gmra.mrb[44].mxu1 %v3889_v0  ;;  %v4445_v63 = vld [vmem:[%s5378_s2] ss:$0 sm:$0xff] }
  0x9f   : > { %1977 = vmatprep.mubr.bf16.mxu0 %v3890_v1  ;;  %2489 = vmatprep.mubr.bf16.mxu1 %v3892_v2 }
  0xa6   : > { %1978 = vmatmul.mubr.bf16.gmra.mrb[48].mxu0 %v3894_v3  ;;  %2490 = vmatmul.mubr.bf16.gmra.mrb[48].mxu1 %v3895_v4 }
  0xa7   : > { %1985 = vmatprep.mubr.bf16.mxu0 %v3896_v5  ;;  %2497 = vmatprep.mubr.bf16.mxu1 %v3898_v6  ;;  %v3984_v6 = vld [vmem:[%s4273_s28 + $0x1b0] ss:$8 sps:$4 sm:$0xff]  }
  0xae   : > { %1986 = vmatmul.mubr.bf16.gmra.mrb[52].mxu0 %v3900_v7  ;;  %2498 = vmatmul.mubr.bf16.gmra.mrb[52].mxu1 %v3901_v8  ;;  %v3985_v7 = vld [vmem:[%s4273_s28 + $0x5b0] ss:$8 sps:$4 sm:$0xff]  }
  0xaf   : > { %1993 = vmatprep.mubr.bf16.mxu0 %v3902_v9  ;;  %2505 = vmatprep.mubr.bf16.mxu1 %v3904_v10  ;;  %v3986_v10 = vld [vmem:[%s4273_s28 + $0x1c4] ss:$8 sps:$4 sm:$0xff]  }
  0xb6   : > { %1994 = vmatmul.mubr.bf16.gmra.mrb[56].mxu0 %v3906_v11  ;;  %2506 = vmatmul.mubr.bf16.gmra.mrb[56].mxu1 %v3907_v12  ;;  %v3988_v11 = vld [vmem:[%s4273_s28 + $0x5c4] ss:$8 sps:$4 sm:$0xff]  }
  0xb7   : > { %2001 = vmatprep.mubr.bf16.mxu0 %v3908_v13  ;;  %2513 = vmatprep.mubr.bf16.mxu1 %v3910_v14 }
  0xbe   : > { %2002 = vmatmul.mubr.bf16.gmra.mrb[60].mxu0 %v3912_v15  ;;  %2514 = vmatmul.mubr.bf16.gmra.mrb[60].mxu1 %v3913_v16 }
  0xbf   : > { %2009 = vmatprep.mubr.bf16.mxu0 %v3914_v17  ;;  %2521 = vmatprep.mubr.bf16.mxu1 %v3916_v18 }
  0xc6   : > { %2010 = vmatmul.mubr.bf16.gmra.mrb[64].mxu0 %v3918_v19  ;;  %2522 = vmatmul.mubr.bf16.gmra.mrb[64].mxu1 %v3919_v20 }
  0xc7   : > { %2017 = vmatprep.mubr.bf16.mxu0 %v3920_v21  ;;  %2529 = vmatprep.mubr.bf16.mxu1 %v3922_v22 }
  0xce   : > { %2018 = vmatmul.mubr.bf16.gmra.mrb[68].mxu0 %v3924_v23  ;;  %2530 = vmatmul.mubr.bf16.gmra.mrb[68].mxu1 %v3925_v24 }
  0xcf   : > { %2025 = vmatprep.mubr.bf16.mxu0 %v3926_v25  ;;  %2537 = vmatprep.mubr.bf16.mxu1 %v3928_v26  ;;  %v3990_v26 = vld [vmem:[%s4273_s28 + $0x1c0] ss:$8 sps:$4 sm:$0xff]  }
  0xd6   : > { %2026 = vmatmul.mubr.bf16.gmra.mrb[72].mxu0 %v3930_v27  ;;  %2538 = vmatmul.mubr.bf16.gmra.mrb[72].mxu1 %v3931_v28  ;;  %v3991_v27 = vld [vmem:[%s4273_s28 + $0x5c0] ss:$8 sps:$4 sm:$0xff]  }
  0xd7   : > { %2033 = vmatprep.mubr.bf16.mxu0 %v3932_v29  ;;  %2545 = vmatprep.mubr.bf16.mxu1 %v3934_v30  ;;  %v3992_v30 = vld [vmem:[%s4273_s28 + $0x1d4] ss:$8 sps:$4 sm:$0xff]  }
  0xde   : > { %2034 = vmatmul.mubr.bf16.gmra.mrb[76].mxu0 %v3936_v31  ;;  %2546 = vmatmul.mubr.bf16.gmra.mrb[76].mxu1 %v3937_v32  ;;  %v3994_v31 = vld [vmem:[%s4273_s28 + $0x5d4] ss:$8 sps:$4 sm:$0xff]  }
  0xdf   : > { %2041 = vmatprep.mubr.bf16.mxu0 %v3938_v33  ;;  %2553 = vmatprep.mubr.bf16.mxu1 %v3940_v34 }
  0xe6   : > { %2042 = vmatmul.mubr.bf16.gmra.mrb[80].mxu0 %v3942_v35  ;;  %2554 = vmatmul.mubr.bf16.gmra.mrb[80].mxu1 %v3943_v36 }
  0xe7   : > { %2049 = vmatprep.mubr.bf16.mxu0 %v3944_v37  ;;  %2561 = vmatprep.mubr.bf16.mxu1 %v3946_v38 }
  0xee   : > { %2050 = vmatmul.mubr.bf16.gmra.mrb[84].mxu0 %v3948_v39  ;;  %2562 = vmatmul.mubr.bf16.gmra.mrb[84].mxu1 %v3949_v40 }
  0xef   : > { %2057 = vmatprep.mubr.bf16.mxu0 %v3950_v41  ;;  %2569 = vmatprep.mubr.bf16.mxu1 %v3952_v42 }
  0xf6   : > { %2058 = vmatmul.mubr.bf16.gmra.mrb[88].mxu0 %v3954_v43  ;;  %2570 = vmatmul.mubr.bf16.gmra.mrb[88].mxu1 %v3955_v44 }
  0xf7   : > { %2065 = vmatprep.mubr.bf16.mxu0 %v3956_v45  ;;  %2577 = vmatprep.mubr.bf16.mxu1 %v3958_v46  ;;  %v3996_v46 = vld [vmem:[%s4273_s28 + $0x1d0] ss:$8 sps:$4 sm:$0xff]  }
  0xfe   : > { %2066 = vmatmul.mubr.bf16.gmra.mrb[92].mxu0 %v3960_v47  ;;  %2578 = vmatmul.mubr.bf16.gmra.mrb[92].mxu1 %v3961_v48  ;;  %v3997_v47 = vld [vmem:[%s4273_s28 + $0x5d0] ss:$8 sps:$4 sm:$0xff]  }
  0xff   : > { %2073 = vmatprep.mubr.bf16.mxu0 %v3962_v49  ;;  %2585 = vmatprep.mubr.bf16.mxu1 %v3964_v50  ;;  %v3998_v50 = vld [vmem:[%s4273_s28 + $0x1e4] ss:$8 sps:$4 sm:$0xff]  }
 0x106   : > { %2074 = vmatmul.mubr.bf16.gmra.mrb[96].mxu0 %v3966_v51  ;;  %2586 = vmatmul.mubr.bf16.gmra.mrb[96].mxu1 %v3967_v52  ;;  %v4000_v51 = vld [vmem:[%s4273_s28 + $0x5e4] ss:$8 sps:$4 sm:$0xff]  }
 0x107   : > { %2081 = vmatprep.mubr.bf16.mxu0 %v3968_v53  ;;  %2593 = vmatprep.mubr.bf16.mxu1 %v3970_v54 }
 0x10e   : > { %2082 = vmatmul.mubr.bf16.gmra.mrb[100].mxu0 %v3972_v55  ;;  %2594 = vmatmul.mubr.bf16.gmra.mrb[100].mxu1 %v3973_v56 }
 0x10f   : > { %2089 = vmatprep.mubr.bf16.mxu0 %v3974_v57  ;;  %2601 = vmatprep.mubr.bf16.mxu1 %v3976_v58 }
 0x116   : > { %2090 = vmatmul.mubr.bf16.gmra.mrb[104].mxu0 %v3978_v59  ;;  %2602 = vmatmul.mubr.bf16.gmra.mrb[104].mxu1 %v3979_v60 }
 0x117   : > { %2097 = vmatprep.mubr.bf16.mxu0 %v3980_v61  ;;  %2609 = vmatprep.mubr.bf16.mxu1 %v3982_v62 }
 0x119   : > { %v1883_v0 = vpop.f32.mrb[0].mxu0  ;;  %v2395_v1 = vpop.f32.mrb[0].mxu1 }
 0x11a   : > { %v1884_v2 = vadd.f32 %v4445_v63, %v1883_v0  ;;  %v2396_v3 = vadd.f32 %v4445_v63, %v2395_v1  ;;  %v1885_v4 = vpop.f32.mrb[1].mxu0  ;;  %v2397_v5 = vpop.f32.mrb[1].mxu1 }
 0x11b   : > { %v1886_v8 = vpop.f32.mrb[2].mxu0  ;;  %v2398_v9 = vpop.f32.mrb[2].mxu1  ;;  %v4003_v4 = vld [vmem:[%s4273_s28 + $0x5e0] ss:$8 sps:$4 sm:$0xff]  }
 0x11c   : > { %v2906_v12 = vmax.f32 %v1884_v2, 0.0  ;;  %v3034_v13 = vmax.f32 %v2396_v3, 0.0  ;;  %v1887_v14 = vadd.f32 %v4445_v63, %v1886_v8  ;;  %v2399_v15 = vadd.f32 %v4445_v63, %v2398_v9  ;;  %v1888_v16 = vpop.f32.mrb[3].mxu0  ;;  %v2400_v17 = vpop.f32.mrb[3].mxu1  ;;  %v4002_v3 = vld [vmem:[%s4273_s28 + $0x1e0] ss:$8 sps:$4 sm:$0xff]  }
 0x11d   : > { %v4006_v8 = vld [vmem:[%s4273_s28 + $0x5f4] ss:$8 sps:$4 sm:$0xff]  }
 0x11e   : > { %3163 = vst.msk [vmem:[%s4456_s5] sm:$0xff] %vm3162_vm0, %v2906_v12  ;;  %3291 = vst.msk [vmem:[%s4456_s5 + $0x400] sm:$0xff] %vm3162_vm0, %v3034_v13  ;;  %v2907_v18 = vmax.f32 %v1887_v14, 0.0  ;;  %v3035_v19 = vmax.f32 %v2399_v15, 0.0  ;;  %2098 = vmatmul.mubr.bf16.gmra.mrb[108].mxu0 %v3984_v6  ;;  %2610 = vmatmul.mubr.bf16.gmra.mrb[108].mxu1 %v3985_v7  ;;  %v4004_v7 = vld [vmem:[%s4273_s28 + $0x1f4] ss:$8 sps:$4 sm:$0xff]  }
 0x11f   : > { %2105 = vmatprep.mubr.bf16.mxu0 %v3986_v10  ;;  %2617 = vmatprep.mubr.bf16.mxu1 %v3988_v11 }
 0x120   : > { %3164 = vst.msk [vmem:[%s4456_s5 + $0x8] sm:$0xff] %vm3162_vm0, %v2907_v18  ;;  %3292 = vst.msk [vmem:[%s4456_s5 + $0x408] sm:$0xff] %vm3162_vm0, %v3035_v19 }
 0x121   : > { %v1891_v20 = vpop.f32.mrb[4].mxu0  ;;  %v2403_v21 = vpop.f32.mrb[4].mxu1 }
 0x122   : > { %v1892_v22 = vadd.f32 %v4445_v63, %v1891_v20  ;;  %v2404_v23 = vadd.f32 %v4445_v63, %v2403_v21  ;;  %v1893_v24 = vpop.f32.mrb[5].mxu0  ;;  %v2405_v25 = vpop.f32.mrb[5].mxu1 }
 0x123   : > { %v1894_v28 = vpop.f32.mrb[6].mxu0  ;;  %v2406_v29 = vpop.f32.mrb[6].mxu1  ;;  %v4009_v24 = vld [vmem:[%s4273_s28 + $0x5f0] ss:$8 sps:$4 sm:$0xff]  }
 0x124   : > { %v2908_v32 = vmax.f32 %v1892_v22, 0.0  ;;  %v3036_v33 = vmax.f32 %v2404_v23, 0.0  ;;  %v1895_v34 = vadd.f32 %v4445_v63, %v1894_v28  ;;  %v2407_v35 = vadd.f32 %v4445_v63, %v2406_v29  ;;  %v1896_v36 = vpop.f32.mrb[7].mxu0  ;;  %v2408_v37 = vpop.f32.mrb[7].mxu1  ;;  %v4008_v23 = vld [vmem:[%s4273_s28 + $0x1f0] ss:$8 sps:$4 sm:$0xff]  }
 0x125   : > { %v4012_v28 = vld [vmem:[%s4273_s28 + $0x604] ss:$8 sps:$4 sm:$0xff]  }
 0x126   : > { %3165 = vst.msk [vmem:[%s4456_s5 + $0x10] sm:$0xff] %vm3162_vm0, %v2908_v32  ;;  %3293 = vst.msk [vmem:[%s4456_s5 + $0x410] sm:$0xff] %vm3162_vm0, %v3036_v33  ;;  %v2909_v38 = vmax.f32 %v1895_v34, 0.0  ;;  %v3037_v39 = vmax.f32 %v2407_v35, 0.0  ;;  %2106 = vmatmul.mubr.bf16.gmra.mrb[112].mxu0 %v3990_v26  ;;  %2618 = vmatmul.mubr.bf16.gmra.mrb[112].mxu1 %v3991_v27  ;;  %v4010_v27 = vld [vmem:[%s4273_s28 + $0x204] ss:$8 sps:$4 sm:$0xff]  }
 0x127   : > { %2113 = vmatprep.mubr.bf16.mxu0 %v3992_v30  ;;  %2625 = vmatprep.mubr.bf16.mxu1 %v3994_v31 }
 0x128   : > { %3166 = vst.msk [vmem:[%s4456_s5 + $0x18] sm:$0xff] %vm3162_vm0, %v2909_v38  ;;  %3294 = vst.msk [vmem:[%s4456_s5 + $0x418] sm:$0xff] %vm3162_vm0, %v3037_v39 }
 0x129   : > { %v1899_v40 = vpop.f32.mrb[8].mxu0  ;;  %v2411_v41 = vpop.f32.mrb[8].mxu1 }
 0x12a   : > { %v1900_v42 = vadd.f32 %v4445_v63, %v1899_v40  ;;  %v2412_v43 = vadd.f32 %v4445_v63, %v2411_v41  ;;  %v1901_v44 = vpop.f32.mrb[9].mxu0  ;;  %v2413_v45 = vpop.f32.mrb[9].mxu1 }
 0x12b   : > { %v1902_v48 = vpop.f32.mrb[10].mxu0  ;;  %v2414_v49 = vpop.f32.mrb[10].mxu1  ;;  %v4015_v44 = vld [vmem:[%s4273_s28 + $0x600] ss:$8 sps:$4 sm:$0xff]  }
 0x12c   : > { %v2910_v52 = vmax.f32 %v1900_v42, 0.0  ;;  %v3038_v53 = vmax.f32 %v2412_v43, 0.0  ;;  %v1903_v54 = vadd.f32 %v4445_v63, %v1902_v48  ;;  %v2415_v55 = vadd.f32 %v4445_v63, %v2414_v49  ;;  %v1904_v56 = vpop.f32.mrb[11].mxu0  ;;  %v2416_v57 = vpop.f32.mrb[11].mxu1  ;;  %v4014_v43 = vld [vmem:[%s4273_s28 + $0x200] ss:$8 sps:$4 sm:$0xff]  }
 0x12d   : > { %v4018_v48 = vld [vmem:[%s4273_s28 + $0x614] ss:$8 sps:$4 sm:$0xff]  }
 0x12e   : > { %3167 = vst.msk [vmem:[%s4456_s5 + $0x20] sm:$0xff] %vm3162_vm0, %v2910_v52  ;;  %3295 = vst.msk [vmem:[%s4456_s5 + $0x420] sm:$0xff] %vm3162_vm0, %v3038_v53  ;;  %v2911_v58 = vmax.f32 %v1903_v54, 0.0  ;;  %v3039_v59 = vmax.f32 %v2415_v55, 0.0  ;;  %2114 = vmatmul.mubr.bf16.gmra.mrb[116].mxu0 %v3996_v46  ;;  %2626 = vmatmul.mubr.bf16.gmra.mrb[116].mxu1 %v3997_v47  ;;  %v4016_v47 = vld [vmem:[%s4273_s28 + $0x214] ss:$8 sps:$4 sm:$0xff]  }
 0x12f   : > { %2121 = vmatprep.mubr.bf16.mxu0 %v3998_v50  ;;  %2633 = vmatprep.mubr.bf16.mxu1 %v4000_v51 }
 0x130   : > { %3168 = vst.msk [vmem:[%s4456_s5 + $0x28] sm:$0xff] %vm3162_vm0, %v2911_v58  ;;  %3296 = vst.msk [vmem:[%s4456_s5 + $0x428] sm:$0xff] %vm3162_vm0, %v3039_v59 }
 0x131   : > { %v1907_v60 = vpop.f32.mrb[12].mxu0  ;;  %v2419_v61 = vpop.f32.mrb[12].mxu1 }
 0x132   : > { %v1908_v62 = vadd.f32 %v4445_v63, %v1907_v60  ;;  %v2420_v0 = vadd.f32 %v4445_v63, %v2419_v61  ;;  %v1909_v1 = vpop.f32.mrb[13].mxu0  ;;  %v2421_v2 = vpop.f32.mrb[13].mxu1 }
 0x133   : > { %v1910_v5 = vpop.f32.mrb[14].mxu0  ;;  %v2422_v6 = vpop.f32.mrb[14].mxu1  ;;  %v4021_v1 = vld [vmem:[%s4273_s28 + $0x610] ss:$8 sps:$4 sm:$0xff]  }
 0x134   : > { %v2912_v9 = vmax.f32 %v1908_v62, 0.0  ;;  %v3040_v10 = vmax.f32 %v2420_v0, 0.0  ;;  %v1911_v11 = vadd.f32 %v4445_v63, %v1910_v5  ;;  %v2423_v12 = vadd.f32 %v4445_v63, %v2422_v6  ;;  %v1912_v13 = vpop.f32.mrb[15].mxu0  ;;  %v2424_v14 = vpop.f32.mrb[15].mxu1  ;;  %v4020_v0 = vld [vmem:[%s4273_s28 + $0x210] ss:$8 sps:$4 sm:$0xff]  }
 0x135   : > { %v4024_v5 = vld [vmem:[%s4273_s28 + $0x624] ss:$8 sps:$4 sm:$0xff]  }
 0x136   : > { %3169 = vst.msk [vmem:[%s4456_s5 + $0x30] sm:$0xff] %vm3162_vm0, %v2912_v9  ;;  %3297 = vst.msk [vmem:[%s4456_s5 + $0x430] sm:$0xff] %vm3162_vm0, %v3040_v10  ;;  %v2913_v15 = vmax.f32 %v1911_v11, 0.0  ;;  %v3041_v16 = vmax.f32 %v2423_v12, 0.0  ;;  %2122 = vmatmul.mubr.bf16.gmra.mrb[120].mxu0 %v4002_v3  ;;  %2634 = vmatmul.mubr.bf16.gmra.mrb[120].mxu1 %v4003_v4  ;;  %v4022_v4 = vld [vmem:[%s4273_s28 + $0x224] ss:$8 sps:$4 sm:$0xff]  }
 0x137   : > { %2129 = vmatprep.mubr.bf16.mxu0 %v4004_v7  ;;  %2641 = vmatprep.mubr.bf16.mxu1 %v4006_v8 }
 0x138   : > { %3170 = vst.msk [vmem:[%s4456_s5 + $0x38] sm:$0xff] %vm3162_vm0, %v2913_v15  ;;  %3298 = vst.msk [vmem:[%s4456_s5 + $0x438] sm:$0xff] %vm3162_vm0, %v3041_v16 }
 0x139   : > { %v1915_v17 = vpop.f32.mrb[16].mxu0  ;;  %v2427_v18 = vpop.f32.mrb[16].mxu1 }
 0x13a   : > { %v1916_v19 = vadd.f32 %v4445_v63, %v1915_v17  ;;  %v2428_v20 = vadd.f32 %v4445_v63, %v2427_v18  ;;  %v1917_v21 = vpop.f32.mrb[17].mxu0  ;;  %v2429_v22 = vpop.f32.mrb[17].mxu1 }
 0x13b   : > { %v1918_v25 = vpop.f32.mrb[18].mxu0  ;;  %v2430_v26 = vpop.f32.mrb[18].mxu1  ;;  %v4027_v21 = vld [vmem:[%s4273_s28 + $0x620] ss:$8 sps:$4 sm:$0xff]  }
 0x13c   : > { %v2914_v29 = vmax.f32 %v1916_v19, 0.0  ;;  %v3042_v30 = vmax.f32 %v2428_v20, 0.0  ;;  %v1919_v31 = vadd.f32 %v4445_v63, %v1918_v25  ;;  %v2431_v32 = vadd.f32 %v4445_v63, %v2430_v26  ;;  %v1920_v33 = vpop.f32.mrb[19].mxu0  ;;  %v2432_v34 = vpop.f32.mrb[19].mxu1  ;;  %v4026_v20 = vld [vmem:[%s4273_s28 + $0x220] ss:$8 sps:$4 sm:$0xff]  }
 0x13d   : > { %v4030_v25 = vld [vmem:[%s4273_s28 + $0x634] ss:$8 sps:$4 sm:$0xff]  }
 0x13e   : > { %3171 = vst.msk [vmem:[%s4456_s5 + $0x40] sm:$0xff] %vm3162_vm0, %v2914_v29  ;;  %3299 = vst.msk [vmem:[%s4456_s5 + $0x440] sm:$0xff] %vm3162_vm0, %v3042_v30  ;;  %v2915_v35 = vmax.f32 %v1919_v31, 0.0  ;;  %v3043_v36 = vmax.f32 %v2431_v32, 0.0  ;;  %2130 = vmatmul.mubr.bf16.gmra.mrb[124].mxu0 %v4008_v23  ;;  %2642 = vmatmul.mubr.bf16.gmra.mrb[124].mxu1 %v4009_v24  ;;  %v4028_v24 = vld [vmem:[%s4273_s28 + $0x234] ss:$8 sps:$4 sm:$0xff]  }
 0x13f   : > { %2137 = vmatprep.mubr.bf16.mxu0 %v4010_v27  ;;  %2649 = vmatprep.mubr.bf16.mxu1 %v4012_v28 }
 0x140   : > { %3172 = vst.msk [vmem:[%s4456_s5 + $0x48] sm:$0xff] %vm3162_vm0, %v2915_v35  ;;  %3300 = vst.msk [vmem:[%s4456_s5 + $0x448] sm:$0xff] %vm3162_vm0, %v3043_v36 }
 0x141   : > { %v1923_v37 = vpop.f32.mrb[20].mxu0  ;;  %v2435_v38 = vpop.f32.mrb[20].mxu1 }
 0x142   : > { %v1924_v39 = vadd.f32 %v4445_v63, %v1923_v37  ;;  %v2436_v40 = vadd.f32 %v4445_v63, %v2435_v38  ;;  %v1925_v41 = vpop.f32.mrb[21].mxu0  ;;  %v2437_v42 = vpop.f32.mrb[21].mxu1 }
 0x143   : > { %v1926_v45 = vpop.f32.mrb[22].mxu0  ;;  %v2438_v46 = vpop.f32.mrb[22].mxu1  ;;  %v4033_v41 = vld [vmem:[%s4273_s28 + $0x630] ss:$8 sps:$4 sm:$0xff]  }
 0x144   : > { %v2916_v49 = vmax.f32 %v1924_v39, 0.0  ;;  %v3044_v50 = vmax.f32 %v2436_v40, 0.0  ;;  %v1927_v51 = vadd.f32 %v4445_v63, %v1926_v45  ;;  %v2439_v52 = vadd.f32 %v4445_v63, %v2438_v46  ;;  %v1928_v53 = vpop.f32.mrb[23].mxu0  ;;  %v2440_v54 = vpop.f32.mrb[23].mxu1  ;;  %v4032_v40 = vld [vmem:[%s4273_s28 + $0x230] ss:$8 sps:$4 sm:$0xff]  }
 0x145   : > { %v4036_v45 = vld [vmem:[%s4273_s28 + $0x644] ss:$8 sps:$4 sm:$0xff]  }
 0x146   : > { %3173 = vst.msk [vmem:[%s4456_s5 + $0x50] sm:$0xff] %vm3162_vm0, %v2916_v49  ;;  %3301 = vst.msk [vmem:[%s4456_s5 + $0x450] sm:$0xff] %vm3162_vm0, %v3044_v50  ;;  %v2917_v55 = vmax.f32 %v1927_v51, 0.0  ;;  %v3045_v56 = vmax.f32 %v2439_v52, 0.0  ;;  %2138 = vmatmul.mubr.bf16.gmra.mrb[128].mxu0 %v4014_v43  ;;  %2650 = vmatmul.mubr.bf16.gmra.mrb[128].mxu1 %v4015_v44  ;;  %v4034_v44 = vld [vmem:[%s4273_s28 + $0x244] ss:$8 sps:$4 sm:$0xff]  }
 0x147   : > { %2145 = vmatprep.mubr.bf16.mxu0 %v4016_v47  ;;  %2657 = vmatprep.mubr.bf16.mxu1 %v4018_v48 }
 0x148   : > { %3174 = vst.msk [vmem:[%s4456_s5 + $0x58] sm:$0xff] %vm3162_vm0, %v2917_v55  ;;  %3302 = vst.msk [vmem:[%s4456_s5 + $0x458] sm:$0xff] %vm3162_vm0, %v3045_v56 }
 0x149   : > { %v1931_v57 = vpop.f32.mrb[24].mxu0  ;;  %v2443_v58 = vpop.f32.mrb[24].mxu1 }
 0x14a   : > { %v1932_v59 = vadd.f32 %v4445_v63, %v1931_v57  ;;  %v2444_v60 = vadd.f32 %v4445_v63, %v2443_v58  ;;  %v1933_v61 = vpop.f32.mrb[25].mxu0  ;;  %v2445_v62 = vpop.f32.mrb[25].mxu1 }
 0x14b   : > { %v1934_v2 = vpop.f32.mrb[26].mxu0  ;;  %v2446_v3 = vpop.f32.mrb[26].mxu1  ;;  %v4039_v61 = vld [vmem:[%s4273_s28 + $0x640] ss:$8 sps:$4 sm:$0xff]  }
 0x14c   : > { %v2918_v6 = vmax.f32 %v1932_v59, 0.0  ;;  %v3046_v7 = vmax.f32 %v2444_v60, 0.0  ;;  %v1935_v8 = vadd.f32 %v4445_v63, %v1934_v2  ;;  %v2447_v9 = vadd.f32 %v4445_v63, %v2446_v3  ;;  %v1936_v10 = vpop.f32.mrb[27].mxu0  ;;  %v2448_v11 = vpop.f32.mrb[27].mxu1  ;;  %v4038_v60 = vld [vmem:[%s4273_s28 + $0x240] ss:$8 sps:$4 sm:$0xff]  }
 0x14d   : > { %v4042_v2 = vld [vmem:[%s4273_s28 + $0x654] ss:$8 sps:$4 sm:$0xff]  }
 0x14e   : > { %3175 = vst.msk [vmem:[%s4456_s5 + $0x60] sm:$0xff] %vm3162_vm0, %v2918_v6  ;;  %3303 = vst.msk [vmem:[%s4456_s5 + $0x460] sm:$0xff] %vm3162_vm0, %v3046_v7  ;;  %v2919_v12 = vmax.f32 %v1935_v8, 0.0  ;;  %v3047_v13 = vmax.f32 %v2447_v9, 0.0  ;;  %2146 = vmatmul.mubr.bf16.gmra.mrb[132].mxu0 %v4020_v0  ;;  %2658 = vmatmul.mubr.bf16.gmra.mrb[132].mxu1 %v4021_v1  ;;  %v4040_v1 = vld [vmem:[%s4273_s28 + $0x254] ss:$8 sps:$4 sm:$0xff]  }
 0x14f   : > { %2153 = vmatprep.mubr.bf16.mxu0 %v4022_v4  ;;  %2665 = vmatprep.mubr.bf16.mxu1 %v4024_v5 }
 0x150   : > { %3176 = vst.msk [vmem:[%s4456_s5 + $0x68] sm:$0xff] %vm3162_vm0, %v2919_v12  ;;  %3304 = vst.msk [vmem:[%s4456_s5 + $0x468] sm:$0xff] %vm3162_vm0, %v3047_v13 }
 0x151   : > { %v1939_v14 = vpop.f32.mrb[28].mxu0  ;;  %v2451_v15 = vpop.f32.mrb[28].mxu1 }
 0x152   : > { %v1940_v16 = vadd.f32 %v4445_v63, %v1939_v14  ;;  %v2452_v17 = vadd.f32 %v4445_v63, %v2451_v15  ;;  %v1941_v18 = vpop.f32.mrb[29].mxu0  ;;  %v2453_v19 = vpop.f32.mrb[29].mxu1 }
 0x153   : > { %v1942_v22 = vpop.f32.mrb[30].mxu0  ;;  %v2454_v23 = vpop.f32.mrb[30].mxu1  ;;  %v4045_v18 = vld [vmem:[%s4273_s28 + $0x650] ss:$8 sps:$4 sm:$0xff]  }
 0x154   : > { %v2920_v26 = vmax.f32 %v1940_v16, 0.0  ;;  %v3048_v27 = vmax.f32 %v2452_v17, 0.0  ;;  %v1943_v28 = vadd.f32 %v4445_v63, %v1942_v22  ;;  %v2455_v29 = vadd.f32 %v4445_v63, %v2454_v23  ;;  %v1944_v30 = vpop.f32.mrb[31].mxu0  ;;  %v2456_v31 = vpop.f32.mrb[31].mxu1  ;;  %v4044_v17 = vld [vmem:[%s4273_s28 + $0x250] ss:$8 sps:$4 sm:$0xff]  }
 0x155   : > { %v4048_v22 = vld [vmem:[%s4273_s28 + $0x664] ss:$8 sps:$4 sm:$0xff]  }
 0x156   : > { %3177 = vst.msk [vmem:[%s4456_s5 + $0x70] sm:$0xff] %vm3162_vm0, %v2920_v26  ;;  %3305 = vst.msk [vmem:[%s4456_s5 + $0x470] sm:$0xff] %vm3162_vm0, %v3048_v27  ;;  %v2921_v32 = vmax.f32 %v1943_v28, 0.0  ;;  %v3049_v33 = vmax.f32 %v2455_v29, 0.0  ;;  %2154 = vmatmul.mubr.bf16.gmra.mrb[136].mxu0 %v4026_v20  ;;  %2666 = vmatmul.mubr.bf16.gmra.mrb[136].mxu1 %v4027_v21  ;;  %v4046_v21 = vld [vmem:[%s4273_s28 + $0x264] ss:$8 sps:$4 sm:$0xff]  }
 0x157   : > { %2161 = vmatprep.mubr.bf16.mxu0 %v4028_v24  ;;  %2673 = vmatprep.mubr.bf16.mxu1 %v4030_v25 }
 0x158   : > { %3178 = vst.msk [vmem:[%s4456_s5 + $0x78] sm:$0xff] %vm3162_vm0, %v2921_v32  ;;  %3306 = vst.msk [vmem:[%s4456_s5 + $0x478] sm:$0xff] %vm3162_vm0, %v3049_v33 }
 0x159   : > { %v1947_v34 = vpop.f32.mrb[32].mxu0  ;;  %v2459_v35 = vpop.f32.mrb[32].mxu1 }
 0x15a   : > { %v1948_v36 = vadd.f32 %v4445_v63, %v1947_v34  ;;  %v2460_v37 = vadd.f32 %v4445_v63, %v2459_v35  ;;  %v1949_v38 = vpop.f32.mrb[33].mxu0  ;;  %v2461_v39 = vpop.f32.mrb[33].mxu1 }
 0x15b   : > { %v1950_v42 = vpop.f32.mrb[34].mxu0  ;;  %v2462_v43 = vpop.f32.mrb[34].mxu1  ;;  %v4051_v38 = vld [vmem:[%s4273_s28 + $0x660] ss:$8 sps:$4 sm:$0xff]  }
 0x15c   : > { %v2922_v46 = vmax.f32 %v1948_v36, 0.0  ;;  %v3050_v47 = vmax.f32 %v2460_v37, 0.0  ;;  %v1951_v48 = vadd.f32 %v4445_v63, %v1950_v42  ;;  %v2463_v49 = vadd.f32 %v4445_v63, %v2462_v43  ;;  %v1952_v50 = vpop.f32.mrb[35].mxu0  ;;  %v2464_v51 = vpop.f32.mrb[35].mxu1  ;;  %v4050_v37 = vld [vmem:[%s4273_s28 + $0x260] ss:$8 sps:$4 sm:$0xff]  }
 0x15d   : > { %v4054_v42 = vld [vmem:[%s4273_s28 + $0x674] ss:$8 sps:$4 sm:$0xff]  }
 0x15e   : > { %3179 = vst.msk [vmem:[%s4456_s5 + $0x80] sm:$0xff] %vm3162_vm0, %v2922_v46  ;;  %3307 = vst.msk [vmem:[%s4456_s5 + $0x480] sm:$0xff] %vm3162_vm0, %v3050_v47  ;;  %v2923_v52 = vmax.f32 %v1951_v48, 0.0  ;;  %v3051_v53 = vmax.f32 %v2463_v49, 0.0  ;;  %2162 = vmatmul.mubr.bf16.gmra.mrb[140].mxu0 %v4032_v40  ;;  %2674 = vmatmul.mubr.bf16.gmra.mrb[140].mxu1 %v4033_v41  ;;  %v4052_v41 = vld [vmem:[%s4273_s28 + $0x274] ss:$8 sps:$4 sm:$0xff]  }
 0x15f   : > { %2169 = vmatprep.mubr.bf16.mxu0 %v4034_v44  ;;  %2681 = vmatprep.mubr.bf16.mxu1 %v4036_v45 }
 0x160   : > { %3180 = vst.msk [vmem:[%s4456_s5 + $0x88] sm:$0xff] %vm3162_vm0, %v2923_v52  ;;  %3308 = vst.msk [vmem:[%s4456_s5 + $0x488] sm:$0xff] %vm3162_vm0, %v3051_v53 }
 0x161   : > { %v1955_v54 = vpop.f32.mrb[36].mxu0  ;;  %v2467_v55 = vpop.f32.mrb[36].mxu1 }
 0x162   : > { %v1956_v56 = vadd.f32 %v4445_v63, %v1955_v54  ;;  %v2468_v57 = vadd.f32 %v4445_v63, %v2467_v55  ;;  %v1957_v58 = vpop.f32.mrb[37].mxu0  ;;  %v2469_v59 = vpop.f32.mrb[37].mxu1 }
 0x163   : > { %v1958_v62 = vpop.f32.mrb[38].mxu0  ;;  %v2470_v0 = vpop.f32.mrb[38].mxu1  ;;  %v4057_v58 = vld [vmem:[%s4273_s28 + $0x670] ss:$8 sps:$4 sm:$0xff]  }
 0x164   : > { %v2924_v3 = vmax.f32 %v1956_v56, 0.0  ;;  %v3052_v4 = vmax.f32 %v2468_v57, 0.0  ;;  %v1959_v5 = vadd.f32 %v4445_v63, %v1958_v62  ;;  %v2471_v6 = vadd.f32 %v4445_v63, %v2470_v0  ;;  %v1960_v7 = vpop.f32.mrb[39].mxu0  ;;  %v2472_v8 = vpop.f32.mrb[39].mxu1  ;;  %v4056_v57 = vld [vmem:[%s4273_s28 + $0x270] ss:$8 sps:$4 sm:$0xff]  }
 0x165   : > { %v4060_v62 = vld [vmem:[%s4273_s28 + $0x684] ss:$8 sps:$4 sm:$0xff]  }
 0x166   : > { %3181 = vst.msk [vmem:[%s4456_s5 + $0x90] sm:$0xff] %vm3162_vm0, %v2924_v3  ;;  %3309 = vst.msk [vmem:[%s4456_s5 + $0x490] sm:$0xff] %vm3162_vm0, %v3052_v4  ;;  %v2925_v9 = vmax.f32 %v1959_v5, 0.0  ;;  %v3053_v10 = vmax.f32 %v2471_v6, 0.0  ;;  %2170 = vmatmul.mubr.bf16.gmra.mrb[144].mxu0 %v4038_v60  ;;  %2682 = vmatmul.mubr.bf16.gmra.mrb[144].mxu1 %v4039_v61  ;;  %v4058_v61 = vld [vmem:[%s4273_s28 + $0x284] ss:$8 sps:$4 sm:$0xff]  }
 0x167   : > { %2177 = vmatprep.mubr.bf16.mxu0 %v4040_v1  ;;  %2689 = vmatprep.mubr.bf16.mxu1 %v4042_v2 }
 0x168   : > { %3182 = vst.msk [vmem:[%s4456_s5 + $0x98] sm:$0xff] %vm3162_vm0, %v2925_v9  ;;  %3310 = vst.msk [vmem:[%s4456_s5 + $0x498] sm:$0xff] %vm3162_vm0, %v3053_v10 }
 0x169   : > { %v1963_v11 = vpop.f32.mrb[40].mxu0  ;;  %v2475_v12 = vpop.f32.mrb[40].mxu1 }
 0x16a   : > { %v1964_v13 = vadd.f32 %v4445_v63, %v1963_v11  ;;  %v2476_v14 = vadd.f32 %v4445_v63, %v2475_v12  ;;  %v1965_v15 = vpop.f32.mrb[41].mxu0  ;;  %v2477_v16 = vpop.f32.mrb[41].mxu1 }
 0x16b   : > { %v1966_v19 = vpop.f32.mrb[42].mxu0  ;;  %v2478_v20 = vpop.f32.mrb[42].mxu1  ;;  %v4063_v15 = vld [vmem:[%s4273_s28 + $0x680] ss:$8 sps:$4 sm:$0xff]  }
 0x16c   : > { %v2926_v23 = vmax.f32 %v1964_v13, 0.0  ;;  %v3054_v24 = vmax.f32 %v2476_v14, 0.0  ;;  %v1967_v25 = vadd.f32 %v4445_v63, %v1966_v19  ;;  %v2479_v26 = vadd.f32 %v4445_v63, %v2478_v20  ;;  %v1968_v27 = vpop.f32.mrb[43].mxu0  ;;  %v2480_v28 = vpop.f32.mrb[43].mxu1  ;;  %v4062_v14 = vld [vmem:[%s4273_s28 + $0x280] ss:$8 sps:$4 sm:$0xff]  }
 0x16d   : > { %v4066_v19 = vld [vmem:[%s4273_s28 + $0x694] ss:$8 sps:$4 sm:$0xff]  }
 0x16e   : > { %3183 = vst.msk [vmem:[%s4456_s5 + $0xa0] sm:$0xff] %vm3162_vm0, %v2926_v23  ;;  %3311 = vst.msk [vmem:[%s4456_s5 + $0x4a0] sm:$0xff] %vm3162_vm0, %v3054_v24  ;;  %v2927_v29 = vmax.f32 %v1967_v25, 0.0  ;;  %v3055_v30 = vmax.f32 %v2479_v26, 0.0  ;;  %2178 = vmatmul.mubr.bf16.gmra.mrb[148].mxu0 %v4044_v17  ;;  %2690 = vmatmul.mubr.bf16.gmra.mrb[148].mxu1 %v4045_v18  ;;  %v4064_v18 = vld [vmem:[%s4273_s28 + $0x294] ss:$8 sps:$4 sm:$0xff]  }
 0x16f   : > { %2185 = vmatprep.mubr.bf16.mxu0 %v4046_v21  ;;  %2697 = vmatprep.mubr.bf16.mxu1 %v4048_v22 }
 0x170   : > { %3184 = vst.msk [vmem:[%s4456_s5 + $0xa8] sm:$0xff] %vm3162_vm0, %v2927_v29  ;;  %3312 = vst.msk [vmem:[%s4456_s5 + $0x4a8] sm:$0xff] %vm3162_vm0, %v3055_v30 }
 0x171   : > { %v1971_v31 = vpop.f32.mrb[44].mxu0  ;;  %v2483_v32 = vpop.f32.mrb[44].mxu1 }
 0x172   : > { %v1972_v33 = vadd.f32 %v4445_v63, %v1971_v31  ;;  %v2484_v34 = vadd.f32 %v4445_v63, %v2483_v32  ;;  %v1973_v35 = vpop.f32.mrb[45].mxu0  ;;  %v2485_v36 = vpop.f32.mrb[45].mxu1 }
 0x173   : > { %v1974_v39 = vpop.f32.mrb[46].mxu0  ;;  %v2486_v40 = vpop.f32.mrb[46].mxu1  ;;  %v4069_v35 = vld [vmem:[%s4273_s28 + $0x690] ss:$8 sps:$4 sm:$0xff]  }
 0x174   : > { %v2928_v43 = vmax.f32 %v1972_v33, 0.0  ;;  %v3056_v44 = vmax.f32 %v2484_v34, 0.0  ;;  %v1975_v45 = vadd.f32 %v4445_v63, %v1974_v39  ;;  %v2487_v46 = vadd.f32 %v4445_v63, %v2486_v40  ;;  %v1976_v47 = vpop.f32.mrb[47].mxu0  ;;  %v2488_v48 = vpop.f32.mrb[47].mxu1  ;;  %v4068_v34 = vld [vmem:[%s4273_s28 + $0x290] ss:$8 sps:$4 sm:$0xff]  }
 0x175   : > { %v4072_v39 = vld [vmem:[%s4273_s28 + $0x6a4] ss:$8 sps:$4 sm:$0xff]  }
 0x176   : > { %3185 = vst.msk [vmem:[%s4456_s5 + $0xb0] sm:$0xff] %vm3162_vm0, %v2928_v43  ;;  %3313 = vst.msk [vmem:[%s4456_s5 + $0x4b0] sm:$0xff] %vm3162_vm0, %v3056_v44  ;;  %v2929_v49 = vmax.f32 %v1975_v45, 0.0  ;;  %v3057_v50 = vmax.f32 %v2487_v46, 0.0  ;;  %2186 = vmatmul.mubr.bf16.gmra.mrb[152].mxu0 %v4050_v37  ;;  %2698 = vmatmul.mubr.bf16.gmra.mrb[152].mxu1 %v4051_v38  ;;  %v4070_v38 = vld [vmem:[%s4273_s28 + $0x2a4] ss:$8 sps:$4 sm:$0xff]  }
 0x177   : > { %2193 = vmatprep.mubr.bf16.mxu0 %v4052_v41  ;;  %2705 = vmatprep.mubr.bf16.mxu1 %v4054_v42 }
 0x178   : > { %3186 = vst.msk [vmem:[%s4456_s5 + $0xb8] sm:$0xff] %vm3162_vm0, %v2929_v49  ;;  %3314 = vst.msk [vmem:[%s4456_s5 + $0x4b8] sm:$0xff] %vm3162_vm0, %v3057_v50 }
 0x179   : > { %v1979_v51 = vpop.f32.mrb[48].mxu0  ;;  %v2491_v52 = vpop.f32.mrb[48].mxu1 }
 0x17a   : > { %v1980_v53 = vadd.f32 %v4445_v63, %v1979_v51  ;;  %v2492_v54 = vadd.f32 %v4445_v63, %v2491_v52  ;;  %v1981_v55 = vpop.f32.mrb[49].mxu0  ;;  %v2493_v56 = vpop.f32.mrb[49].mxu1 }
 0x17b   : > { %v1982_v59 = vpop.f32.mrb[50].mxu0  ;;  %v2494_v60 = vpop.f32.mrb[50].mxu1  ;;  %v4075_v55 = vld [vmem:[%s4273_s28 + $0x6a0] ss:$8 sps:$4 sm:$0xff]  }
 0x17c   : > { %v2930_v0 = vmax.f32 %v1980_v53, 0.0  ;;  %v3058_v1 = vmax.f32 %v2492_v54, 0.0  ;;  %v1983_v2 = vadd.f32 %v4445_v63, %v1982_v59  ;;  %v2495_v3 = vadd.f32 %v4445_v63, %v2494_v60  ;;  %v1984_v4 = vpop.f32.mrb[51].mxu0  ;;  %v2496_v5 = vpop.f32.mrb[51].mxu1  ;;  %v4074_v54 = vld [vmem:[%s4273_s28 + $0x2a0] ss:$8 sps:$4 sm:$0xff]  }
 0x17d   : > { %v4078_v59 = vld [vmem:[%s4273_s28 + $0x6b4] ss:$8 sps:$4 sm:$0xff]  }
 0x17e   : > { %3187 = vst.msk [vmem:[%s4456_s5 + $0xc0] sm:$0xff] %vm3162_vm0, %v2930_v0  ;;  %3315 = vst.msk [vmem:[%s4456_s5 + $0x4c0] sm:$0xff] %vm3162_vm0, %v3058_v1  ;;  %v2931_v6 = vmax.f32 %v1983_v2, 0.0  ;;  %v3059_v7 = vmax.f32 %v2495_v3, 0.0  ;;  %2194 = vmatmul.mubr.bf16.gmra.mrb[156].mxu0 %v4056_v57  ;;  %2706 = vmatmul.mubr.bf16.gmra.mrb[156].mxu1 %v4057_v58  ;;  %v4076_v58 = vld [vmem:[%s4273_s28 + $0x2b4] ss:$8 sps:$4 sm:$0xff]  }
 0x17f   : > { %2201 = vmatprep.mubr.bf16.mxu0 %v4058_v61  ;;  %2713 = vmatprep.mubr.bf16.mxu1 %v4060_v62 }
 0x180   : > { %3188 = vst.msk [vmem:[%s4456_s5 + $0xc8] sm:$0xff] %vm3162_vm0, %v2931_v6  ;;  %3316 = vst.msk [vmem:[%s4456_s5 + $0x4c8] sm:$0xff] %vm3162_vm0, %v3059_v7 }
 0x181   : > { %v1987_v8 = vpop.f32.mrb[52].mxu0  ;;  %v2499_v9 = vpop.f32.mrb[52].mxu1 }
 0x182   : > { %v1988_v10 = vadd.f32 %v4445_v63, %v1987_v8  ;;  %v2500_v11 = vadd.f32 %v4445_v63, %v2499_v9  ;;  %v1989_v12 = vpop.f32.mrb[53].mxu0  ;;  %v2501_v13 = vpop.f32.mrb[53].mxu1 }
 0x183   : > { %v1990_v16 = vpop.f32.mrb[54].mxu0  ;;  %v2502_v17 = vpop.f32.mrb[54].mxu1  ;;  %v4081_v12 = vld [vmem:[%s4273_s28 + $0x6b0] ss:$8 sps:$4 sm:$0xff]  }
 0x184   : > { %v2932_v20 = vmax.f32 %v1988_v10, 0.0  ;;  %v3060_v21 = vmax.f32 %v2500_v11, 0.0  ;;  %v1991_v22 = vadd.f32 %v4445_v63, %v1990_v16  ;;  %v2503_v23 = vadd.f32 %v4445_v63, %v2502_v17  ;;  %v1992_v24 = vpop.f32.mrb[55].mxu0  ;;  %v2504_v25 = vpop.f32.mrb[55].mxu1  ;;  %v4080_v11 = vld [vmem:[%s4273_s28 + $0x2b0] ss:$8 sps:$4 sm:$0xff]  }
 0x185   : > { %v4084_v16 = vld [vmem:[%s4273_s28 + $0x6c4] ss:$8 sps:$4 sm:$0xff]  }
 0x186   : > { %3189 = vst.msk [vmem:[%s4456_s5 + $0xd0] sm:$0xff] %vm3162_vm0, %v2932_v20  ;;  %3317 = vst.msk [vmem:[%s4456_s5 + $0x4d0] sm:$0xff] %vm3162_vm0, %v3060_v21  ;;  %v2933_v26 = vmax.f32 %v1991_v22, 0.0  ;;  %v3061_v27 = vmax.f32 %v2503_v23, 0.0  ;;  %2202 = vmatmul.mubr.bf16.gmra.mrb[160].mxu0 %v4062_v14  ;;  %2714 = vmatmul.mubr.bf16.gmra.mrb[160].mxu1 %v4063_v15  ;;  %v4082_v15 = vld [vmem:[%s4273_s28 + $0x2c4] ss:$8 sps:$4 sm:$0xff]  }
 0x187   : > { %2209 = vmatprep.mubr.bf16.mxu0 %v4064_v18  ;;  %2721 = vmatprep.mubr.bf16.mxu1 %v4066_v19 }
 0x188   : > { %3190 = vst.msk [vmem:[%s4456_s5 + $0xd8] sm:$0xff] %vm3162_vm0, %v2933_v26  ;;  %3318 = vst.msk [vmem:[%s4456_s5 + $0x4d8] sm:$0xff] %vm3162_vm0, %v3061_v27 }
 0x189   : > { %v1995_v28 = vpop.f32.mrb[56].mxu0  ;;  %v2507_v29 = vpop.f32.mrb[56].mxu1 }
 0x18a   : > { %v1996_v30 = vadd.f32 %v4445_v63, %v1995_v28  ;;  %v2508_v31 = vadd.f32 %v4445_v63, %v2507_v29  ;;  %v1997_v32 = vpop.f32.mrb[57].mxu0  ;;  %v2509_v33 = vpop.f32.mrb[57].mxu1 }
 0x18b   : > { %v1998_v36 = vpop.f32.mrb[58].mxu0  ;;  %v2510_v37 = vpop.f32.mrb[58].mxu1  ;;  %v4087_v32 = vld [vmem:[%s4273_s28 + $0x6c0] ss:$8 sps:$4 sm:$0xff]  }
 0x18c   : > { %v2934_v40 = vmax.f32 %v1996_v30, 0.0  ;;  %v3062_v41 = vmax.f32 %v2508_v31, 0.0  ;;  %v1999_v42 = vadd.f32 %v4445_v63, %v1998_v36  ;;  %v2511_v43 = vadd.f32 %v4445_v63, %v2510_v37  ;;  %v2000_v44 = vpop.f32.mrb[59].mxu0  ;;  %v2512_v45 = vpop.f32.mrb[59].mxu1  ;;  %v4086_v31 = vld [vmem:[%s4273_s28 + $0x2c0] ss:$8 sps:$4 sm:$0xff]  }
 0x18d   : > { %v4090_v36 = vld [vmem:[%s4273_s28 + $0x6d4] ss:$8 sps:$4 sm:$0xff]  }
 0x18e   : > { %3191 = vst.msk [vmem:[%s4456_s5 + $0xe0] sm:$0xff] %vm3162_vm0, %v2934_v40  ;;  %3319 = vst.msk [vmem:[%s4456_s5 + $0x4e0] sm:$0xff] %vm3162_vm0, %v3062_v41  ;;  %v2935_v46 = vmax.f32 %v1999_v42, 0.0  ;;  %v3063_v47 = vmax.f32 %v2511_v43, 0.0  ;;  %2210 = vmatmul.mubr.bf16.gmra.mrb[164].mxu0 %v4068_v34  ;;  %2722 = vmatmul.mubr.bf16.gmra.mrb[164].mxu1 %v4069_v35  ;;  %v4088_v35 = vld [vmem:[%s4273_s28 + $0x2d4] ss:$8 sps:$4 sm:$0xff]  }
 0x18f   : > { %2217 = vmatprep.mubr.bf16.mxu0 %v4070_v38  ;;  %2729 = vmatprep.mubr.bf16.mxu1 %v4072_v39 }
 0x190   : > { %3192 = vst.msk [vmem:[%s4456_s5 + $0xe8] sm:$0xff] %vm3162_vm0, %v2935_v46  ;;  %3320 = vst.msk [vmem:[%s4456_s5 + $0x4e8] sm:$0xff] %vm3162_vm0, %v3063_v47 }
 0x191   : > { %v2003_v48 = vpop.f32.mrb[60].mxu0  ;;  %v2515_v49 = vpop.f32.mrb[60].mxu1 }
 0x192   : > { %v2004_v50 = vadd.f32 %v4445_v63, %v2003_v48  ;;  %v2516_v51 = vadd.f32 %v4445_v63, %v2515_v49  ;;  %v2005_v52 = vpop.f32.mrb[61].mxu0  ;;  %v2517_v53 = vpop.f32.mrb[61].mxu1  ;;  %v4746_v48 = vld [vmem:[%s5378_s2] ss:$0 sm:$0xff] }
 0x193   : > { %v2006_v56 = vpop.f32.mrb[62].mxu0  ;;  %v2518_v57 = vpop.f32.mrb[62].mxu1  ;;  %v4092_v52 = vld [vmem:[%s4273_s28 + $0x2d0] ss:$8 sps:$4 sm:$0xff]  }
 0x194   : > { %v2936_v60 = vmax.f32 %v2004_v50, 0.0  ;;  %v3064_v61 = vmax.f32 %v2516_v51, 0.0  ;;  %v2007_v62 = vadd.f32 %v4445_v63, %v2006_v56  ;;  %v2519_v0 = vadd.f32 %v4445_v63, %v2518_v57  ;;  %v2008_v1 = vpop.f32.mrb[63].mxu0  ;;  %v2520_v2 = vpop.f32.mrb[63].mxu1  ;;  %v4093_v53 = vld [vmem:[%s4273_s28 + $0x6d0] ss:$8 sps:$4 sm:$0xff]  }
 0x195   : > { %v4094_v56 = vld [vmem:[%s4273_s28 + $0x2e4] ss:$8 sps:$4 sm:$0xff]  }
 0x196   : > { %3193 = vst.msk [vmem:[%s4456_s5 + $0xf0] sm:$0xff] %vm3162_vm0, %v2936_v60  ;;  %3321 = vst.msk [vmem:[%s4456_s5 + $0x4f0] sm:$0xff] %vm3162_vm0, %v3064_v61  ;;  %v2937_v3 = vmax.f32 %v2007_v62, 0.0  ;;  %v3065_v4 = vmax.f32 %v2519_v0, 0.0  ;;  %2218 = vmatmul.mubr.bf16.gmra.mrb[168].mxu0 %v4074_v54  ;;  %2730 = vmatmul.mubr.bf16.gmra.mrb[168].mxu1 %v4075_v55  ;;  %v4096_v57 = vld [vmem:[%s4273_s28 + $0x6e4] ss:$8 sps:$4 sm:$0xff]  }
 0x197   : > { %2225 = vmatprep.mubr.bf16.mxu0 %v4076_v58  ;;  %2737 = vmatprep.mubr.bf16.mxu1 %v4078_v59 }
 0x198   : > { %3194 = vst.msk [vmem:[%s4456_s5 + $0xf8] sm:$0xff] %vm3162_vm0, %v2937_v3  ;;  %3322 = vst.msk [vmem:[%s4456_s5 + $0x4f8] sm:$0xff] %vm3162_vm0, %v3065_v4 }
 0x199   : > { %v2011_v5 = vpop.f32.mrb[64].mxu0  ;;  %v2523_v6 = vpop.f32.mrb[64].mxu1 }
 0x19a   : > { %v2012_v7 = vadd.f32 %v4445_v63, %v2011_v5  ;;  %v2524_v8 = vadd.f32 %v4445_v63, %v2523_v6  ;;  %v2013_v9 = vpop.f32.mrb[65].mxu0  ;;  %v2525_v10 = vpop.f32.mrb[65].mxu1 }
 0x19b   : > { %v2014_v13 = vpop.f32.mrb[66].mxu0  ;;  %v2526_v14 = vpop.f32.mrb[66].mxu1  ;;  %v4099_v9 = vld [vmem:[%s4273_s28 + $0x6e0] ss:$8 sps:$4 sm:$0xff]  }
 0x19c   : > { %v2938_v17 = vmax.f32 %v2012_v7, 0.0  ;;  %v3066_v18 = vmax.f32 %v2524_v8, 0.0  ;;  %v2015_v19 = vadd.f32 %v4445_v63, %v2014_v13  ;;  %v2527_v20 = vadd.f32 %v4445_v63, %v2526_v14  ;;  %v2016_v21 = vpop.f32.mrb[67].mxu0  ;;  %v2528_v22 = vpop.f32.mrb[67].mxu1  ;;  %v4098_v8 = vld [vmem:[%s4273_s28 + $0x2e0] ss:$8 sps:$4 sm:$0xff]  }
 0x19d   : > { %v4102_v13 = vld [vmem:[%s4273_s28 + $0x6f4] ss:$8 sps:$4 sm:$0xff]  }
 0x19e   : > { %3195 = vst.msk [vmem:[%s4456_s5 + $0x100] sm:$0xff] %vm3162_vm0, %v2938_v17  ;;  %3323 = vst.msk [vmem:[%s4456_s5 + $0x500] sm:$0xff] %vm3162_vm0, %v3066_v18  ;;  %v2939_v23 = vmax.f32 %v2015_v19, 0.0  ;;  %v3067_v24 = vmax.f32 %v2527_v20, 0.0  ;;  %2226 = vmatmul.mubr.bf16.gmra.mrb[172].mxu0 %v4080_v11  ;;  %2738 = vmatmul.mubr.bf16.gmra.mrb[172].mxu1 %v4081_v12  ;;  %v4100_v12 = vld [vmem:[%s4273_s28 + $0x2f4] ss:$8 sps:$4 sm:$0xff]  }
 0x19f   : > { %2233 = vmatprep.mubr.bf16.mxu0 %v4082_v15  ;;  %2745 = vmatprep.mubr.bf16.mxu1 %v4084_v16 }
 0x1a0   : > { %3196 = vst.msk [vmem:[%s4456_s5 + $0x108] sm:$0xff] %vm3162_vm0, %v2939_v23  ;;  %3324 = vst.msk [vmem:[%s4456_s5 + $0x508] sm:$0xff] %vm3162_vm0, %v3067_v24 }
 0x1a1   : > { %v2019_v25 = vpop.f32.mrb[68].mxu0  ;;  %v2531_v26 = vpop.f32.mrb[68].mxu1 }
 0x1a2   : > { %v2020_v27 = vadd.f32 %v4445_v63, %v2019_v25  ;;  %v2532_v28 = vadd.f32 %v4445_v63, %v2531_v26  ;;  %v2021_v29 = vpop.f32.mrb[69].mxu0  ;;  %v2533_v30 = vpop.f32.mrb[69].mxu1 }
 0x1a3   : > { %v2022_v33 = vpop.f32.mrb[70].mxu0  ;;  %v2534_v34 = vpop.f32.mrb[70].mxu1  ;;  %v4105_v29 = vld [vmem:[%s4273_s28 + $0x6f0] ss:$8 sps:$4 sm:$0xff]  }
 0x1a4   : > { %v2940_v37 = vmax.f32 %v2020_v27, 0.0  ;;  %v3068_v38 = vmax.f32 %v2532_v28, 0.0  ;;  %v2023_v39 = vadd.f32 %v4445_v63, %v2022_v33  ;;  %v2535_v40 = vadd.f32 %v4445_v63, %v2534_v34  ;;  %v2024_v41 = vpop.f32.mrb[71].mxu0  ;;  %v2536_v42 = vpop.f32.mrb[71].mxu1  ;;  %v4104_v28 = vld [vmem:[%s4273_s28 + $0x2f0] ss:$8 sps:$4 sm:$0xff]  }
 0x1a5   : > { %v4108_v33 = vld [vmem:[%s4273_s28 + $0x704] ss:$8 sps:$4 sm:$0xff]  }
 0x1a6   : > { %3197 = vst.msk [vmem:[%s4456_s5 + $0x110] sm:$0xff] %vm3162_vm0, %v2940_v37  ;;  %3325 = vst.msk [vmem:[%s4456_s5 + $0x510] sm:$0xff] %vm3162_vm0, %v3068_v38  ;;  %v2941_v43 = vmax.f32 %v2023_v39, 0.0  ;;  %v3069_v44 = vmax.f32 %v2535_v40, 0.0  ;;  %2234 = vmatmul.mubr.bf16.gmra.mrb[176].mxu0 %v4086_v31  ;;  %2746 = vmatmul.mubr.bf16.gmra.mrb[176].mxu1 %v4087_v32  ;;  %v4106_v32 = vld [vmem:[%s4273_s28 + $0x304] ss:$8 sps:$4 sm:$0xff]  }
 0x1a7   : > { %2241 = vmatprep.mubr.bf16.mxu0 %v4088_v35  ;;  %2753 = vmatprep.mubr.bf16.mxu1 %v4090_v36 }
 0x1a8   : > { %3198 = vst.msk [vmem:[%s4456_s5 + $0x118] sm:$0xff] %vm3162_vm0, %v2941_v43  ;;  %3326 = vst.msk [vmem:[%s4456_s5 + $0x518] sm:$0xff] %vm3162_vm0, %v3069_v44 }
 0x1a9   : > { %v2027_v45 = vpop.f32.mrb[72].mxu0  ;;  %v2539_v46 = vpop.f32.mrb[72].mxu1 }
 0x1aa   : > { %v2028_v47 = vadd.f32 %v4445_v63, %v2027_v45  ;;  %v2540_v49 = vadd.f32 %v4746_v48, %v2539_v46  ;;  %v2029_v50 = vpop.f32.mrb[73].mxu0  ;;  %v2541_v51 = vpop.f32.mrb[73].mxu1 }
 0x1ab   : > { %v2030_v54 = vpop.f32.mrb[74].mxu0  ;;  %v2542_v55 = vpop.f32.mrb[74].mxu1  ;;  %v4111_v50 = vld [vmem:[%s4273_s28 + $0x700] ss:$8 sps:$4 sm:$0xff]  }
 0x1ac   : > { %v2942_v63 = vmax.f32 %v2028_v47, 0.0  ;;  %v3070_v58 = vmax.f32 %v2540_v49, 0.0  ;;  %v2031_v59 = vadd.f32 %v4746_v48, %v2030_v54  ;;  %v2543_v60 = vadd.f32 %v4746_v48, %v2542_v55  ;;  %v2032_v61 = vpop.f32.mrb[75].mxu0  ;;  %v2544_v62 = vpop.f32.mrb[75].mxu1  ;;  %v4110_v49 = vld [vmem:[%s4273_s28 + $0x300] ss:$8 sps:$4 sm:$0xff]  }
 0x1ad   : > { %v4114_v54 = vld [vmem:[%s4273_s28 + $0x714] ss:$8 sps:$4 sm:$0xff]  }
 0x1ae   : > { %3199 = vst.msk [vmem:[%s4456_s5 + $0x120] sm:$0xff] %vm3162_vm0, %v2942_v63  ;;  %3327 = vst.msk [vmem:[%s4456_s5 + $0x520] sm:$0xff] %vm3162_vm0, %v3070_v58  ;;  %v2943_v0 = vmax.f32 %v2031_v59, 0.0  ;;  %v3071_v1 = vmax.f32 %v2543_v60, 0.0  ;;  %2242 = vmatmul.mubr.bf16.gmra.mrb[180].mxu0 %v4092_v52  ;;  %2754 = vmatmul.mubr.bf16.gmra.mrb[180].mxu1 %v4093_v53  ;;  %v4112_v53 = vld [vmem:[%s4273_s28 + $0x314] ss:$8 sps:$4 sm:$0xff]  }
 0x1af   : > { %2249 = vmatprep.mubr.bf16.mxu0 %v4094_v56  ;;  %2761 = vmatprep.mubr.bf16.mxu1 %v4096_v57 }
 0x1b0   : > { %3200 = vst.msk [vmem:[%s4456_s5 + $0x128] sm:$0xff] %vm3162_vm0, %v2943_v0  ;;  %3328 = vst.msk [vmem:[%s4456_s5 + $0x528] sm:$0xff] %vm3162_vm0, %v3071_v1 }
 0x1b1   : > { %v2035_v2 = vpop.f32.mrb[76].mxu0  ;;  %v2547_v3 = vpop.f32.mrb[76].mxu1 }
 0x1b2   : > { %v2036_v4 = vadd.f32 %v4746_v48, %v2035_v2  ;;  %v2548_v5 = vadd.f32 %v4746_v48, %v2547_v3  ;;  %v2037_v6 = vpop.f32.mrb[77].mxu0  ;;  %v2549_v7 = vpop.f32.mrb[77].mxu1 }
 0x1b3   : > { %v2038_v10 = vpop.f32.mrb[78].mxu0  ;;  %v2550_v11 = vpop.f32.mrb[78].mxu1  ;;  %v4117_v6 = vld [vmem:[%s4273_s28 + $0x710] ss:$8 sps:$4 sm:$0xff]  }
 0x1b4   : > { %v2944_v14 = vmax.f32 %v2036_v4, 0.0  ;;  %v3072_v15 = vmax.f32 %v2548_v5, 0.0  ;;  %v2039_v16 = vadd.f32 %v4746_v48, %v2038_v10  ;;  %v2551_v17 = vadd.f32 %v4746_v48, %v2550_v11  ;;  %v2040_v18 = vpop.f32.mrb[79].mxu0  ;;  %v2552_v19 = vpop.f32.mrb[79].mxu1  ;;  %v4116_v5 = vld [vmem:[%s4273_s28 + $0x310] ss:$8 sps:$4 sm:$0xff]  }
 0x1b5   : > { %v4120_v10 = vld [vmem:[%s4273_s28 + $0x724] ss:$8 sps:$4 sm:$0xff]  }
 0x1b6   : > { %3201 = vst.msk [vmem:[%s4456_s5 + $0x130] sm:$0xff] %vm3162_vm0, %v2944_v14  ;;  %3329 = vst.msk [vmem:[%s4456_s5 + $0x530] sm:$0xff] %vm3162_vm0, %v3072_v15  ;;  %v2945_v20 = vmax.f32 %v2039_v16, 0.0  ;;  %v3073_v21 = vmax.f32 %v2551_v17, 0.0  ;;  %2250 = vmatmul.mubr.bf16.gmra.mrb[184].mxu0 %v4098_v8  ;;  %2762 = vmatmul.mubr.bf16.gmra.mrb[184].mxu1 %v4099_v9  ;;  %v4118_v9 = vld [vmem:[%s4273_s28 + $0x324] ss:$8 sps:$4 sm:$0xff]  }
 0x1b7   : > { %2257 = vmatprep.mubr.bf16.mxu0 %v4100_v12  ;;  %2769 = vmatprep.mubr.bf16.mxu1 %v4102_v13 }
 0x1b8   : > { %3202 = vst.msk [vmem:[%s4456_s5 + $0x138] sm:$0xff] %vm3162_vm0, %v2945_v20  ;;  %3330 = vst.msk [vmem:[%s4456_s5 + $0x538] sm:$0xff] %vm3162_vm0, %v3073_v21 }
 0x1b9   : > { %v2043_v22 = vpop.f32.mrb[80].mxu0  ;;  %v2555_v23 = vpop.f32.mrb[80].mxu1 }
 0x1ba   : > { %v2044_v24 = vadd.f32 %v4746_v48, %v2043_v22  ;;  %v2556_v25 = vadd.f32 %v4746_v48, %v2555_v23  ;;  %v2045_v26 = vpop.f32.mrb[81].mxu0  ;;  %v2557_v27 = vpop.f32.mrb[81].mxu1 }
 0x1bb   : > { %v2046_v30 = vpop.f32.mrb[82].mxu0  ;;  %v2558_v31 = vpop.f32.mrb[82].mxu1  ;;  %v4123_v26 = vld [vmem:[%s4273_s28 + $0x720] ss:$8 sps:$4 sm:$0xff]  }
 0x1bc   : > { %v2946_v34 = vmax.f32 %v2044_v24, 0.0  ;;  %v3074_v35 = vmax.f32 %v2556_v25, 0.0  ;;  %v2047_v36 = vadd.f32 %v4746_v48, %v2046_v30  ;;  %v2559_v37 = vadd.f32 %v4746_v48, %v2558_v31  ;;  %v2048_v38 = vpop.f32.mrb[83].mxu0  ;;  %v2560_v39 = vpop.f32.mrb[83].mxu1  ;;  %v4122_v25 = vld [vmem:[%s4273_s28 + $0x320] ss:$8 sps:$4 sm:$0xff]  }
 0x1bd   : > { %v4126_v30 = vld [vmem:[%s4273_s28 + $0x734] ss:$8 sps:$4 sm:$0xff]  }
 0x1be   : > { %3203 = vst.msk [vmem:[%s4456_s5 + $0x140] sm:$0xff] %vm3162_vm0, %v2946_v34  ;;  %3331 = vst.msk [vmem:[%s4456_s5 + $0x540] sm:$0xff] %vm3162_vm0, %v3074_v35  ;;  %v2947_v40 = vmax.f32 %v2047_v36, 0.0  ;;  %v3075_v41 = vmax.f32 %v2559_v37, 0.0  ;;  %2258 = vmatmul.mubr.bf16.gmra.mrb[188].mxu0 %v4104_v28  ;;  %2770 = vmatmul.mubr.bf16.gmra.mrb[188].mxu1 %v4105_v29  ;;  %v4124_v29 = vld [vmem:[%s4273_s28 + $0x334] ss:$8 sps:$4 sm:$0xff]  }
 0x1bf   : > { %2265 = vmatprep.mubr.bf16.mxu0 %v4106_v32  ;;  %2777 = vmatprep.mubr.bf16.mxu1 %v4108_v33 }
 0x1c0   : > { %3204 = vst.msk [vmem:[%s4456_s5 + $0x148] sm:$0xff] %vm3162_vm0, %v2947_v40  ;;  %3332 = vst.msk [vmem:[%s4456_s5 + $0x548] sm:$0xff] %vm3162_vm0, %v3075_v41 }
 0x1c1   : > { %v2051_v42 = vpop.f32.mrb[84].mxu0  ;;  %v2563_v43 = vpop.f32.mrb[84].mxu1 }
 0x1c2   : > { %v2052_v44 = vadd.f32 %v4746_v48, %v2051_v42  ;;  %v2564_v45 = vadd.f32 %v4746_v48, %v2563_v43  ;;  %v2053_v46 = vpop.f32.mrb[85].mxu0  ;;  %v2565_v47 = vpop.f32.mrb[85].mxu1 }
 0x1c3   : > { %v2054_v51 = vpop.f32.mrb[86].mxu0  ;;  %v2566_v52 = vpop.f32.mrb[86].mxu1  ;;  %v4129_v46 = vld [vmem:[%s4273_s28 + $0x730] ss:$8 sps:$4 sm:$0xff]  }
 0x1c4   : > { %v2948_v55 = vmax.f32 %v2052_v44, 0.0  ;;  %v3076_v56 = vmax.f32 %v2564_v45, 0.0  ;;  %v2055_v57 = vadd.f32 %v4746_v48, %v2054_v51  ;;  %v2567_v63 = vadd.f32 %v4746_v48, %v2566_v52  ;;  %v2056_v58 = vpop.f32.mrb[87].mxu0  ;;  %v2568_v59 = vpop.f32.mrb[87].mxu1  ;;  %v4128_v45 = vld [vmem:[%s4273_s28 + $0x330] ss:$8 sps:$4 sm:$0xff]  }
 0x1c5   : > { %v4132_v51 = vld [vmem:[%s4273_s28 + $0x744] ss:$8 sps:$4 sm:$0xff]  }
 0x1c6   : > { %3205 = vst.msk [vmem:[%s4456_s5 + $0x150] sm:$0xff] %vm3162_vm0, %v2948_v55  ;;  %3333 = vst.msk [vmem:[%s4456_s5 + $0x550] sm:$0xff] %vm3162_vm0, %v3076_v56  ;;  %v2949_v60 = vmax.f32 %v2055_v57, 0.0  ;;  %v3077_v61 = vmax.f32 %v2567_v63, 0.0  ;;  %2266 = vmatmul.mubr.bf16.gmra.mrb[192].mxu0 %v4110_v49  ;;  %2778 = vmatmul.mubr.bf16.gmra.mrb[192].mxu1 %v4111_v50  ;;  %v4130_v50 = vld [vmem:[%s4273_s28 + $0x344] ss:$8 sps:$4 sm:$0xff]  }
 0x1c7   : > { %2273 = vmatprep.mubr.bf16.mxu0 %v4112_v53  ;;  %2785 = vmatprep.mubr.bf16.mxu1 %v4114_v54 }
 0x1c8   : > { %3206 = vst.msk [vmem:[%s4456_s5 + $0x158] sm:$0xff] %vm3162_vm0, %v2949_v60  ;;  %3334 = vst.msk [vmem:[%s4456_s5 + $0x558] sm:$0xff] %vm3162_vm0, %v3077_v61 }
 0x1c9   : > { %v2059_v62 = vpop.f32.mrb[88].mxu0  ;;  %v2571_v0 = vpop.f32.mrb[88].mxu1 }
 0x1ca   : > { %v2060_v1 = vadd.f32 %v4746_v48, %v2059_v62  ;;  %v2572_v2 = vadd.f32 %v4746_v48, %v2571_v0  ;;  %v2061_v3 = vpop.f32.mrb[89].mxu0  ;;  %v2573_v4 = vpop.f32.mrb[89].mxu1 }
 0x1cb   : > { %v2062_v7 = vpop.f32.mrb[90].mxu0  ;;  %v2574_v8 = vpop.f32.mrb[90].mxu1  ;;  %v4135_v3 = vld [vmem:[%s4273_s28 + $0x740] ss:$8 sps:$4 sm:$0xff]  }
 0x1cc   : > { %v2950_v11 = vmax.f32 %v2060_v1, 0.0  ;;  %v3078_v12 = vmax.f32 %v2572_v2, 0.0  ;;  %v2063_v13 = vadd.f32 %v4746_v48, %v2062_v7  ;;  %v2575_v14 = vadd.f32 %v4746_v48, %v2574_v8  ;;  %v2064_v15 = vpop.f32.mrb[91].mxu0  ;;  %v2576_v16 = vpop.f32.mrb[91].mxu1  ;;  %v4134_v2 = vld [vmem:[%s4273_s28 + $0x340] ss:$8 sps:$4 sm:$0xff]  }
 0x1cd   : > { %v4138_v7 = vld [vmem:[%s4273_s28 + $0x754] ss:$8 sps:$4 sm:$0xff]  }
 0x1ce   : > { %3207 = vst.msk [vmem:[%s4456_s5 + $0x160] sm:$0xff] %vm3162_vm0, %v2950_v11  ;;  %3335 = vst.msk [vmem:[%s4456_s5 + $0x560] sm:$0xff] %vm3162_vm0, %v3078_v12  ;;  %v2951_v17 = vmax.f32 %v2063_v13, 0.0  ;;  %v3079_v18 = vmax.f32 %v2575_v14, 0.0  ;;  %2274 = vmatmul.mubr.bf16.gmra.mrb[196].mxu0 %v4116_v5  ;;  %2786 = vmatmul.mubr.bf16.gmra.mrb[196].mxu1 %v4117_v6  ;;  %v4136_v6 = vld [vmem:[%s4273_s28 + $0x354] ss:$8 sps:$4 sm:$0xff]  }
 0x1cf   : > { %2281 = vmatprep.mubr.bf16.mxu0 %v4118_v9  ;;  %2793 = vmatprep.mubr.bf16.mxu1 %v4120_v10 }
 0x1d0   : > { %3208 = vst.msk [vmem:[%s4456_s5 + $0x168] sm:$0xff] %vm3162_vm0, %v2951_v17  ;;  %3336 = vst.msk [vmem:[%s4456_s5 + $0x568] sm:$0xff] %vm3162_vm0, %v3079_v18 }
 0x1d1   : > { %v2067_v19 = vpop.f32.mrb[92].mxu0  ;;  %v2579_v20 = vpop.f32.mrb[92].mxu1 }
 0x1d2   : > { %v2068_v21 = vadd.f32 %v4746_v48, %v2067_v19  ;;  %v2580_v22 = vadd.f32 %v4746_v48, %v2579_v20  ;;  %v2069_v23 = vpop.f32.mrb[93].mxu0  ;;  %v2581_v24 = vpop.f32.mrb[93].mxu1 }
 0x1d3   : > { %v2070_v27 = vpop.f32.mrb[94].mxu0  ;;  %v2582_v28 = vpop.f32.mrb[94].mxu1  ;;  %v4141_v23 = vld [vmem:[%s4273_s28 + $0x750] ss:$8 sps:$4 sm:$0xff]  }
 0x1d4   : > { %v2952_v31 = vmax.f32 %v2068_v21, 0.0  ;;  %v3080_v32 = vmax.f32 %v2580_v22, 0.0  ;;  %v2071_v33 = vadd.f32 %v4746_v48, %v2070_v27  ;;  %v2583_v34 = vadd.f32 %v4746_v48, %v2582_v28  ;;  %v2072_v35 = vpop.f32.mrb[95].mxu0  ;;  %v2584_v36 = vpop.f32.mrb[95].mxu1  ;;  %v4140_v22 = vld [vmem:[%s4273_s28 + $0x350] ss:$8 sps:$4 sm:$0xff]  }
 0x1d5   : > { %v4144_v27 = vld [vmem:[%s4273_s28 + $0x764] ss:$8 sps:$4 sm:$0xff]  }
 0x1d6   : > { %3209 = vst.msk [vmem:[%s4456_s5 + $0x170] sm:$0xff] %vm3162_vm0, %v2952_v31  ;;  %3337 = vst.msk [vmem:[%s4456_s5 + $0x570] sm:$0xff] %vm3162_vm0, %v3080_v32  ;;  %v2953_v37 = vmax.f32 %v2071_v33, 0.0  ;;  %v3081_v38 = vmax.f32 %v2583_v34, 0.0  ;;  %2282 = vmatmul.mubr.bf16.gmra.mrb[200].mxu0 %v4122_v25  ;;  %2794 = vmatmul.mubr.bf16.gmra.mrb[200].mxu1 %v4123_v26  ;;  %v4142_v26 = vld [vmem:[%s4273_s28 + $0x364] ss:$8 sps:$4 sm:$0xff]  }
 0x1d7   : > { %2289 = vmatprep.mubr.bf16.mxu0 %v4124_v29  ;;  %2801 = vmatprep.mubr.bf16.mxu1 %v4126_v30 }
 0x1d8   : > { %3210 = vst.msk [vmem:[%s4456_s5 + $0x178] sm:$0xff] %vm3162_vm0, %v2953_v37  ;;  %3338 = vst.msk [vmem:[%s4456_s5 + $0x578] sm:$0xff] %vm3162_vm0, %v3081_v38 }
 0x1d9   : > { %v2075_v39 = vpop.f32.mrb[96].mxu0  ;;  %v2587_v40 = vpop.f32.mrb[96].mxu1 }
 0x1da   : > { %v2076_v41 = vadd.f32 %v4746_v48, %v2075_v39  ;;  %v2588_v42 = vadd.f32 %v4746_v48, %v2587_v40  ;;  %v2077_v43 = vpop.f32.mrb[97].mxu0  ;;  %v2589_v44 = vpop.f32.mrb[97].mxu1 }
 0x1db   : > { %v2078_v47 = vpop.f32.mrb[98].mxu0  ;;  %v2590_v49 = vpop.f32.mrb[98].mxu1  ;;  %v4147_v43 = vld [vmem:[%s4273_s28 + $0x760] ss:$8 sps:$4 sm:$0xff]  }
 0x1dc   : > { %v2954_v52 = vmax.f32 %v2076_v41, 0.0  ;;  %v3082_v53 = vmax.f32 %v2588_v42, 0.0  ;;  %v2079_v54 = vadd.f32 %v4746_v48, %v2078_v47  ;;  %v2591_v55 = vadd.f32 %v4746_v48, %v2590_v49  ;;  %v2080_v56 = vpop.f32.mrb[99].mxu0  ;;  %v2592_v57 = vpop.f32.mrb[99].mxu1  ;;  %v4146_v42 = vld [vmem:[%s4273_s28 + $0x360] ss:$8 sps:$4 sm:$0xff]  }
 0x1dd   : > { %v4150_v47 = vld [vmem:[%s4273_s28 + $0x774] ss:$8 sps:$4 sm:$0xff]  }
 0x1de   : > { %3211 = vst.msk [vmem:[%s4456_s5 + $0x180] sm:$0xff] %vm3162_vm0, %v2954_v52  ;;  %3339 = vst.msk [vmem:[%s4456_s5 + $0x580] sm:$0xff] %vm3162_vm0, %v3082_v53  ;;  %v2955_v63 = vmax.f32 %v2079_v54, 0.0  ;;  %v3083_v58 = vmax.f32 %v2591_v55, 0.0  ;;  %2290 = vmatmul.mubr.bf16.gmra.mrb[204].mxu0 %v4128_v45  ;;  %2802 = vmatmul.mubr.bf16.gmra.mrb[204].mxu1 %v4129_v46  ;;  %v4148_v46 = vld [vmem:[%s4273_s28 + $0x374] ss:$8 sps:$4 sm:$0xff]  }
 0x1df   : > { %2297 = vmatprep.mubr.bf16.mxu0 %v4130_v50  ;;  %2809 = vmatprep.mubr.bf16.mxu1 %v4132_v51 }
 0x1e0   : > { %3212 = vst.msk [vmem:[%s4456_s5 + $0x188] sm:$0xff] %vm3162_vm0, %v2955_v63  ;;  %3340 = vst.msk [vmem:[%s4456_s5 + $0x588] sm:$0xff] %vm3162_vm0, %v3083_v58 }
 0x1e1   : > { %v2083_v59 = vpop.f32.mrb[100].mxu0  ;;  %v2595_v60 = vpop.f32.mrb[100].mxu1 }
 0x1e2   : > { %v2084_v61 = vadd.f32 %v4746_v48, %v2083_v59  ;;  %v2596_v62 = vadd.f32 %v4746_v48, %v2595_v60  ;;  %v2085_v0 = vpop.f32.mrb[101].mxu0  ;;  %v2597_v1 = vpop.f32.mrb[101].mxu1 }
 0x1e3   : > { %v2086_v4 = vpop.f32.mrb[102].mxu0  ;;  %v2598_v5 = vpop.f32.mrb[102].mxu1  ;;  %v4153_v0 = vld [vmem:[%s4273_s28 + $0x770] ss:$8 sps:$4 sm:$0xff]  }
 0x1e4   : > { %v2956_v8 = vmax.f32 %v2084_v61, 0.0  ;;  %v3084_v9 = vmax.f32 %v2596_v62, 0.0  ;;  %v2087_v10 = vadd.f32 %v4746_v48, %v2086_v4  ;;  %v2599_v11 = vadd.f32 %v4746_v48, %v2598_v5  ;;  %v2088_v12 = vpop.f32.mrb[103].mxu0  ;;  %v2600_v13 = vpop.f32.mrb[103].mxu1  ;;  %v4152_v62 = vld [vmem:[%s4273_s28 + $0x370] ss:$8 sps:$4 sm:$0xff]  }
 0x1e5   : > { %v4156_v4 = vld [vmem:[%s4273_s28 + $0x784] ss:$8 sps:$4 sm:$0xff]  }
 0x1e6   : > { %3213 = vst.msk [vmem:[%s4456_s5 + $0x190] sm:$0xff] %vm3162_vm0, %v2956_v8  ;;  %3341 = vst.msk [vmem:[%s4456_s5 + $0x590] sm:$0xff] %vm3162_vm0, %v3084_v9  ;;  %v2957_v14 = vmax.f32 %v2087_v10, 0.0  ;;  %v3085_v15 = vmax.f32 %v2599_v11, 0.0  ;;  %2298 = vmatmul.mubr.bf16.gmra.mrb[208].mxu0 %v4134_v2  ;;  %2810 = vmatmul.mubr.bf16.gmra.mrb[208].mxu1 %v4135_v3  ;;  %v4154_v3 = vld [vmem:[%s4273_s28 + $0x384] ss:$8 sps:$4 sm:$0xff]  }
 0x1e7   : > { %2305 = vmatprep.mubr.bf16.mxu0 %v4136_v6  ;;  %2817 = vmatprep.mubr.bf16.mxu1 %v4138_v7 }
 0x1e8   : > { %3214 = vst.msk [vmem:[%s4456_s5 + $0x198] sm:$0xff] %vm3162_vm0, %v2957_v14  ;;  %3342 = vst.msk [vmem:[%s4456_s5 + $0x598] sm:$0xff] %vm3162_vm0, %v3085_v15 }
 0x1e9   : > { %v2091_v16 = vpop.f32.mrb[104].mxu0  ;;  %v2603_v17 = vpop.f32.mrb[104].mxu1 }
 0x1ea   : > { %v2092_v18 = vadd.f32 %v4746_v48, %v2091_v16  ;;  %v2604_v19 = vadd.f32 %v4746_v48, %v2603_v17  ;;  %v2093_v20 = vpop.f32.mrb[105].mxu0  ;;  %v2605_v21 = vpop.f32.mrb[105].mxu1 }
 0x1eb   : > { %v2094_v24 = vpop.f32.mrb[106].mxu0  ;;  %v2606_v25 = vpop.f32.mrb[106].mxu1  ;;  %v4159_v20 = vld [vmem:[%s4273_s28 + $0x780] ss:$8 sps:$4 sm:$0xff]  }
 0x1ec   : > { %v2958_v28 = vmax.f32 %v2092_v18, 0.0  ;;  %v3086_v29 = vmax.f32 %v2604_v19, 0.0  ;;  %v2095_v30 = vadd.f32 %v4746_v48, %v2094_v24  ;;  %v2607_v31 = vadd.f32 %v4746_v48, %v2606_v25  ;;  %v2096_v32 = vpop.f32.mrb[107].mxu0  ;;  %v2608_v33 = vpop.f32.mrb[107].mxu1  ;;  %v4158_v19 = vld [vmem:[%s4273_s28 + $0x380] ss:$8 sps:$4 sm:$0xff]  }
 0x1ed   : > { %v4162_v24 = vld [vmem:[%s4273_s28 + $0x794] ss:$8 sps:$4 sm:$0xff]  }
 0x1ee   : > { %3215 = vst.msk [vmem:[%s4456_s5 + $0x1a0] sm:$0xff] %vm3162_vm0, %v2958_v28  ;;  %3343 = vst.msk [vmem:[%s4456_s5 + $0x5a0] sm:$0xff] %vm3162_vm0, %v3086_v29  ;;  %v2959_v34 = vmax.f32 %v2095_v30, 0.0  ;;  %v3087_v35 = vmax.f32 %v2607_v31, 0.0  ;;  %2306 = vmatmul.mubr.bf16.gmra.mrb[212].mxu0 %v4140_v22  ;;  %2818 = vmatmul.mubr.bf16.gmra.mrb[212].mxu1 %v4141_v23  ;;  %v4160_v23 = vld [vmem:[%s4273_s28 + $0x394] ss:$8 sps:$4 sm:$0xff]  }
 0x1ef   : > { %2313 = vmatprep.mubr.bf16.mxu0 %v4142_v26  ;;  %2825 = vmatprep.mubr.bf16.mxu1 %v4144_v27 }
 0x1f0   : > { %3216 = vst.msk [vmem:[%s4456_s5 + $0x1a8] sm:$0xff] %vm3162_vm0, %v2959_v34  ;;  %3344 = vst.msk [vmem:[%s4456_s5 + $0x5a8] sm:$0xff] %vm3162_vm0, %v3087_v35 }
 0x1f1   : > { %v2099_v36 = vpop.f32.mrb[108].mxu0  ;;  %v2611_v37 = vpop.f32.mrb[108].mxu1 }
 0x1f2   : > { %v2100_v38 = vadd.f32 %v4746_v48, %v2099_v36  ;;  %v2612_v39 = vadd.f32 %v4746_v48, %v2611_v37  ;;  %v2101_v40 = vpop.f32.mrb[109].mxu0  ;;  %v2613_v41 = vpop.f32.mrb[109].mxu1 }
 0x1f3   : > { %v2102_v44 = vpop.f32.mrb[110].mxu0  ;;  %v2614_v45 = vpop.f32.mrb[110].mxu1  ;;  %v4165_v40 = vld [vmem:[%s4273_s28 + $0x790] ss:$8 sps:$4 sm:$0xff]  }
 0x1f4   : > { %v2960_v49 = vmax.f32 %v2100_v38, 0.0  ;;  %v3088_v50 = vmax.f32 %v2612_v39, 0.0  ;;  %v2103_v51 = vadd.f32 %v4746_v48, %v2102_v44  ;;  %v2615_v52 = vadd.f32 %v4746_v48, %v2614_v45  ;;  %v2104_v53 = vpop.f32.mrb[111].mxu0  ;;  %v2616_v54 = vpop.f32.mrb[111].mxu1  ;;  %v4164_v39 = vld [vmem:[%s4273_s28 + $0x390] ss:$8 sps:$4 sm:$0xff]  }
 0x1f5   : > { %v4168_v44 = vld [vmem:[%s4273_s28 + $0x7a4] ss:$8 sps:$4 sm:$0xff]  }
 0x1f6   : > { %3217 = vst.msk [vmem:[%s4456_s5 + $0x1b0] sm:$0xff] %vm3162_vm0, %v2960_v49  ;;  %3345 = vst.msk [vmem:[%s4456_s5 + $0x5b0] sm:$0xff] %vm3162_vm0, %v3088_v50  ;;  %v2961_v55 = vmax.f32 %v2103_v51, 0.0  ;;  %v3089_v56 = vmax.f32 %v2615_v52, 0.0  ;;  %2314 = vmatmul.mubr.bf16.gmra.mrb[216].mxu0 %v4146_v42  ;;  %2826 = vmatmul.mubr.bf16.gmra.mrb[216].mxu1 %v4147_v43  ;;  %v4166_v43 = vld [vmem:[%s4273_s28 + $0x3a4] ss:$8 sps:$4 sm:$0xff]  }
 0x1f7   : > { %2321 = vmatprep.mubr.bf16.mxu0 %v4148_v46  ;;  %2833 = vmatprep.mubr.bf16.mxu1 %v4150_v47 }
 0x1f8   : > { %3218 = vst.msk [vmem:[%s4456_s5 + $0x1b8] sm:$0xff] %vm3162_vm0, %v2961_v55  ;;  %3346 = vst.msk [vmem:[%s4456_s5 + $0x5b8] sm:$0xff] %vm3162_vm0, %v3089_v56 }
 0x1f9   : > { %v2107_v57 = vpop.f32.mrb[112].mxu0  ;;  %v2619_v63 = vpop.f32.mrb[112].mxu1 }
 0x1fa   : > { %v2108_v58 = vadd.f32 %v4746_v48, %v2107_v57  ;;  %v2620_v59 = vadd.f32 %v4746_v48, %v2619_v63  ;;  %v2109_v60 = vpop.f32.mrb[113].mxu0  ;;  %v2621_v61 = vpop.f32.mrb[113].mxu1 }
 0x1fb   : > { %v2110_v1 = vpop.f32.mrb[114].mxu0  ;;  %v2622_v2 = vpop.f32.mrb[114].mxu1  ;;  %v4171_v60 = vld [vmem:[%s4273_s28 + $0x7a0] ss:$8 sps:$4 sm:$0xff]  }
 0x1fc   : > { %v2962_v5 = vmax.f32 %v2108_v58, 0.0  ;;  %v3090_v6 = vmax.f32 %v2620_v59, 0.0  ;;  %v2111_v7 = vadd.f32 %v4746_v48, %v2110_v1  ;;  %v2623_v8 = vadd.f32 %v4746_v48, %v2622_v2  ;;  %v2112_v9 = vpop.f32.mrb[115].mxu0  ;;  %v2624_v10 = vpop.f32.mrb[115].mxu1  ;;  %v4170_v59 = vld [vmem:[%s4273_s28 + $0x3a0] ss:$8 sps:$4 sm:$0xff]  }
 0x1fd   : > { %v4174_v1 = vld [vmem:[%s4273_s28 + $0x7b4] ss:$8 sps:$4 sm:$0xff]  }
 0x1fe   : > { %3219 = vst.msk [vmem:[%s4456_s5 + $0x1c0] sm:$0xff] %vm3162_vm0, %v2962_v5  ;;  %3347 = vst.msk [vmem:[%s4456_s5 + $0x5c0] sm:$0xff] %vm3162_vm0, %v3090_v6  ;;  %v2963_v11 = vmax.f32 %v2111_v7, 0.0  ;;  %v3091_v12 = vmax.f32 %v2623_v8, 0.0  ;;  %2322 = vmatmul.mubr.bf16.gmra.mrb[220].mxu0 %v4152_v62  ;;  %2834 = vmatmul.mubr.bf16.gmra.mrb[220].mxu1 %v4153_v0  ;;  %v4172_v0 = vld [vmem:[%s4273_s28 + $0x3b4] ss:$8 sps:$4 sm:$0xff]  }
 0x1ff   : > { %2329 = vmatprep.mubr.bf16.mxu0 %v4154_v3  ;;  %2841 = vmatprep.mubr.bf16.mxu1 %v4156_v4 }
 0x200   : > { %3220 = vst.msk [vmem:[%s4456_s5 + $0x1c8] sm:$0xff] %vm3162_vm0, %v2963_v11  ;;  %3348 = vst.msk [vmem:[%s4456_s5 + $0x5c8] sm:$0xff] %vm3162_vm0, %v3091_v12 }
 0x201   : > { %v2115_v13 = vpop.f32.mrb[116].mxu0  ;;  %v2627_v14 = vpop.f32.mrb[116].mxu1 }
 0x202   : > { %v2116_v15 = vadd.f32 %v4746_v48, %v2115_v13  ;;  %v2628_v16 = vadd.f32 %v4746_v48, %v2627_v14  ;;  %v2117_v17 = vpop.f32.mrb[117].mxu0  ;;  %v2629_v18 = vpop.f32.mrb[117].mxu1 }
 0x203   : > { %v2118_v21 = vpop.f32.mrb[118].mxu0  ;;  %v2630_v22 = vpop.f32.mrb[118].mxu1  ;;  %v4177_v17 = vld [vmem:[%s4273_s28 + $0x7b0] ss:$8 sps:$4 sm:$0xff]  }
 0x204   : > { %v2964_v25 = vmax.f32 %v2116_v15, 0.0  ;;  %v3092_v26 = vmax.f32 %v2628_v16, 0.0  ;;  %v2119_v27 = vadd.f32 %v4746_v48, %v2118_v21  ;;  %v2631_v28 = vadd.f32 %v4746_v48, %v2630_v22  ;;  %v2120_v29 = vpop.f32.mrb[119].mxu0  ;;  %v2632_v30 = vpop.f32.mrb[119].mxu1  ;;  %v4176_v16 = vld [vmem:[%s4273_s28 + $0x3b0] ss:$8 sps:$4 sm:$0xff]  }
 0x205   : > { %v4180_v21 = vld [vmem:[%s4273_s28 + $0x7c4] ss:$8 sps:$4 sm:$0xff]  }
 0x206   : > { %3221 = vst.msk [vmem:[%s4456_s5 + $0x1d0] sm:$0xff] %vm3162_vm0, %v2964_v25  ;;  %3349 = vst.msk [vmem:[%s4456_s5 + $0x5d0] sm:$0xff] %vm3162_vm0, %v3092_v26  ;;  %v2965_v31 = vmax.f32 %v2119_v27, 0.0  ;;  %v3093_v32 = vmax.f32 %v2631_v28, 0.0  ;;  %2330 = vmatmul.mubr.bf16.gmra.mrb[224].mxu0 %v4158_v19  ;;  %2842 = vmatmul.mubr.bf16.gmra.mrb[224].mxu1 %v4159_v20  ;;  %v4178_v20 = vld [vmem:[%s4273_s28 + $0x3c4] ss:$8 sps:$4 sm:$0xff]  }
 0x207   : > { %2337 = vmatprep.mubr.bf16.mxu0 %v4160_v23  ;;  %2849 = vmatprep.mubr.bf16.mxu1 %v4162_v24 }
 0x208   : > { %3222 = vst.msk [vmem:[%s4456_s5 + $0x1d8] sm:$0xff] %vm3162_vm0, %v2965_v31  ;;  %3350 = vst.msk [vmem:[%s4456_s5 + $0x5d8] sm:$0xff] %vm3162_vm0, %v3093_v32 }
 0x209   : > { %v2123_v33 = vpop.f32.mrb[120].mxu0  ;;  %v2635_v34 = vpop.f32.mrb[120].mxu1 }
 0x20a   : > { %v2124_v35 = vadd.f32 %v4746_v48, %v2123_v33  ;;  %v2636_v36 = vadd.f32 %v4746_v48, %v2635_v34  ;;  %v2125_v37 = vpop.f32.mrb[121].mxu0  ;;  %v2637_v38 = vpop.f32.mrb[121].mxu1 }
 0x20b   : > { %v2126_v41 = vpop.f32.mrb[122].mxu0  ;;  %v2638_v42 = vpop.f32.mrb[122].mxu1  ;;  %v4183_v37 = vld [vmem:[%s4273_s28 + $0x7c0] ss:$8 sps:$4 sm:$0xff]  }
 0x20c   : > { %v2966_v45 = vmax.f32 %v2124_v35, 0.0  ;;  %v3094_v46 = vmax.f32 %v2636_v36, 0.0  ;;  %v2127_v47 = vadd.f32 %v4746_v48, %v2126_v41  ;;  %v2639_v49 = vadd.f32 %v4746_v48, %v2638_v42  ;;  %v2128_v50 = vpop.f32.mrb[123].mxu0  ;;  %v2640_v51 = vpop.f32.mrb[123].mxu1  ;;  %v4182_v36 = vld [vmem:[%s4273_s28 + $0x3c0] ss:$8 sps:$4 sm:$0xff]  }
 0x20d   : > { %v4186_v41 = vld [vmem:[%s4273_s28 + $0x7d4] ss:$8 sps:$4 sm:$0xff]  }
 0x20e   : > { %3223 = vst.msk [vmem:[%s4456_s5 + $0x1e0] sm:$0xff] %vm3162_vm0, %v2966_v45  ;;  %3351 = vst.msk [vmem:[%s4456_s5 + $0x5e0] sm:$0xff] %vm3162_vm0, %v3094_v46  ;;  %v2967_v52 = vmax.f32 %v2127_v47, 0.0  ;;  %v3095_v53 = vmax.f32 %v2639_v49, 0.0  ;;  %2338 = vmatmul.mubr.bf16.gmra.mrb[228].mxu0 %v4164_v39  ;;  %2850 = vmatmul.mubr.bf16.gmra.mrb[228].mxu1 %v4165_v40  ;;  %v4184_v40 = vld [vmem:[%s4273_s28 + $0x3d4] ss:$8 sps:$4 sm:$0xff]  }
 0x20f   : > { %2345 = vmatprep.mubr.bf16.mxu0 %v4166_v43  ;;  %2857 = vmatprep.mubr.bf16.mxu1 %v4168_v44 }
 0x210   : > { %3224 = vst.msk [vmem:[%s4456_s5 + $0x1e8] sm:$0xff] %vm3162_vm0, %v2967_v52  ;;  %3352 = vst.msk [vmem:[%s4456_s5 + $0x5e8] sm:$0xff] %vm3162_vm0, %v3095_v53 }
 0x211   : > { %v2131_v54 = vpop.f32.mrb[124].mxu0  ;;  %v2643_v55 = vpop.f32.mrb[124].mxu1 }
 0x212   : > { %v2132_v56 = vadd.f32 %v4746_v48, %v2131_v54  ;;  %v2644_v57 = vadd.f32 %v4746_v48, %v2643_v55  ;;  %v2133_v63 = vpop.f32.mrb[125].mxu0  ;;  %v2645_v58 = vpop.f32.mrb[125].mxu1 }
 0x213   : > { %v2134_v61 = vpop.f32.mrb[126].mxu0  ;;  %v2646_v62 = vpop.f32.mrb[126].mxu1  ;;  %v4189_v63 = vld [vmem:[%s4273_s28 + $0x7d0] ss:$8 sps:$4 sm:$0xff]  }
 0x214   : > { %v2968_v2 = vmax.f32 %v2132_v56, 0.0  ;;  %v3096_v3 = vmax.f32 %v2644_v57, 0.0  ;;  %v2135_v4 = vadd.f32 %v4746_v48, %v2134_v61  ;;  %v2647_v5 = vadd.f32 %v4746_v48, %v2646_v62  ;;  %v2136_v6 = vpop.f32.mrb[127].mxu0  ;;  %v2648_v7 = vpop.f32.mrb[127].mxu1  ;;  %v4188_v57 = vld [vmem:[%s4273_s28 + $0x3d0] ss:$8 sps:$4 sm:$0xff]  }
 0x215   : > { %v4192_v61 = vld [vmem:[%s4273_s28 + $0x7e4] ss:$8 sps:$4 sm:$0xff]  }
 0x216   : > { %3225 = vst.msk [vmem:[%s4456_s5 + $0x1f0] sm:$0xff] %vm3162_vm0, %v2968_v2  ;;  %3353 = vst.msk [vmem:[%s4456_s5 + $0x5f0] sm:$0xff] %vm3162_vm0, %v3096_v3  ;;  %v2969_v8 = vmax.f32 %v2135_v4, 0.0  ;;  %v3097_v9 = vmax.f32 %v2647_v5, 0.0  ;;  %2346 = vmatmul.mubr.bf16.gmra.mrb[232].mxu0 %v4170_v59  ;;  %2858 = vmatmul.mubr.bf16.gmra.mrb[232].mxu1 %v4171_v60  ;;  %v4190_v60 = vld [vmem:[%s4273_s28 + $0x3e4] ss:$8 sps:$4 sm:$0xff]  }
 0x217   : > { %2353 = vmatprep.mubr.bf16.mxu0 %v4172_v0  ;;  %2865 = vmatprep.mubr.bf16.mxu1 %v4174_v1 }
 0x218   : > { %3226 = vst.msk [vmem:[%s4456_s5 + $0x1f8] sm:$0xff] %vm3162_vm0, %v2969_v8  ;;  %3354 = vst.msk [vmem:[%s4456_s5 + $0x5f8] sm:$0xff] %vm3162_vm0, %v3097_v9 }
 0x219   : > { %v2139_v10 = vpop.f32.mrb[128].mxu0  ;;  %v2651_v11 = vpop.f32.mrb[128].mxu1 }
 0x21a   : > { %v2140_v12 = vadd.f32 %v4746_v48, %v2139_v10  ;;  %v2652_v13 = vadd.f32 %v4746_v48, %v2651_v11  ;;  %v2141_v14 = vpop.f32.mrb[129].mxu0  ;;  %v2653_v15 = vpop.f32.mrb[129].mxu1 }
 0x21b   : > { %v2142_v18 = vpop.f32.mrb[130].mxu0  ;;  %v2654_v19 = vpop.f32.mrb[130].mxu1  ;;  %v4195_v14 = vld [vmem:[%s4273_s28 + $0x7e0] ss:$8 sps:$4 sm:$0xff]  }
 0x21c   : > { %v2970_v22 = vmax.f32 %v2140_v12, 0.0  ;;  %v3098_v23 = vmax.f32 %v2652_v13, 0.0  ;;  %v2143_v24 = vadd.f32 %v4746_v48, %v2142_v18  ;;  %v2655_v25 = vadd.f32 %v4746_v48, %v2654_v19  ;;  %v2144_v26 = vpop.f32.mrb[131].mxu0  ;;  %v2656_v27 = vpop.f32.mrb[131].mxu1  ;;  %v4194_v13 = vld [vmem:[%s4273_s28 + $0x3e0] ss:$8 sps:$4 sm:$0xff]  }
 0x21d   : > { %v4198_v18 = vld [vmem:[%s4273_s28 + $0x7f4] ss:$8 sps:$4 sm:$0xff]  }
 0x21e   : > { %3227 = vst.msk [vmem:[%s4456_s5 + $0x200] sm:$0xff] %vm3162_vm0, %v2970_v22  ;;  %3355 = vst.msk [vmem:[%s4456_s5 + $0x600] sm:$0xff] %vm3162_vm0, %v3098_v23  ;;  %v2971_v28 = vmax.f32 %v2143_v24, 0.0  ;;  %v3099_v29 = vmax.f32 %v2655_v25, 0.0  ;;  %2354 = vmatmul.mubr.bf16.gmra.mrb[236].mxu0 %v4176_v16  ;;  %2866 = vmatmul.mubr.bf16.gmra.mrb[236].mxu1 %v4177_v17  ;;  %v4196_v17 = vld [vmem:[%s4273_s28 + $0x3f4] ss:$8 sps:$4 sm:$0xff]  }
 0x21f   : > { %2361 = vmatprep.mubr.bf16.mxu0 %v4178_v20  ;;  %2873 = vmatprep.mubr.bf16.mxu1 %v4180_v21 }
 0x220   : > { %3228 = vst.msk [vmem:[%s4456_s5 + $0x208] sm:$0xff] %vm3162_vm0, %v2971_v28  ;;  %3356 = vst.msk [vmem:[%s4456_s5 + $0x608] sm:$0xff] %vm3162_vm0, %v3099_v29 }
 0x221   : > { %v2147_v30 = vpop.f32.mrb[132].mxu0  ;;  %v2659_v31 = vpop.f32.mrb[132].mxu1 }
 0x222   : > { %v2148_v32 = vadd.f32 %v4746_v48, %v2147_v30  ;;  %v2660_v33 = vadd.f32 %v4746_v48, %v2659_v31  ;;  %v2149_v34 = vpop.f32.mrb[133].mxu0  ;;  %v2661_v35 = vpop.f32.mrb[133].mxu1 }
 0x223   : > { %v2150_v38 = vpop.f32.mrb[134].mxu0  ;;  %v2662_v39 = vpop.f32.mrb[134].mxu1  ;;  %v4201_v34 = vld [vmem:[%s4273_s28 + $0x7f0] ss:$8 sps:$4 sm:$0xff]  }
 0x224   : > { %v2972_v42 = vmax.f32 %v2148_v32, 0.0  ;;  %v3100_v43 = vmax.f32 %v2660_v33, 0.0  ;;  %v2151_v44 = vadd.f32 %v4746_v48, %v2150_v38  ;;  %v2663_v45 = vadd.f32 %v4746_v48, %v2662_v39  ;;  %v2152_v46 = vpop.f32.mrb[135].mxu0  ;;  %v2664_v47 = vpop.f32.mrb[135].mxu1  ;;  %v4200_v33 = vld [vmem:[%s4273_s28 + $0x3f0] ss:$8 sps:$4 sm:$0xff]  }
 0x225   : > { %v5042_v39 = vld [vmem:[%s5378_s2] ss:$0 sm:$0xff] }
 0x226   : > { %3229 = vst.msk [vmem:[%s4456_s5 + $0x210] sm:$0xff] %vm3162_vm0, %v2972_v42  ;;  %3357 = vst.msk [vmem:[%s4456_s5 + $0x610] sm:$0xff] %vm3162_vm0, %v3100_v43  ;;  %v2973_v49 = vmax.f32 %v2151_v44, 0.0  ;;  %v3101_v50 = vmax.f32 %v2663_v45, 0.0  ;;  %2362 = vmatmul.mubr.bf16.gmra.mrb[240].mxu0 %v4182_v36  ;;  %2874 = vmatmul.mubr.bf16.gmra.mrb[240].mxu1 %v4183_v37 }
 0x227   : > { %2369 = vmatprep.mubr.bf16.mxu0 %v4184_v40  ;;  %2881 = vmatprep.mubr.bf16.mxu1 %v4186_v41 }
 0x228   : > { %3230 = vst.msk [vmem:[%s4456_s5 + $0x218] sm:$0xff] %vm3162_vm0, %v2973_v49  ;;  %3358 = vst.msk [vmem:[%s4456_s5 + $0x618] sm:$0xff] %vm3162_vm0, %v3101_v50 }
 0x229   : > { %v2155_v51 = vpop.f32.mrb[136].mxu0  ;;  %v2667_v52 = vpop.f32.mrb[136].mxu1 }
 0x22a   : > { %v2156_v53 = vadd.f32 %v4746_v48, %v2155_v51  ;;  %v2668_v54 = vadd.f32 %v4746_v48, %v2667_v52  ;;  %v2157_v55 = vpop.f32.mrb[137].mxu0  ;;  %v2669_v56 = vpop.f32.mrb[137].mxu1 }
 0x22b   : > { %v2158_v58 = vpop.f32.mrb[138].mxu0  ;;  %v2670_v59 = vpop.f32.mrb[138].mxu1 }
 0x22c   : > { %v2974_v62 = vmax.f32 %v2156_v53, 0.0  ;;  %v3102_v0 = vmax.f32 %v2668_v54, 0.0  ;;  %v2159_v1 = vadd.f32 %v4746_v48, %v2158_v58  ;;  %v2671_v2 = vadd.f32 %v4746_v48, %v2670_v59  ;;  %v2160_v3 = vpop.f32.mrb[139].mxu0  ;;  %v2672_v4 = vpop.f32.mrb[139].mxu1 }
 0x22e   : > { %3231 = vst.msk [vmem:[%s4456_s5 + $0x220] sm:$0xff] %vm3162_vm0, %v2974_v62  ;;  %3359 = vst.msk [vmem:[%s4456_s5 + $0x620] sm:$0xff] %vm3162_vm0, %v3102_v0  ;;  %v2975_v5 = vmax.f32 %v2159_v1, 0.0  ;;  %v3103_v6 = vmax.f32 %v2671_v2, 0.0  ;;  %2370 = vmatmul.mubr.bf16.gmra.mrb[244].mxu0 %v4188_v57  ;;  %2882 = vmatmul.mubr.bf16.gmra.mrb[244].mxu1 %v4189_v63 }
 0x22f   : > { %2377 = vmatprep.mubr.bf16.mxu0 %v4190_v60  ;;  %2889 = vmatprep.mubr.bf16.mxu1 %v4192_v61 }
 0x230   : > { %3232 = vst.msk [vmem:[%s4456_s5 + $0x228] sm:$0xff] %vm3162_vm0, %v2975_v5  ;;  %3360 = vst.msk [vmem:[%s4456_s5 + $0x628] sm:$0xff] %vm3162_vm0, %v3103_v6 }
 0x231   : > { %v2163_v7 = vpop.f32.mrb[140].mxu0  ;;  %v2675_v8 = vpop.f32.mrb[140].mxu1 }
 0x232   : > { %v2164_v9 = vadd.f32 %v4746_v48, %v2163_v7  ;;  %v2676_v10 = vadd.f32 %v4746_v48, %v2675_v8  ;;  %v2165_v11 = vpop.f32.mrb[141].mxu0  ;;  %v2677_v12 = vpop.f32.mrb[141].mxu1 }
 0x233   : > { %v2166_v15 = vpop.f32.mrb[142].mxu0  ;;  %v2678_v16 = vpop.f32.mrb[142].mxu1 }
 0x234   : > { %v2976_v19 = vmax.f32 %v2164_v9, 0.0  ;;  %v3104_v20 = vmax.f32 %v2676_v10, 0.0  ;;  %v2167_v21 = vadd.f32 %v4746_v48, %v2166_v15  ;;  %v2679_v22 = vadd.f32 %v4746_v48, %v2678_v16  ;;  %v2168_v23 = vpop.f32.mrb[143].mxu0  ;;  %v2680_v24 = vpop.f32.mrb[143].mxu1 }
 0x236   : > { %3233 = vst.msk [vmem:[%s4456_s5 + $0x230] sm:$0xff] %vm3162_vm0, %v2976_v19  ;;  %3361 = vst.msk [vmem:[%s4456_s5 + $0x630] sm:$0xff] %vm3162_vm0, %v3104_v20  ;;  %v2977_v25 = vmax.f32 %v2167_v21, 0.0  ;;  %v3105_v26 = vmax.f32 %v2679_v22, 0.0  ;;  %2378 = vmatmul.mubr.bf16.gmra.mrb[248].mxu0 %v4194_v13  ;;  %2890 = vmatmul.mubr.bf16.gmra.mrb[248].mxu1 %v4195_v14 }
 0x237   : > { %2385 = vmatprep.mubr.bf16.mxu0 %v4196_v17  ;;  %2897 = vmatprep.mubr.bf16.mxu1 %v4198_v18 }
 0x238   : > { %3234 = vst.msk [vmem:[%s4456_s5 + $0x238] sm:$0xff] %vm3162_vm0, %v2977_v25  ;;  %3362 = vst.msk [vmem:[%s4456_s5 + $0x638] sm:$0xff] %vm3162_vm0, %v3105_v26 }
 0x239   : > { %v2171_v27 = vpop.f32.mrb[144].mxu0  ;;  %v2683_v28 = vpop.f32.mrb[144].mxu1 }
 0x23a   : > { %v2172_v29 = vadd.f32 %v4746_v48, %v2171_v27  ;;  %v2684_v30 = vadd.f32 %v4746_v48, %v2683_v28  ;;  %v2173_v31 = vpop.f32.mrb[145].mxu0  ;;  %v2685_v32 = vpop.f32.mrb[145].mxu1 }
 0x23b   : > { %v2174_v35 = vpop.f32.mrb[146].mxu0  ;;  %v2686_v36 = vpop.f32.mrb[146].mxu1 }
 0x23c   : > { %v2978_v37 = vmax.f32 %v2172_v29, 0.0  ;;  %v3106_v38 = vmax.f32 %v2684_v30, 0.0  ;;  %v2175_v40 = vadd.f32 %v5042_v39, %v2174_v35  ;;  %v2687_v41 = vadd.f32 %v5042_v39, %v2686_v36  ;;  %v2176_v48 = vpop.f32.mrb[147].mxu0  ;;  %v2688_v42 = vpop.f32.mrb[147].mxu1 }
 0x23e   : > { %3235 = vst.msk [vmem:[%s4456_s5 + $0x240] sm:$0xff] %vm3162_vm0, %v2978_v37  ;;  %3363 = vst.msk [vmem:[%s4456_s5 + $0x640] sm:$0xff] %vm3162_vm0, %v3106_v38  ;;  %v2979_v43 = vmax.f32 %v2175_v40, 0.0  ;;  %v3107_v44 = vmax.f32 %v2687_v41, 0.0  ;;  %2386 = vmatmul.mubr.bf16.gmra.mrb[252].mxu0 %v4200_v33  ;;  %2898 = vmatmul.mubr.bf16.gmra.mrb[252].mxu1 %v4201_v34 }
 0x240   : > { %3236 = vst.msk [vmem:[%s4456_s5 + $0x248] sm:$0xff] %vm3162_vm0, %v2979_v43  ;;  %3364 = vst.msk [vmem:[%s4456_s5 + $0x648] sm:$0xff] %vm3162_vm0, %v3107_v44 }
 0x241   : > { %v2179_v45 = vpop.f32.mrb[148].mxu0  ;;  %v2691_v46 = vpop.f32.mrb[148].mxu1 }
 0x242   : > { %v2180_v47 = vadd.f32 %v5042_v39, %v2179_v45  ;;  %v2692_v49 = vadd.f32 %v5042_v39, %v2691_v46  ;;  %v2181_v50 = vpop.f32.mrb[149].mxu0  ;;  %v2693_v51 = vpop.f32.mrb[149].mxu1 }
 0x243   : > { %v2182_v52 = vpop.f32.mrb[150].mxu0  ;;  %v2694_v53 = vpop.f32.mrb[150].mxu1 }
 0x244   : > { %v2980_v54 = vmax.f32 %v2180_v47, 0.0  ;;  %v3108_v55 = vmax.f32 %v2692_v49, 0.0  ;;  %v2183_v56 = vadd.f32 %v5042_v39, %v2182_v52  ;;  %v2695_v57 = vadd.f32 %v5042_v39, %v2694_v53  ;;  %v2184_v63 = vpop.f32.mrb[151].mxu0  ;;  %v2696_v58 = vpop.f32.mrb[151].mxu1 }
 0x246   : > { %3237 = vst.msk [vmem:[%s4456_s5 + $0x250] sm:$0xff] %vm3162_vm0, %v2980_v54  ;;  %3365 = vst.msk [vmem:[%s4456_s5 + $0x650] sm:$0xff] %vm3162_vm0, %v3108_v55  ;;  %v2981_v59 = vmax.f32 %v2183_v56, 0.0  ;;  %v3109_v60 = vmax.f32 %v2695_v57, 0.0 }
 0x248   : > { %3238 = vst.msk [vmem:[%s4456_s5 + $0x258] sm:$0xff] %vm3162_vm0, %v2981_v59  ;;  %3366 = vst.msk [vmem:[%s4456_s5 + $0x658] sm:$0xff] %vm3162_vm0, %v3109_v60 }
 0x249   : > { %v2187_v61 = vpop.f32.mrb[152].mxu0  ;;  %v2699_v62 = vpop.f32.mrb[152].mxu1 }
 0x24a   : > { %v2188_v0 = vadd.f32 %v5042_v39, %v2187_v61  ;;  %v2700_v1 = vadd.f32 %v5042_v39, %v2699_v62  ;;  %v2189_v2 = vpop.f32.mrb[153].mxu0  ;;  %v2701_v3 = vpop.f32.mrb[153].mxu1 }
 0x24b   : > { %v2190_v4 = vpop.f32.mrb[154].mxu0  ;;  %v2702_v5 = vpop.f32.mrb[154].mxu1 }
 0x24c   : > { %v2982_v6 = vmax.f32 %v2188_v0, 0.0  ;;  %v3110_v7 = vmax.f32 %v2700_v1, 0.0  ;;  %v2191_v8 = vadd.f32 %v5042_v39, %v2190_v4  ;;  %v2703_v9 = vadd.f32 %v5042_v39, %v2702_v5  ;;  %v2192_v10 = vpop.f32.mrb[155].mxu0  ;;  %v2704_v11 = vpop.f32.mrb[155].mxu1 }
 0x24e   : > { %3239 = vst.msk [vmem:[%s4456_s5 + $0x260] sm:$0xff] %vm3162_vm0, %v2982_v6  ;;  %3367 = vst.msk [vmem:[%s4456_s5 + $0x660] sm:$0xff] %vm3162_vm0, %v3110_v7  ;;  %v2983_v12 = vmax.f32 %v2191_v8, 0.0  ;;  %v3111_v13 = vmax.f32 %v2703_v9, 0.0 }
 0x250   : > { %3240 = vst.msk [vmem:[%s4456_s5 + $0x268] sm:$0xff] %vm3162_vm0, %v2983_v12  ;;  %3368 = vst.msk [vmem:[%s4456_s5 + $0x668] sm:$0xff] %vm3162_vm0, %v3111_v13 }
 0x251   : > { %v2195_v14 = vpop.f32.mrb[156].mxu0  ;;  %v2707_v15 = vpop.f32.mrb[156].mxu1 }
 0x252   : > { %v2196_v16 = vadd.f32 %v5042_v39, %v2195_v14  ;;  %v2708_v17 = vadd.f32 %v5042_v39, %v2707_v15  ;;  %v2197_v18 = vpop.f32.mrb[157].mxu0  ;;  %v2709_v19 = vpop.f32.mrb[157].mxu1 }
 0x253   : > { %v2198_v20 = vpop.f32.mrb[158].mxu0  ;;  %v2710_v21 = vpop.f32.mrb[158].mxu1 }
 0x254   : > { %v2984_v22 = vmax.f32 %v2196_v16, 0.0  ;;  %v3112_v23 = vmax.f32 %v2708_v17, 0.0  ;;  %v2199_v24 = vadd.f32 %v5042_v39, %v2198_v20  ;;  %v2711_v25 = vadd.f32 %v5042_v39, %v2710_v21  ;;  %v2200_v26 = vpop.f32.mrb[159].mxu0  ;;  %v2712_v27 = vpop.f32.mrb[159].mxu1 }
 0x256   : > { %3241 = vst.msk [vmem:[%s4456_s5 + $0x270] sm:$0xff] %vm3162_vm0, %v2984_v22  ;;  %3369 = vst.msk [vmem:[%s4456_s5 + $0x670] sm:$0xff] %vm3162_vm0, %v3112_v23  ;;  %v2985_v28 = vmax.f32 %v2199_v24, 0.0  ;;  %v3113_v29 = vmax.f32 %v2711_v25, 0.0 }
 0x258   : > { %3242 = vst.msk [vmem:[%s4456_s5 + $0x278] sm:$0xff] %vm3162_vm0, %v2985_v28  ;;  %3370 = vst.msk [vmem:[%s4456_s5 + $0x678] sm:$0xff] %vm3162_vm0, %v3113_v29 }
 0x259   : > { %v2203_v30 = vpop.f32.mrb[160].mxu0  ;;  %v2715_v31 = vpop.f32.mrb[160].mxu1 }
 0x25a   : > { %v2204_v32 = vadd.f32 %v5042_v39, %v2203_v30  ;;  %v2716_v33 = vadd.f32 %v5042_v39, %v2715_v31  ;;  %v2205_v34 = vpop.f32.mrb[161].mxu0  ;;  %v2717_v35 = vpop.f32.mrb[161].mxu1 }
 0x25b   : > { %v2206_v36 = vpop.f32.mrb[162].mxu0  ;;  %v2718_v37 = vpop.f32.mrb[162].mxu1 }
 0x25c   : > { %v2986_v38 = vmax.f32 %v2204_v32, 0.0  ;;  %v3114_v40 = vmax.f32 %v2716_v33, 0.0  ;;  %v2207_v41 = vadd.f32 %v5042_v39, %v2206_v36  ;;  %v2719_v48 = vadd.f32 %v5042_v39, %v2718_v37  ;;  %v2208_v42 = vpop.f32.mrb[163].mxu0  ;;  %v2720_v43 = vpop.f32.mrb[163].mxu1 }
 0x25e   : > { %3243 = vst.msk [vmem:[%s4456_s5 + $0x280] sm:$0xff] %vm3162_vm0, %v2986_v38  ;;  %3371 = vst.msk [vmem:[%s4456_s5 + $0x680] sm:$0xff] %vm3162_vm0, %v3114_v40  ;;  %v2987_v44 = vmax.f32 %v2207_v41, 0.0  ;;  %v3115_v45 = vmax.f32 %v2719_v48, 0.0 }
 0x260   : > { %3244 = vst.msk [vmem:[%s4456_s5 + $0x288] sm:$0xff] %vm3162_vm0, %v2987_v44  ;;  %3372 = vst.msk [vmem:[%s4456_s5 + $0x688] sm:$0xff] %vm3162_vm0, %v3115_v45 }
 0x261   : > { %v2211_v46 = vpop.f32.mrb[164].mxu0  ;;  %v2723_v47 = vpop.f32.mrb[164].mxu1 }
 0x262   : > { %v2212_v49 = vadd.f32 %v5042_v39, %v2211_v46  ;;  %v2724_v50 = vadd.f32 %v5042_v39, %v2723_v47  ;;  %v2213_v51 = vpop.f32.mrb[165].mxu0  ;;  %v2725_v52 = vpop.f32.mrb[165].mxu1 }
 0x263   : > { %v2214_v53 = vpop.f32.mrb[166].mxu0  ;;  %v2726_v54 = vpop.f32.mrb[166].mxu1 }
 0x264   : > { %v2988_v55 = vmax.f32 %v2212_v49, 0.0  ;;  %v3116_v56 = vmax.f32 %v2724_v50, 0.0  ;;  %v2215_v57 = vadd.f32 %v5042_v39, %v2214_v53  ;;  %v2727_v63 = vadd.f32 %v5042_v39, %v2726_v54  ;;  %v2216_v58 = vpop.f32.mrb[167].mxu0  ;;  %v2728_v59 = vpop.f32.mrb[167].mxu1 }
 0x266   : > { %3245 = vst.msk [vmem:[%s4456_s5 + $0x290] sm:$0xff] %vm3162_vm0, %v2988_v55  ;;  %3373 = vst.msk [vmem:[%s4456_s5 + $0x690] sm:$0xff] %vm3162_vm0, %v3116_v56  ;;  %v2989_v60 = vmax.f32 %v2215_v57, 0.0  ;;  %v3117_v61 = vmax.f32 %v2727_v63, 0.0 }
 0x268   : > { %3246 = vst.msk [vmem:[%s4456_s5 + $0x298] sm:$0xff] %vm3162_vm0, %v2989_v60  ;;  %3374 = vst.msk [vmem:[%s4456_s5 + $0x698] sm:$0xff] %vm3162_vm0, %v3117_v61 }
 0x269   : > { %v2219_v62 = vpop.f32.mrb[168].mxu0  ;;  %v2731_v0 = vpop.f32.mrb[168].mxu1 }
 0x26a   : > { %v2220_v1 = vadd.f32 %v5042_v39, %v2219_v62  ;;  %v2732_v2 = vadd.f32 %v5042_v39, %v2731_v0  ;;  %v2221_v3 = vpop.f32.mrb[169].mxu0  ;;  %v2733_v4 = vpop.f32.mrb[169].mxu1 }
 0x26b   : > { %v2222_v5 = vpop.f32.mrb[170].mxu0  ;;  %v2734_v6 = vpop.f32.mrb[170].mxu1 }
 0x26c   : > { %v2990_v7 = vmax.f32 %v2220_v1, 0.0  ;;  %v3118_v8 = vmax.f32 %v2732_v2, 0.0  ;;  %v2223_v9 = vadd.f32 %v5042_v39, %v2222_v5  ;;  %v2735_v10 = vadd.f32 %v5042_v39, %v2734_v6  ;;  %v2224_v11 = vpop.f32.mrb[171].mxu0  ;;  %v2736_v12 = vpop.f32.mrb[171].mxu1 }
 0x26e   : > { %3247 = vst.msk [vmem:[%s4456_s5 + $0x2a0] sm:$0xff] %vm3162_vm0, %v2990_v7  ;;  %3375 = vst.msk [vmem:[%s4456_s5 + $0x6a0] sm:$0xff] %vm3162_vm0, %v3118_v8  ;;  %v2991_v13 = vmax.f32 %v2223_v9, 0.0  ;;  %v3119_v14 = vmax.f32 %v2735_v10, 0.0 }
 0x270   : > { %3248 = vst.msk [vmem:[%s4456_s5 + $0x2a8] sm:$0xff] %vm3162_vm0, %v2991_v13  ;;  %3376 = vst.msk [vmem:[%s4456_s5 + $0x6a8] sm:$0xff] %vm3162_vm0, %v3119_v14 }
 0x271   : > { %v2227_v15 = vpop.f32.mrb[172].mxu0  ;;  %v2739_v16 = vpop.f32.mrb[172].mxu1 }
 0x272   : > { %v2228_v17 = vadd.f32 %v5042_v39, %v2227_v15  ;;  %v2740_v18 = vadd.f32 %v5042_v39, %v2739_v16  ;;  %v2229_v19 = vpop.f32.mrb[173].mxu0  ;;  %v2741_v20 = vpop.f32.mrb[173].mxu1 }
 0x273   : > { %v2230_v21 = vpop.f32.mrb[174].mxu0  ;;  %v2742_v22 = vpop.f32.mrb[174].mxu1 }
 0x274   : > { %v2992_v23 = vmax.f32 %v2228_v17, 0.0  ;;  %v3120_v24 = vmax.f32 %v2740_v18, 0.0  ;;  %v2231_v25 = vadd.f32 %v5042_v39, %v2230_v21  ;;  %v2743_v26 = vadd.f32 %v5042_v39, %v2742_v22  ;;  %v2232_v27 = vpop.f32.mrb[175].mxu0  ;;  %v2744_v28 = vpop.f32.mrb[175].mxu1 }
 0x276   : > { %3249 = vst.msk [vmem:[%s4456_s5 + $0x2b0] sm:$0xff] %vm3162_vm0, %v2992_v23  ;;  %3377 = vst.msk [vmem:[%s4456_s5 + $0x6b0] sm:$0xff] %vm3162_vm0, %v3120_v24  ;;  %v2993_v29 = vmax.f32 %v2231_v25, 0.0  ;;  %v3121_v30 = vmax.f32 %v2743_v26, 0.0 }
 0x278   : > { %3250 = vst.msk [vmem:[%s4456_s5 + $0x2b8] sm:$0xff] %vm3162_vm0, %v2993_v29  ;;  %3378 = vst.msk [vmem:[%s4456_s5 + $0x6b8] sm:$0xff] %vm3162_vm0, %v3121_v30 }
 0x279   : > { %v2235_v31 = vpop.f32.mrb[176].mxu0  ;;  %v2747_v32 = vpop.f32.mrb[176].mxu1 }
 0x27a   : > { %v2236_v33 = vadd.f32 %v5042_v39, %v2235_v31  ;;  %v2748_v34 = vadd.f32 %v5042_v39, %v2747_v32  ;;  %v2237_v35 = vpop.f32.mrb[177].mxu0  ;;  %v2749_v36 = vpop.f32.mrb[177].mxu1 }
 0x27b   : > { %v2238_v37 = vpop.f32.mrb[178].mxu0  ;;  %v2750_v38 = vpop.f32.mrb[178].mxu1 }
 0x27c   : > { %v2994_v40 = vmax.f32 %v2236_v33, 0.0  ;;  %v3122_v41 = vmax.f32 %v2748_v34, 0.0  ;;  %v2239_v48 = vadd.f32 %v5042_v39, %v2238_v37  ;;  %v2751_v42 = vadd.f32 %v5042_v39, %v2750_v38  ;;  %v2240_v43 = vpop.f32.mrb[179].mxu0  ;;  %v2752_v44 = vpop.f32.mrb[179].mxu1 }
 0x27e   : > { %3251 = vst.msk [vmem:[%s4456_s5 + $0x2c0] sm:$0xff] %vm3162_vm0, %v2994_v40  ;;  %3379 = vst.msk [vmem:[%s4456_s5 + $0x6c0] sm:$0xff] %vm3162_vm0, %v3122_v41  ;;  %v2995_v45 = vmax.f32 %v2239_v48, 0.0  ;;  %v3123_v46 = vmax.f32 %v2751_v42, 0.0 }
 0x280   : > { %3252 = vst.msk [vmem:[%s4456_s5 + $0x2c8] sm:$0xff] %vm3162_vm0, %v2995_v45  ;;  %3380 = vst.msk [vmem:[%s4456_s5 + $0x6c8] sm:$0xff] %vm3162_vm0, %v3123_v46 }
 0x281   : > { %v2243_v47 = vpop.f32.mrb[180].mxu0  ;;  %v2755_v49 = vpop.f32.mrb[180].mxu1 }
 0x282   : > { %v2244_v50 = vadd.f32 %v5042_v39, %v2243_v47  ;;  %v2756_v51 = vadd.f32 %v5042_v39, %v2755_v49  ;;  %v2245_v52 = vpop.f32.mrb[181].mxu0  ;;  %v2757_v53 = vpop.f32.mrb[181].mxu1 }
 0x283   : > { %v2246_v54 = vpop.f32.mrb[182].mxu0  ;;  %v2758_v55 = vpop.f32.mrb[182].mxu1 }
 0x284   : > { %v2996_v56 = vmax.f32 %v2244_v50, 0.0  ;;  %v3124_v57 = vmax.f32 %v2756_v51, 0.0  ;;  %v2247_v63 = vadd.f32 %v5042_v39, %v2246_v54  ;;  %v2759_v58 = vadd.f32 %v5042_v39, %v2758_v55  ;;  %v2248_v59 = vpop.f32.mrb[183].mxu0  ;;  %v2760_v60 = vpop.f32.mrb[183].mxu1 }
 0x286   : > { %3253 = vst.msk [vmem:[%s4456_s5 + $0x2d0] sm:$0xff] %vm3162_vm0, %v2996_v56  ;;  %3381 = vst.msk [vmem:[%s4456_s5 + $0x6d0] sm:$0xff] %vm3162_vm0, %v3124_v57  ;;  %v2997_v61 = vmax.f32 %v2247_v63, 0.0  ;;  %v3125_v62 = vmax.f32 %v2759_v58, 0.0 }
 0x288   : > { %3254 = vst.msk [vmem:[%s4456_s5 + $0x2d8] sm:$0xff] %vm3162_vm0, %v2997_v61  ;;  %3382 = vst.msk [vmem:[%s4456_s5 + $0x6d8] sm:$0xff] %vm3162_vm0, %v3125_v62 }
 0x289   : > { %v2251_v0 = vpop.f32.mrb[184].mxu0  ;;  %v2763_v1 = vpop.f32.mrb[184].mxu1 }
 0x28a   : > { %v2252_v2 = vadd.f32 %v5042_v39, %v2251_v0  ;;  %v2764_v3 = vadd.f32 %v5042_v39, %v2763_v1  ;;  %v2253_v4 = vpop.f32.mrb[185].mxu0  ;;  %v2765_v5 = vpop.f32.mrb[185].mxu1 }
 0x28b   : > { %v2254_v6 = vpop.f32.mrb[186].mxu0  ;;  %v2766_v7 = vpop.f32.mrb[186].mxu1 }
 0x28c   : > { %v2998_v8 = vmax.f32 %v2252_v2, 0.0  ;;  %v3126_v9 = vmax.f32 %v2764_v3, 0.0  ;;  %v2255_v10 = vadd.f32 %v5042_v39, %v2254_v6  ;;  %v2767_v11 = vadd.f32 %v5042_v39, %v2766_v7  ;;  %v2256_v12 = vpop.f32.mrb[187].mxu0  ;;  %v2768_v13 = vpop.f32.mrb[187].mxu1 }
 0x28e   : > { %3255 = vst.msk [vmem:[%s4456_s5 + $0x2e0] sm:$0xff] %vm3162_vm0, %v2998_v8  ;;  %3383 = vst.msk [vmem:[%s4456_s5 + $0x6e0] sm:$0xff] %vm3162_vm0, %v3126_v9  ;;  %v2999_v14 = vmax.f32 %v2255_v10, 0.0  ;;  %v3127_v15 = vmax.f32 %v2767_v11, 0.0 }
 0x290   : > { %3256 = vst.msk [vmem:[%s4456_s5 + $0x2e8] sm:$0xff] %vm3162_vm0, %v2999_v14  ;;  %3384 = vst.msk [vmem:[%s4456_s5 + $0x6e8] sm:$0xff] %vm3162_vm0, %v3127_v15 }
 0x291   : > { %v2259_v16 = vpop.f32.mrb[188].mxu0  ;;  %v2771_v17 = vpop.f32.mrb[188].mxu1 }
 0x292   : > { %v2260_v18 = vadd.f32 %v5042_v39, %v2259_v16  ;;  %v2772_v19 = vadd.f32 %v5042_v39, %v2771_v17  ;;  %v2261_v20 = vpop.f32.mrb[189].mxu0  ;;  %v2773_v21 = vpop.f32.mrb[189].mxu1 }
 0x293   : > { %v2262_v22 = vpop.f32.mrb[190].mxu0  ;;  %v2774_v23 = vpop.f32.mrb[190].mxu1 }
 0x294   : > { %v3000_v24 = vmax.f32 %v2260_v18, 0.0  ;;  %v3128_v25 = vmax.f32 %v2772_v19, 0.0  ;;  %v2263_v26 = vadd.f32 %v5042_v39, %v2262_v22  ;;  %v2775_v27 = vadd.f32 %v5042_v39, %v2774_v23  ;;  %v2264_v28 = vpop.f32.mrb[191].mxu0  ;;  %v2776_v29 = vpop.f32.mrb[191].mxu1 }
 0x296   : > { %3257 = vst.msk [vmem:[%s4456_s5 + $0x2f0] sm:$0xff] %vm3162_vm0, %v3000_v24  ;;  %3385 = vst.msk [vmem:[%s4456_s5 + $0x6f0] sm:$0xff] %vm3162_vm0, %v3128_v25  ;;  %v3001_v30 = vmax.f32 %v2263_v26, 0.0  ;;  %v3129_v31 = vmax.f32 %v2775_v27, 0.0 }
 0x298   : > { %3258 = vst.msk [vmem:[%s4456_s5 + $0x2f8] sm:$0xff] %vm3162_vm0, %v3001_v30  ;;  %3386 = vst.msk [vmem:[%s4456_s5 + $0x6f8] sm:$0xff] %vm3162_vm0, %v3129_v31 }
 0x299   : > { %v2267_v32 = vpop.f32.mrb[192].mxu0  ;;  %v2779_v33 = vpop.f32.mrb[192].mxu1 }
 0x29a   : > { %v2268_v34 = vadd.f32 %v5042_v39, %v2267_v32  ;;  %v2780_v35 = vadd.f32 %v5042_v39, %v2779_v33  ;;  %v2269_v36 = vpop.f32.mrb[193].mxu0  ;;  %v2781_v37 = vpop.f32.mrb[193].mxu1 }
 0x29b   : > { %v2270_v38 = vpop.f32.mrb[194].mxu0  ;;  %v2782_v40 = vpop.f32.mrb[194].mxu1 }
 0x29c   : > { %v3002_v41 = vmax.f32 %v2268_v34, 0.0  ;;  %v3130_v48 = vmax.f32 %v2780_v35, 0.0  ;;  %v2271_v42 = vadd.f32 %v5042_v39, %v2270_v38  ;;  %v2783_v43 = vadd.f32 %v5042_v39, %v2782_v40  ;;  %v2272_v44 = vpop.f32.mrb[195].mxu0  ;;  %v2784_v45 = vpop.f32.mrb[195].mxu1 }
 0x29e   : > { %3259 = vst.msk [vmem:[%s4456_s5 + $0x300] sm:$0xff] %vm3162_vm0, %v3002_v41  ;;  %3387 = vst.msk [vmem:[%s4456_s5 + $0x700] sm:$0xff] %vm3162_vm0, %v3130_v48  ;;  %v3003_v46 = vmax.f32 %v2271_v42, 0.0  ;;  %v3131_v47 = vmax.f32 %v2783_v43, 0.0 }
 0x2a0   : > { %3260 = vst.msk [vmem:[%s4456_s5 + $0x308] sm:$0xff] %vm3162_vm0, %v3003_v46  ;;  %3388 = vst.msk [vmem:[%s4456_s5 + $0x708] sm:$0xff] %vm3162_vm0, %v3131_v47 }
 0x2a1   : > { %v2275_v49 = vpop.f32.mrb[196].mxu0  ;;  %v2787_v50 = vpop.f32.mrb[196].mxu1 }
 0x2a2   : > { %v2276_v51 = vadd.f32 %v5042_v39, %v2275_v49  ;;  %v2788_v52 = vadd.f32 %v5042_v39, %v2787_v50  ;;  %v2277_v53 = vpop.f32.mrb[197].mxu0  ;;  %v2789_v54 = vpop.f32.mrb[197].mxu1 }
 0x2a3   : > { %v2278_v55 = vpop.f32.mrb[198].mxu0  ;;  %v2790_v56 = vpop.f32.mrb[198].mxu1 }
 0x2a4   : > { %v3004_v57 = vmax.f32 %v2276_v51, 0.0  ;;  %v3132_v63 = vmax.f32 %v2788_v52, 0.0  ;;  %v2279_v58 = vadd.f32 %v5042_v39, %v2278_v55  ;;  %v2791_v59 = vadd.f32 %v5042_v39, %v2790_v56  ;;  %v2280_v60 = vpop.f32.mrb[199].mxu0  ;;  %v2792_v61 = vpop.f32.mrb[199].mxu1 }
 0x2a6   : > { %3261 = vst.msk [vmem:[%s4456_s5 + $0x310] sm:$0xff] %vm3162_vm0, %v3004_v57  ;;  %3389 = vst.msk [vmem:[%s4456_s5 + $0x710] sm:$0xff] %vm3162_vm0, %v3132_v63  ;;  %v3005_v62 = vmax.f32 %v2279_v58, 0.0  ;;  %v3133_v0 = vmax.f32 %v2791_v59, 0.0 }
 0x2a8   : > { %3262 = vst.msk [vmem:[%s4456_s5 + $0x318] sm:$0xff] %vm3162_vm0, %v3005_v62  ;;  %3390 = vst.msk [vmem:[%s4456_s5 + $0x718] sm:$0xff] %vm3162_vm0, %v3133_v0 }
 0x2a9   : > { %v2283_v1 = vpop.f32.mrb[200].mxu0  ;;  %v2795_v2 = vpop.f32.mrb[200].mxu1 }
 0x2aa   : > { %v2284_v3 = vadd.f32 %v5042_v39, %v2283_v1  ;;  %v2796_v4 = vadd.f32 %v5042_v39, %v2795_v2  ;;  %v2285_v5 = vpop.f32.mrb[201].mxu0  ;;  %v2797_v6 = vpop.f32.mrb[201].mxu1 }
 0x2ab   : > { %v2286_v7 = vpop.f32.mrb[202].mxu0  ;;  %v2798_v8 = vpop.f32.mrb[202].mxu1 }
 0x2ac   : > { %v3006_v9 = vmax.f32 %v2284_v3, 0.0  ;;  %v3134_v10 = vmax.f32 %v2796_v4, 0.0  ;;  %v2287_v11 = vadd.f32 %v5042_v39, %v2286_v7  ;;  %v2799_v12 = vadd.f32 %v5042_v39, %v2798_v8  ;;  %v2288_v13 = vpop.f32.mrb[203].mxu0  ;;  %v2800_v14 = vpop.f32.mrb[203].mxu1 }
 0x2ae   : > { %3263 = vst.msk [vmem:[%s4456_s5 + $0x320] sm:$0xff] %vm3162_vm0, %v3006_v9  ;;  %3391 = vst.msk [vmem:[%s4456_s5 + $0x720] sm:$0xff] %vm3162_vm0, %v3134_v10  ;;  %v3007_v15 = vmax.f32 %v2287_v11, 0.0  ;;  %v3135_v16 = vmax.f32 %v2799_v12, 0.0 }
 0x2b0   : > { %3264 = vst.msk [vmem:[%s4456_s5 + $0x328] sm:$0xff] %vm3162_vm0, %v3007_v15  ;;  %3392 = vst.msk [vmem:[%s4456_s5 + $0x728] sm:$0xff] %vm3162_vm0, %v3135_v16 }
 0x2b1   : > { %v2291_v17 = vpop.f32.mrb[204].mxu0  ;;  %v2803_v18 = vpop.f32.mrb[204].mxu1 }
 0x2b2   : > { %v2292_v19 = vadd.f32 %v5042_v39, %v2291_v17  ;;  %v2804_v20 = vadd.f32 %v5042_v39, %v2803_v18  ;;  %v2293_v21 = vpop.f32.mrb[205].mxu0  ;;  %v2805_v22 = vpop.f32.mrb[205].mxu1 }
 0x2b3   : > { %v2294_v23 = vpop.f32.mrb[206].mxu0  ;;  %v2806_v24 = vpop.f32.mrb[206].mxu1 }
 0x2b4   : > { %v3008_v25 = vmax.f32 %v2292_v19, 0.0  ;;  %v3136_v26 = vmax.f32 %v2804_v20, 0.0  ;;  %v2295_v27 = vadd.f32 %v5042_v39, %v2294_v23  ;;  %v2807_v28 = vadd.f32 %v5042_v39, %v2806_v24  ;;  %v2296_v29 = vpop.f32.mrb[207].mxu0  ;;  %v2808_v30 = vpop.f32.mrb[207].mxu1 }
 0x2b6   : > { %3265 = vst.msk [vmem:[%s4456_s5 + $0x330] sm:$0xff] %vm3162_vm0, %v3008_v25  ;;  %3393 = vst.msk [vmem:[%s4456_s5 + $0x730] sm:$0xff] %vm3162_vm0, %v3136_v26  ;;  %v3009_v31 = vmax.f32 %v2295_v27, 0.0  ;;  %v3137_v32 = vmax.f32 %v2807_v28, 0.0 }
 0x2b8   : > { %3266 = vst.msk [vmem:[%s4456_s5 + $0x338] sm:$0xff] %vm3162_vm0, %v3009_v31  ;;  %3394 = vst.msk [vmem:[%s4456_s5 + $0x738] sm:$0xff] %vm3162_vm0, %v3137_v32 }
 0x2b9   : > { %v2299_v33 = vpop.f32.mrb[208].mxu0  ;;  %v2811_v34 = vpop.f32.mrb[208].mxu1 }
 0x2ba   : > { %v2300_v35 = vadd.f32 %v5042_v39, %v2299_v33  ;;  %v2812_v36 = vadd.f32 %v5042_v39, %v2811_v34  ;;  %v2301_v37 = vpop.f32.mrb[209].mxu0  ;;  %v2813_v38 = vpop.f32.mrb[209].mxu1 }
 0x2bb   : > { %v2302_v40 = vpop.f32.mrb[210].mxu0  ;;  %v2814_v41 = vpop.f32.mrb[210].mxu1 }
 0x2bc   : > { %v3010_v48 = vmax.f32 %v2300_v35, 0.0  ;;  %v3138_v42 = vmax.f32 %v2812_v36, 0.0  ;;  %v2303_v43 = vadd.f32 %v5042_v39, %v2302_v40  ;;  %v2815_v44 = vadd.f32 %v5042_v39, %v2814_v41  ;;  %v2304_v45 = vpop.f32.mrb[211].mxu0  ;;  %v2816_v46 = vpop.f32.mrb[211].mxu1 }
 0x2be   : > { %3267 = vst.msk [vmem:[%s4456_s5 + $0x340] sm:$0xff] %vm3162_vm0, %v3010_v48  ;;  %3395 = vst.msk [vmem:[%s4456_s5 + $0x740] sm:$0xff] %vm3162_vm0, %v3138_v42  ;;  %v3011_v47 = vmax.f32 %v2303_v43, 0.0  ;;  %v3139_v49 = vmax.f32 %v2815_v44, 0.0 }
 0x2c0   : > { %3268 = vst.msk [vmem:[%s4456_s5 + $0x348] sm:$0xff] %vm3162_vm0, %v3011_v47  ;;  %3396 = vst.msk [vmem:[%s4456_s5 + $0x748] sm:$0xff] %vm3162_vm0, %v3139_v49 }
 0x2c1   : > { %v2307_v50 = vpop.f32.mrb[212].mxu0  ;;  %v2819_v51 = vpop.f32.mrb[212].mxu1 }
 0x2c2   : > { %v2308_v52 = vadd.f32 %v5042_v39, %v2307_v50  ;;  %v2820_v53 = vadd.f32 %v5042_v39, %v2819_v51  ;;  %v2309_v54 = vpop.f32.mrb[213].mxu0  ;;  %v2821_v55 = vpop.f32.mrb[213].mxu1 }
 0x2c3   : > { %v2310_v56 = vpop.f32.mrb[214].mxu0  ;;  %v2822_v57 = vpop.f32.mrb[214].mxu1 }
 0x2c4   : > { %v3012_v63 = vmax.f32 %v2308_v52, 0.0  ;;  %v3140_v58 = vmax.f32 %v2820_v53, 0.0  ;;  %v2311_v59 = vadd.f32 %v5042_v39, %v2310_v56  ;;  %v2823_v60 = vadd.f32 %v5042_v39, %v2822_v57  ;;  %v2312_v61 = vpop.f32.mrb[215].mxu0  ;;  %v2824_v62 = vpop.f32.mrb[215].mxu1 }
 0x2c6   : > { %3269 = vst.msk [vmem:[%s4456_s5 + $0x350] sm:$0xff] %vm3162_vm0, %v3012_v63  ;;  %3397 = vst.msk [vmem:[%s4456_s5 + $0x750] sm:$0xff] %vm3162_vm0, %v3140_v58  ;;  %v3013_v0 = vmax.f32 %v2311_v59, 0.0  ;;  %v3141_v1 = vmax.f32 %v2823_v60, 0.0 }
 0x2c8   : > { %3270 = vst.msk [vmem:[%s4456_s5 + $0x358] sm:$0xff] %vm3162_vm0, %v3013_v0  ;;  %3398 = vst.msk [vmem:[%s4456_s5 + $0x758] sm:$0xff] %vm3162_vm0, %v3141_v1 }
 0x2c9   : > { %v2315_v2 = vpop.f32.mrb[216].mxu0  ;;  %v2827_v3 = vpop.f32.mrb[216].mxu1 }
 0x2ca   : > { %v2316_v4 = vadd.f32 %v5042_v39, %v2315_v2  ;;  %v2828_v5 = vadd.f32 %v5042_v39, %v2827_v3  ;;  %v2317_v6 = vpop.f32.mrb[217].mxu0  ;;  %v2829_v7 = vpop.f32.mrb[217].mxu1 }
 0x2cb   : > { %v2318_v8 = vpop.f32.mrb[218].mxu0  ;;  %v2830_v9 = vpop.f32.mrb[218].mxu1 }
 0x2cc   : > { %v3014_v10 = vmax.f32 %v2316_v4, 0.0  ;;  %v3142_v11 = vmax.f32 %v2828_v5, 0.0  ;;  %v2319_v12 = vadd.f32 %v5042_v39, %v2318_v8  ;;  %v2831_v13 = vadd.f32 %v5042_v39, %v2830_v9  ;;  %v2320_v14 = vpop.f32.mrb[219].mxu0  ;;  %v2832_v15 = vpop.f32.mrb[219].mxu1 }
 0x2ce   : > { %3271 = vst.msk [vmem:[%s4456_s5 + $0x360] sm:$0xff] %vm3162_vm0, %v3014_v10  ;;  %3399 = vst.msk [vmem:[%s4456_s5 + $0x760] sm:$0xff] %vm3162_vm0, %v3142_v11  ;;  %v3015_v16 = vmax.f32 %v2319_v12, 0.0  ;;  %v3143_v17 = vmax.f32 %v2831_v13, 0.0 }
 0x2d0   : > { %3272 = vst.msk [vmem:[%s4456_s5 + $0x368] sm:$0xff] %vm3162_vm0, %v3015_v16  ;;  %3400 = vst.msk [vmem:[%s4456_s5 + $0x768] sm:$0xff] %vm3162_vm0, %v3143_v17 }
 0x2d1   : > { %v2323_v18 = vpop.f32.mrb[220].mxu0  ;;  %v2835_v19 = vpop.f32.mrb[220].mxu1 }
 0x2d2   : > { %v2324_v20 = vadd.f32 %v5042_v39, %v2323_v18  ;;  %v2836_v21 = vadd.f32 %v5042_v39, %v2835_v19  ;;  %v2325_v22 = vpop.f32.mrb[221].mxu0  ;;  %v2837_v23 = vpop.f32.mrb[221].mxu1 }
 0x2d3   : > { %v2326_v24 = vpop.f32.mrb[222].mxu0  ;;  %v2838_v25 = vpop.f32.mrb[222].mxu1 }
 0x2d4   : > { %v3016_v26 = vmax.f32 %v2324_v20, 0.0  ;;  %v3144_v27 = vmax.f32 %v2836_v21, 0.0  ;;  %v2327_v28 = vadd.f32 %v5042_v39, %v2326_v24  ;;  %v2839_v29 = vadd.f32 %v5042_v39, %v2838_v25  ;;  %v2328_v30 = vpop.f32.mrb[223].mxu0  ;;  %v2840_v31 = vpop.f32.mrb[223].mxu1 }
 0x2d6   : > { %3273 = vst.msk [vmem:[%s4456_s5 + $0x370] sm:$0xff] %vm3162_vm0, %v3016_v26  ;;  %3401 = vst.msk [vmem:[%s4456_s5 + $0x770] sm:$0xff] %vm3162_vm0, %v3144_v27  ;;  %v3017_v32 = vmax.f32 %v2327_v28, 0.0  ;;  %v3145_v33 = vmax.f32 %v2839_v29, 0.0 }
 0x2d8   : > { %3274 = vst.msk [vmem:[%s4456_s5 + $0x378] sm:$0xff] %vm3162_vm0, %v3017_v32  ;;  %3402 = vst.msk [vmem:[%s4456_s5 + $0x778] sm:$0xff] %vm3162_vm0, %v3145_v33 }
 0x2d9   : > { %v2331_v34 = vpop.f32.mrb[224].mxu0  ;;  %v2843_v35 = vpop.f32.mrb[224].mxu1 }
 0x2da   : > { %v2332_v36 = vadd.f32 %v5042_v39, %v2331_v34  ;;  %v2844_v37 = vadd.f32 %v5042_v39, %v2843_v35  ;;  %v2333_v38 = vpop.f32.mrb[225].mxu0  ;;  %v2845_v40 = vpop.f32.mrb[225].mxu1 }
 0x2db   : > { %v2334_v41 = vpop.f32.mrb[226].mxu0  ;;  %v2846_v48 = vpop.f32.mrb[226].mxu1 }
 0x2dc   : > { %v3018_v42 = vmax.f32 %v2332_v36, 0.0  ;;  %v3146_v43 = vmax.f32 %v2844_v37, 0.0  ;;  %v2335_v44 = vadd.f32 %v5042_v39, %v2334_v41  ;;  %v2847_v45 = vadd.f32 %v5042_v39, %v2846_v48  ;;  %v2336_v46 = vpop.f32.mrb[227].mxu0  ;;  %v2848_v47 = vpop.f32.mrb[227].mxu1 }
 0x2de   : > { %3275 = vst.msk [vmem:[%s4456_s5 + $0x380] sm:$0xff] %vm3162_vm0, %v3018_v42  ;;  %3403 = vst.msk [vmem:[%s4456_s5 + $0x780] sm:$0xff] %vm3162_vm0, %v3146_v43  ;;  %v3019_v49 = vmax.f32 %v2335_v44, 0.0  ;;  %v3147_v50 = vmax.f32 %v2847_v45, 0.0 }
 0x2e0   : > { %3276 = vst.msk [vmem:[%s4456_s5 + $0x388] sm:$0xff] %vm3162_vm0, %v3019_v49  ;;  %3404 = vst.msk [vmem:[%s4456_s5 + $0x788] sm:$0xff] %vm3162_vm0, %v3147_v50 }
 0x2e1   : > { %v2339_v51 = vpop.f32.mrb[228].mxu0  ;;  %v2851_v52 = vpop.f32.mrb[228].mxu1 }
 0x2e2   : > { %v2340_v53 = vadd.f32 %v5042_v39, %v2339_v51  ;;  %v2852_v54 = vadd.f32 %v5042_v39, %v2851_v52  ;;  %v2341_v55 = vpop.f32.mrb[229].mxu0  ;;  %v2853_v56 = vpop.f32.mrb[229].mxu1 }
 0x2e3   : > { %v2342_v57 = vpop.f32.mrb[230].mxu0  ;;  %v2854_v63 = vpop.f32.mrb[230].mxu1 }
 0x2e4   : > { %v3020_v58 = vmax.f32 %v2340_v53, 0.0  ;;  %v3148_v59 = vmax.f32 %v2852_v54, 0.0  ;;  %v2343_v60 = vadd.f32 %v5042_v39, %v2342_v57  ;;  %v2855_v61 = vadd.f32 %v5042_v39, %v2854_v63  ;;  %v2344_v62 = vpop.f32.mrb[231].mxu0  ;;  %v2856_v0 = vpop.f32.mrb[231].mxu1 }
 0x2e6   : > { %3277 = vst.msk [vmem:[%s4456_s5 + $0x390] sm:$0xff] %vm3162_vm0, %v3020_v58  ;;  %3405 = vst.msk [vmem:[%s4456_s5 + $0x790] sm:$0xff] %vm3162_vm0, %v3148_v59  ;;  %v3021_v1 = vmax.f32 %v2343_v60, 0.0  ;;  %v3149_v2 = vmax.f32 %v2855_v61, 0.0 }
 0x2e8   : > { %3278 = vst.msk [vmem:[%s4456_s5 + $0x398] sm:$0xff] %vm3162_vm0, %v3021_v1  ;;  %3406 = vst.msk [vmem:[%s4456_s5 + $0x798] sm:$0xff] %vm3162_vm0, %v3149_v2 }
 0x2e9   : > { %v2347_v3 = vpop.f32.mrb[232].mxu0  ;;  %v2859_v4 = vpop.f32.mrb[232].mxu1 }
 0x2ea   : > { %v2348_v5 = vadd.f32 %v5042_v39, %v2347_v3  ;;  %v2860_v6 = vadd.f32 %v5042_v39, %v2859_v4  ;;  %v2349_v7 = vpop.f32.mrb[233].mxu0  ;;  %v2861_v8 = vpop.f32.mrb[233].mxu1 }
 0x2eb   : > { %v2350_v9 = vpop.f32.mrb[234].mxu0  ;;  %v2862_v10 = vpop.f32.mrb[234].mxu1 }
 0x2ec   : > { %v3022_v11 = vmax.f32 %v2348_v5, 0.0  ;;  %v3150_v12 = vmax.f32 %v2860_v6, 0.0  ;;  %v2351_v13 = vadd.f32 %v5042_v39, %v2350_v9  ;;  %v2863_v14 = vadd.f32 %v5042_v39, %v2862_v10  ;;  %v2352_v15 = vpop.f32.mrb[235].mxu0  ;;  %v2864_v16 = vpop.f32.mrb[235].mxu1 }
 0x2ee   : > { %3279 = vst.msk [vmem:[%s4456_s5 + $0x3a0] sm:$0xff] %vm3162_vm0, %v3022_v11  ;;  %3407 = vst.msk [vmem:[%s4456_s5 + $0x7a0] sm:$0xff] %vm3162_vm0, %v3150_v12  ;;  %v3023_v17 = vmax.f32 %v2351_v13, 0.0  ;;  %v3151_v18 = vmax.f32 %v2863_v14, 0.0 }
 0x2f0   : > { %3280 = vst.msk [vmem:[%s4456_s5 + $0x3a8] sm:$0xff] %vm3162_vm0, %v3023_v17  ;;  %3408 = vst.msk [vmem:[%s4456_s5 + $0x7a8] sm:$0xff] %vm3162_vm0, %v3151_v18 }
 0x2f1   : > { %v2355_v19 = vpop.f32.mrb[236].mxu0  ;;  %v2867_v20 = vpop.f32.mrb[236].mxu1 }
 0x2f2   : > { %v2356_v21 = vadd.f32 %v5042_v39, %v2355_v19  ;;  %v2868_v22 = vadd.f32 %v5042_v39, %v2867_v20  ;;  %v2357_v23 = vpop.f32.mrb[237].mxu0  ;;  %v2869_v24 = vpop.f32.mrb[237].mxu1 }
 0x2f3   : > { %v2358_v25 = vpop.f32.mrb[238].mxu0  ;;  %v2870_v26 = vpop.f32.mrb[238].mxu1 }
 0x2f4   : > { %v3024_v27 = vmax.f32 %v2356_v21, 0.0  ;;  %v3152_v28 = vmax.f32 %v2868_v22, 0.0  ;;  %v2359_v29 = vadd.f32 %v5042_v39, %v2358_v25  ;;  %v2871_v30 = vadd.f32 %v5042_v39, %v2870_v26  ;;  %v2360_v31 = vpop.f32.mrb[239].mxu0  ;;  %v2872_v32 = vpop.f32.mrb[239].mxu1 }
 0x2f6   : > { %3281 = vst.msk [vmem:[%s4456_s5 + $0x3b0] sm:$0xff] %vm3162_vm0, %v3024_v27  ;;  %3409 = vst.msk [vmem:[%s4456_s5 + $0x7b0] sm:$0xff] %vm3162_vm0, %v3152_v28  ;;  %v3025_v33 = vmax.f32 %v2359_v29, 0.0  ;;  %v3153_v34 = vmax.f32 %v2871_v30, 0.0 }
 0x2f8   : > { %3282 = vst.msk [vmem:[%s4456_s5 + $0x3b8] sm:$0xff] %vm3162_vm0, %v3025_v33  ;;  %3410 = vst.msk [vmem:[%s4456_s5 + $0x7b8] sm:$0xff] %vm3162_vm0, %v3153_v34 }
 0x2f9   : > { %v2363_v35 = vpop.f32.mrb[240].mxu0  ;;  %v2875_v36 = vpop.f32.mrb[240].mxu1 }
 0x2fa   : > { %v2364_v37 = vadd.f32 %v5042_v39, %v2363_v35  ;;  %v2876_v38 = vadd.f32 %v5042_v39, %v2875_v36  ;;  %v2365_v40 = vpop.f32.mrb[241].mxu0  ;;  %v2877_v41 = vpop.f32.mrb[241].mxu1 }
 0x2fb   : > { %v2366_v48 = vpop.f32.mrb[242].mxu0  ;;  %v2878_v42 = vpop.f32.mrb[242].mxu1 }
 0x2fc   : > { %v3026_v43 = vmax.f32 %v2364_v37, 0.0  ;;  %v3154_v44 = vmax.f32 %v2876_v38, 0.0  ;;  %v2367_v45 = vadd.f32 %v5042_v39, %v2366_v48  ;;  %v2879_v46 = vadd.f32 %v5042_v39, %v2878_v42  ;;  %v2368_v47 = vpop.f32.mrb[243].mxu0  ;;  %v2880_v49 = vpop.f32.mrb[243].mxu1 }
 0x2fe   : > { %3283 = vst.msk [vmem:[%s4456_s5 + $0x3c0] sm:$0xff] %vm3162_vm0, %v3026_v43  ;;  %3411 = vst.msk [vmem:[%s4456_s5 + $0x7c0] sm:$0xff] %vm3162_vm0, %v3154_v44  ;;  %v3027_v50 = vmax.f32 %v2367_v45, 0.0  ;;  %v3155_v51 = vmax.f32 %v2879_v46, 0.0 }
 0x300   : > { %3284 = vst.msk [vmem:[%s4456_s5 + $0x3c8] sm:$0xff] %vm3162_vm0, %v3027_v50  ;;  %3412 = vst.msk [vmem:[%s4456_s5 + $0x7c8] sm:$0xff] %vm3162_vm0, %v3155_v51 }
 0x301   : > { %v2371_v52 = vpop.f32.mrb[244].mxu0  ;;  %v2883_v53 = vpop.f32.mrb[244].mxu1 }
 0x302   : > { %v2372_v54 = vadd.f32 %v5042_v39, %v2371_v52  ;;  %v2884_v55 = vadd.f32 %v5042_v39, %v2883_v53  ;;  %v2373_v56 = vpop.f32.mrb[245].mxu0  ;;  %v2885_v57 = vpop.f32.mrb[245].mxu1 }
 0x303   : > { %v2374_v63 = vpop.f32.mrb[246].mxu0  ;;  %v2886_v58 = vpop.f32.mrb[246].mxu1 }
 0x304   : > { %v3028_v59 = vmax.f32 %v2372_v54, 0.0  ;;  %v3156_v60 = vmax.f32 %v2884_v55, 0.0  ;;  %v2375_v61 = vadd.f32 %v5042_v39, %v2374_v63  ;;  %v2887_v62 = vadd.f32 %v5042_v39, %v2886_v58  ;;  %v2376_v0 = vpop.f32.mrb[247].mxu0  ;;  %v2888_v1 = vpop.f32.mrb[247].mxu1  ;;  %v4204_v39 = vld [vmem:[%s5378_s2] ss:$0 sm:$0xff] }
 0x306   : > { %3285 = vst.msk [vmem:[%s4456_s5 + $0x3d0] sm:$0xff] %vm3162_vm0, %v3028_v59  ;;  %3413 = vst.msk [vmem:[%s4456_s5 + $0x7d0] sm:$0xff] %vm3162_vm0, %v3156_v60  ;;  %v3029_v2 = vmax.f32 %v2375_v61, 0.0  ;;  %v3157_v3 = vmax.f32 %v2887_v62, 0.0 }
 0x308   : > { %3286 = vst.msk [vmem:[%s4456_s5 + $0x3d8] sm:$0xff] %vm3162_vm0, %v3029_v2  ;;  %3414 = vst.msk [vmem:[%s4456_s5 + $0x7d8] sm:$0xff] %vm3162_vm0, %v3157_v3 }
 0x309   : > { %v2379_v4 = vpop.f32.mrb[248].mxu0  ;;  %v2891_v5 = vpop.f32.mrb[248].mxu1 }
 0x30a   : > { %v2380_v6 = vadd.f32 %v4204_v39, %v2379_v4  ;;  %v2892_v7 = vadd.f32 %v4204_v39, %v2891_v5  ;;  %v2381_v8 = vpop.f32.mrb[249].mxu0  ;;  %v2893_v9 = vpop.f32.mrb[249].mxu1 }
 0x30b   : > { %v2382_v10 = vpop.f32.mrb[250].mxu0  ;;  %v2894_v11 = vpop.f32.mrb[250].mxu1 }
 0x30c   : > { %v3030_v12 = vmax.f32 %v2380_v6, 0.0  ;;  %v3158_v13 = vmax.f32 %v2892_v7, 0.0  ;;  %v2383_v14 = vadd.f32 %v4204_v39, %v2382_v10  ;;  %v2895_v15 = vadd.f32 %v4204_v39, %v2894_v11  ;;  %v2384_v16 = vpop.f32.mrb[251].mxu0  ;;  %v2896_v17 = vpop.f32.mrb[251].mxu1 }
 0x30e   : > { %3287 = vst.msk [vmem:[%s4456_s5 + $0x3e0] sm:$0xff] %vm3162_vm0, %v3030_v12  ;;  %3415 = vst.msk [vmem:[%s4456_s5 + $0x7e0] sm:$0xff] %vm3162_vm0, %v3158_v13  ;;  %v3031_v18 = vmax.f32 %v2383_v14, 0.0  ;;  %v3159_v19 = vmax.f32 %v2895_v15, 0.0 }
 0x310   : > { %3288 = vst.msk [vmem:[%s4456_s5 + $0x3e8] sm:$0xff] %vm3162_vm0, %v3031_v18  ;;  %3416 = vst.msk [vmem:[%s4456_s5 + $0x7e8] sm:$0xff] %vm3162_vm0, %v3159_v19 }
 0x311   : > { %v2387_v20 = vpop.f32.mrb[252].mxu0  ;;  %v2899_v21 = vpop.f32.mrb[252].mxu1 }
 0x312   : > { %v2388_v22 = vadd.f32 %v4204_v39, %v2387_v20  ;;  %v2900_v23 = vadd.f32 %v4204_v39, %v2899_v21  ;;  %v2389_v24 = vpop.f32.mrb[253].mxu0  ;;  %v2901_v25 = vpop.f32.mrb[253].mxu1 }
 0x313   : > { %v2390_v26 = vpop.f32.mrb[254].mxu0  ;;  %v2902_v27 = vpop.f32.mrb[254].mxu1 }
 0x314   : > { %v3032_v28 = vmax.f32 %v2388_v22, 0.0  ;;  %v3160_v29 = vmax.f32 %v2900_v23, 0.0  ;;  %v2391_v30 = vadd.f32 %v4204_v39, %v2390_v26  ;;  %v2903_v31 = vadd.f32 %v4204_v39, %v2902_v27  ;;  %v2392_v32 = vpop.f32.mrb[255].mxu0  ;;  %v2904_v33 = vpop.f32.mrb[255].mxu1 }
 0x316   : > { %3289 = vst.msk [vmem:[%s4456_s5 + $0x3f0] sm:$0xff] %vm3162_vm0, %v3032_v28  ;;  %3417 = vst.msk [vmem:[%s4456_s5 + $0x7f0] sm:$0xff] %vm3162_vm0, %v3160_v29  ;;  %v3033_v34 = vmax.f32 %v2391_v30, 0.0  ;;  %v3161_v35 = vmax.f32 %v2903_v31, 0.0 }
 0x318   : > { %3290 = vst.msk [vmem:[%s4456_s5 + $0x3f8] sm:$0xff] %vm3162_vm0, %v3033_v34  ;;  %3418 = vst.msk [vmem:[%s4456_s5 + $0x7f8] sm:$0xff] %vm3162_vm0, %v3161_v35 }
 0x319 PF: > { %s13_s12 = sadd.s32 1, %s4211_s12  }
 0x31a   : > { %p10_p4 = scmp.ge.s32.totalorder %s13_s12, 4  }
 0x31c   :  { %12 = sbr.rel (!%p10_p4) target bundleno = 1 (0x1), region = 62 }

// kernel: cis_resnet_forward.9
= control target key start
LH: loop header
LB: loop body
LE: loop exit
PB: predicated region body
PF: predicated region fallthrough
CT: control target
= control target key end

     0   :  { %s3158_s0 = inlined_call_operand.vmem [shape: f32[512,128], index: 0, kind: input, shape index: {}]   ;;  %s3159_s1 = inlined_call_operand.vmem [shape: f32[512,128], index: 1, kind: input, shape index: {}]   ;;  %s3160_s2 = inlined_call_operand.vmem [shape: f32[512,128], index: 2, kind: input, shape index: {}]   ;;  %s3161_s3 = inlined_call_operand.vmem [shape: f32[512,128], index: 3, kind: input, shape index: {}]   ;;  %s3162_s4 = inlined_call_operand.vmem [shape: f32[512,128], index: 4, kind: input, shape index: {}]   ;;  %s3163_s5 = inlined_call_operand.vmem [shape: f32[512,128], index: 5, kind: input, shape index: {}]   ;;  %s3164_s6 = inlined_call_operand.vmem [shape: f32[512,128], index: 6, kind: input, shape index: {}]   ;;  %s3165_s7 = inlined_call_operand.vmem [shape: f32[512,128], index: 7, kind: input, shape index: {}]   ;;  %s3166_s8 = inlined_call_operand.vmem [shape: f32[512,128], index: 8, kind: input, shape index: {}]   ;;  %s3167_s9 = inlined_call_operand.vmem [shape: f32[512,128], index: 9, kind: output, shape index: {}]  }
   0x1   :  { %v32_v0 = vld [vmem:[%s3158_s0] sm:$0xff]  ;;  %v33_v6 = vld [vmem:[%s3158_s0 + $0x8] sm:$0xff]  ;;  %v34_v15 = vld [vmem:[%s3158_s0 + $0x10] sm:$0xff] }
   0x2   :  { %v96_v1 = vld [vmem:[%s3159_s1] sm:$0xff]  ;;  %v97_v7 = vld [vmem:[%s3159_s1 + $0x8] sm:$0xff]  ;;  %v98_v16 = vld [vmem:[%s3159_s1 + $0x10] sm:$0xff] }
   0x3   :  { %v224_v2 = vld [vmem:[%s3160_s2] sm:$0xff]  ;;  %v160_v3 = vmax.f32 %v32_v0, %v96_v1  ;;  %v225_v8 = vld [vmem:[%s3160_s2 + $0x8] sm:$0xff]  ;;  %v161_v10 = vmax.f32 %v33_v6, %v97_v7  ;;  %v226_v17 = vld [vmem:[%s3160_s2 + $0x10] sm:$0xff]  ;;  %v162_v20 = vmax.f32 %v34_v15, %v98_v16 }
   0x4   :  { %v352_v4 = vld [vmem:[%s3161_s3] sm:$0xff]  ;;  %v353_v13 = vld [vmem:[%s3161_s3 + $0x8] sm:$0xff]  ;;  %v354_v24 = vld [vmem:[%s3161_s3 + $0x10] sm:$0xff] }
   0x5   :  { %v288_v5 = vmax.f32 %v160_v3, %v224_v2  ;;  %v480_v9 = vld [vmem:[%s3162_s4] sm:$0xff]  ;;  %v289_v14 = vmax.f32 %v161_v10, %v225_v8  ;;  %v481_v19 = vld [vmem:[%s3162_s4 + $0x8] sm:$0xff]  ;;  %v290_v26 = vmax.f32 %v162_v20, %v226_v17  ;;  %v35_v27 = vld [vmem:[%s3158_s0 + $0x18] sm:$0xff] }
   0x6   :  { %v608_v12 = vld [vmem:[%s3163_s5] sm:$0xff]  ;;  %v609_v23 = vld [vmem:[%s3163_s5 + $0x8] sm:$0xff]  ;;  %v99_v28 = vld [vmem:[%s3159_s1 + $0x18] sm:$0xff] }
   0x7   :  { %v416_v11 = vmax.f32 %v288_v5, %v352_v4  ;;  %v736_v21 = vld [vmem:[%s3164_s6] sm:$0xff]  ;;  %v417_v22 = vmax.f32 %v289_v14, %v353_v13  ;;  %v227_v29 = vld [vmem:[%s3160_s2 + $0x18] sm:$0xff]  ;;  %v482_v33 = vld [vmem:[%s3162_s4 + $0x10] sm:$0xff]  ;;  %v163_v34 = vmax.f32 %v35_v27, %v99_v28  ;;  %v418_v37 = vmax.f32 %v290_v26, %v354_v24 }
   0x8   :  { %v864_v30 = vld [vmem:[%s3165_s7] sm:$0xff]  ;;  %v737_v36 = vld [vmem:[%s3164_s6 + $0x8] sm:$0xff]  ;;  %v610_v38 = vld [vmem:[%s3163_s5 + $0x10] sm:$0xff] }
   0x9   :  { %v544_v18 = vmax.f32 %v416_v11, %v480_v9  ;;  %v992_v31 = vld [vmem:[%s3166_s8] sm:$0xff]  ;;  %v545_v32 = vmax.f32 %v417_v22, %v481_v19  ;;  %v355_v39 = vld [vmem:[%s3161_s3 + $0x18] sm:$0xff]  ;;  %v291_v41 = vmax.f32 %v163_v34, %v227_v29  ;;  %v865_v46 = vld [vmem:[%s3165_s7 + $0x8] sm:$0xff]  ;;  %v546_v48 = vmax.f32 %v418_v37, %v482_v33 }
   0xa   :  { %v36_v42 = vld [vmem:[%s3158_s0 + $0x20] sm:$0xff]  ;;  %v993_v47 = vld [vmem:[%s3166_s8 + $0x8] sm:$0xff]  ;;  %v483_v49 = vld [vmem:[%s3162_s4 + $0x18] sm:$0xff] }
   0xb   :  { %v672_v25 = vmax.f32 %v544_v18, %v608_v12  ;;  %v673_v40 = vmax.f32 %v545_v32, %v609_v23  ;;  %v100_v43 = vld [vmem:[%s3159_s1 + $0x20] sm:$0xff]  ;;  %v738_v52 = vld [vmem:[%s3164_s6 + $0x10] sm:$0xff]  ;;  %v419_v53 = vmax.f32 %v291_v41, %v355_v39  ;;  %v611_v54 = vld [vmem:[%s3163_s5 + $0x18] sm:$0xff]  ;;  %v674_v57 = vmax.f32 %v546_v48, %v610_v38 }
   0xc   :  { %v228_v44 = vld [vmem:[%s3160_s2 + $0x20] sm:$0xff]  ;;  %v164_v50 = vmax.f32 %v36_v42, %v100_v43  ;;  %v37_v59 = vld [vmem:[%s3158_s0 + $0x28] sm:$0xff]  ;;  %v866_v63 = vld [vmem:[%s3165_s7 + $0x10] sm:$0xff] }
   0xd   :  { %v800_v35 = vmax.f32 %v672_v25, %v736_v21  ;;  %v801_v51 = vmax.f32 %v673_v40, %v737_v36  ;;  %v356_v55 = vld [vmem:[%s3161_s3 + $0x20] sm:$0xff]  ;;  %v101_v60 = vld [vmem:[%s3159_s1 + $0x28] sm:$0xff]  ;;  %v994_v0 = vld [vmem:[%s3166_s8 + $0x10] sm:$0xff]  ;;  %v547_v1 = vmax.f32 %v419_v53, %v483_v49  ;;  %v802_v4 = vmax.f32 %v674_v57, %v738_v52 }
   0xe   :  { %v292_v58 = vmax.f32 %v164_v50, %v228_v44  ;;  %v229_v61 = vld [vmem:[%s3160_s2 + $0x28] sm:$0xff]  ;;  %v484_v2 = vld [vmem:[%s3162_s4 + $0x20] sm:$0xff]  ;;  %v165_v3 = vmax.f32 %v37_v59, %v101_v60  ;;  %v739_v5 = vld [vmem:[%s3164_s6 + $0x18] sm:$0xff] }
   0xf   :  { %v928_v45 = vmax.f32 %v800_v35, %v864_v30  ;;  %v929_v62 = vmax.f32 %v801_v51, %v865_v46  ;;  %v612_v7 = vld [vmem:[%s3163_s5 + $0x20] sm:$0xff]  ;;  %v357_v8 = vld [vmem:[%s3161_s3 + $0x28] sm:$0xff]  ;;  %v675_v10 = vmax.f32 %v547_v1, %v611_v54  ;;  %v38_v12 = vld [vmem:[%s3158_s0 + $0x30] sm:$0xff]  ;;  %v930_v15 = vmax.f32 %v802_v4, %v866_v63 }
  0x10   :  { %v420_v6 = vmax.f32 %v292_v58, %v356_v55  ;;  %v293_v11 = vmax.f32 %v165_v3, %v229_v61  ;;  %v102_v13 = vld [vmem:[%s3159_s1 + $0x30] sm:$0xff]  ;;  %v867_v16 = vld [vmem:[%s3165_s7 + $0x18] sm:$0xff]  ;;  %v485_v19 = vld [vmem:[%s3162_s4 + $0x28] sm:$0xff] }
  0x11   :  { %v1056_v56 = vmax.f32 %v928_v45, %v992_v31  ;;  %v1057_v9 = vmax.f32 %v929_v62, %v993_v47  ;;  %v230_v14 = vld [vmem:[%s3160_s2 + $0x30] sm:$0xff]  ;;  %v995_v17 = vld [vmem:[%s3166_s8 + $0x18] sm:$0xff]  ;;  %v166_v20 = vmax.f32 %v38_v12, %v102_v13  ;;  %v803_v21 = vmax.f32 %v675_v10, %v739_v5  ;;  %v740_v22 = vld [vmem:[%s3164_s6 + $0x20] sm:$0xff] }
  0x12   :  { %v548_v18 = vmax.f32 %v420_v6, %v484_v2  ;;  %v421_v23 = vmax.f32 %v293_v11, %v357_v8  ;;  %v613_v24 = vld [vmem:[%s3163_s5 + $0x28] sm:$0xff]  ;;  %v358_v25 = vld [vmem:[%s3161_s3 + $0x30] sm:$0xff]  ;;  %v1058_v26 = vmax.f32 %v930_v15, %v994_v0  ;;  %v39_v29 = vld [vmem:[%s3158_s0 + $0x38] sm:$0xff] }
  0x13   :  { %1120 = vst [vmem:[%s3167_s9] sm:$0xff] %v1056_v56  ;;  %1121 = vst [vmem:[%s3167_s9 + $0x8] sm:$0xff] %v1057_v9  ;;  %v294_v28 = vmax.f32 %v166_v20, %v230_v14  ;;  %v103_v30 = vld [vmem:[%s3159_s1 + $0x38] sm:$0xff]  ;;  %v931_v32 = vmax.f32 %v803_v21, %v867_v16  ;;  %v868_v33 = vld [vmem:[%s3165_s7 + $0x20] sm:$0xff] }
  0x14   :  { %v676_v27 = vmax.f32 %v548_v18, %v612_v7  ;;  %v231_v31 = vld [vmem:[%s3160_s2 + $0x38] sm:$0xff]  ;;  %v996_v34 = vld [vmem:[%s3166_s8 + $0x20] sm:$0xff]  ;;  %v549_v35 = vmax.f32 %v421_v23, %v485_v19  ;;  %v486_v36 = vld [vmem:[%s3162_s4 + $0x30] sm:$0xff]  ;;  %v167_v37 = vmax.f32 %v39_v29, %v103_v30  ;;  %1122 = vst [vmem:[%s3167_s9 + $0x10] sm:$0xff] %v1058_v26 }
  0x15   :  { %v741_v39 = vld [vmem:[%s3164_s6 + $0x28] sm:$0xff]  ;;  %v422_v40 = vmax.f32 %v294_v28, %v358_v25  ;;  %v614_v41 = vld [vmem:[%s3163_s5 + $0x30] sm:$0xff]  ;;  %v359_v42 = vld [vmem:[%s3161_s3 + $0x38] sm:$0xff]  ;;  %v1059_v43 = vmax.f32 %v931_v32, %v995_v17 }
  0x16   :  { %v804_v38 = vmax.f32 %v676_v27, %v740_v22  ;;  %v677_v44 = vmax.f32 %v549_v35, %v613_v24  ;;  %v295_v45 = vmax.f32 %v167_v37, %v231_v31  ;;  %v40_v46 = vld [vmem:[%s3158_s0 + $0x40] sm:$0xff]  ;;  %v869_v50 = vld [vmem:[%s3165_s7 + $0x28] sm:$0xff]  ;;  %v487_v53 = vld [vmem:[%s3162_s4 + $0x38] sm:$0xff] }
  0x17   :  { %v104_v47 = vld [vmem:[%s3159_s1 + $0x40] sm:$0xff]  ;;  %v997_v51 = vld [vmem:[%s3166_s8 + $0x28] sm:$0xff]  ;;  %v550_v52 = vmax.f32 %v422_v40, %v486_v36  ;;  %1123 = vst [vmem:[%s3167_s9 + $0x18] sm:$0xff] %v1059_v43  ;;  %v742_v56 = vld [vmem:[%s3164_s6 + $0x30] sm:$0xff] }
  0x18   :  { %v232_v48 = vld [vmem:[%s3160_s2 + $0x40] sm:$0xff]  ;;  %v932_v49 = vmax.f32 %v804_v38, %v868_v33  ;;  %v168_v54 = vmax.f32 %v40_v46, %v104_v47  ;;  %v805_v55 = vmax.f32 %v677_v44, %v741_v39  ;;  %v423_v57 = vmax.f32 %v295_v45, %v359_v42  ;;  %v615_v58 = vld [vmem:[%s3163_s5 + $0x38] sm:$0xff]  ;;  %v41_v63 = vld [vmem:[%s3158_s0 + $0x48] sm:$0xff] }
  0x19   :  { %v360_v59 = vld [vmem:[%s3161_s3 + $0x40] sm:$0xff]  ;;  %v678_v61 = vmax.f32 %v550_v52, %v614_v41  ;;  %v105_v0 = vld [vmem:[%s3159_s1 + $0x48] sm:$0xff]  ;;  %v870_v3 = vld [vmem:[%s3165_s7 + $0x30] sm:$0xff] }
  0x1a   :  { %v1060_v60 = vmax.f32 %v932_v49, %v996_v34  ;;  %v296_v62 = vmax.f32 %v168_v54, %v232_v48  ;;  %v233_v1 = vld [vmem:[%s3160_s2 + $0x48] sm:$0xff]  ;;  %v933_v2 = vmax.f32 %v805_v55, %v869_v50  ;;  %v998_v4 = vld [vmem:[%s3166_s8 + $0x30] sm:$0xff]  ;;  %v551_v5 = vmax.f32 %v423_v57, %v487_v53  ;;  %v488_v6 = vld [vmem:[%s3162_s4 + $0x40] sm:$0xff] }
  0x1b   :  { %v169_v7 = vmax.f32 %v41_v63, %v105_v0  ;;  %v806_v8 = vmax.f32 %v678_v61, %v742_v56  ;;  %v743_v9 = vld [vmem:[%s3164_s6 + $0x38] sm:$0xff]  ;;  %v616_v11 = vld [vmem:[%s3163_s5 + $0x40] sm:$0xff]  ;;  %v361_v12 = vld [vmem:[%s3161_s3 + $0x48] sm:$0xff] }
  0x1c   :  { %1124 = vst [vmem:[%s3167_s9 + $0x20] sm:$0xff] %v1060_v60  ;;  %v424_v10 = vmax.f32 %v296_v62, %v360_v59  ;;  %v1061_v13 = vmax.f32 %v933_v2, %v997_v51  ;;  %v679_v14 = vmax.f32 %v551_v5, %v615_v58  ;;  %v42_v16 = vld [vmem:[%s3158_s0 + $0x50] sm:$0xff]  ;;  %v871_v20 = vld [vmem:[%s3165_s7 + $0x38] sm:$0xff]  ;;  %v489_v23 = vld [vmem:[%s3162_s4 + $0x48] sm:$0xff] }
  0x1d   :  { %v297_v15 = vmax.f32 %v169_v7, %v233_v1  ;;  %v106_v17 = vld [vmem:[%s3159_s1 + $0x50] sm:$0xff]  ;;  %v934_v19 = vmax.f32 %v806_v8, %v870_v3  ;;  %v999_v21 = vld [vmem:[%s3166_s8 + $0x38] sm:$0xff]  ;;  %v744_v26 = vld [vmem:[%s3164_s6 + $0x40] sm:$0xff] }
  0x1e   :  { %v234_v18 = vld [vmem:[%s3160_s2 + $0x50] sm:$0xff]  ;;  %v552_v22 = vmax.f32 %v424_v10, %v488_v6  ;;  %v170_v24 = vmax.f32 %v42_v16, %v106_v17  ;;  %1125 = vst [vmem:[%s3167_s9 + $0x28] sm:$0xff] %v1061_v13  ;;  %v807_v25 = vmax.f32 %v679_v14, %v743_v9  ;;  %v617_v28 = vld [vmem:[%s3163_s5 + $0x48] sm:$0xff]  ;;  %v43_v33 = vld [vmem:[%s3158_s0 + $0x58] sm:$0xff] }
  0x1f   :  { %v425_v27 = vmax.f32 %v297_v15, %v361_v12  ;;  %v362_v29 = vld [vmem:[%s3161_s3 + $0x50] sm:$0xff]  ;;  %v1062_v30 = vmax.f32 %v934_v19, %v998_v4  ;;  %v107_v34 = vld [vmem:[%s3159_s1 + $0x58] sm:$0xff]  ;;  %v872_v37 = vld [vmem:[%s3165_s7 + $0x40] sm:$0xff] }
  0x20   :  { %v680_v31 = vmax.f32 %v552_v22, %v616_v11  ;;  %v298_v32 = vmax.f32 %v170_v24, %v234_v18  ;;  %v235_v35 = vld [vmem:[%s3160_s2 + $0x58] sm:$0xff]  ;;  %v935_v36 = vmax.f32 %v807_v25, %v871_v20  ;;  %v1000_v38 = vld [vmem:[%s3166_s8 + $0x40] sm:$0xff]  ;;  %v490_v40 = vld [vmem:[%s3162_s4 + $0x50] sm:$0xff]  ;;  %v171_v41 = vmax.f32 %v43_v33, %v107_v34 }
  0x21   :  { %v553_v39 = vmax.f32 %v425_v27, %v489_v23  ;;  %1126 = vst [vmem:[%s3167_s9 + $0x30] sm:$0xff] %v1062_v30  ;;  %v745_v43 = vld [vmem:[%s3164_s6 + $0x48] sm:$0xff]  ;;  %v618_v45 = vld [vmem:[%s3163_s5 + $0x50] sm:$0xff]  ;;  %v363_v46 = vld [vmem:[%s3161_s3 + $0x58] sm:$0xff] }
  0x22   :  { %v808_v42 = vmax.f32 %v680_v31, %v744_v26  ;;  %v426_v44 = vmax.f32 %v298_v32, %v362_v29  ;;  %v1063_v47 = vmax.f32 %v935_v36, %v999_v21  ;;  %v299_v49 = vmax.f32 %v171_v41, %v235_v35  ;;  %v44_v50 = vld [vmem:[%s3158_s0 + $0x60] sm:$0xff]  ;;  %v873_v54 = vld [vmem:[%s3165_s7 + $0x48] sm:$0xff]  ;;  %v491_v57 = vld [vmem:[%s3162_s4 + $0x58] sm:$0xff] }
  0x23   :  { %v681_v48 = vmax.f32 %v553_v39, %v617_v28  ;;  %v108_v51 = vld [vmem:[%s3159_s1 + $0x60] sm:$0xff]  ;;  %v1001_v55 = vld [vmem:[%s3166_s8 + $0x48] sm:$0xff]  ;;  %v746_v60 = vld [vmem:[%s3164_s6 + $0x50] sm:$0xff] }
  0x24   :  { %v236_v52 = vld [vmem:[%s3160_s2 + $0x60] sm:$0xff]  ;;  %v936_v53 = vmax.f32 %v808_v42, %v872_v37  ;;  %v554_v56 = vmax.f32 %v426_v44, %v490_v40  ;;  %v172_v58 = vmax.f32 %v44_v50, %v108_v51  ;;  %1127 = vst [vmem:[%s3167_s9 + $0x38] sm:$0xff] %v1063_v47  ;;  %v427_v61 = vmax.f32 %v299_v49, %v363_v46  ;;  %v619_v62 = vld [vmem:[%s3163_s5 + $0x58] sm:$0xff]  ;;  %v45_v3 = vld [vmem:[%s3158_s0 + $0x68] sm:$0xff] }
  0x25   :  { %v809_v59 = vmax.f32 %v681_v48, %v745_v43  ;;  %v364_v63 = vld [vmem:[%s3161_s3 + $0x60] sm:$0xff]  ;;  %v109_v4 = vld [vmem:[%s3159_s1 + $0x68] sm:$0xff]  ;;  %v874_v7 = vld [vmem:[%s3165_s7 + $0x50] sm:$0xff] }
  0x26   :  { %v1064_v0 = vmax.f32 %v936_v53, %v1000_v38  ;;  %v682_v1 = vmax.f32 %v554_v56, %v618_v45  ;;  %v300_v2 = vmax.f32 %v172_v58, %v236_v52  ;;  %v237_v5 = vld [vmem:[%s3160_s2 + $0x68] sm:$0xff]  ;;  %v1002_v8 = vld [vmem:[%s3166_s8 + $0x50] sm:$0xff]  ;;  %v555_v9 = vmax.f32 %v427_v61, %v491_v57  ;;  %v492_v10 = vld [vmem:[%s3162_s4 + $0x60] sm:$0xff] }
  0x27   :  { %v937_v6 = vmax.f32 %v809_v59, %v873_v54  ;;  %v173_v11 = vmax.f32 %v45_v3, %v109_v4  ;;  %v747_v13 = vld [vmem:[%s3164_s6 + $0x58] sm:$0xff]  ;;  %v620_v15 = vld [vmem:[%s3163_s5 + $0x60] sm:$0xff]  ;;  %v365_v16 = vld [vmem:[%s3161_s3 + $0x68] sm:$0xff] }
  0x28   :  { %1128 = vst [vmem:[%s3167_s9 + $0x40] sm:$0xff] %v1064_v0  ;;  %v810_v12 = vmax.f32 %v682_v1, %v746_v60  ;;  %v428_v14 = vmax.f32 %v300_v2, %v364_v63  ;;  %v683_v18 = vmax.f32 %v555_v9, %v619_v62  ;;  %v46_v20 = vld [vmem:[%s3158_s0 + $0x70] sm:$0xff]  ;;  %v875_v24 = vld [vmem:[%s3165_s7 + $0x58] sm:$0xff]  ;;  %v493_v27 = vld [vmem:[%s3162_s4 + $0x68] sm:$0xff] }
  0x29   :  { %v1065_v17 = vmax.f32 %v937_v6, %v1001_v55  ;;  %v301_v19 = vmax.f32 %v173_v11, %v237_v5  ;;  %v110_v21 = vld [vmem:[%s3159_s1 + $0x70] sm:$0xff]  ;;  %v1003_v25 = vld [vmem:[%s3166_s8 + $0x58] sm:$0xff]  ;;  %v748_v30 = vld [vmem:[%s3164_s6 + $0x60] sm:$0xff] }
  0x2a   :  { %v238_v22 = vld [vmem:[%s3160_s2 + $0x70] sm:$0xff]  ;;  %v938_v23 = vmax.f32 %v810_v12, %v874_v7  ;;  %v556_v26 = vmax.f32 %v428_v14, %v492_v10  ;;  %v174_v28 = vmax.f32 %v46_v20, %v110_v21  ;;  %v811_v29 = vmax.f32 %v683_v18, %v747_v13  ;;  %v621_v32 = vld [vmem:[%s3163_s5 + $0x68] sm:$0xff]  ;;  %v47_v37 = vld [vmem:[%s3158_s0 + $0x78] sm:$0xff] }
  0x2b   :  { %1129 = vst [vmem:[%s3167_s9 + $0x48] sm:$0xff] %v1065_v17  ;;  %v429_v31 = vmax.f32 %v301_v19, %v365_v16  ;;  %v366_v33 = vld [vmem:[%s3161_s3 + $0x70] sm:$0xff]  ;;  %v111_v38 = vld [vmem:[%s3159_s1 + $0x78] sm:$0xff]  ;;  %v876_v41 = vld [vmem:[%s3165_s7 + $0x60] sm:$0xff] }
  0x2c   :  { %v1066_v34 = vmax.f32 %v938_v23, %v1002_v8  ;;  %v684_v35 = vmax.f32 %v556_v26, %v620_v15  ;;  %v302_v36 = vmax.f32 %v174_v28, %v238_v22  ;;  %v239_v39 = vld [vmem:[%s3160_s2 + $0x78] sm:$0xff]  ;;  %v939_v40 = vmax.f32 %v811_v29, %v875_v24  ;;  %v1004_v42 = vld [vmem:[%s3166_s8 + $0x60] sm:$0xff]  ;;  %v494_v44 = vld [vmem:[%s3162_s4 + $0x70] sm:$0xff] }
  0x2d   :  { %v557_v43 = vmax.f32 %v429_v31, %v493_v27  ;;  %v175_v45 = vmax.f32 %v47_v37, %v111_v38  ;;  %v749_v47 = vld [vmem:[%s3164_s6 + $0x68] sm:$0xff]  ;;  %v622_v49 = vld [vmem:[%s3163_s5 + $0x70] sm:$0xff]  ;;  %v367_v50 = vld [vmem:[%s3161_s3 + $0x78] sm:$0xff] }
  0x2e   :  { %1130 = vst [vmem:[%s3167_s9 + $0x50] sm:$0xff] %v1066_v34  ;;  %v812_v46 = vmax.f32 %v684_v35, %v748_v30  ;;  %v430_v48 = vmax.f32 %v302_v36, %v366_v33  ;;  %v1067_v51 = vmax.f32 %v939_v40, %v1003_v25  ;;  %v48_v54 = vld [vmem:[%s3158_s0 + $0x80] sm:$0xff]  ;;  %v877_v58 = vld [vmem:[%s3165_s7 + $0x68] sm:$0xff]  ;;  %v495_v61 = vld [vmem:[%s3162_s4 + $0x78] sm:$0xff] }
  0x2f   :  { %v685_v52 = vmax.f32 %v557_v43, %v621_v32  ;;  %v303_v53 = vmax.f32 %v175_v45, %v239_v39  ;;  %v112_v55 = vld [vmem:[%s3159_s1 + $0x80] sm:$0xff]  ;;  %v1005_v59 = vld [vmem:[%s3166_s8 + $0x68] sm:$0xff]  ;;  %v750_v0 = vld [vmem:[%s3164_s6 + $0x70] sm:$0xff] }
  0x30   :  { %v240_v56 = vld [vmem:[%s3160_s2 + $0x80] sm:$0xff]  ;;  %v940_v57 = vmax.f32 %v812_v46, %v876_v41  ;;  %v558_v60 = vmax.f32 %v430_v48, %v494_v44  ;;  %v176_v62 = vmax.f32 %v48_v54, %v112_v55  ;;  %1131 = vst [vmem:[%s3167_s9 + $0x58] sm:$0xff] %v1067_v51  ;;  %v623_v2 = vld [vmem:[%s3163_s5 + $0x78] sm:$0xff]  ;;  %v49_v7 = vld [vmem:[%s3158_s0 + $0x88] sm:$0xff] }
  0x31   :  { %v813_v63 = vmax.f32 %v685_v52, %v749_v47  ;;  %v431_v1 = vmax.f32 %v303_v53, %v367_v50  ;;  %v368_v3 = vld [vmem:[%s3161_s3 + $0x80] sm:$0xff]  ;;  %v113_v8 = vld [vmem:[%s3159_s1 + $0x88] sm:$0xff]  ;;  %v878_v11 = vld [vmem:[%s3165_s7 + $0x70] sm:$0xff] }
  0x32   :  { %v1068_v4 = vmax.f32 %v940_v57, %v1004_v42  ;;  %v686_v5 = vmax.f32 %v558_v60, %v622_v49  ;;  %v304_v6 = vmax.f32 %v176_v62, %v240_v56  ;;  %v241_v9 = vld [vmem:[%s3160_s2 + $0x88] sm:$0xff]  ;;  %v1006_v12 = vld [vmem:[%s3166_s8 + $0x70] sm:$0xff]  ;;  %v496_v14 = vld [vmem:[%s3162_s4 + $0x80] sm:$0xff]  ;;  %v177_v15 = vmax.f32 %v49_v7, %v113_v8 }
  0x33   :  { %v941_v10 = vmax.f32 %v813_v63, %v877_v58  ;;  %v559_v13 = vmax.f32 %v431_v1, %v495_v61  ;;  %v751_v17 = vld [vmem:[%s3164_s6 + $0x78] sm:$0xff]  ;;  %v624_v19 = vld [vmem:[%s3163_s5 + $0x80] sm:$0xff]  ;;  %v369_v20 = vld [vmem:[%s3161_s3 + $0x88] sm:$0xff] }
  0x34   :  { %1132 = vst [vmem:[%s3167_s9 + $0x60] sm:$0xff] %v1068_v4  ;;  %v814_v16 = vmax.f32 %v686_v5, %v750_v0  ;;  %v432_v18 = vmax.f32 %v304_v6, %v368_v3  ;;  %v305_v23 = vmax.f32 %v177_v15, %v241_v9  ;;  %v50_v24 = vld [vmem:[%s3158_s0 + $0x90] sm:$0xff]  ;;  %v879_v28 = vld [vmem:[%s3165_s7 + $0x78] sm:$0xff]  ;;  %v497_v31 = vld [vmem:[%s3162_s4 + $0x88] sm:$0xff] }
  0x35   :  { %v1069_v21 = vmax.f32 %v941_v10, %v1005_v59  ;;  %v687_v22 = vmax.f32 %v559_v13, %v623_v2  ;;  %v114_v25 = vld [vmem:[%s3159_s1 + $0x90] sm:$0xff]  ;;  %v1007_v29 = vld [vmem:[%s3166_s8 + $0x78] sm:$0xff]  ;;  %v752_v34 = vld [vmem:[%s3164_s6 + $0x80] sm:$0xff] }
  0x36   :  { %v242_v26 = vld [vmem:[%s3160_s2 + $0x90] sm:$0xff]  ;;  %v942_v27 = vmax.f32 %v814_v16, %v878_v11  ;;  %v560_v30 = vmax.f32 %v432_v18, %v496_v14  ;;  %v178_v32 = vmax.f32 %v50_v24, %v114_v25  ;;  %v433_v35 = vmax.f32 %v305_v23, %v369_v20  ;;  %v625_v36 = vld [vmem:[%s3163_s5 + $0x88] sm:$0xff]  ;;  %v51_v41 = vld [vmem:[%s3158_s0 + $0x98] sm:$0xff] }
  0x37   :  { %1133 = vst [vmem:[%s3167_s9 + $0x68] sm:$0xff] %v1069_v21  ;;  %v815_v33 = vmax.f32 %v687_v22, %v751_v17  ;;  %v370_v37 = vld [vmem:[%s3161_s3 + $0x90] sm:$0xff]  ;;  %v115_v42 = vld [vmem:[%s3159_s1 + $0x98] sm:$0xff]  ;;  %v880_v45 = vld [vmem:[%s3165_s7 + $0x80] sm:$0xff] }
  0x38   :  { %v1070_v38 = vmax.f32 %v942_v27, %v1006_v12  ;;  %v688_v39 = vmax.f32 %v560_v30, %v624_v19  ;;  %v306_v40 = vmax.f32 %v178_v32, %v242_v26  ;;  %v243_v43 = vld [vmem:[%s3160_s2 + $0x98] sm:$0xff]  ;;  %v1008_v46 = vld [vmem:[%s3166_s8 + $0x80] sm:$0xff]  ;;  %v561_v47 = vmax.f32 %v433_v35, %v497_v31  ;;  %v498_v48 = vld [vmem:[%s3162_s4 + $0x90] sm:$0xff] }
  0x39   :  { %v943_v44 = vmax.f32 %v815_v33, %v879_v28  ;;  %v179_v49 = vmax.f32 %v51_v41, %v115_v42  ;;  %v753_v51 = vld [vmem:[%s3164_s6 + $0x88] sm:$0xff]  ;;  %v626_v53 = vld [vmem:[%s3163_s5 + $0x90] sm:$0xff]  ;;  %v371_v54 = vld [vmem:[%s3161_s3 + $0x98] sm:$0xff] }
  0x3a   :  { %1134 = vst [vmem:[%s3167_s9 + $0x70] sm:$0xff] %v1070_v38  ;;  %v816_v50 = vmax.f32 %v688_v39, %v752_v34  ;;  %v434_v52 = vmax.f32 %v306_v40, %v370_v37  ;;  %v689_v56 = vmax.f32 %v561_v47, %v625_v36  ;;  %v52_v58 = vld [vmem:[%s3158_s0 + $0xa0] sm:$0xff]  ;;  %v881_v62 = vld [vmem:[%s3165_s7 + $0x88] sm:$0xff]  ;;  %v499_v1 = vld [vmem:[%s3162_s4 + $0x98] sm:$0xff] }
  0x3b   :  { %v1071_v55 = vmax.f32 %v943_v44, %v1007_v29  ;;  %v307_v57 = vmax.f32 %v179_v49, %v243_v43  ;;  %v116_v59 = vld [vmem:[%s3159_s1 + $0xa0] sm:$0xff]  ;;  %v1009_v63 = vld [vmem:[%s3166_s8 + $0x88] sm:$0xff]  ;;  %v754_v4 = vld [vmem:[%s3164_s6 + $0x90] sm:$0xff] }
  0x3c   :  { %v244_v60 = vld [vmem:[%s3160_s2 + $0xa0] sm:$0xff]  ;;  %v944_v61 = vmax.f32 %v816_v50, %v880_v45  ;;  %v562_v0 = vmax.f32 %v434_v52, %v498_v48  ;;  %v180_v2 = vmax.f32 %v52_v58, %v116_v59  ;;  %v817_v3 = vmax.f32 %v689_v56, %v753_v51  ;;  %v627_v6 = vld [vmem:[%s3163_s5 + $0x98] sm:$0xff]  ;;  %v53_v11 = vld [vmem:[%s3158_s0 + $0xa8] sm:$0xff] }
  0x3d   :  { %1135 = vst [vmem:[%s3167_s9 + $0x78] sm:$0xff] %v1071_v55  ;;  %v435_v5 = vmax.f32 %v307_v57, %v371_v54  ;;  %v372_v7 = vld [vmem:[%s3161_s3 + $0xa0] sm:$0xff]  ;;  %v117_v12 = vld [vmem:[%s3159_s1 + $0xa8] sm:$0xff]  ;;  %v882_v15 = vld [vmem:[%s3165_s7 + $0x90] sm:$0xff] }
  0x3e   :  { %v1072_v8 = vmax.f32 %v944_v61, %v1008_v46  ;;  %v690_v9 = vmax.f32 %v562_v0, %v626_v53  ;;  %v308_v10 = vmax.f32 %v180_v2, %v244_v60  ;;  %v245_v13 = vld [vmem:[%s3160_s2 + $0xa8] sm:$0xff]  ;;  %v945_v14 = vmax.f32 %v817_v3, %v881_v62  ;;  %v1010_v16 = vld [vmem:[%s3166_s8 + $0x90] sm:$0xff]  ;;  %v500_v18 = vld [vmem:[%s3162_s4 + $0xa0] sm:$0xff] }
  0x3f   :  { %v563_v17 = vmax.f32 %v435_v5, %v499_v1  ;;  %v181_v19 = vmax.f32 %v53_v11, %v117_v12  ;;  %v755_v21 = vld [vmem:[%s3164_s6 + $0x98] sm:$0xff]  ;;  %v628_v23 = vld [vmem:[%s3163_s5 + $0xa0] sm:$0xff]  ;;  %v373_v24 = vld [vmem:[%s3161_s3 + $0xa8] sm:$0xff] }
  0x40   :  { %1136 = vst [vmem:[%s3167_s9 + $0x80] sm:$0xff] %v1072_v8  ;;  %v818_v20 = vmax.f32 %v690_v9, %v754_v4  ;;  %v436_v22 = vmax.f32 %v308_v10, %v372_v7  ;;  %v1073_v25 = vmax.f32 %v945_v14, %v1009_v63  ;;  %v54_v28 = vld [vmem:[%s3158_s0 + $0xb0] sm:$0xff]  ;;  %v883_v32 = vld [vmem:[%s3165_s7 + $0x98] sm:$0xff]  ;;  %v501_v35 = vld [vmem:[%s3162_s4 + $0xa8] sm:$0xff] }
  0x41   :  { %v691_v26 = vmax.f32 %v563_v17, %v627_v6  ;;  %v309_v27 = vmax.f32 %v181_v19, %v245_v13  ;;  %v118_v29 = vld [vmem:[%s3159_s1 + $0xb0] sm:$0xff]  ;;  %v1011_v33 = vld [vmem:[%s3166_s8 + $0x98] sm:$0xff]  ;;  %v756_v38 = vld [vmem:[%s3164_s6 + $0xa0] sm:$0xff] }
  0x42   :  { %v246_v30 = vld [vmem:[%s3160_s2 + $0xb0] sm:$0xff]  ;;  %v946_v31 = vmax.f32 %v818_v20, %v882_v15  ;;  %v564_v34 = vmax.f32 %v436_v22, %v500_v18  ;;  %v182_v36 = vmax.f32 %v54_v28, %v118_v29  ;;  %1137 = vst [vmem:[%s3167_s9 + $0x88] sm:$0xff] %v1073_v25  ;;  %v629_v40 = vld [vmem:[%s3163_s5 + $0xa8] sm:$0xff]  ;;  %v55_v45 = vld [vmem:[%s3158_s0 + $0xb8] sm:$0xff] }
  0x43   :  { %v819_v37 = vmax.f32 %v691_v26, %v755_v21  ;;  %v437_v39 = vmax.f32 %v309_v27, %v373_v24  ;;  %v374_v41 = vld [vmem:[%s3161_s3 + $0xb0] sm:$0xff]  ;;  %v119_v46 = vld [vmem:[%s3159_s1 + $0xb8] sm:$0xff]  ;;  %v884_v49 = vld [vmem:[%s3165_s7 + $0xa0] sm:$0xff] }
  0x44   :  { %v1074_v42 = vmax.f32 %v946_v31, %v1010_v16  ;;  %v692_v43 = vmax.f32 %v564_v34, %v628_v23  ;;  %v310_v44 = vmax.f32 %v182_v36, %v246_v30  ;;  %v247_v47 = vld [vmem:[%s3160_s2 + $0xb8] sm:$0xff]  ;;  %v1012_v50 = vld [vmem:[%s3166_s8 + $0xa0] sm:$0xff]  ;;  %v502_v52 = vld [vmem:[%s3162_s4 + $0xb0] sm:$0xff]  ;;  %v183_v53 = vmax.f32 %v55_v45, %v119_v46 }
  0x45   :  { %v947_v48 = vmax.f32 %v819_v37, %v883_v32  ;;  %v565_v51 = vmax.f32 %v437_v39, %v501_v35  ;;  %v757_v55 = vld [vmem:[%s3164_s6 + $0xa8] sm:$0xff]  ;;  %v630_v57 = vld [vmem:[%s3163_s5 + $0xb0] sm:$0xff]  ;;  %v375_v58 = vld [vmem:[%s3161_s3 + $0xb8] sm:$0xff] }
  0x46   :  { %1138 = vst [vmem:[%s3167_s9 + $0x90] sm:$0xff] %v1074_v42  ;;  %v820_v54 = vmax.f32 %v692_v43, %v756_v38  ;;  %v438_v56 = vmax.f32 %v310_v44, %v374_v41  ;;  %v311_v61 = vmax.f32 %v183_v53, %v247_v47  ;;  %v56_v62 = vld [vmem:[%s3158_s0 + $0xc0] sm:$0xff]  ;;  %v885_v2 = vld [vmem:[%s3165_s7 + $0xa8] sm:$0xff]  ;;  %v503_v5 = vld [vmem:[%s3162_s4 + $0xb8] sm:$0xff] }
  0x47   :  { %v1075_v59 = vmax.f32 %v947_v48, %v1011_v33  ;;  %v693_v60 = vmax.f32 %v565_v51, %v629_v40  ;;  %v120_v63 = vld [vmem:[%s3159_s1 + $0xc0] sm:$0xff]  ;;  %v1013_v3 = vld [vmem:[%s3166_s8 + $0xa8] sm:$0xff]  ;;  %v758_v8 = vld [vmem:[%s3164_s6 + $0xb0] sm:$0xff] }
  0x48   :  { %v248_v0 = vld [vmem:[%s3160_s2 + $0xc0] sm:$0xff]  ;;  %v948_v1 = vmax.f32 %v820_v54, %v884_v49  ;;  %v566_v4 = vmax.f32 %v438_v56, %v502_v52  ;;  %v184_v6 = vmax.f32 %v56_v62, %v120_v63  ;;  %v439_v9 = vmax.f32 %v311_v61, %v375_v58  ;;  %v631_v10 = vld [vmem:[%s3163_s5 + $0xb8] sm:$0xff]  ;;  %v57_v15 = vld [vmem:[%s3158_s0 + $0xc8] sm:$0xff] }
  0x49   :  { %1139 = vst [vmem:[%s3167_s9 + $0x98] sm:$0xff] %v1075_v59  ;;  %v821_v7 = vmax.f32 %v693_v60, %v757_v55  ;;  %v376_v11 = vld [vmem:[%s3161_s3 + $0xc0] sm:$0xff]  ;;  %v121_v16 = vld [vmem:[%s3159_s1 + $0xc8] sm:$0xff]  ;;  %v886_v19 = vld [vmem:[%s3165_s7 + $0xb0] sm:$0xff] }
  0x4a   :  { %v1076_v12 = vmax.f32 %v948_v1, %v1012_v50  ;;  %v694_v13 = vmax.f32 %v566_v4, %v630_v57  ;;  %v312_v14 = vmax.f32 %v184_v6, %v248_v0  ;;  %v249_v17 = vld [vmem:[%s3160_s2 + $0xc8] sm:$0xff]  ;;  %v1014_v20 = vld [vmem:[%s3166_s8 + $0xb0] sm:$0xff]  ;;  %v567_v21 = vmax.f32 %v439_v9, %v503_v5  ;;  %v504_v22 = vld [vmem:[%s3162_s4 + $0xc0] sm:$0xff] }
  0x4b   :  { %v949_v18 = vmax.f32 %v821_v7, %v885_v2  ;;  %v185_v23 = vmax.f32 %v57_v15, %v121_v16  ;;  %v759_v25 = vld [vmem:[%s3164_s6 + $0xb8] sm:$0xff]  ;;  %v632_v27 = vld [vmem:[%s3163_s5 + $0xc0] sm:$0xff]  ;;  %v377_v28 = vld [vmem:[%s3161_s3 + $0xc8] sm:$0xff] }
  0x4c   :  { %1140 = vst [vmem:[%s3167_s9 + $0xa0] sm:$0xff] %v1076_v12  ;;  %v822_v24 = vmax.f32 %v694_v13, %v758_v8  ;;  %v440_v26 = vmax.f32 %v312_v14, %v376_v11  ;;  %v695_v30 = vmax.f32 %v567_v21, %v631_v10  ;;  %v58_v32 = vld [vmem:[%s3158_s0 + $0xd0] sm:$0xff]  ;;  %v887_v36 = vld [vmem:[%s3165_s7 + $0xb8] sm:$0xff]  ;;  %v505_v39 = vld [vmem:[%s3162_s4 + $0xc8] sm:$0xff] }
  0x4d   :  { %v1077_v29 = vmax.f32 %v949_v18, %v1013_v3  ;;  %v313_v31 = vmax.f32 %v185_v23, %v249_v17  ;;  %v122_v33 = vld [vmem:[%s3159_s1 + $0xd0] sm:$0xff]  ;;  %v1015_v37 = vld [vmem:[%s3166_s8 + $0xb8] sm:$0xff]  ;;  %v760_v42 = vld [vmem:[%s3164_s6 + $0xc0] sm:$0xff] }
  0x4e   :  { %v250_v34 = vld [vmem:[%s3160_s2 + $0xd0] sm:$0xff]  ;;  %v950_v35 = vmax.f32 %v822_v24, %v886_v19  ;;  %v568_v38 = vmax.f32 %v440_v26, %v504_v22  ;;  %v186_v40 = vmax.f32 %v58_v32, %v122_v33  ;;  %v823_v41 = vmax.f32 %v695_v30, %v759_v25  ;;  %v633_v44 = vld [vmem:[%s3163_s5 + $0xc8] sm:$0xff]  ;;  %v59_v49 = vld [vmem:[%s3158_s0 + $0xd8] sm:$0xff] }
  0x4f   :  { %1141 = vst [vmem:[%s3167_s9 + $0xa8] sm:$0xff] %v1077_v29  ;;  %v441_v43 = vmax.f32 %v313_v31, %v377_v28  ;;  %v378_v45 = vld [vmem:[%s3161_s3 + $0xd0] sm:$0xff]  ;;  %v123_v50 = vld [vmem:[%s3159_s1 + $0xd8] sm:$0xff]  ;;  %v888_v53 = vld [vmem:[%s3165_s7 + $0xc0] sm:$0xff] }
  0x50   :  { %v1078_v46 = vmax.f32 %v950_v35, %v1014_v20  ;;  %v696_v47 = vmax.f32 %v568_v38, %v632_v27  ;;  %v314_v48 = vmax.f32 %v186_v40, %v250_v34  ;;  %v251_v51 = vld [vmem:[%s3160_s2 + $0xd8] sm:$0xff]  ;;  %v951_v52 = vmax.f32 %v823_v41, %v887_v36  ;;  %v1016_v54 = vld [vmem:[%s3166_s8 + $0xc0] sm:$0xff]  ;;  %v506_v56 = vld [vmem:[%s3162_s4 + $0xd0] sm:$0xff] }
  0x51   :  { %v569_v55 = vmax.f32 %v441_v43, %v505_v39  ;;  %v187_v57 = vmax.f32 %v59_v49, %v123_v50  ;;  %v761_v59 = vld [vmem:[%s3164_s6 + $0xc8] sm:$0xff]  ;;  %v634_v61 = vld [vmem:[%s3163_s5 + $0xd0] sm:$0xff]  ;;  %v379_v62 = vld [vmem:[%s3161_s3 + $0xd8] sm:$0xff] }
  0x52   :  { %1142 = vst [vmem:[%s3167_s9 + $0xb0] sm:$0xff] %v1078_v46  ;;  %v824_v58 = vmax.f32 %v696_v47, %v760_v42  ;;  %v442_v60 = vmax.f32 %v314_v48, %v378_v45  ;;  %v1079_v63 = vmax.f32 %v951_v52, %v1015_v37  ;;  %v60_v2 = vld [vmem:[%s3158_s0 + $0xe0] sm:$0xff]  ;;  %v889_v6 = vld [vmem:[%s3165_s7 + $0xc8] sm:$0xff]  ;;  %v507_v9 = vld [vmem:[%s3162_s4 + $0xd8] sm:$0xff] }
  0x53   :  { %v697_v0 = vmax.f32 %v569_v55, %v633_v44  ;;  %v315_v1 = vmax.f32 %v187_v57, %v251_v51  ;;  %v124_v3 = vld [vmem:[%s3159_s1 + $0xe0] sm:$0xff]  ;;  %v1017_v7 = vld [vmem:[%s3166_s8 + $0xc8] sm:$0xff]  ;;  %v762_v12 = vld [vmem:[%s3164_s6 + $0xd0] sm:$0xff] }
  0x54   :  { %v252_v4 = vld [vmem:[%s3160_s2 + $0xe0] sm:$0xff]  ;;  %v952_v5 = vmax.f32 %v824_v58, %v888_v53  ;;  %v570_v8 = vmax.f32 %v442_v60, %v506_v56  ;;  %v188_v10 = vmax.f32 %v60_v2, %v124_v3  ;;  %1143 = vst [vmem:[%s3167_s9 + $0xb8] sm:$0xff] %v1079_v63  ;;  %v635_v14 = vld [vmem:[%s3163_s5 + $0xd8] sm:$0xff]  ;;  %v61_v19 = vld [vmem:[%s3158_s0 + $0xe8] sm:$0xff] }
  0x55   :  { %v825_v11 = vmax.f32 %v697_v0, %v761_v59  ;;  %v443_v13 = vmax.f32 %v315_v1, %v379_v62  ;;  %v380_v15 = vld [vmem:[%s3161_s3 + $0xe0] sm:$0xff]  ;;  %v125_v20 = vld [vmem:[%s3159_s1 + $0xe8] sm:$0xff]  ;;  %v890_v23 = vld [vmem:[%s3165_s7 + $0xd0] sm:$0xff] }
  0x56   :  { %v1080_v16 = vmax.f32 %v952_v5, %v1016_v54  ;;  %v698_v17 = vmax.f32 %v570_v8, %v634_v61  ;;  %v316_v18 = vmax.f32 %v188_v10, %v252_v4  ;;  %v253_v21 = vld [vmem:[%s3160_s2 + $0xe8] sm:$0xff]  ;;  %v1018_v24 = vld [vmem:[%s3166_s8 + $0xd0] sm:$0xff]  ;;  %v508_v26 = vld [vmem:[%s3162_s4 + $0xe0] sm:$0xff]  ;;  %v189_v27 = vmax.f32 %v61_v19, %v125_v20 }
  0x57   :  { %v953_v22 = vmax.f32 %v825_v11, %v889_v6  ;;  %v571_v25 = vmax.f32 %v443_v13, %v507_v9  ;;  %v763_v29 = vld [vmem:[%s3164_s6 + $0xd8] sm:$0xff]  ;;  %v636_v31 = vld [vmem:[%s3163_s5 + $0xe0] sm:$0xff]  ;;  %v381_v32 = vld [vmem:[%s3161_s3 + $0xe8] sm:$0xff] }
  0x58   :  { %1144 = vst [vmem:[%s3167_s9 + $0xc0] sm:$0xff] %v1080_v16  ;;  %v826_v28 = vmax.f32 %v698_v17, %v762_v12  ;;  %v444_v30 = vmax.f32 %v316_v18, %v380_v15  ;;  %v317_v35 = vmax.f32 %v189_v27, %v253_v21  ;;  %v62_v36 = vld [vmem:[%s3158_s0 + $0xf0] sm:$0xff]  ;;  %v891_v40 = vld [vmem:[%s3165_s7 + $0xd8] sm:$0xff]  ;;  %v509_v43 = vld [vmem:[%s3162_s4 + $0xe8] sm:$0xff] }
  0x59   :  { %v1081_v33 = vmax.f32 %v953_v22, %v1017_v7  ;;  %v699_v34 = vmax.f32 %v571_v25, %v635_v14  ;;  %v126_v37 = vld [vmem:[%s3159_s1 + $0xf0] sm:$0xff]  ;;  %v1019_v41 = vld [vmem:[%s3166_s8 + $0xd8] sm:$0xff]  ;;  %v764_v46 = vld [vmem:[%s3164_s6 + $0xe0] sm:$0xff] }
  0x5a   :  { %v254_v38 = vld [vmem:[%s3160_s2 + $0xf0] sm:$0xff]  ;;  %v954_v39 = vmax.f32 %v826_v28, %v890_v23  ;;  %v572_v42 = vmax.f32 %v444_v30, %v508_v26  ;;  %v190_v44 = vmax.f32 %v62_v36, %v126_v37  ;;  %v445_v47 = vmax.f32 %v317_v35, %v381_v32  ;;  %v637_v48 = vld [vmem:[%s3163_s5 + $0xe8] sm:$0xff]  ;;  %v63_v53 = vld [vmem:[%s3158_s0 + $0xf8] sm:$0xff] }
  0x5b   :  { %1145 = vst [vmem:[%s3167_s9 + $0xc8] sm:$0xff] %v1081_v33  ;;  %v827_v45 = vmax.f32 %v699_v34, %v763_v29  ;;  %v382_v49 = vld [vmem:[%s3161_s3 + $0xf0] sm:$0xff]  ;;  %v127_v54 = vld [vmem:[%s3159_s1 + $0xf8] sm:$0xff]  ;;  %v892_v57 = vld [vmem:[%s3165_s7 + $0xe0] sm:$0xff] }
  0x5c   :  { %v1082_v50 = vmax.f32 %v954_v39, %v1018_v24  ;;  %v700_v51 = vmax.f32 %v572_v42, %v636_v31  ;;  %v318_v52 = vmax.f32 %v190_v44, %v254_v38  ;;  %v255_v55 = vld [vmem:[%s3160_s2 + $0xf8] sm:$0xff]  ;;  %v1020_v58 = vld [vmem:[%s3166_s8 + $0xe0] sm:$0xff]  ;;  %v573_v59 = vmax.f32 %v445_v47, %v509_v43  ;;  %v510_v60 = vld [vmem:[%s3162_s4 + $0xf0] sm:$0xff] }
  0x5d   :  { %v955_v56 = vmax.f32 %v827_v45, %v891_v40  ;;  %v191_v61 = vmax.f32 %v63_v53, %v127_v54  ;;  %v765_v63 = vld [vmem:[%s3164_s6 + $0xe8] sm:$0xff]  ;;  %v638_v1 = vld [vmem:[%s3163_s5 + $0xf0] sm:$0xff]  ;;  %v383_v2 = vld [vmem:[%s3161_s3 + $0xf8] sm:$0xff] }
  0x5e   :  { %1146 = vst [vmem:[%s3167_s9 + $0xd0] sm:$0xff] %v1082_v50  ;;  %v828_v62 = vmax.f32 %v700_v51, %v764_v46  ;;  %v446_v0 = vmax.f32 %v318_v52, %v382_v49  ;;  %v701_v4 = vmax.f32 %v573_v59, %v637_v48  ;;  %v64_v6 = vld [vmem:[%s3158_s0 + $0x100] sm:$0xff]  ;;  %v893_v10 = vld [vmem:[%s3165_s7 + $0xe8] sm:$0xff]  ;;  %v511_v13 = vld [vmem:[%s3162_s4 + $0xf8] sm:$0xff] }
  0x5f   :  { %v1083_v3 = vmax.f32 %v955_v56, %v1019_v41  ;;  %v319_v5 = vmax.f32 %v191_v61, %v255_v55  ;;  %v128_v7 = vld [vmem:[%s3159_s1 + $0x100] sm:$0xff]  ;;  %v1021_v11 = vld [vmem:[%s3166_s8 + $0xe8] sm:$0xff]  ;;  %v766_v16 = vld [vmem:[%s3164_s6 + $0xf0] sm:$0xff] }
  0x60   :  { %v256_v8 = vld [vmem:[%s3160_s2 + $0x100] sm:$0xff]  ;;  %v956_v9 = vmax.f32 %v828_v62, %v892_v57  ;;  %v574_v12 = vmax.f32 %v446_v0, %v510_v60  ;;  %v192_v14 = vmax.f32 %v64_v6, %v128_v7  ;;  %v829_v15 = vmax.f32 %v701_v4, %v765_v63  ;;  %v639_v18 = vld [vmem:[%s3163_s5 + $0xf8] sm:$0xff]  ;;  %v65_v23 = vld [vmem:[%s3158_s0 + $0x108] sm:$0xff] }
  0x61   :  { %1147 = vst [vmem:[%s3167_s9 + $0xd8] sm:$0xff] %v1083_v3  ;;  %v447_v17 = vmax.f32 %v319_v5, %v383_v2  ;;  %v384_v19 = vld [vmem:[%s3161_s3 + $0x100] sm:$0xff]  ;;  %v129_v24 = vld [vmem:[%s3159_s1 + $0x108] sm:$0xff]  ;;  %v894_v27 = vld [vmem:[%s3165_s7 + $0xf0] sm:$0xff] }
  0x62   :  { %v1084_v20 = vmax.f32 %v956_v9, %v1020_v58  ;;  %v702_v21 = vmax.f32 %v574_v12, %v638_v1  ;;  %v320_v22 = vmax.f32 %v192_v14, %v256_v8  ;;  %v257_v25 = vld [vmem:[%s3160_s2 + $0x108] sm:$0xff]  ;;  %v957_v26 = vmax.f32 %v829_v15, %v893_v10  ;;  %v1022_v28 = vld [vmem:[%s3166_s8 + $0xf0] sm:$0xff]  ;;  %v512_v30 = vld [vmem:[%s3162_s4 + $0x100] sm:$0xff] }
  0x63   :  { %v575_v29 = vmax.f32 %v447_v17, %v511_v13  ;;  %v193_v31 = vmax.f32 %v65_v23, %v129_v24  ;;  %v767_v33 = vld [vmem:[%s3164_s6 + $0xf8] sm:$0xff]  ;;  %v640_v35 = vld [vmem:[%s3163_s5 + $0x100] sm:$0xff]  ;;  %v385_v36 = vld [vmem:[%s3161_s3 + $0x108] sm:$0xff] }
  0x64   :  { %1148 = vst [vmem:[%s3167_s9 + $0xe0] sm:$0xff] %v1084_v20  ;;  %v830_v32 = vmax.f32 %v702_v21, %v766_v16  ;;  %v448_v34 = vmax.f32 %v320_v22, %v384_v19  ;;  %v1085_v37 = vmax.f32 %v957_v26, %v1021_v11  ;;  %v66_v40 = vld [vmem:[%s3158_s0 + $0x110] sm:$0xff]  ;;  %v895_v44 = vld [vmem:[%s3165_s7 + $0xf8] sm:$0xff]  ;;  %v513_v47 = vld [vmem:[%s3162_s4 + $0x108] sm:$0xff] }
  0x65   :  { %v703_v38 = vmax.f32 %v575_v29, %v639_v18  ;;  %v321_v39 = vmax.f32 %v193_v31, %v257_v25  ;;  %v130_v41 = vld [vmem:[%s3159_s1 + $0x110] sm:$0xff]  ;;  %v1023_v45 = vld [vmem:[%s3166_s8 + $0xf8] sm:$0xff]  ;;  %v768_v50 = vld [vmem:[%s3164_s6 + $0x100] sm:$0xff] }
  0x66   :  { %v258_v42 = vld [vmem:[%s3160_s2 + $0x110] sm:$0xff]  ;;  %v958_v43 = vmax.f32 %v830_v32, %v894_v27  ;;  %v576_v46 = vmax.f32 %v448_v34, %v512_v30  ;;  %v194_v48 = vmax.f32 %v66_v40, %v130_v41  ;;  %1149 = vst [vmem:[%s3167_s9 + $0xe8] sm:$0xff] %v1085_v37  ;;  %v641_v52 = vld [vmem:[%s3163_s5 + $0x108] sm:$0xff]  ;;  %v67_v57 = vld [vmem:[%s3158_s0 + $0x118] sm:$0xff] }
  0x67   :  { %v831_v49 = vmax.f32 %v703_v38, %v767_v33  ;;  %v449_v51 = vmax.f32 %v321_v39, %v385_v36  ;;  %v386_v53 = vld [vmem:[%s3161_s3 + $0x110] sm:$0xff]  ;;  %v131_v58 = vld [vmem:[%s3159_s1 + $0x118] sm:$0xff]  ;;  %v896_v61 = vld [vmem:[%s3165_s7 + $0x100] sm:$0xff] }
  0x68   :  { %v1086_v54 = vmax.f32 %v958_v43, %v1022_v28  ;;  %v704_v55 = vmax.f32 %v576_v46, %v640_v35  ;;  %v322_v56 = vmax.f32 %v194_v48, %v258_v42  ;;  %v259_v59 = vld [vmem:[%s3160_s2 + $0x118] sm:$0xff]  ;;  %v1024_v62 = vld [vmem:[%s3166_s8 + $0x100] sm:$0xff]  ;;  %v514_v0 = vld [vmem:[%s3162_s4 + $0x110] sm:$0xff]  ;;  %v195_v1 = vmax.f32 %v67_v57, %v131_v58 }
  0x69   :  { %v959_v60 = vmax.f32 %v831_v49, %v895_v44  ;;  %v577_v63 = vmax.f32 %v449_v51, %v513_v47  ;;  %v769_v3 = vld [vmem:[%s3164_s6 + $0x108] sm:$0xff]  ;;  %v642_v5 = vld [vmem:[%s3163_s5 + $0x110] sm:$0xff]  ;;  %v387_v6 = vld [vmem:[%s3161_s3 + $0x118] sm:$0xff] }
  0x6a   :  { %1150 = vst [vmem:[%s3167_s9 + $0xf0] sm:$0xff] %v1086_v54  ;;  %v832_v2 = vmax.f32 %v704_v55, %v768_v50  ;;  %v450_v4 = vmax.f32 %v322_v56, %v386_v53  ;;  %v323_v9 = vmax.f32 %v195_v1, %v259_v59  ;;  %v68_v10 = vld [vmem:[%s3158_s0 + $0x120] sm:$0xff]  ;;  %v897_v14 = vld [vmem:[%s3165_s7 + $0x108] sm:$0xff]  ;;  %v515_v17 = vld [vmem:[%s3162_s4 + $0x118] sm:$0xff] }
  0x6b   :  { %v1087_v7 = vmax.f32 %v959_v60, %v1023_v45  ;;  %v705_v8 = vmax.f32 %v577_v63, %v641_v52  ;;  %v132_v11 = vld [vmem:[%s3159_s1 + $0x120] sm:$0xff]  ;;  %v1025_v15 = vld [vmem:[%s3166_s8 + $0x108] sm:$0xff]  ;;  %v770_v20 = vld [vmem:[%s3164_s6 + $0x110] sm:$0xff] }
  0x6c   :  { %v260_v12 = vld [vmem:[%s3160_s2 + $0x120] sm:$0xff]  ;;  %v960_v13 = vmax.f32 %v832_v2, %v896_v61  ;;  %v578_v16 = vmax.f32 %v450_v4, %v514_v0  ;;  %v196_v18 = vmax.f32 %v68_v10, %v132_v11  ;;  %v451_v21 = vmax.f32 %v323_v9, %v387_v6  ;;  %v643_v22 = vld [vmem:[%s3163_s5 + $0x118] sm:$0xff]  ;;  %v69_v27 = vld [vmem:[%s3158_s0 + $0x128] sm:$0xff] }
  0x6d   :  { %1151 = vst [vmem:[%s3167_s9 + $0xf8] sm:$0xff] %v1087_v7  ;;  %v833_v19 = vmax.f32 %v705_v8, %v769_v3  ;;  %v388_v23 = vld [vmem:[%s3161_s3 + $0x120] sm:$0xff]  ;;  %v133_v28 = vld [vmem:[%s3159_s1 + $0x128] sm:$0xff]  ;;  %v898_v31 = vld [vmem:[%s3165_s7 + $0x110] sm:$0xff] }
  0x6e   :  { %v1088_v24 = vmax.f32 %v960_v13, %v1024_v62  ;;  %v706_v25 = vmax.f32 %v578_v16, %v642_v5  ;;  %v324_v26 = vmax.f32 %v196_v18, %v260_v12  ;;  %v261_v29 = vld [vmem:[%s3160_s2 + $0x128] sm:$0xff]  ;;  %v1026_v32 = vld [vmem:[%s3166_s8 + $0x110] sm:$0xff]  ;;  %v579_v33 = vmax.f32 %v451_v21, %v515_v17  ;;  %v516_v34 = vld [vmem:[%s3162_s4 + $0x120] sm:$0xff] }
  0x6f   :  { %v961_v30 = vmax.f32 %v833_v19, %v897_v14  ;;  %v197_v35 = vmax.f32 %v69_v27, %v133_v28  ;;  %v771_v37 = vld [vmem:[%s3164_s6 + $0x118] sm:$0xff]  ;;  %v644_v39 = vld [vmem:[%s3163_s5 + $0x120] sm:$0xff]  ;;  %v389_v40 = vld [vmem:[%s3161_s3 + $0x128] sm:$0xff] }
  0x70   :  { %1152 = vst [vmem:[%s3167_s9 + $0x100] sm:$0xff] %v1088_v24  ;;  %v834_v36 = vmax.f32 %v706_v25, %v770_v20  ;;  %v452_v38 = vmax.f32 %v324_v26, %v388_v23  ;;  %v707_v42 = vmax.f32 %v579_v33, %v643_v22  ;;  %v70_v44 = vld [vmem:[%s3158_s0 + $0x130] sm:$0xff]  ;;  %v899_v48 = vld [vmem:[%s3165_s7 + $0x118] sm:$0xff]  ;;  %v517_v51 = vld [vmem:[%s3162_s4 + $0x128] sm:$0xff] }
  0x71   :  { %v1089_v41 = vmax.f32 %v961_v30, %v1025_v15  ;;  %v325_v43 = vmax.f32 %v197_v35, %v261_v29  ;;  %v134_v45 = vld [vmem:[%s3159_s1 + $0x130] sm:$0xff]  ;;  %v1027_v49 = vld [vmem:[%s3166_s8 + $0x118] sm:$0xff]  ;;  %v772_v54 = vld [vmem:[%s3164_s6 + $0x120] sm:$0xff] }
  0x72   :  { %v262_v46 = vld [vmem:[%s3160_s2 + $0x130] sm:$0xff]  ;;  %v962_v47 = vmax.f32 %v834_v36, %v898_v31  ;;  %v580_v50 = vmax.f32 %v452_v38, %v516_v34  ;;  %v198_v52 = vmax.f32 %v70_v44, %v134_v45  ;;  %v835_v53 = vmax.f32 %v707_v42, %v771_v37  ;;  %v645_v56 = vld [vmem:[%s3163_s5 + $0x128] sm:$0xff]  ;;  %v71_v61 = vld [vmem:[%s3158_s0 + $0x138] sm:$0xff] }
  0x73   :  { %1153 = vst [vmem:[%s3167_s9 + $0x108] sm:$0xff] %v1089_v41  ;;  %v453_v55 = vmax.f32 %v325_v43, %v389_v40  ;;  %v390_v57 = vld [vmem:[%s3161_s3 + $0x130] sm:$0xff]  ;;  %v135_v62 = vld [vmem:[%s3159_s1 + $0x138] sm:$0xff]  ;;  %v900_v1 = vld [vmem:[%s3165_s7 + $0x120] sm:$0xff] }
  0x74   :  { %v1090_v58 = vmax.f32 %v962_v47, %v1026_v32  ;;  %v708_v59 = vmax.f32 %v580_v50, %v644_v39  ;;  %v326_v60 = vmax.f32 %v198_v52, %v262_v46  ;;  %v263_v63 = vld [vmem:[%s3160_s2 + $0x138] sm:$0xff]  ;;  %v963_v0 = vmax.f32 %v835_v53, %v899_v48  ;;  %v1028_v2 = vld [vmem:[%s3166_s8 + $0x120] sm:$0xff]  ;;  %v518_v4 = vld [vmem:[%s3162_s4 + $0x130] sm:$0xff] }
  0x75   :  { %v581_v3 = vmax.f32 %v453_v55, %v517_v51  ;;  %v199_v5 = vmax.f32 %v71_v61, %v135_v62  ;;  %v773_v7 = vld [vmem:[%s3164_s6 + $0x128] sm:$0xff]  ;;  %v646_v9 = vld [vmem:[%s3163_s5 + $0x130] sm:$0xff]  ;;  %v391_v10 = vld [vmem:[%s3161_s3 + $0x138] sm:$0xff] }
  0x76   :  { %1154 = vst [vmem:[%s3167_s9 + $0x110] sm:$0xff] %v1090_v58  ;;  %v836_v6 = vmax.f32 %v708_v59, %v772_v54  ;;  %v454_v8 = vmax.f32 %v326_v60, %v390_v57  ;;  %v1091_v11 = vmax.f32 %v963_v0, %v1027_v49  ;;  %v72_v14 = vld [vmem:[%s3158_s0 + $0x140] sm:$0xff]  ;;  %v901_v18 = vld [vmem:[%s3165_s7 + $0x128] sm:$0xff]  ;;  %v519_v21 = vld [vmem:[%s3162_s4 + $0x138] sm:$0xff] }
  0x77   :  { %v709_v12 = vmax.f32 %v581_v3, %v645_v56  ;;  %v327_v13 = vmax.f32 %v199_v5, %v263_v63  ;;  %v136_v15 = vld [vmem:[%s3159_s1 + $0x140] sm:$0xff]  ;;  %v1029_v19 = vld [vmem:[%s3166_s8 + $0x128] sm:$0xff]  ;;  %v774_v24 = vld [vmem:[%s3164_s6 + $0x130] sm:$0xff] }
  0x78   :  { %v264_v16 = vld [vmem:[%s3160_s2 + $0x140] sm:$0xff]  ;;  %v964_v17 = vmax.f32 %v836_v6, %v900_v1  ;;  %v582_v20 = vmax.f32 %v454_v8, %v518_v4  ;;  %v200_v22 = vmax.f32 %v72_v14, %v136_v15  ;;  %1155 = vst [vmem:[%s3167_s9 + $0x118] sm:$0xff] %v1091_v11  ;;  %v647_v26 = vld [vmem:[%s3163_s5 + $0x138] sm:$0xff]  ;;  %v73_v31 = vld [vmem:[%s3158_s0 + $0x148] sm:$0xff] }
  0x79   :  { %v837_v23 = vmax.f32 %v709_v12, %v773_v7  ;;  %v455_v25 = vmax.f32 %v327_v13, %v391_v10  ;;  %v392_v27 = vld [vmem:[%s3161_s3 + $0x140] sm:$0xff]  ;;  %v137_v32 = vld [vmem:[%s3159_s1 + $0x148] sm:$0xff]  ;;  %v902_v35 = vld [vmem:[%s3165_s7 + $0x130] sm:$0xff] }
  0x7a   :  { %v1092_v28 = vmax.f32 %v964_v17, %v1028_v2  ;;  %v710_v29 = vmax.f32 %v582_v20, %v646_v9  ;;  %v328_v30 = vmax.f32 %v200_v22, %v264_v16  ;;  %v265_v33 = vld [vmem:[%s3160_s2 + $0x148] sm:$0xff]  ;;  %v1030_v36 = vld [vmem:[%s3166_s8 + $0x130] sm:$0xff]  ;;  %v520_v38 = vld [vmem:[%s3162_s4 + $0x140] sm:$0xff]  ;;  %v201_v39 = vmax.f32 %v73_v31, %v137_v32 }
  0x7b   :  { %v965_v34 = vmax.f32 %v837_v23, %v901_v18  ;;  %v583_v37 = vmax.f32 %v455_v25, %v519_v21  ;;  %v775_v41 = vld [vmem:[%s3164_s6 + $0x138] sm:$0xff]  ;;  %v648_v43 = vld [vmem:[%s3163_s5 + $0x140] sm:$0xff]  ;;  %v393_v44 = vld [vmem:[%s3161_s3 + $0x148] sm:$0xff] }
  0x7c   :  { %1156 = vst [vmem:[%s3167_s9 + $0x120] sm:$0xff] %v1092_v28  ;;  %v838_v40 = vmax.f32 %v710_v29, %v774_v24  ;;  %v456_v42 = vmax.f32 %v328_v30, %v392_v27  ;;  %v329_v47 = vmax.f32 %v201_v39, %v265_v33  ;;  %v74_v48 = vld [vmem:[%s3158_s0 + $0x150] sm:$0xff]  ;;  %v903_v52 = vld [vmem:[%s3165_s7 + $0x138] sm:$0xff]  ;;  %v521_v55 = vld [vmem:[%s3162_s4 + $0x148] sm:$0xff] }
  0x7d   :  { %v1093_v45 = vmax.f32 %v965_v34, %v1029_v19  ;;  %v711_v46 = vmax.f32 %v583_v37, %v647_v26  ;;  %v138_v49 = vld [vmem:[%s3159_s1 + $0x150] sm:$0xff]  ;;  %v1031_v53 = vld [vmem:[%s3166_s8 + $0x138] sm:$0xff]  ;;  %v776_v58 = vld [vmem:[%s3164_s6 + $0x140] sm:$0xff] }
  0x7e   :  { %v266_v50 = vld [vmem:[%s3160_s2 + $0x150] sm:$0xff]  ;;  %v966_v51 = vmax.f32 %v838_v40, %v902_v35  ;;  %v584_v54 = vmax.f32 %v456_v42, %v520_v38  ;;  %v202_v56 = vmax.f32 %v74_v48, %v138_v49  ;;  %v457_v59 = vmax.f32 %v329_v47, %v393_v44  ;;  %v649_v60 = vld [vmem:[%s3163_s5 + $0x148] sm:$0xff]  ;;  %v75_v1 = vld [vmem:[%s3158_s0 + $0x158] sm:$0xff] }
  0x7f   :  { %1157 = vst [vmem:[%s3167_s9 + $0x128] sm:$0xff] %v1093_v45  ;;  %v839_v57 = vmax.f32 %v711_v46, %v775_v41  ;;  %v394_v61 = vld [vmem:[%s3161_s3 + $0x150] sm:$0xff]  ;;  %v139_v2 = vld [vmem:[%s3159_s1 + $0x158] sm:$0xff]  ;;  %v904_v5 = vld [vmem:[%s3165_s7 + $0x140] sm:$0xff] }
  0x80   :  { %v1094_v62 = vmax.f32 %v966_v51, %v1030_v36  ;;  %v712_v63 = vmax.f32 %v584_v54, %v648_v43  ;;  %v330_v0 = vmax.f32 %v202_v56, %v266_v50  ;;  %v267_v3 = vld [vmem:[%s3160_s2 + $0x158] sm:$0xff]  ;;  %v1032_v6 = vld [vmem:[%s3166_s8 + $0x140] sm:$0xff]  ;;  %v585_v7 = vmax.f32 %v457_v59, %v521_v55  ;;  %v522_v8 = vld [vmem:[%s3162_s4 + $0x150] sm:$0xff] }
  0x81   :  { %v967_v4 = vmax.f32 %v839_v57, %v903_v52  ;;  %v203_v9 = vmax.f32 %v75_v1, %v139_v2  ;;  %v777_v11 = vld [vmem:[%s3164_s6 + $0x148] sm:$0xff]  ;;  %v650_v13 = vld [vmem:[%s3163_s5 + $0x150] sm:$0xff]  ;;  %v395_v14 = vld [vmem:[%s3161_s3 + $0x158] sm:$0xff] }
  0x82   :  { %1158 = vst [vmem:[%s3167_s9 + $0x130] sm:$0xff] %v1094_v62  ;;  %v840_v10 = vmax.f32 %v712_v63, %v776_v58  ;;  %v458_v12 = vmax.f32 %v330_v0, %v394_v61  ;;  %v713_v16 = vmax.f32 %v585_v7, %v649_v60  ;;  %v76_v18 = vld [vmem:[%s3158_s0 + $0x160] sm:$0xff]  ;;  %v905_v22 = vld [vmem:[%s3165_s7 + $0x148] sm:$0xff]  ;;  %v523_v25 = vld [vmem:[%s3162_s4 + $0x158] sm:$0xff] }
  0x83   :  { %v1095_v15 = vmax.f32 %v967_v4, %v1031_v53  ;;  %v331_v17 = vmax.f32 %v203_v9, %v267_v3  ;;  %v140_v19 = vld [vmem:[%s3159_s1 + $0x160] sm:$0xff]  ;;  %v1033_v23 = vld [vmem:[%s3166_s8 + $0x148] sm:$0xff]  ;;  %v778_v28 = vld [vmem:[%s3164_s6 + $0x150] sm:$0xff] }
  0x84   :  { %v268_v20 = vld [vmem:[%s3160_s2 + $0x160] sm:$0xff]  ;;  %v968_v21 = vmax.f32 %v840_v10, %v904_v5  ;;  %v586_v24 = vmax.f32 %v458_v12, %v522_v8  ;;  %v204_v26 = vmax.f32 %v76_v18, %v140_v19  ;;  %v841_v27 = vmax.f32 %v713_v16, %v777_v11  ;;  %v651_v30 = vld [vmem:[%s3163_s5 + $0x158] sm:$0xff]  ;;  %v77_v35 = vld [vmem:[%s3158_s0 + $0x168] sm:$0xff] }
  0x85   :  { %1159 = vst [vmem:[%s3167_s9 + $0x138] sm:$0xff] %v1095_v15  ;;  %v459_v29 = vmax.f32 %v331_v17, %v395_v14  ;;  %v396_v31 = vld [vmem:[%s3161_s3 + $0x160] sm:$0xff]  ;;  %v141_v36 = vld [vmem:[%s3159_s1 + $0x168] sm:$0xff]  ;;  %v906_v39 = vld [vmem:[%s3165_s7 + $0x150] sm:$0xff] }
  0x86   :  { %v1096_v32 = vmax.f32 %v968_v21, %v1032_v6  ;;  %v714_v33 = vmax.f32 %v586_v24, %v650_v13  ;;  %v332_v34 = vmax.f32 %v204_v26, %v268_v20  ;;  %v269_v37 = vld [vmem:[%s3160_s2 + $0x168] sm:$0xff]  ;;  %v969_v38 = vmax.f32 %v841_v27, %v905_v22  ;;  %v1034_v40 = vld [vmem:[%s3166_s8 + $0x150] sm:$0xff]  ;;  %v524_v42 = vld [vmem:[%s3162_s4 + $0x160] sm:$0xff] }
  0x87   :  { %v587_v41 = vmax.f32 %v459_v29, %v523_v25  ;;  %v205_v43 = vmax.f32 %v77_v35, %v141_v36  ;;  %v779_v45 = vld [vmem:[%s3164_s6 + $0x158] sm:$0xff]  ;;  %v652_v47 = vld [vmem:[%s3163_s5 + $0x160] sm:$0xff]  ;;  %v397_v48 = vld [vmem:[%s3161_s3 + $0x168] sm:$0xff] }
  0x88   :  { %1160 = vst [vmem:[%s3167_s9 + $0x140] sm:$0xff] %v1096_v32  ;;  %v842_v44 = vmax.f32 %v714_v33, %v778_v28  ;;  %v460_v46 = vmax.f32 %v332_v34, %v396_v31  ;;  %v1097_v49 = vmax.f32 %v969_v38, %v1033_v23  ;;  %v78_v52 = vld [vmem:[%s3158_s0 + $0x170] sm:$0xff]  ;;  %v907_v56 = vld [vmem:[%s3165_s7 + $0x158] sm:$0xff]  ;;  %v525_v59 = vld [vmem:[%s3162_s4 + $0x168] sm:$0xff] }
  0x89   :  { %v715_v50 = vmax.f32 %v587_v41, %v651_v30  ;;  %v333_v51 = vmax.f32 %v205_v43, %v269_v37  ;;  %v142_v53 = vld [vmem:[%s3159_s1 + $0x170] sm:$0xff]  ;;  %v1035_v57 = vld [vmem:[%s3166_s8 + $0x158] sm:$0xff]  ;;  %v780_v62 = vld [vmem:[%s3164_s6 + $0x160] sm:$0xff] }
  0x8a   :  { %v270_v54 = vld [vmem:[%s3160_s2 + $0x170] sm:$0xff]  ;;  %v970_v55 = vmax.f32 %v842_v44, %v906_v39  ;;  %v588_v58 = vmax.f32 %v460_v46, %v524_v42  ;;  %v206_v60 = vmax.f32 %v78_v52, %v142_v53  ;;  %1161 = vst [vmem:[%s3167_s9 + $0x148] sm:$0xff] %v1097_v49  ;;  %v653_v0 = vld [vmem:[%s3163_s5 + $0x168] sm:$0xff]  ;;  %v79_v5 = vld [vmem:[%s3158_s0 + $0x178] sm:$0xff] }
  0x8b   :  { %v843_v61 = vmax.f32 %v715_v50, %v779_v45  ;;  %v461_v63 = vmax.f32 %v333_v51, %v397_v48  ;;  %v398_v1 = vld [vmem:[%s3161_s3 + $0x170] sm:$0xff]  ;;  %v143_v6 = vld [vmem:[%s3159_s1 + $0x178] sm:$0xff]  ;;  %v908_v9 = vld [vmem:[%s3165_s7 + $0x160] sm:$0xff] }
  0x8c   :  { %v1098_v2 = vmax.f32 %v970_v55, %v1034_v40  ;;  %v716_v3 = vmax.f32 %v588_v58, %v652_v47  ;;  %v334_v4 = vmax.f32 %v206_v60, %v270_v54  ;;  %v271_v7 = vld [vmem:[%s3160_s2 + $0x178] sm:$0xff]  ;;  %v1036_v10 = vld [vmem:[%s3166_s8 + $0x160] sm:$0xff]  ;;  %v526_v12 = vld [vmem:[%s3162_s4 + $0x170] sm:$0xff]  ;;  %v207_v13 = vmax.f32 %v79_v5, %v143_v6 }
  0x8d   :  { %v971_v8 = vmax.f32 %v843_v61, %v907_v56  ;;  %v589_v11 = vmax.f32 %v461_v63, %v525_v59  ;;  %v781_v15 = vld [vmem:[%s3164_s6 + $0x168] sm:$0xff]  ;;  %v654_v17 = vld [vmem:[%s3163_s5 + $0x170] sm:$0xff]  ;;  %v399_v18 = vld [vmem:[%s3161_s3 + $0x178] sm:$0xff] }
  0x8e   :  { %1162 = vst [vmem:[%s3167_s9 + $0x150] sm:$0xff] %v1098_v2  ;;  %v844_v14 = vmax.f32 %v716_v3, %v780_v62  ;;  %v462_v16 = vmax.f32 %v334_v4, %v398_v1  ;;  %v335_v21 = vmax.f32 %v207_v13, %v271_v7  ;;  %v80_v22 = vld [vmem:[%s3158_s0 + $0x180] sm:$0xff]  ;;  %v909_v26 = vld [vmem:[%s3165_s7 + $0x168] sm:$0xff]  ;;  %v527_v29 = vld [vmem:[%s3162_s4 + $0x178] sm:$0xff] }
  0x8f   :  { %v1099_v19 = vmax.f32 %v971_v8, %v1035_v57  ;;  %v717_v20 = vmax.f32 %v589_v11, %v653_v0  ;;  %v144_v23 = vld [vmem:[%s3159_s1 + $0x180] sm:$0xff]  ;;  %v1037_v27 = vld [vmem:[%s3166_s8 + $0x168] sm:$0xff]  ;;  %v782_v32 = vld [vmem:[%s3164_s6 + $0x170] sm:$0xff] }
  0x90   :  { %v272_v24 = vld [vmem:[%s3160_s2 + $0x180] sm:$0xff]  ;;  %v972_v25 = vmax.f32 %v844_v14, %v908_v9  ;;  %v590_v28 = vmax.f32 %v462_v16, %v526_v12  ;;  %v208_v30 = vmax.f32 %v80_v22, %v144_v23  ;;  %v463_v33 = vmax.f32 %v335_v21, %v399_v18  ;;  %v655_v34 = vld [vmem:[%s3163_s5 + $0x178] sm:$0xff]  ;;  %v81_v39 = vld [vmem:[%s3158_s0 + $0x188] sm:$0xff] }
  0x91   :  { %1163 = vst [vmem:[%s3167_s9 + $0x158] sm:$0xff] %v1099_v19  ;;  %v845_v31 = vmax.f32 %v717_v20, %v781_v15  ;;  %v400_v35 = vld [vmem:[%s3161_s3 + $0x180] sm:$0xff]  ;;  %v145_v40 = vld [vmem:[%s3159_s1 + $0x188] sm:$0xff]  ;;  %v910_v43 = vld [vmem:[%s3165_s7 + $0x170] sm:$0xff] }
  0x92   :  { %v1100_v36 = vmax.f32 %v972_v25, %v1036_v10  ;;  %v718_v37 = vmax.f32 %v590_v28, %v654_v17  ;;  %v336_v38 = vmax.f32 %v208_v30, %v272_v24  ;;  %v273_v41 = vld [vmem:[%s3160_s2 + $0x188] sm:$0xff]  ;;  %v1038_v44 = vld [vmem:[%s3166_s8 + $0x170] sm:$0xff]  ;;  %v591_v45 = vmax.f32 %v463_v33, %v527_v29  ;;  %v528_v46 = vld [vmem:[%s3162_s4 + $0x180] sm:$0xff] }
  0x93   :  { %v973_v42 = vmax.f32 %v845_v31, %v909_v26  ;;  %v209_v47 = vmax.f32 %v81_v39, %v145_v40  ;;  %v783_v49 = vld [vmem:[%s3164_s6 + $0x178] sm:$0xff]  ;;  %v656_v51 = vld [vmem:[%s3163_s5 + $0x180] sm:$0xff]  ;;  %v401_v52 = vld [vmem:[%s3161_s3 + $0x188] sm:$0xff] }
  0x94   :  { %1164 = vst [vmem:[%s3167_s9 + $0x160] sm:$0xff] %v1100_v36  ;;  %v846_v48 = vmax.f32 %v718_v37, %v782_v32  ;;  %v464_v50 = vmax.f32 %v336_v38, %v400_v35  ;;  %v719_v54 = vmax.f32 %v591_v45, %v655_v34  ;;  %v82_v56 = vld [vmem:[%s3158_s0 + $0x190] sm:$0xff]  ;;  %v911_v60 = vld [vmem:[%s3165_s7 + $0x178] sm:$0xff]  ;;  %v529_v63 = vld [vmem:[%s3162_s4 + $0x188] sm:$0xff] }
  0x95   :  { %v1101_v53 = vmax.f32 %v973_v42, %v1037_v27  ;;  %v337_v55 = vmax.f32 %v209_v47, %v273_v41  ;;  %v146_v57 = vld [vmem:[%s3159_s1 + $0x190] sm:$0xff]  ;;  %v1039_v61 = vld [vmem:[%s3166_s8 + $0x178] sm:$0xff]  ;;  %v784_v2 = vld [vmem:[%s3164_s6 + $0x180] sm:$0xff] }
  0x96   :  { %v274_v58 = vld [vmem:[%s3160_s2 + $0x190] sm:$0xff]  ;;  %v974_v59 = vmax.f32 %v846_v48, %v910_v43  ;;  %v592_v62 = vmax.f32 %v464_v50, %v528_v46  ;;  %v210_v0 = vmax.f32 %v82_v56, %v146_v57  ;;  %v847_v1 = vmax.f32 %v719_v54, %v783_v49  ;;  %v657_v4 = vld [vmem:[%s3163_s5 + $0x188] sm:$0xff]  ;;  %v83_v9 = vld [vmem:[%s3158_s0 + $0x198] sm:$0xff] }
  0x97   :  { %1165 = vst [vmem:[%s3167_s9 + $0x168] sm:$0xff] %v1101_v53  ;;  %v465_v3 = vmax.f32 %v337_v55, %v401_v52  ;;  %v402_v5 = vld [vmem:[%s3161_s3 + $0x190] sm:$0xff]  ;;  %v147_v10 = vld [vmem:[%s3159_s1 + $0x198] sm:$0xff]  ;;  %v912_v13 = vld [vmem:[%s3165_s7 + $0x180] sm:$0xff] }
  0x98   :  { %v1102_v6 = vmax.f32 %v974_v59, %v1038_v44  ;;  %v720_v7 = vmax.f32 %v592_v62, %v656_v51  ;;  %v338_v8 = vmax.f32 %v210_v0, %v274_v58  ;;  %v275_v11 = vld [vmem:[%s3160_s2 + $0x198] sm:$0xff]  ;;  %v975_v12 = vmax.f32 %v847_v1, %v911_v60  ;;  %v1040_v14 = vld [vmem:[%s3166_s8 + $0x180] sm:$0xff]  ;;  %v530_v16 = vld [vmem:[%s3162_s4 + $0x190] sm:$0xff] }
  0x99   :  { %v593_v15 = vmax.f32 %v465_v3, %v529_v63  ;;  %v211_v17 = vmax.f32 %v83_v9, %v147_v10  ;;  %v785_v19 = vld [vmem:[%s3164_s6 + $0x188] sm:$0xff]  ;;  %v658_v21 = vld [vmem:[%s3163_s5 + $0x190] sm:$0xff]  ;;  %v403_v22 = vld [vmem:[%s3161_s3 + $0x198] sm:$0xff] }
  0x9a   :  { %1166 = vst [vmem:[%s3167_s9 + $0x170] sm:$0xff] %v1102_v6  ;;  %v848_v18 = vmax.f32 %v720_v7, %v784_v2  ;;  %v466_v20 = vmax.f32 %v338_v8, %v402_v5  ;;  %v1103_v23 = vmax.f32 %v975_v12, %v1039_v61  ;;  %v84_v26 = vld [vmem:[%s3158_s0 + $0x1a0] sm:$0xff]  ;;  %v913_v30 = vld [vmem:[%s3165_s7 + $0x188] sm:$0xff]  ;;  %v531_v33 = vld [vmem:[%s3162_s4 + $0x198] sm:$0xff] }
  0x9b   :  { %v721_v24 = vmax.f32 %v593_v15, %v657_v4  ;;  %v339_v25 = vmax.f32 %v211_v17, %v275_v11  ;;  %v148_v27 = vld [vmem:[%s3159_s1 + $0x1a0] sm:$0xff]  ;;  %v1041_v31 = vld [vmem:[%s3166_s8 + $0x188] sm:$0xff]  ;;  %v786_v36 = vld [vmem:[%s3164_s6 + $0x190] sm:$0xff] }
  0x9c   :  { %v276_v28 = vld [vmem:[%s3160_s2 + $0x1a0] sm:$0xff]  ;;  %v976_v29 = vmax.f32 %v848_v18, %v912_v13  ;;  %v594_v32 = vmax.f32 %v466_v20, %v530_v16  ;;  %v212_v34 = vmax.f32 %v84_v26, %v148_v27  ;;  %1167 = vst [vmem:[%s3167_s9 + $0x178] sm:$0xff] %v1103_v23  ;;  %v659_v38 = vld [vmem:[%s3163_s5 + $0x198] sm:$0xff]  ;;  %v85_v43 = vld [vmem:[%s3158_s0 + $0x1a8] sm:$0xff] }
  0x9d   :  { %v849_v35 = vmax.f32 %v721_v24, %v785_v19  ;;  %v467_v37 = vmax.f32 %v339_v25, %v403_v22  ;;  %v404_v39 = vld [vmem:[%s3161_s3 + $0x1a0] sm:$0xff]  ;;  %v149_v44 = vld [vmem:[%s3159_s1 + $0x1a8] sm:$0xff]  ;;  %v914_v47 = vld [vmem:[%s3165_s7 + $0x190] sm:$0xff] }
  0x9e   :  { %v1104_v40 = vmax.f32 %v976_v29, %v1040_v14  ;;  %v722_v41 = vmax.f32 %v594_v32, %v658_v21  ;;  %v340_v42 = vmax.f32 %v212_v34, %v276_v28  ;;  %v277_v45 = vld [vmem:[%s3160_s2 + $0x1a8] sm:$0xff]  ;;  %v1042_v48 = vld [vmem:[%s3166_s8 + $0x190] sm:$0xff]  ;;  %v532_v50 = vld [vmem:[%s3162_s4 + $0x1a0] sm:$0xff]  ;;  %v213_v51 = vmax.f32 %v85_v43, %v149_v44 }
  0x9f   :  { %v977_v46 = vmax.f32 %v849_v35, %v913_v30  ;;  %v595_v49 = vmax.f32 %v467_v37, %v531_v33  ;;  %v787_v53 = vld [vmem:[%s3164_s6 + $0x198] sm:$0xff]  ;;  %v660_v55 = vld [vmem:[%s3163_s5 + $0x1a0] sm:$0xff]  ;;  %v405_v56 = vld [vmem:[%s3161_s3 + $0x1a8] sm:$0xff] }
  0xa0   :  { %1168 = vst [vmem:[%s3167_s9 + $0x180] sm:$0xff] %v1104_v40  ;;  %v850_v52 = vmax.f32 %v722_v41, %v786_v36  ;;  %v468_v54 = vmax.f32 %v340_v42, %v404_v39  ;;  %v341_v59 = vmax.f32 %v213_v51, %v277_v45  ;;  %v86_v60 = vld [vmem:[%s3158_s0 + $0x1b0] sm:$0xff]  ;;  %v915_v0 = vld [vmem:[%s3165_s7 + $0x198] sm:$0xff]  ;;  %v533_v3 = vld [vmem:[%s3162_s4 + $0x1a8] sm:$0xff] }
  0xa1   :  { %v1105_v57 = vmax.f32 %v977_v46, %v1041_v31  ;;  %v723_v58 = vmax.f32 %v595_v49, %v659_v38  ;;  %v150_v61 = vld [vmem:[%s3159_s1 + $0x1b0] sm:$0xff]  ;;  %v1043_v1 = vld [vmem:[%s3166_s8 + $0x198] sm:$0xff]  ;;  %v788_v6 = vld [vmem:[%s3164_s6 + $0x1a0] sm:$0xff] }
  0xa2   :  { %v278_v62 = vld [vmem:[%s3160_s2 + $0x1b0] sm:$0xff]  ;;  %v978_v63 = vmax.f32 %v850_v52, %v914_v47  ;;  %v596_v2 = vmax.f32 %v468_v54, %v532_v50  ;;  %v214_v4 = vmax.f32 %v86_v60, %v150_v61  ;;  %v469_v7 = vmax.f32 %v341_v59, %v405_v56  ;;  %v661_v8 = vld [vmem:[%s3163_s5 + $0x1a8] sm:$0xff]  ;;  %v87_v13 = vld [vmem:[%s3158_s0 + $0x1b8] sm:$0xff] }
  0xa3   :  { %1169 = vst [vmem:[%s3167_s9 + $0x188] sm:$0xff] %v1105_v57  ;;  %v851_v5 = vmax.f32 %v723_v58, %v787_v53  ;;  %v406_v9 = vld [vmem:[%s3161_s3 + $0x1b0] sm:$0xff]  ;;  %v151_v14 = vld [vmem:[%s3159_s1 + $0x1b8] sm:$0xff]  ;;  %v916_v17 = vld [vmem:[%s3165_s7 + $0x1a0] sm:$0xff] }
  0xa4   :  { %v1106_v10 = vmax.f32 %v978_v63, %v1042_v48  ;;  %v724_v11 = vmax.f32 %v596_v2, %v660_v55  ;;  %v342_v12 = vmax.f32 %v214_v4, %v278_v62  ;;  %v279_v15 = vld [vmem:[%s3160_s2 + $0x1b8] sm:$0xff]  ;;  %v1044_v18 = vld [vmem:[%s3166_s8 + $0x1a0] sm:$0xff]  ;;  %v597_v19 = vmax.f32 %v469_v7, %v533_v3  ;;  %v534_v20 = vld [vmem:[%s3162_s4 + $0x1b0] sm:$0xff] }
  0xa5   :  { %v979_v16 = vmax.f32 %v851_v5, %v915_v0  ;;  %v215_v21 = vmax.f32 %v87_v13, %v151_v14  ;;  %v789_v23 = vld [vmem:[%s3164_s6 + $0x1a8] sm:$0xff]  ;;  %v662_v25 = vld [vmem:[%s3163_s5 + $0x1b0] sm:$0xff]  ;;  %v407_v26 = vld [vmem:[%s3161_s3 + $0x1b8] sm:$0xff] }
  0xa6   :  { %1170 = vst [vmem:[%s3167_s9 + $0x190] sm:$0xff] %v1106_v10  ;;  %v852_v22 = vmax.f32 %v724_v11, %v788_v6  ;;  %v470_v24 = vmax.f32 %v342_v12, %v406_v9  ;;  %v725_v28 = vmax.f32 %v597_v19, %v661_v8  ;;  %v88_v30 = vld [vmem:[%s3158_s0 + $0x1c0] sm:$0xff]  ;;  %v917_v34 = vld [vmem:[%s3165_s7 + $0x1a8] sm:$0xff]  ;;  %v535_v37 = vld [vmem:[%s3162_s4 + $0x1b8] sm:$0xff] }
  0xa7   :  { %v1107_v27 = vmax.f32 %v979_v16, %v1043_v1  ;;  %v343_v29 = vmax.f32 %v215_v21, %v279_v15  ;;  %v152_v31 = vld [vmem:[%s3159_s1 + $0x1c0] sm:$0xff]  ;;  %v1045_v35 = vld [vmem:[%s3166_s8 + $0x1a8] sm:$0xff]  ;;  %v790_v40 = vld [vmem:[%s3164_s6 + $0x1b0] sm:$0xff] }
  0xa8   :  { %v280_v32 = vld [vmem:[%s3160_s2 + $0x1c0] sm:$0xff]  ;;  %v980_v33 = vmax.f32 %v852_v22, %v916_v17  ;;  %v598_v36 = vmax.f32 %v470_v24, %v534_v20  ;;  %v216_v38 = vmax.f32 %v88_v30, %v152_v31  ;;  %v853_v39 = vmax.f32 %v725_v28, %v789_v23  ;;  %v663_v42 = vld [vmem:[%s3163_s5 + $0x1b8] sm:$0xff]  ;;  %v89_v47 = vld [vmem:[%s3158_s0 + $0x1c8] sm:$0xff] }
  0xa9   :  { %1171 = vst [vmem:[%s3167_s9 + $0x198] sm:$0xff] %v1107_v27  ;;  %v471_v41 = vmax.f32 %v343_v29, %v407_v26  ;;  %v408_v43 = vld [vmem:[%s3161_s3 + $0x1c0] sm:$0xff]  ;;  %v153_v48 = vld [vmem:[%s3159_s1 + $0x1c8] sm:$0xff]  ;;  %v918_v51 = vld [vmem:[%s3165_s7 + $0x1b0] sm:$0xff] }
  0xaa   :  { %v1108_v44 = vmax.f32 %v980_v33, %v1044_v18  ;;  %v726_v45 = vmax.f32 %v598_v36, %v662_v25  ;;  %v344_v46 = vmax.f32 %v216_v38, %v280_v32  ;;  %v281_v49 = vld [vmem:[%s3160_s2 + $0x1c8] sm:$0xff]  ;;  %v981_v50 = vmax.f32 %v853_v39, %v917_v34  ;;  %v1046_v52 = vld [vmem:[%s3166_s8 + $0x1b0] sm:$0xff]  ;;  %v536_v54 = vld [vmem:[%s3162_s4 + $0x1c0] sm:$0xff] }
  0xab   :  { %v599_v53 = vmax.f32 %v471_v41, %v535_v37  ;;  %v217_v55 = vmax.f32 %v89_v47, %v153_v48  ;;  %v791_v57 = vld [vmem:[%s3164_s6 + $0x1b8] sm:$0xff]  ;;  %v664_v59 = vld [vmem:[%s3163_s5 + $0x1c0] sm:$0xff]  ;;  %v409_v60 = vld [vmem:[%s3161_s3 + $0x1c8] sm:$0xff] }
  0xac   :  { %1172 = vst [vmem:[%s3167_s9 + $0x1a0] sm:$0xff] %v1108_v44  ;;  %v854_v56 = vmax.f32 %v726_v45, %v790_v40  ;;  %v472_v58 = vmax.f32 %v344_v46, %v408_v43  ;;  %v1109_v61 = vmax.f32 %v981_v50, %v1045_v35  ;;  %v90_v0 = vld [vmem:[%s3158_s0 + $0x1d0] sm:$0xff]  ;;  %v919_v4 = vld [vmem:[%s3165_s7 + $0x1b8] sm:$0xff]  ;;  %v537_v7 = vld [vmem:[%s3162_s4 + $0x1c8] sm:$0xff] }
  0xad   :  { %v727_v62 = vmax.f32 %v599_v53, %v663_v42  ;;  %v345_v63 = vmax.f32 %v217_v55, %v281_v49  ;;  %v154_v1 = vld [vmem:[%s3159_s1 + $0x1d0] sm:$0xff]  ;;  %v1047_v5 = vld [vmem:[%s3166_s8 + $0x1b8] sm:$0xff]  ;;  %v792_v10 = vld [vmem:[%s3164_s6 + $0x1c0] sm:$0xff] }
  0xae   :  { %v282_v2 = vld [vmem:[%s3160_s2 + $0x1d0] sm:$0xff]  ;;  %v982_v3 = vmax.f32 %v854_v56, %v918_v51  ;;  %v600_v6 = vmax.f32 %v472_v58, %v536_v54  ;;  %v218_v8 = vmax.f32 %v90_v0, %v154_v1  ;;  %1173 = vst [vmem:[%s3167_s9 + $0x1a8] sm:$0xff] %v1109_v61  ;;  %v665_v12 = vld [vmem:[%s3163_s5 + $0x1c8] sm:$0xff]  ;;  %v91_v17 = vld [vmem:[%s3158_s0 + $0x1d8] sm:$0xff] }
  0xaf   :  { %v855_v9 = vmax.f32 %v727_v62, %v791_v57  ;;  %v473_v11 = vmax.f32 %v345_v63, %v409_v60  ;;  %v410_v13 = vld [vmem:[%s3161_s3 + $0x1d0] sm:$0xff]  ;;  %v155_v18 = vld [vmem:[%s3159_s1 + $0x1d8] sm:$0xff]  ;;  %v920_v21 = vld [vmem:[%s3165_s7 + $0x1c0] sm:$0xff] }
  0xb0   :  { %v1110_v14 = vmax.f32 %v982_v3, %v1046_v52  ;;  %v728_v15 = vmax.f32 %v600_v6, %v664_v59  ;;  %v346_v16 = vmax.f32 %v218_v8, %v282_v2  ;;  %v283_v19 = vld [vmem:[%s3160_s2 + $0x1d8] sm:$0xff]  ;;  %v1048_v22 = vld [vmem:[%s3166_s8 + $0x1c0] sm:$0xff]  ;;  %v538_v24 = vld [vmem:[%s3162_s4 + $0x1d0] sm:$0xff]  ;;  %v219_v25 = vmax.f32 %v91_v17, %v155_v18 }
  0xb1   :  { %v983_v20 = vmax.f32 %v855_v9, %v919_v4  ;;  %v601_v23 = vmax.f32 %v473_v11, %v537_v7  ;;  %v793_v27 = vld [vmem:[%s3164_s6 + $0x1c8] sm:$0xff]  ;;  %v666_v29 = vld [vmem:[%s3163_s5 + $0x1d0] sm:$0xff]  ;;  %v411_v30 = vld [vmem:[%s3161_s3 + $0x1d8] sm:$0xff] }
  0xb2   :  { %1174 = vst [vmem:[%s3167_s9 + $0x1b0] sm:$0xff] %v1110_v14  ;;  %v856_v26 = vmax.f32 %v728_v15, %v792_v10  ;;  %v474_v28 = vmax.f32 %v346_v16, %v410_v13  ;;  %v347_v33 = vmax.f32 %v219_v25, %v283_v19  ;;  %v92_v34 = vld [vmem:[%s3158_s0 + $0x1e0] sm:$0xff]  ;;  %v921_v38 = vld [vmem:[%s3165_s7 + $0x1c8] sm:$0xff]  ;;  %v539_v41 = vld [vmem:[%s3162_s4 + $0x1d8] sm:$0xff] }
  0xb3   :  { %v1111_v31 = vmax.f32 %v983_v20, %v1047_v5  ;;  %v729_v32 = vmax.f32 %v601_v23, %v665_v12  ;;  %v156_v35 = vld [vmem:[%s3159_s1 + $0x1e0] sm:$0xff]  ;;  %v1049_v39 = vld [vmem:[%s3166_s8 + $0x1c8] sm:$0xff]  ;;  %v794_v44 = vld [vmem:[%s3164_s6 + $0x1d0] sm:$0xff] }
  0xb4   :  { %v284_v36 = vld [vmem:[%s3160_s2 + $0x1e0] sm:$0xff]  ;;  %v984_v37 = vmax.f32 %v856_v26, %v920_v21  ;;  %v602_v40 = vmax.f32 %v474_v28, %v538_v24  ;;  %v220_v42 = vmax.f32 %v92_v34, %v156_v35  ;;  %v475_v45 = vmax.f32 %v347_v33, %v411_v30  ;;  %v667_v46 = vld [vmem:[%s3163_s5 + $0x1d8] sm:$0xff]  ;;  %v93_v51 = vld [vmem:[%s3158_s0 + $0x1e8] sm:$0xff] }
  0xb5   :  { %1175 = vst [vmem:[%s3167_s9 + $0x1b8] sm:$0xff] %v1111_v31  ;;  %v857_v43 = vmax.f32 %v729_v32, %v793_v27  ;;  %v412_v47 = vld [vmem:[%s3161_s3 + $0x1e0] sm:$0xff]  ;;  %v157_v52 = vld [vmem:[%s3159_s1 + $0x1e8] sm:$0xff]  ;;  %v922_v55 = vld [vmem:[%s3165_s7 + $0x1d0] sm:$0xff] }
  0xb6   :  { %v1112_v48 = vmax.f32 %v984_v37, %v1048_v22  ;;  %v730_v49 = vmax.f32 %v602_v40, %v666_v29  ;;  %v348_v50 = vmax.f32 %v220_v42, %v284_v36  ;;  %v285_v53 = vld [vmem:[%s3160_s2 + $0x1e8] sm:$0xff]  ;;  %v1050_v56 = vld [vmem:[%s3166_s8 + $0x1d0] sm:$0xff]  ;;  %v603_v57 = vmax.f32 %v475_v45, %v539_v41  ;;  %v540_v58 = vld [vmem:[%s3162_s4 + $0x1e0] sm:$0xff] }
  0xb7   :  { %v985_v54 = vmax.f32 %v857_v43, %v921_v38  ;;  %v221_v59 = vmax.f32 %v93_v51, %v157_v52  ;;  %v795_v61 = vld [vmem:[%s3164_s6 + $0x1d8] sm:$0xff]  ;;  %v668_v63 = vld [vmem:[%s3163_s5 + $0x1e0] sm:$0xff]  ;;  %v413_v0 = vld [vmem:[%s3161_s3 + $0x1e8] sm:$0xff] }
  0xb8   :  { %1176 = vst [vmem:[%s3167_s9 + $0x1c0] sm:$0xff] %v1112_v48  ;;  %v858_v60 = vmax.f32 %v730_v49, %v794_v44  ;;  %v476_v62 = vmax.f32 %v348_v50, %v412_v47  ;;  %v731_v2 = vmax.f32 %v603_v57, %v667_v46  ;;  %v94_v4 = vld [vmem:[%s3158_s0 + $0x1f0] sm:$0xff]  ;;  %v923_v8 = vld [vmem:[%s3165_s7 + $0x1d8] sm:$0xff]  ;;  %v541_v11 = vld [vmem:[%s3162_s4 + $0x1e8] sm:$0xff] }
  0xb9   :  { %v1113_v1 = vmax.f32 %v985_v54, %v1049_v39  ;;  %v349_v3 = vmax.f32 %v221_v59, %v285_v53  ;;  %v158_v5 = vld [vmem:[%s3159_s1 + $0x1f0] sm:$0xff]  ;;  %v1051_v9 = vld [vmem:[%s3166_s8 + $0x1d8] sm:$0xff]  ;;  %v796_v14 = vld [vmem:[%s3164_s6 + $0x1e0] sm:$0xff] }
  0xba   :  { %v286_v6 = vld [vmem:[%s3160_s2 + $0x1f0] sm:$0xff]  ;;  %v986_v7 = vmax.f32 %v858_v60, %v922_v55  ;;  %v604_v10 = vmax.f32 %v476_v62, %v540_v58  ;;  %v222_v12 = vmax.f32 %v94_v4, %v158_v5  ;;  %v859_v13 = vmax.f32 %v731_v2, %v795_v61  ;;  %v669_v16 = vld [vmem:[%s3163_s5 + $0x1e8] sm:$0xff]  ;;  %v95_v21 = vld [vmem:[%s3158_s0 + $0x1f8] sm:$0xff] }
  0xbb   :  { %1177 = vst [vmem:[%s3167_s9 + $0x1c8] sm:$0xff] %v1113_v1  ;;  %v477_v15 = vmax.f32 %v349_v3, %v413_v0  ;;  %v414_v17 = vld [vmem:[%s3161_s3 + $0x1f0] sm:$0xff]  ;;  %v159_v22 = vld [vmem:[%s3159_s1 + $0x1f8] sm:$0xff]  ;;  %v924_v25 = vld [vmem:[%s3165_s7 + $0x1e0] sm:$0xff] }
  0xbc   :  { %v1114_v18 = vmax.f32 %v986_v7, %v1050_v56  ;;  %v732_v19 = vmax.f32 %v604_v10, %v668_v63  ;;  %v350_v20 = vmax.f32 %v222_v12, %v286_v6  ;;  %v287_v23 = vld [vmem:[%s3160_s2 + $0x1f8] sm:$0xff]  ;;  %v987_v24 = vmax.f32 %v859_v13, %v923_v8  ;;  %v542_v27 = vld [vmem:[%s3162_s4 + $0x1f0] sm:$0xff]  ;;  %v797_v30 = vld [vmem:[%s3164_s6 + $0x1e8] sm:$0xff] }
  0xbd   :  { %v605_v26 = vmax.f32 %v477_v15, %v541_v11  ;;  %v223_v28 = vmax.f32 %v95_v21, %v159_v22  ;;  %v415_v32 = vld [vmem:[%s3161_s3 + $0x1f8] sm:$0xff]  ;;  %v1052_v34 = vld [vmem:[%s3166_s8 + $0x1e0] sm:$0xff]  ;;  %v670_v36 = vld [vmem:[%s3163_s5 + $0x1f0] sm:$0xff] }
  0xbe   :  { %1178 = vst [vmem:[%s3167_s9 + $0x1d0] sm:$0xff] %v1114_v18  ;;  %v860_v29 = vmax.f32 %v732_v19, %v796_v14  ;;  %v478_v31 = vmax.f32 %v350_v20, %v414_v17  ;;  %v1115_v33 = vmax.f32 %v987_v24, %v1051_v9  ;;  %v925_v39 = vld [vmem:[%s3165_s7 + $0x1e8] sm:$0xff]  ;;  %v543_v41 = vld [vmem:[%s3162_s4 + $0x1f8] sm:$0xff]  ;;  %v798_v43 = vld [vmem:[%s3164_s6 + $0x1f0] sm:$0xff] }
  0xbf   :  { %v733_v35 = vmax.f32 %v605_v26, %v669_v16  ;;  %v351_v37 = vmax.f32 %v223_v28, %v287_v23  ;;  %v1053_v46 = vld [vmem:[%s3166_s8 + $0x1e8] sm:$0xff]  ;;  %v671_v48 = vld [vmem:[%s3163_s5 + $0x1f8] sm:$0xff]  ;;  %v926_v50 = vld [vmem:[%s3165_s7 + $0x1f0] sm:$0xff] }
  0xc0   :  { %v988_v38 = vmax.f32 %v860_v29, %v924_v25  ;;  %v606_v40 = vmax.f32 %v478_v31, %v542_v27  ;;  %1179 = vst [vmem:[%s3167_s9 + $0x1d8] sm:$0xff] %v1115_v33  ;;  %v799_v53 = vld [vmem:[%s3164_s6 + $0x1f8] sm:$0xff]  ;;  %v1054_v55 = vld [vmem:[%s3166_s8 + $0x1f0] sm:$0xff] }
  0xc1   :  { %v861_v42 = vmax.f32 %v733_v35, %v797_v30  ;;  %v479_v44 = vmax.f32 %v351_v37, %v415_v32  ;;  %v927_v58 = vld [vmem:[%s3165_s7 + $0x1f8] sm:$0xff] }
  0xc2   :  { %v1116_v45 = vmax.f32 %v988_v38, %v1052_v34  ;;  %v734_v47 = vmax.f32 %v606_v40, %v670_v36  ;;  %v1055_v61 = vld [vmem:[%s3166_s8 + $0x1f8] sm:$0xff] }
  0xc3   :  { %v989_v49 = vmax.f32 %v861_v42, %v925_v39  ;;  %v607_v51 = vmax.f32 %v479_v44, %v543_v41 }
  0xc4   :  { %1180 = vst [vmem:[%s3167_s9 + $0x1e0] sm:$0xff] %v1116_v45  ;;  %v862_v52 = vmax.f32 %v734_v47, %v798_v43 }
  0xc5   :  { %v1117_v54 = vmax.f32 %v989_v49, %v1053_v46  ;;  %v735_v56 = vmax.f32 %v607_v51, %v671_v48 }
  0xc6   :  { %v990_v57 = vmax.f32 %v862_v52, %v926_v50 }
  0xc7   :  { %1181 = vst [vmem:[%s3167_s9 + $0x1e8] sm:$0xff] %v1117_v54  ;;  %v863_v59 = vmax.f32 %v735_v56, %v799_v53 }
  0xc8   :  { %v1118_v60 = vmax.f32 %v990_v57, %v1054_v55 }
  0xc9   :  { %v991_v62 = vmax.f32 %v863_v59, %v927_v58 }
  0xca   :  { %1182 = vst [vmem:[%s3167_s9 + $0x1f0] sm:$0xff] %v1118_v60 }
  0xcb   :  { %v1119_v63 = vmax.f32 %v991_v62, %v1055_v61 }
  0xcd   :  { %1183 = vst [vmem:[%s3167_s9 + $0x1f8] sm:$0xff] %v1119_v63 }

// kernel: cis_resnet_forward.10
= control target key start
LH: loop header
LB: loop body
LE: loop exit
PB: predicated region body
PF: predicated region fallthrough
CT: control target
= control target key end

     0   :  { %s3392_s12 = smov 0   ;;  %s4248_s0 = inlined_call_operand.vmem [shape: bf16[1024,640], index: 0, kind: input, shape index: {}]   ;;  %s4249_s1 = inlined_call_operand.vmem [shape: bf16[640,64], index: 1, kind: input, shape index: {}]   ;;  %s4250_s2 = inlined_call_operand.vmem [shape: f32[1,64], index: 2, kind: input, shape index: {}]   ;;  %s4251_s3 = inlined_call_operand.vmem [shape: f32[1024,64], index: 3, kind: output, shape index: {}]  }
   0x1 LB: > { %s2581_s13 = sadd.s32 4294967295, %s3369_s12   ;;  %p2585_p0 = scmp.ge.s32.totalorder %s3369_s12, 1  ;;  %s3369_s12 = sphi %s3392_s12, %s13_s12  }
   0x2   : > { %p139_p1 = scmp.lt.s32.totalorder %s3369_s12, 3 }
   0x4   : > { %p140_p2 = pnand %p2585_p0, %p139_p1 }
   0x6   : > { %143 = sbr.rel (%p140_p2) target bundleno = 611 (0x263), region = 32 }
   0xd   : > { %v3099_v0 = vld [vmem:[%s4249_s1] sm:$0xff]   ;;  %v3371_v1 = vmov 0   ;;  %s2586_s16 = sshll.u32 %s2581_s13, 6  ;;  %v3100_v2 = vld [vmem:[%s4249_s1 + $0x8] sm:$0xff]   ;;  %v3101_v3 = vld [vmem:[%s4249_s1 + $0x10] sm:$0xff]   ;;  %vm2460_vm0 = vcmask 523264  }
   0xe   : > { %1529 = vmatprep.subr.bf16.mxu0 %v3371_v1  ;;  %2913 = vmatprep.subr.bf16.mxu1 %v3371_v1  ;;  %p165_p3 = scmp.lt.s32.totalorder %s2586_s16, 127  ;;  %v3102_v4 = vld [vmem:[%s4249_s1 + $0x18] sm:$0xff]   ;;  %v3103_v5 = vld [vmem:[%s4249_s1 + $0x20] sm:$0xff]   ;;  %v3104_v7 = vld [vmem:[%s4249_s1 + $0x28] sm:$0xff]  }
   0xf   : > { %1530 = vmatpush1.bf16.msra.mxu0 %v3099_v0  ;;  %2929 = vmatpush1.bf16.msra.mxu1 %v3099_v0  ;;  %v3105_v9 = vld [vmem:[%s4249_s1 + $0x30] sm:$0xff]   ;;  %v3106_v10 = vld [vmem:[%s4249_s1 + $0x38] sm:$0xff]   ;;  %v3107_v11 = vld [vmem:[%s4249_s1 + $0x40] sm:$0xff]  }
  0x10   : > { %1531 = vmatprep.subr.bf16.mxu0 %v3371_v1  ;;  %2914 = vmatprep.subr.bf16.mxu1 %v3371_v1  ;;  %s4281_s16 = smov (!%p165_p3, %s2586_s16), 127  ;;  %v3108_v12 = vld [vmem:[%s4249_s1 + $0x48] sm:$0xff]   ;;  %v3109_v13 = vld [vmem:[%s4249_s1 + $0x50] sm:$0xff]   ;;  %v3110_v14 = vld [vmem:[%s4249_s1 + $0x58] sm:$0xff]  }
  0x11   : > { %s3089_s23 = smul.u32 20, %s4281_s16  ;;  %v3111_v15 = vld [vmem:[%s4249_s1 + $0x60] sm:$0xff]   ;;  %v3112_v16 = vld [vmem:[%s4249_s1 + $0x68] sm:$0xff]   ;;  %v3113_v17 = vld [vmem:[%s4249_s1 + $0x70] sm:$0xff]   ;;  %s2589_s27 = sshll.u32 %s4281_s16, 3 }
  0x12   : > { %v3114_v18 = vld [vmem:[%s4249_s1 + $0x78] sm:$0xff]   ;;  %v3122_v19 = vld [vmem:[%s4249_s1 + $0x100] sm:$0xff]   ;;  %v3147_v25 = vld [vmem:[%s4249_s1 + $0x108] sm:$0xff]   ;;  %s3951_s30 = scalar_lea.vmem %s4251_s3, %s2589_s27 }
  0x13   : > { %1532 = vmatpush1.bf16.msra.mxu0 %v3100_v2  ;;  %2930 = vmatpush1.bf16.msra.mxu1 %v3100_v2  ;;  %s3429_s28 = scalar_lea.vmem %s4248_s0, %s3089_s23  ;;  %v3121_v22 = vld [vmem:[%s4249_s1 + $0x80] sm:$0xff]   ;;  %v3123_v26 = vld [vmem:[%s4249_s1 + $0x88] sm:$0xff]   ;;  %v3172_v27 = vld [vmem:[%s4249_s1 + $0x110] sm:$0xff]  }
  0x14   : > { %1533 = vmatprep.subr.bf16.mxu0 %v3371_v1  ;;  %2915 = vmatprep.subr.bf16.mxu1 %v3371_v1  ;;  %v3117_v6 = vld [vmem:[%s3429_s28 + $0x4] ss:$20 sps:$4 sm:$0xff]   ;;  %v3115_v20 = vld [vmem:[%s3429_s28] ss:$20 sps:$4 sm:$0xff]   ;;  %v3128_v28 = vld [vmem:[%s3429_s28 + $0x28] ss:$20 sps:$4 sm:$0xff]  }
  0x15   : > { %v3120_v8 = vld [vmem:[%s3429_s28 + $0x144] ss:$20 sps:$4 sm:$0xff]   ;;  %1561 = vmatprep.mubr.bf16.mxu0 %v3117_v6  ;;  %v3118_v21 = vld [vmem:[%s3429_s28 + $0x140] ss:$20 sps:$4 sm:$0xff]   ;;  %v3129_v29 = vld [vmem:[%s3429_s28 + $0x168] ss:$20 sps:$4 sm:$0xff]  }
  0x16   : > { %1625 = vmatprep.mubr.bf16.mxu1 %v3120_v8  ;;  %v3124_v23 = vld [vmem:[%s3429_s28 + $0x2c] ss:$20 sps:$4 sm:$0xff]   ;;  %v3130_v30 = vld [vmem:[%s4249_s1 + $0x90] sm:$0xff]   ;;  %v3194_v33 = vld [vmem:[%s4249_s1 + $0x118] sm:$0xff]  }
  0x17   : > { %1534 = vmatpush1.bf16.msra.mxu0 %v3101_v3  ;;  %2931 = vmatpush1.bf16.msra.mxu1 %v3101_v3  ;;  %v3126_v24 = vld [vmem:[%s3429_s28 + $0x16c] ss:$20 sps:$4 sm:$0xff]   ;;  %v3132_v31 = vld [vmem:[%s3429_s28 + $0x54] ss:$20 sps:$4 sm:$0xff]   ;;  %v3131_v34 = vld [vmem:[%s4249_s1 + $0x98] sm:$0xff]  }
  0x18   : > { %1535 = vmatprep.subr.bf16.mxu0 %v3371_v1  ;;  %2916 = vmatprep.subr.bf16.mxu1 %v3371_v1  ;;  %v3134_v32 = vld [vmem:[%s3429_s28 + $0x194] ss:$20 sps:$4 sm:$0xff]   ;;  %v3136_v35 = vld [vmem:[%s3429_s28 + $0x50] ss:$20 sps:$4 sm:$0xff]   ;;  %v3144_v43 = vld [vmem:[%s3429_s28 + $0x78] ss:$20 sps:$4 sm:$0xff]  }
  0x19   : > { %v3137_v36 = vld [vmem:[%s3429_s28 + $0x190] ss:$20 sps:$4 sm:$0xff]   ;;  %v3139_v41 = vld [vmem:[%s4249_s1 + $0xa8] sm:$0xff]   ;;  %v3148_v49 = vld [vmem:[%s4249_s1 + $0xb8] sm:$0xff]  }
  0x1a   : > { %v3138_v37 = vld [vmem:[%s4249_s1 + $0xa0] sm:$0xff]   ;;  %v3140_v38 = vld [vmem:[%s3429_s28 + $0x7c] ss:$20 sps:$4 sm:$0xff]   ;;  %v3232_v42 = vld [vmem:[%s4249_s1 + $0x128] sm:$0xff]  }
  0x1b   : > { %1536 = vmatpush1.bf16.msra.mxu0 %v3102_v4  ;;  %2932 = vmatpush1.bf16.msra.mxu1 %v3102_v4  ;;  %v3142_v39 = vld [vmem:[%s3429_s28 + $0x1bc] ss:$20 sps:$4 sm:$0xff]   ;;  %v3213_v40 = vld [vmem:[%s4249_s1 + $0x120] sm:$0xff]   ;;  %v3145_v44 = vld [vmem:[%s3429_s28 + $0x1b8] ss:$20 sps:$4 sm:$0xff]  }
  0x1c   : > { %1537 = vmatprep.subr.bf16.mxu0 %v3371_v1  ;;  %2917 = vmatprep.subr.bf16.mxu1 %v3371_v1  ;;  %v3146_v45 = vld [vmem:[%s4249_s1 + $0xb0] sm:$0xff]   ;;  %v3149_v46 = vld [vmem:[%s3429_s28 + $0xa4] ss:$20 sps:$4 sm:$0xff]   ;;  %v3157_v53 = vld [vmem:[%s3429_s28 + $0xcc] ss:$20 sps:$4 sm:$0xff]  }
  0x1d   : > { %v3151_v47 = vld [vmem:[%s3429_s28 + $0x1e4] ss:$20 sps:$4 sm:$0xff]   ;;  %v3251_v48 = vld [vmem:[%s4249_s1 + $0x130] sm:$0xff]   ;;  %v3159_v54 = vld [vmem:[%s3429_s28 + $0x20c] ss:$20 sps:$4 sm:$0xff]  }
  0x1e   : > { %v3153_v50 = vld [vmem:[%s3429_s28 + $0xa0] ss:$20 sps:$4 sm:$0xff]   ;;  %v3156_v55 = vld [vmem:[%s4249_s1 + $0xc8] sm:$0xff]   ;;  %v3270_v61 = vld [vmem:[%s4249_s1 + $0x138] sm:$0xff]  }
  0x1f   : > { %1538 = vmatpush1.bf16.msra.mxu0 %v3103_v5  ;;  %2933 = vmatpush1.bf16.msra.mxu1 %v3103_v5  ;;  %v3154_v51 = vld [vmem:[%s3429_s28 + $0x1e0] ss:$20 sps:$4 sm:$0xff]   ;;  %v3161_v56 = vld [vmem:[%s3429_s28 + $0xc8] ss:$20 sps:$4 sm:$0xff]   ;;  %v3169_v63 = vld [vmem:[%s3429_s28 + $0xf0] ss:$20 sps:$4 sm:$0xff]  }
  0x20   : > { %1539 = vmatprep.subr.bf16.mxu0 %v3371_v1  ;;  %2918 = vmatprep.subr.bf16.mxu1 %v3371_v1  ;;  %v3155_v52 = vld [vmem:[%s4249_s1 + $0xc0] sm:$0xff]   ;;  %v3162_v57 = vld [vmem:[%s3429_s28 + $0x208] ss:$20 sps:$4 sm:$0xff]   ;;  %v3163_v58 = vld [vmem:[%s4249_s1 + $0xd0] sm:$0xff]  }
  0x21   : > { %v3165_v59 = vld [vmem:[%s3429_s28 + $0xf4] ss:$20 sps:$4 sm:$0xff]   ;;  %v3164_v62 = vld [vmem:[%s4249_s1 + $0xd8] sm:$0xff]   ;;  %v3170_v0 = vld [vmem:[%s3429_s28 + $0x230] ss:$20 sps:$4 sm:$0xff]  }
  0x22   : > { %v3167_v60 = vld [vmem:[%s3429_s28 + $0x234] ss:$20 sps:$4 sm:$0xff]   ;;  %v3171_v2 = vld [vmem:[%s4249_s1 + $0xe0] sm:$0xff]   ;;  %v3174_v3 = vld [vmem:[%s3429_s28 + $0x11c] ss:$20 sps:$4 sm:$0xff]  }
  0x23   : > { %1540 = vmatpush1.bf16.msra.mxu0 %v3104_v7  ;;  %2934 = vmatpush1.bf16.msra.mxu1 %v3104_v7  ;;  %v3176_v4 = vld [vmem:[%s3429_s28 + $0x25c] ss:$20 sps:$4 sm:$0xff]   ;;  %v3173_v5 = vld [vmem:[%s4249_s1 + $0xe8] sm:$0xff]  }
  0x24   : > { %1541 = vmatprep.subr.bf16.mxu0 %v3371_v1  ;;  %2919 = vmatprep.subr.bf16.mxu1 %v3371_v1  ;;  %v3178_v6 = vld [vmem:[%s3429_s28 + $0x118] ss:$20 sps:$4 sm:$0xff]   ;;  %v3180_v8 = vld [vmem:[%s4249_s1 + $0xf0] sm:$0xff]  }
  0x25   : > { %v3179_v7 = vld [vmem:[%s3429_s28 + $0x258] ss:$20 sps:$4 sm:$0xff]  }
  0x27   : > { %1542 = vmatpush1.bf16.msra.mxu0 %v3105_v9  ;;  %2935 = vmatpush1.bf16.msra.mxu1 %v3105_v9  ;;  %v3182_v9 = vld [vmem:[%s3429_s28 + $0x284] ss:$20 sps:$4 sm:$0xff]  }
  0x28   : > { %1543 = vmatprep.subr.bf16.mxu0 %v3371_v1  ;;  %2920 = vmatprep.subr.bf16.mxu1 %v3371_v1 }
  0x2b   : > { %1544 = vmatpush1.bf16.msra.mxu0 %v3106_v10  ;;  %2936 = vmatpush1.bf16.msra.mxu1 %v3106_v10  ;;  %v3186_v10 = vld [vmem:[%s3429_s28 + $0xc] ss:$20 sps:$4 sm:$0xff]  }
  0x2c   : > { %1545 = vmatprep.subr.bf16.mxu0 %v3371_v1  ;;  %2921 = vmatprep.subr.bf16.mxu1 %v3371_v1 }
  0x2f   : > { %1546 = vmatpush1.bf16.msra.mxu0 %v3107_v11  ;;  %2937 = vmatpush1.bf16.msra.mxu1 %v3107_v11  ;;  %v3181_v11 = vld [vmem:[%s4249_s1 + $0xf8] sm:$0xff]  }
  0x30   : > { %1547 = vmatprep.subr.bf16.mxu0 %v3371_v1  ;;  %2922 = vmatprep.subr.bf16.mxu1 %v3371_v1 }
  0x33   : > { %1548 = vmatpush1.bf16.msra.mxu0 %v3108_v12  ;;  %2938 = vmatpush1.bf16.msra.mxu1 %v3108_v12  ;;  %v3184_v12 = vld [vmem:[%s3429_s28 + $0x8] ss:$20 sps:$4 sm:$0xff]  }
  0x34   : > { %1549 = vmatprep.subr.bf16.mxu0 %v3371_v1  ;;  %2923 = vmatprep.subr.bf16.mxu1 %v3371_v1 }
  0x37   : > { %1550 = vmatpush1.bf16.msra.mxu0 %v3109_v13  ;;  %2939 = vmatpush1.bf16.msra.mxu1 %v3109_v13  ;;  %v3187_v13 = vld [vmem:[%s3429_s28 + $0x280] ss:$20 sps:$4 sm:$0xff]  }
  0x38   : > { %1551 = vmatprep.subr.bf16.mxu0 %v3371_v1  ;;  %2924 = vmatprep.subr.bf16.mxu1 %v3371_v1 }
  0x3b   : > { %1552 = vmatpush1.bf16.msra.mxu0 %v3110_v14  ;;  %2940 = vmatpush1.bf16.msra.mxu1 %v3110_v14  ;;  %v3188_v14 = vld [vmem:[%s3429_s28 + $0x2ac] ss:$20 sps:$4 sm:$0xff]  }
  0x3c   : > { %1553 = vmatprep.subr.bf16.mxu0 %v3371_v1  ;;  %2925 = vmatprep.subr.bf16.mxu1 %v3371_v1 }
  0x3f   : > { %1554 = vmatpush1.bf16.msra.mxu0 %v3111_v15  ;;  %2941 = vmatpush1.bf16.msra.mxu1 %v3111_v15  ;;  %v3190_v15 = vld [vmem:[%s3429_s28 + $0x34] ss:$20 sps:$4 sm:$0xff]  }
  0x40   : > { %1555 = vmatprep.subr.bf16.mxu0 %v3371_v1  ;;  %2926 = vmatprep.subr.bf16.mxu1 %v3371_v1 }
  0x43   : > { %1556 = vmatpush1.bf16.msra.mxu0 %v3112_v16  ;;  %2942 = vmatpush1.bf16.msra.mxu1 %v3112_v16  ;;  %v3192_v16 = vld [vmem:[%s3429_s28 + $0x2a8] ss:$20 sps:$4 sm:$0xff]  }
  0x44   : > { %1557 = vmatprep.subr.bf16.mxu0 %v3371_v1  ;;  %2927 = vmatprep.subr.bf16.mxu1 %v3371_v1 }
  0x47   : > { %1558 = vmatpush1.bf16.msra.mxu0 %v3113_v17  ;;  %2943 = vmatpush1.bf16.msra.mxu1 %v3113_v17  ;;  %v3193_v17 = vld [vmem:[%s3429_s28 + $0x30] ss:$20 sps:$4 sm:$0xff]  }
  0x48   : > { %1559 = vmatprep.subr.bf16.mxu0 %v3371_v1  ;;  %2928 = vmatprep.subr.bf16.mxu1 %v3371_v1 }
  0x4b   : > { %1560 = vmatpush1.bf16.msra.mxu0 %v3114_v18  ;;  %2944 = vmatpush1.bf16.msra.mxu1 %v3114_v18  ;;  %v3195_v18 = vld [vmem:[%s3429_s28 + $0x2d4] ss:$20 sps:$4 sm:$0xff]  }
  0x4c   : > { %1818 = vmatprep.subr.bf16.mxu0 %v3371_v1  ;;  %2833 = vmatprep.subr.bf16.mxu1 %v3122_v19 }
  0x4e   : > { %1562 = vmatmul.mubr.bf16.vlgmr.msra.gmra.mrb[0].mxu0 %v3115_v20  ;;  %1626 = vmatmul.mubr.bf16.vlgmr.msra.gmra.mrb[0].mxu1 %v3118_v21  ;;  %v3200_v20 = vld [vmem:[%s3429_s28 + $0x58] ss:$20 sps:$4 sm:$0xff]   ;;  %v3201_v21 = vld [vmem:[%s3429_s28 + $0x2fc] ss:$20 sps:$4 sm:$0xff]  }
  0x4f   : > { %1819 = vmatpush1.bf16.msra.mxu0 %v3121_v22  ;;  %2834 = vmatpush3.bf16.msra.mxu1 %v3122_v19  ;;  %v3199_v19 = vld [vmem:[%s3429_s28 + $0x2d0] ss:$20 sps:$4 sm:$0xff]  }
  0x50   : > { %1820 = vmatprep.subr.bf16.mxu0 %v3371_v1  ;;  %1569 = vmatprep.mubr.bf16.mxu0 %v3124_v23  ;;  %v3203_v22 = vld [vmem:[%s3429_s28 + $0x84] ss:$20 sps:$4 sm:$0xff]  }
  0x51   : > { %1633 = vmatprep.mubr.bf16.mxu1 %v3126_v24  ;;  %2835 = vmatprep.subr.bf16.mxu1 %v3147_v25  ;;  %v3205_v23 = vld [vmem:[%s3429_s28 + $0x2f8] ss:$20 sps:$4 sm:$0xff]   ;;  %v3206_v24 = vld [vmem:[%s3429_s28 + $0x80] ss:$20 sps:$4 sm:$0xff]  }
  0x53   : > { %1821 = vmatpush1.bf16.msra.mxu0 %v3123_v26  ;;  %2836 = vmatpush3.bf16.msra.mxu1 %v3147_v25  ;;  %v3207_v25 = vld [vmem:[%s3429_s28 + $0x324] ss:$20 sps:$4 sm:$0xff]   ;;  %v3209_v26 = vld [vmem:[%s3429_s28 + $0xac] ss:$20 sps:$4 sm:$0xff]  }
  0x54   : > { %1822 = vmatprep.subr.bf16.mxu0 %v3371_v1  ;;  %2837 = vmatprep.subr.bf16.mxu1 %v3172_v27 }
  0x56   : > { %1570 = vmatmul.mubr.bf16.gmra.mrb[4].mxu0 %v3128_v28  ;;  %1634 = vmatmul.mubr.bf16.gmra.mrb[4].mxu1 %v3129_v29  ;;  %v3212_v28 = vld [vmem:[%s3429_s28 + $0xa8] ss:$20 sps:$4 sm:$0xff]   ;;  %v3214_v29 = vld [vmem:[%s3429_s28 + $0x34c] ss:$20 sps:$4 sm:$0xff]  }
  0x57   : > { %1823 = vmatpush1.bf16.msra.mxu0 %v3130_v30  ;;  %1577 = vmatprep.mubr.bf16.mxu0 %v3132_v31  ;;  %v3216_v30 = vld [vmem:[%s3429_s28 + $0xd4] ss:$20 sps:$4 sm:$0xff]  }
  0x58   : > { %1824 = vmatprep.subr.bf16.mxu0 %v3371_v1  ;;  %1641 = vmatprep.mubr.bf16.mxu1 %v3134_v32  ;;  %v3218_v31 = vld [vmem:[%s3429_s28 + $0x348] ss:$20 sps:$4 sm:$0xff]   ;;  %v3219_v32 = vld [vmem:[%s3429_s28 + $0xd0] ss:$20 sps:$4 sm:$0xff]  }
  0x59   : > { %2838 = vmatpush3.bf16.msra.mxu1 %v3172_v27  ;;  %v3211_v27 = vld [vmem:[%s3429_s28 + $0x320] ss:$20 sps:$4 sm:$0xff]  }
  0x5a   : > { %2839 = vmatprep.subr.bf16.mxu1 %v3194_v33 }
  0x5b   : > { %1825 = vmatpush1.bf16.msra.mxu0 %v3131_v34  ;;  %v3222_v34 = vld [vmem:[%s3429_s28 + $0xfc] ss:$20 sps:$4 sm:$0xff]  }
  0x5c   : > { %1826 = vmatprep.subr.bf16.mxu0 %v3371_v1 }
  0x5d   : > { %2840 = vmatpush3.bf16.msra.mxu1 %v3194_v33  ;;  %v3220_v33 = vld [vmem:[%s3429_s28 + $0x374] ss:$20 sps:$4 sm:$0xff]  }
  0x5e   : > { %1578 = vmatmul.mubr.bf16.gmra.mrb[8].mxu0 %v3136_v35  ;;  %1642 = vmatmul.mubr.bf16.gmra.mrb[8].mxu1 %v3137_v36  ;;  %v3224_v35 = vld [vmem:[%s3429_s28 + $0x370] ss:$20 sps:$4 sm:$0xff]   ;;  %v3225_v36 = vld [vmem:[%s3429_s28 + $0xf8] ss:$20 sps:$4 sm:$0xff]  }
  0x5f   : > { %1827 = vmatpush1.bf16.msra.mxu0 %v3138_v37  ;;  %1585 = vmatprep.mubr.bf16.mxu0 %v3140_v38  ;;  %v3226_v37 = vld [vmem:[%s3429_s28 + $0x39c] ss:$20 sps:$4 sm:$0xff]   ;;  %v3228_v38 = vld [vmem:[%s3429_s28 + $0x124] ss:$20 sps:$4 sm:$0xff]  }
  0x60   : > { %1828 = vmatprep.subr.bf16.mxu0 %v3371_v1  ;;  %1649 = vmatprep.mubr.bf16.mxu1 %v3142_v39  ;;  %v3230_v39 = vld [vmem:[%s3429_s28 + $0x398] ss:$20 sps:$4 sm:$0xff]  }
  0x61   : > { %2841 = vmatprep.subr.bf16.mxu1 %v3213_v40 }
  0x62   : > { %2842 = vmatpush3.bf16.msra.mxu1 %v3213_v40  ;;  %v3231_v40 = vld [vmem:[%s3429_s28 + $0x120] ss:$20 sps:$4 sm:$0xff]  }
  0x63   : > { %1829 = vmatpush1.bf16.msra.mxu0 %v3139_v41  ;;  %2843 = vmatprep.subr.bf16.mxu1 %v3232_v42  ;;  %v3233_v41 = vld [vmem:[%s3429_s28 + $0x3c4] ss:$20 sps:$4 sm:$0xff]  }
  0x64   : > { %1830 = vmatprep.subr.bf16.mxu0 %v3371_v1 }
  0x66   : > { %1586 = vmatmul.mubr.bf16.gmra.mrb[12].mxu0 %v3144_v43  ;;  %1650 = vmatmul.mubr.bf16.gmra.mrb[12].mxu1 %v3145_v44  ;;  %v3237_v43 = vld [vmem:[%s3429_s28 + $0x3c0] ss:$20 sps:$4 sm:$0xff]   ;;  %v3238_v44 = vld [vmem:[%s3429_s28 + $0x148] ss:$20 sps:$4 sm:$0xff]  }
  0x67   : > { %1831 = vmatpush1.bf16.msra.mxu0 %v3146_v45  ;;  %1593 = vmatprep.mubr.bf16.mxu0 %v3149_v46  ;;  %v3239_v45 = vld [vmem:[%s3429_s28 + $0x3ec] ss:$20 sps:$4 sm:$0xff]   ;;  %v3241_v46 = vld [vmem:[%s3429_s28 + $0x174] ss:$20 sps:$4 sm:$0xff]  }
  0x68   : > { %1832 = vmatprep.subr.bf16.mxu0 %v3371_v1  ;;  %1657 = vmatprep.mubr.bf16.mxu1 %v3151_v47  ;;  %v3243_v47 = vld [vmem:[%s3429_s28 + $0x3e8] ss:$20 sps:$4 sm:$0xff]  }
  0x69   : > { %2844 = vmatpush3.bf16.msra.mxu1 %v3232_v42  ;;  %v3235_v42 = vld [vmem:[%s3429_s28 + $0x14c] ss:$20 sps:$4 sm:$0xff]  }
  0x6a   : > { %2845 = vmatprep.subr.bf16.mxu1 %v3251_v48 }
  0x6b   : > { %1833 = vmatpush1.bf16.msra.mxu0 %v3148_v49  ;;  %v3245_v49 = vld [vmem:[%s3429_s28 + $0x414] ss:$20 sps:$4 sm:$0xff]  }
  0x6c   : > { %1834 = vmatprep.subr.bf16.mxu0 %v3371_v1 }
  0x6d   : > { %2846 = vmatpush3.bf16.msra.mxu1 %v3251_v48  ;;  %v3244_v48 = vld [vmem:[%s3429_s28 + $0x170] ss:$20 sps:$4 sm:$0xff]  }
  0x6e   : > { %1594 = vmatmul.mubr.bf16.gmra.mrb[16].mxu0 %v3153_v50  ;;  %1658 = vmatmul.mubr.bf16.gmra.mrb[16].mxu1 %v3154_v51  ;;  %v3247_v50 = vld [vmem:[%s3429_s28 + $0x19c] ss:$20 sps:$4 sm:$0xff]  }
  0x6f   : > { %1835 = vmatpush1.bf16.msra.mxu0 %v3155_v52  ;;  %1601 = vmatprep.mubr.bf16.mxu0 %v3157_v53  ;;  %v3249_v51 = vld [vmem:[%s3429_s28 + $0x410] ss:$20 sps:$4 sm:$0xff]   ;;  %v3250_v52 = vld [vmem:[%s3429_s28 + $0x198] ss:$20 sps:$4 sm:$0xff]  }
  0x70   : > { %1836 = vmatprep.subr.bf16.mxu0 %v3371_v1  ;;  %1665 = vmatprep.mubr.bf16.mxu1 %v3159_v54  ;;  %v3252_v53 = vld [vmem:[%s3429_s28 + $0x43c] ss:$20 sps:$4 sm:$0xff]   ;;  %v3254_v54 = vld [vmem:[%s3429_s28 + $0x1c4] ss:$20 sps:$4 sm:$0xff]  }
  0x71   : > { %2847 = vmatprep.subr.bf16.mxu1 %v3270_v61 }
  0x72   : > { %2848 = vmatpush3.bf16.msra.mxu1 %v3270_v61  ;;  %v3264_v61 = vld [vmem:[%s3429_s28 + $0x48c] ss:$20 sps:$4 sm:$0xff]  }
  0x73   : > { %1837 = vmatpush1.bf16.msra.mxu0 %v3156_v55  ;;  %v3256_v55 = vld [vmem:[%s3429_s28 + $0x438] ss:$20 sps:$4 sm:$0xff]  }
  0x74   : > { %1838 = vmatprep.subr.bf16.mxu0 %v3371_v1 }
  0x76   : > { %1602 = vmatmul.mubr.bf16.gmra.mrb[20].mxu0 %v3161_v56  ;;  %1666 = vmatmul.mubr.bf16.gmra.mrb[20].mxu1 %v3162_v57  ;;  %v3257_v56 = vld [vmem:[%s3429_s28 + $0x1c0] ss:$20 sps:$4 sm:$0xff]   ;;  %v3258_v57 = vld [vmem:[%s3429_s28 + $0x464] ss:$20 sps:$4 sm:$0xff]  }
  0x77   : > { %1839 = vmatpush1.bf16.msra.mxu0 %v3163_v58  ;;  %1609 = vmatprep.mubr.bf16.mxu0 %v3165_v59  ;;  %v3260_v58 = vld [vmem:[%s3429_s28 + $0x1ec] ss:$20 sps:$4 sm:$0xff]  }
  0x78   : > { %1840 = vmatprep.subr.bf16.mxu0 %v3371_v1  ;;  %1673 = vmatprep.mubr.bf16.mxu1 %v3167_v60  ;;  %v3262_v59 = vld [vmem:[%s3429_s28 + $0x460] ss:$20 sps:$4 sm:$0xff]   ;;  %v3263_v60 = vld [vmem:[%s3429_s28 + $0x1e8] ss:$20 sps:$4 sm:$0xff]  }
  0x7b   : > { %1841 = vmatpush1.bf16.msra.mxu0 %v3164_v62  ;;  %v3266_v62 = vld [vmem:[%s3429_s28 + $0x214] ss:$20 sps:$4 sm:$0xff]  }
  0x7c   : > { %1842 = vmatprep.subr.bf16.mxu0 %v3371_v1 }
  0x7e   : > { %1610 = vmatmul.mubr.bf16.gmra.mrb[24].mxu0 %v3169_v63  ;;  %1674 = vmatmul.mubr.bf16.gmra.mrb[24].mxu1 %v3170_v0  ;;  %v3268_v63 = vld [vmem:[%s3429_s28 + $0x488] ss:$20 sps:$4 sm:$0xff]   ;;  %v3269_v0 = vld [vmem:[%s3429_s28 + $0x210] ss:$20 sps:$4 sm:$0xff]  }
  0x7f   : > { %1843 = vmatpush1.bf16.msra.mxu0 %v3171_v2  ;;  %1617 = vmatprep.mubr.bf16.mxu0 %v3174_v3  ;;  %v3271_v2 = vld [vmem:[%s3429_s28 + $0x4b4] ss:$20 sps:$4 sm:$0xff]   ;;  %v3273_v3 = vld [vmem:[%s3429_s28 + $0x23c] ss:$20 sps:$4 sm:$0xff]  }
  0x80   : > { %1844 = vmatprep.subr.bf16.mxu0 %v3371_v1  ;;  %1681 = vmatprep.mubr.bf16.mxu1 %v3176_v4  ;;  %v3275_v4 = vld [vmem:[%s3429_s28 + $0x4b0] ss:$20 sps:$4 sm:$0xff]  }
  0x83   : > { %1845 = vmatpush1.bf16.msra.mxu0 %v3173_v5  ;;  %v3276_v5 = vld [vmem:[%s3429_s28 + $0x238] ss:$20 sps:$4 sm:$0xff]  }
  0x84   : > { %1846 = vmatprep.subr.bf16.mxu0 %v3371_v1 }
  0x86   : > { %1618 = vmatmul.mubr.bf16.gmra.mrb[28].mxu0 %v3178_v6  ;;  %1682 = vmatmul.mubr.bf16.gmra.mrb[28].mxu1 %v3179_v7  ;;  %v3277_v6 = vld [vmem:[%s3429_s28 + $0x4dc] ss:$20 sps:$4 sm:$0xff]   ;;  %v3279_v7 = vld [vmem:[%s3429_s28 + $0x264] ss:$20 sps:$4 sm:$0xff]  }
  0x87   : > { %1847 = vmatpush1.bf16.msra.mxu0 %v3180_v8  ;;  %1689 = vmatprep.mubr.bf16.mxu1 %v3182_v9  ;;  %v3281_v8 = vld [vmem:[%s3429_s28 + $0x4d8] ss:$20 sps:$4 sm:$0xff]   ;;  %v3282_v9 = vld [vmem:[%s3429_s28 + $0x260] ss:$20 sps:$4 sm:$0xff]  }
  0x88   : > { %1848 = vmatprep.subr.bf16.mxu0 %v3371_v1  ;;  %1850 = vmatprep.mubr.bf16.mxu0 %v3186_v10  ;;  %v3197_v1 = vld [vmem:[%s3429_s28 + $0x5c] ss:$20 sps:$4 sm:$0xff]   ;;  %v3283_v10 = vld [vmem:[%s3429_s28 + $0x28c] ss:$20 sps:$4 sm:$0xff]  }
  0x8b   : > { %1849 = vmatpush1.bf16.msra.mxu0 %v3181_v11  ;;  %v3285_v11 = vld [vmem:[%s3429_s28 + $0x10] ss:$20 sps:$4 sm:$0xff]  }
  0x8e   : > { %1690 = vmatmul.mubr.bf16.gmra.mrb[32].mxu1 %v3187_v13  ;;  %1851 = vmatmul.mubr.bf16.vlgmr.msra.gmra.mrb[0].mxu0 %v3184_v12  ;;  %v3286_v12 = vld [vmem:[%s3429_s28 + $0x288] ss:$20 sps:$4 sm:$0xff]   ;;  %v3287_v13 = vld [vmem:[%s3429_s28 + $0x38] ss:$20 sps:$4 sm:$0xff]  }
  0x8f   : > { %1697 = vmatprep.mubr.bf16.mxu1 %v3188_v14  ;;  %1858 = vmatprep.mubr.bf16.mxu0 %v3190_v15  ;;  %v3288_v14 = vld [vmem:[%s3429_s28 + $0x2b4] ss:$20 sps:$4 sm:$0xff]  }
  0x90   : > { %v3290_v15 = vld [vmem:[%s3429_s28 + $0x60] ss:$20 sps:$4 sm:$0xff]  }
  0x96   : > { %1698 = vmatmul.mubr.bf16.gmra.mrb[36].mxu1 %v3192_v16  ;;  %1859 = vmatmul.mubr.bf16.gmra.mrb[4].mxu0 %v3193_v17  ;;  %v3291_v16 = vld [vmem:[%s3429_s28 + $0x2b0] ss:$20 sps:$4 sm:$0xff]   ;;  %v3292_v17 = vld [vmem:[%s3429_s28 + $0x88] ss:$20 sps:$4 sm:$0xff]  }
  0x97   : > { %1705 = vmatprep.mubr.bf16.mxu1 %v3195_v18  ;;  %1866 = vmatprep.mubr.bf16.mxu0 %v3197_v1  ;;  %v3293_v18 = vld [vmem:[%s3429_s28 + $0x2dc] ss:$20 sps:$4 sm:$0xff]  }
  0x98   : > { %v3295_v1 = vld [vmem:[%s3429_s28 + $0xb0] ss:$20 sps:$4 sm:$0xff]  }
  0x9e   : > { %1706 = vmatmul.mubr.bf16.gmra.mrb[40].mxu1 %v3199_v19  ;;  %1867 = vmatmul.mubr.bf16.gmra.mrb[8].mxu0 %v3200_v20  ;;  %v3296_v19 = vld [vmem:[%s3429_s28 + $0x2d8] ss:$20 sps:$4 sm:$0xff]  }
  0x9f   : > { %1713 = vmatprep.mubr.bf16.mxu1 %v3201_v21  ;;  %1874 = vmatprep.mubr.bf16.mxu0 %v3203_v22  ;;  %v3297_v20 = vld [vmem:[%s3429_s28 + $0xd8] ss:$20 sps:$4 sm:$0xff]   ;;  %v3300_v22 = vld [vmem:[%s3429_s28 + $0x100] ss:$20 sps:$4 sm:$0xff]  }
  0xa0   : > { %v3298_v21 = vld [vmem:[%s3429_s28 + $0x304] ss:$20 sps:$4 sm:$0xff]  }
  0xa6   : > { %1714 = vmatmul.mubr.bf16.gmra.mrb[44].mxu1 %v3205_v23  ;;  %1875 = vmatmul.mubr.bf16.gmra.mrb[12].mxu0 %v3206_v24 }
  0xa7   : > { %1721 = vmatprep.mubr.bf16.mxu1 %v3207_v25  ;;  %1882 = vmatprep.mubr.bf16.mxu0 %v3209_v26  ;;  %v3301_v25 = vld [vmem:[%s3429_s28 + $0x300] ss:$20 sps:$4 sm:$0xff]   ;;  %v3302_v26 = vld [vmem:[%s3429_s28 + $0x128] ss:$20 sps:$4 sm:$0xff]  }
  0xae   : > { %1722 = vmatmul.mubr.bf16.gmra.mrb[48].mxu1 %v3211_v27  ;;  %1883 = vmatmul.mubr.bf16.gmra.mrb[16].mxu0 %v3212_v28  ;;  %v3303_v28 = vld [vmem:[%s3429_s28 + $0x32c] ss:$20 sps:$4 sm:$0xff]  }
  0xaf   : > { %1729 = vmatprep.mubr.bf16.mxu1 %v3214_v29  ;;  %1890 = vmatprep.mubr.bf16.mxu0 %v3216_v30  ;;  %v3305_v29 = vld [vmem:[%s3429_s28 + $0x150] ss:$20 sps:$4 sm:$0xff]  }
  0xb6   : > { %1730 = vmatmul.mubr.bf16.gmra.mrb[52].mxu1 %v3218_v31  ;;  %1891 = vmatmul.mubr.bf16.gmra.mrb[20].mxu0 %v3219_v32 }
  0xb7   : > { %1737 = vmatprep.mubr.bf16.mxu1 %v3220_v33  ;;  %1898 = vmatprep.mubr.bf16.mxu0 %v3222_v34  ;;  %v3306_v33 = vld [vmem:[%s3429_s28 + $0x328] ss:$20 sps:$4 sm:$0xff]   ;;  %v3307_v34 = vld [vmem:[%s3429_s28 + $0x178] ss:$20 sps:$4 sm:$0xff]  }
  0xbe   : > { %1738 = vmatmul.mubr.bf16.gmra.mrb[56].mxu1 %v3224_v35  ;;  %1899 = vmatmul.mubr.bf16.gmra.mrb[24].mxu0 %v3225_v36  ;;  %v3308_v36 = vld [vmem:[%s3429_s28 + $0x354] ss:$20 sps:$4 sm:$0xff]  }
  0xbf   : > { %1745 = vmatprep.mubr.bf16.mxu1 %v3226_v37  ;;  %1906 = vmatprep.mubr.bf16.mxu0 %v3228_v38  ;;  %v3310_v37 = vld [vmem:[%s3429_s28 + $0x1a0] ss:$20 sps:$4 sm:$0xff]  }
  0xc6   : > { %1746 = vmatmul.mubr.bf16.gmra.mrb[60].mxu1 %v3230_v39  ;;  %1907 = vmatmul.mubr.bf16.gmra.mrb[28].mxu0 %v3231_v40 }
  0xc7   : > { %1753 = vmatprep.mubr.bf16.mxu1 %v3233_v41  ;;  %1914 = vmatprep.mubr.bf16.mxu0 %v3235_v42  ;;  %v3311_v41 = vld [vmem:[%s3429_s28 + $0x350] ss:$20 sps:$4 sm:$0xff]   ;;  %v3312_v42 = vld [vmem:[%s3429_s28 + $0x1c8] ss:$20 sps:$4 sm:$0xff]  }
  0xce   : > { %1754 = vmatmul.mubr.bf16.gmra.mrb[64].mxu1 %v3237_v43  ;;  %1915 = vmatmul.mubr.bf16.gmra.mrb[32].mxu0 %v3238_v44  ;;  %v3313_v44 = vld [vmem:[%s3429_s28 + $0x37c] ss:$20 sps:$4 sm:$0xff]  }
  0xcf   : > { %1761 = vmatprep.mubr.bf16.mxu1 %v3239_v45  ;;  %1922 = vmatprep.mubr.bf16.mxu0 %v3241_v46  ;;  %v3315_v45 = vld [vmem:[%s3429_s28 + $0x1f0] ss:$20 sps:$4 sm:$0xff]  }
  0xd6   : > { %1762 = vmatmul.mubr.bf16.gmra.mrb[68].mxu1 %v3243_v47  ;;  %1923 = vmatmul.mubr.bf16.gmra.mrb[36].mxu0 %v3244_v48 }
  0xd7   : > { %1769 = vmatprep.mubr.bf16.mxu1 %v3245_v49  ;;  %1930 = vmatprep.mubr.bf16.mxu0 %v3247_v50  ;;  %v3316_v49 = vld [vmem:[%s3429_s28 + $0x378] ss:$20 sps:$4 sm:$0xff]  }
  0xd8   : > { %v3317_v50 = vld [vmem:[%s3429_s28 + $0x218] ss:$20 sps:$4 sm:$0xff]  }
  0xde   : > { %1770 = vmatmul.mubr.bf16.gmra.mrb[72].mxu1 %v3249_v51  ;;  %1931 = vmatmul.mubr.bf16.gmra.mrb[40].mxu0 %v3250_v52  ;;  %v3318_v52 = vld [vmem:[%s3429_s28 + $0x3a4] ss:$20 sps:$4 sm:$0xff]  }
  0xdf   : > { %1777 = vmatprep.mubr.bf16.mxu1 %v3252_v53  ;;  %1938 = vmatprep.mubr.bf16.mxu0 %v3254_v54  ;;  %v3320_v53 = vld [vmem:[%s3429_s28 + $0x240] ss:$20 sps:$4 sm:$0xff]  }
  0xe6   : > { %1778 = vmatmul.mubr.bf16.gmra.mrb[76].mxu1 %v3256_v55  ;;  %1939 = vmatmul.mubr.bf16.gmra.mrb[44].mxu0 %v3257_v56 }
  0xe7   : > { %1785 = vmatprep.mubr.bf16.mxu1 %v3258_v57  ;;  %1946 = vmatprep.mubr.bf16.mxu0 %v3260_v58  ;;  %v3321_v57 = vld [vmem:[%s3429_s28 + $0x3a0] ss:$20 sps:$4 sm:$0xff]   ;;  %v3322_v58 = vld [vmem:[%s3429_s28 + $0x268] ss:$20 sps:$4 sm:$0xff]  }
  0xee   : > { %1786 = vmatmul.mubr.bf16.gmra.mrb[80].mxu1 %v3262_v59  ;;  %1947 = vmatmul.mubr.bf16.gmra.mrb[48].mxu0 %v3263_v60  ;;  %v3323_v60 = vld [vmem:[%s3429_s28 + $0x3cc] ss:$20 sps:$4 sm:$0xff]  }
  0xef   : > { %1793 = vmatprep.mubr.bf16.mxu1 %v3264_v61  ;;  %1954 = vmatprep.mubr.bf16.mxu0 %v3266_v62  ;;  %v3325_v61 = vld [vmem:[%s3429_s28 + $0x290] ss:$20 sps:$4 sm:$0xff]  }
  0xf6   : > { %1794 = vmatmul.mubr.bf16.gmra.mrb[84].mxu1 %v3268_v63  ;;  %1955 = vmatmul.mubr.bf16.gmra.mrb[52].mxu0 %v3269_v0 }
  0xf7   : > { %1801 = vmatprep.mubr.bf16.mxu1 %v3271_v2  ;;  %1962 = vmatprep.mubr.bf16.mxu0 %v3273_v3  ;;  %v3326_v2 = vld [vmem:[%s3429_s28 + $0x3c8] ss:$20 sps:$4 sm:$0xff]   ;;  %v3327_v3 = vld [vmem:[%s3429_s28 + $0x2b8] ss:$20 sps:$4 sm:$0xff]  }
  0xfe   : > { %1802 = vmatmul.mubr.bf16.gmra.mrb[88].mxu1 %v3275_v4  ;;  %1963 = vmatmul.mubr.bf16.gmra.mrb[56].mxu0 %v3276_v5  ;;  %v3328_v5 = vld [vmem:[%s3429_s28 + $0x3f4] ss:$20 sps:$4 sm:$0xff]  }
  0xff   : > { %1809 = vmatprep.mubr.bf16.mxu1 %v3277_v6  ;;  %1970 = vmatprep.mubr.bf16.mxu0 %v3279_v7  ;;  %v3330_v6 = vld [vmem:[%s3429_s28 + $0x2e0] ss:$20 sps:$4 sm:$0xff]  }
 0x106   : > { %1810 = vmatmul.mubr.bf16.gmra.mrb[92].mxu1 %v3281_v8  ;;  %1971 = vmatmul.mubr.bf16.gmra.mrb[60].mxu0 %v3282_v9 }
 0x107   : > { %1978 = vmatprep.mubr.bf16.mxu0 %v3283_v10  ;;  %2849 = vmatprep.mubr.bf16.mxu1 %v3285_v11  ;;  %v3331_v10 = vld [vmem:[%s3429_s28 + $0x3f0] ss:$20 sps:$4 sm:$0xff]   ;;  %v3332_v11 = vld [vmem:[%s3429_s28 + $0x308] ss:$20 sps:$4 sm:$0xff]  }
 0x10e   : > { %1979 = vmatmul.mubr.bf16.gmra.mrb[64].mxu0 %v3286_v12  ;;  %2850 = vmatmul.mubr.bf16.vlgmr.msra.gmra.mrb[96].mxu1 %v3287_v13  ;;  %v3333_v13 = vld [vmem:[%s3429_s28 + $0x41c] ss:$20 sps:$4 sm:$0xff]  }
 0x10f   : > { %1986 = vmatprep.mubr.bf16.mxu0 %v3288_v14  ;;  %2853 = vmatprep.mubr.bf16.mxu1 %v3290_v15  ;;  %v3335_v14 = vld [vmem:[%s3429_s28 + $0x330] ss:$20 sps:$4 sm:$0xff]  }
 0x116   : > { %1987 = vmatmul.mubr.bf16.gmra.mrb[68].mxu0 %v3291_v16  ;;  %2854 = vmatmul.mubr.bf16.gmra.mrb[100].mxu1 %v3292_v17 }
 0x117   : > { %1994 = vmatprep.mubr.bf16.mxu0 %v3293_v18  ;;  %2857 = vmatprep.mubr.bf16.mxu1 %v3295_v1  ;;  %v3336_v18 = vld [vmem:[%s3429_s28 + $0x418] ss:$20 sps:$4 sm:$0xff]  }
 0x118   : > { %v3337_v1 = vld [vmem:[%s3429_s28 + $0x358] ss:$20 sps:$4 sm:$0xff]  }
 0x11e   : > { %1995 = vmatmul.mubr.bf16.gmra.mrb[72].mxu0 %v3296_v19  ;;  %2858 = vmatmul.mubr.bf16.gmra.mrb[104].mxu1 %v3297_v20  ;;  %v3338_v20 = vld [vmem:[%s3429_s28 + $0x444] ss:$20 sps:$4 sm:$0xff]  }
 0x11f   : > { %2002 = vmatprep.mubr.bf16.mxu0 %v3298_v21  ;;  %2861 = vmatprep.mubr.bf16.mxu1 %v3300_v22  ;;  %v3340_v21 = vld [vmem:[%s3429_s28 + $0x380] ss:$20 sps:$4 sm:$0xff]  }
 0x121   : > { %v3686_v23 = vpop.f32.mrb[0].mxu1 }
 0x122   : > { %v1629_v24 = vpop.f32.mrb[1].mxu1 }
 0x123   : > { %v3690_v27 = vpop.f32.mrb[2].mxu1 }
 0x124   : > { %v1632_v30 = vpop.f32.mrb[3].mxu1 }
 0x125   : > { %v3342_v30 = vld [vmem:[%s3429_s28 + $0x3a8] ss:$20 sps:$4 sm:$0xff]  }
 0x126   : > { %2003 = vmatmul.mubr.bf16.gmra.mrb[76].mxu0 %v3301_v25  ;;  %2862 = vmatmul.mubr.bf16.gmra.mrb[108].mxu1 %v3302_v26 }
 0x127   : > { %2010 = vmatprep.mubr.bf16.mxu0 %v3303_v28  ;;  %2865 = vmatprep.mubr.bf16.mxu1 %v3305_v29  ;;  %v3341_v29 = vld [vmem:[%s3429_s28 + $0x440] ss:$20 sps:$4 sm:$0xff]  }
 0x129   : > { %v3694_v31 = vpop.f32.mrb[4].mxu1 }
 0x12a   : > { %v1637_v32 = vpop.f32.mrb[5].mxu1 }
 0x12b   : > { %v3698_v35 = vpop.f32.mrb[6].mxu1 }
 0x12c   : > { %v1640_v38 = vpop.f32.mrb[7].mxu1 }
 0x12e   : > { %2011 = vmatmul.mubr.bf16.gmra.mrb[80].mxu0 %v3306_v33  ;;  %2866 = vmatmul.mubr.bf16.gmra.mrb[112].mxu1 %v3307_v34  ;;  %v3343_v34 = vld [vmem:[%s3429_s28 + $0x46c] ss:$20 sps:$4 sm:$0xff]  }
 0x12f   : > { %2018 = vmatprep.mubr.bf16.mxu0 %v3308_v36  ;;  %2869 = vmatprep.mubr.bf16.mxu1 %v3310_v37  ;;  %v3345_v36 = vld [vmem:[%s3429_s28 + $0x3d0] ss:$20 sps:$4 sm:$0xff]  }
 0x131   : > { %v3702_v39 = vpop.f32.mrb[8].mxu1 }
 0x132   : > { %v1645_v40 = vpop.f32.mrb[9].mxu1 }
 0x133   : > { %v3706_v43 = vpop.f32.mrb[10].mxu1 }
 0x134   : > { %v1648_v46 = vpop.f32.mrb[11].mxu1 }
 0x135   : > { %v3347_v46 = vld [vmem:[%s3429_s28 + $0x3f8] ss:$20 sps:$4 sm:$0xff]  }
 0x136   : > { %2019 = vmatmul.mubr.bf16.gmra.mrb[84].mxu0 %v3311_v41  ;;  %2870 = vmatmul.mubr.bf16.gmra.mrb[116].mxu1 %v3312_v42 }
 0x137   : > { %2026 = vmatprep.mubr.bf16.mxu0 %v3313_v44  ;;  %2873 = vmatprep.mubr.bf16.mxu1 %v3315_v45  ;;  %v3346_v45 = vld [vmem:[%s3429_s28 + $0x468] ss:$20 sps:$4 sm:$0xff]  }
 0x139   : > { %v3710_v47 = vpop.f32.mrb[12].mxu1 }
 0x13a   : > { %v1653_v48 = vpop.f32.mrb[13].mxu1 }
 0x13b   : > { %v3714_v51 = vpop.f32.mrb[14].mxu1 }
 0x13c   : > { %v1656_v54 = vpop.f32.mrb[15].mxu1 }
 0x13e   : > { %2027 = vmatmul.mubr.bf16.gmra.mrb[88].mxu0 %v3316_v49  ;;  %2874 = vmatmul.mubr.bf16.gmra.mrb[120].mxu1 %v3317_v50  ;;  %v3348_v50 = vld [vmem:[%s3429_s28 + $0x494] ss:$20 sps:$4 sm:$0xff]  }
 0x13f   : > { %2034 = vmatprep.mubr.bf16.mxu0 %v3318_v52  ;;  %2877 = vmatprep.mubr.bf16.mxu1 %v3320_v53  ;;  %v3350_v52 = vld [vmem:[%s3429_s28 + $0x420] ss:$20 sps:$4 sm:$0xff]  }
 0x141   : > { %v3718_v55 = vpop.f32.mrb[16].mxu1 }
 0x142   : > { %v1661_v56 = vpop.f32.mrb[17].mxu1 }
 0x143   : > { %v3722_v59 = vpop.f32.mrb[18].mxu1 }
 0x144   : > { %v1664_v62 = vpop.f32.mrb[19].mxu1 }
 0x145   : > { %v3352_v62 = vld [vmem:[%s3429_s28 + $0x448] ss:$20 sps:$4 sm:$0xff]  }
 0x146   : > { %2035 = vmatmul.mubr.bf16.gmra.mrb[92].mxu0 %v3321_v57  ;;  %2878 = vmatmul.mubr.bf16.gmra.mrb[124].mxu1 %v3322_v58 }
 0x147   : > { %2042 = vmatprep.mubr.bf16.mxu0 %v3323_v60  ;;  %2881 = vmatprep.mubr.bf16.mxu1 %v3325_v61  ;;  %v3351_v61 = vld [vmem:[%s3429_s28 + $0x490] ss:$20 sps:$4 sm:$0xff]  }
 0x149   : > { %v3726_v63 = vpop.f32.mrb[20].mxu1 }
 0x14a   : > { %v1669_v0 = vpop.f32.mrb[21].mxu1 }
 0x14b   : > { %v3730_v4 = vpop.f32.mrb[22].mxu1 }
 0x14c   : > { %v1672_v7 = vpop.f32.mrb[23].mxu1 }
 0x14e   : > { %2043 = vmatmul.mubr.bf16.gmra.mrb[96].mxu0 %v3326_v2  ;;  %2882 = vmatmul.mubr.bf16.gmra.mrb[128].mxu1 %v3327_v3  ;;  %v3353_v3 = vld [vmem:[%s3429_s28 + $0x4bc] ss:$20 sps:$4 sm:$0xff]  }
 0x14f   : > { %2050 = vmatprep.mubr.bf16.mxu0 %v3328_v5  ;;  %2885 = vmatprep.mubr.bf16.mxu1 %v3330_v6  ;;  %v3355_v5 = vld [vmem:[%s3429_s28 + $0x470] ss:$20 sps:$4 sm:$0xff]  }
 0x151   : > { %v3734_v8 = vpop.f32.mrb[24].mxu1 }
 0x152   : > { %v1677_v9 = vpop.f32.mrb[25].mxu1 }
 0x153   : > { %v3738_v12 = vpop.f32.mrb[26].mxu1 }
 0x154   : > { %v1680_v15 = vpop.f32.mrb[27].mxu1 }
 0x155   : > { %v3357_v15 = vld [vmem:[%s3429_s28 + $0x498] ss:$20 sps:$4 sm:$0xff]  }
 0x156   : > { %2051 = vmatmul.mubr.bf16.gmra.mrb[100].mxu0 %v3331_v10  ;;  %2886 = vmatmul.mubr.bf16.gmra.mrb[132].mxu1 %v3332_v11 }
 0x157   : > { %2058 = vmatprep.mubr.bf16.mxu0 %v3333_v13  ;;  %2889 = vmatprep.mubr.bf16.mxu1 %v3335_v14  ;;  %v3356_v14 = vld [vmem:[%s3429_s28 + $0x4b8] ss:$20 sps:$4 sm:$0xff]  }
 0x159   : > { %v3742_v16 = vpop.f32.mrb[28].mxu1 }
 0x15a   : > { %v1685_v17 = vpop.f32.mrb[29].mxu1 }
 0x15b   : > { %v3746_v19 = vpop.f32.mrb[30].mxu1 }
 0x15c   : > { %v1688_v22 = vpop.f32.mrb[31].mxu1 }
 0x15e   : > { %2059 = vmatmul.mubr.bf16.gmra.mrb[104].mxu0 %v3336_v18  ;;  %2890 = vmatmul.mubr.bf16.gmra.mrb[136].mxu1 %v3337_v1  ;;  %v3358_v1 = vld [vmem:[%s3429_s28 + $0x4e4] ss:$20 sps:$4 sm:$0xff]  }
 0x15f   : > { %2066 = vmatprep.mubr.bf16.mxu0 %v3338_v20  ;;  %2893 = vmatprep.mubr.bf16.mxu1 %v3340_v21  ;;  %v3360_v20 = vld [vmem:[%s3429_s28 + $0x4c0] ss:$20 sps:$4 sm:$0xff]  }
 0x161   : > { %v3750_v24 = vpop.f32.mrb[32].mxu1  ;;  %v3752_v25 = vpop.f32.mrb[0].mxu0 }
 0x162   : > { %v1693_v26 = vpop.f32.mrb[33].mxu1  ;;  %v1854_v28 = vpop.f32.mrb[1].mxu0 }
 0x163   : > { %v3756_v32 = vpop.f32.mrb[34].mxu1  ;;  %v3758_v33 = vpop.f32.mrb[2].mxu0 }
 0x164   : > { %v1696_v37 = vpop.f32.mrb[35].mxu1  ;;  %v1857_v38 = vpop.f32.mrb[3].mxu0 }
 0x166   : > { %2067 = vmatmul.mubr.bf16.gmra.mrb[108].mxu0 %v3341_v29  ;;  %2894 = vmatmul.mubr.bf16.gmra.mrb[140].mxu1 %v3342_v30 }
 0x167   : > { %2074 = vmatprep.mubr.bf16.mxu0 %v3343_v34  ;;  %2897 = vmatprep.mubr.bf16.mxu1 %v3345_v36  ;;  %v3361_v34 = vld [vmem:[%s3429_s28 + $0x4e0] ss:$20 sps:$4 sm:$0xff]   ;;  %v3362_v36 = vld [vmem:[%s3429_s28 + $0x4e8] ss:$20 sps:$4 sm:$0xff]  }
 0x169   : > { %v3762_v40 = vpop.f32.mrb[36].mxu1  ;;  %v3764_v41 = vpop.f32.mrb[4].mxu0 }
 0x16a   : > { %v1701_v42 = vpop.f32.mrb[37].mxu1  ;;  %v1862_v44 = vpop.f32.mrb[5].mxu0 }
 0x16b   : > { %v3768_v48 = vpop.f32.mrb[38].mxu1  ;;  %v3770_v49 = vpop.f32.mrb[6].mxu0 }
 0x16c   : > { %v1704_v53 = vpop.f32.mrb[39].mxu1  ;;  %v1865_v54 = vpop.f32.mrb[7].mxu0 }
 0x16e   : > { %2075 = vmatmul.mubr.bf16.gmra.mrb[112].mxu0 %v3346_v45  ;;  %2898 = vmatmul.mubr.bf16.gmra.mrb[144].mxu1 %v3347_v46 }
 0x16f   : > { %2082 = vmatprep.mubr.bf16.mxu0 %v3348_v50  ;;  %2901 = vmatprep.mubr.bf16.mxu1 %v3350_v52 }
 0x171   : > { %v3774_v56 = vpop.f32.mrb[40].mxu1  ;;  %v3776_v57 = vpop.f32.mrb[8].mxu0 }
 0x172   : > { %v1709_v58 = vpop.f32.mrb[41].mxu1  ;;  %v1870_v60 = vpop.f32.mrb[9].mxu0 }
 0x173   : > { %v3780_v0 = vpop.f32.mrb[42].mxu1  ;;  %v3782_v2 = vpop.f32.mrb[10].mxu0 }
 0x174   : > { %v1712_v6 = vpop.f32.mrb[43].mxu1  ;;  %v1873_v7 = vpop.f32.mrb[11].mxu0 }
 0x176   : > { %2083 = vmatmul.mubr.bf16.gmra.mrb[116].mxu0 %v3351_v61  ;;  %2902 = vmatmul.mubr.bf16.gmra.mrb[148].mxu1 %v3352_v62 }
 0x177   : > { %2090 = vmatprep.mubr.bf16.mxu0 %v3353_v3  ;;  %2905 = vmatprep.mubr.bf16.mxu1 %v3355_v5 }
 0x179   : > { %v3786_v9 = vpop.f32.mrb[44].mxu1  ;;  %v3788_v10 = vpop.f32.mrb[12].mxu0 }
 0x17a   : > { %v1717_v11 = vpop.f32.mrb[45].mxu1  ;;  %v1878_v13 = vpop.f32.mrb[13].mxu0 }
 0x17b   : > { %v3792_v17 = vpop.f32.mrb[46].mxu1  ;;  %v3794_v18 = vpop.f32.mrb[14].mxu0 }
 0x17c   : > { %v1720_v21 = vpop.f32.mrb[47].mxu1  ;;  %v1881_v22 = vpop.f32.mrb[15].mxu0 }
 0x17e   : > { %2091 = vmatmul.mubr.bf16.gmra.mrb[120].mxu0 %v3356_v14  ;;  %2906 = vmatmul.mubr.bf16.gmra.mrb[152].mxu1 %v3357_v15 }
 0x17f   : > { %2098 = vmatprep.mubr.bf16.mxu0 %v3358_v1  ;;  %2909 = vmatprep.mubr.bf16.mxu1 %v3360_v20 }
 0x181   : > { %v3798_v26 = vpop.f32.mrb[48].mxu1  ;;  %v3800_v28 = vpop.f32.mrb[16].mxu0 }
 0x182   : > { %v1725_v29 = vpop.f32.mrb[49].mxu1  ;;  %v1886_v30 = vpop.f32.mrb[17].mxu0 }
 0x183   : > { %v3804_v37 = vpop.f32.mrb[50].mxu1  ;;  %v3806_v38 = vpop.f32.mrb[18].mxu0 }
 0x184   : > { %v1728_v42 = vpop.f32.mrb[51].mxu1  ;;  %v1889_v44 = vpop.f32.mrb[19].mxu0 }
 0x186   : > { %2099 = vmatmul.mubr.bf16.gmra.mrb[124].mxu0 %v3361_v34  ;;  %2910 = vmatmul.mubr.bf16.gmra.mrb[156].mxu1 %v3362_v36  ;;  %v3835_v34 = vld [vmem:[%s4250_s2] ss:$0 sm:$0xff] }
 0x187   : > { %v1628_v36 = vadd.f32 %v3835_v34, %v3686_v23  ;;  %v1636_v23 = vadd.f32 %v3835_v34, %v3694_v31  ;;  %v1644_v31 = vadd.f32 %v3835_v34, %v3702_v39  ;;  %v1652_v39 = vadd.f32 %v3835_v34, %v3710_v47 }
 0x188   : > { %v1660_v47 = vadd.f32 %v3835_v34, %v3718_v55  ;;  %v1668_v55 = vadd.f32 %v3835_v34, %v3726_v63  ;;  %v1676_v63 = vadd.f32 %v3835_v34, %v3734_v8  ;;  %v1684_v8 = vadd.f32 %v3835_v34, %v3742_v16 }
 0x189   : > { %v3808_v45 = vpop.f32.mrb[52].mxu1  ;;  %v3810_v46 = vpop.f32.mrb[20].mxu0  ;;  %v1692_v16 = vadd.f32 %v3835_v34, %v3750_v24 }
 0x18a   : > { %v1733_v50 = vpop.f32.mrb[53].mxu1  ;;  %v1894_v52 = vpop.f32.mrb[21].mxu0 }
 0x18b   : > { %v3812_v53 = vpop.f32.mrb[54].mxu1  ;;  %v3814_v54 = vpop.f32.mrb[22].mxu0  ;;  %v1631_v50 = vadd.f32 %v3835_v34, %v3690_v27  ;;  %v1639_v27 = vadd.f32 %v3835_v34, %v3698_v35  ;;  %v1647_v35 = vadd.f32 %v3835_v34, %v3706_v43  ;;  %v1655_v43 = vadd.f32 %v3835_v34, %v3714_v51 }
 0x18c   : > { %v1736_v58 = vpop.f32.mrb[55].mxu1  ;;  %v1897_v60 = vpop.f32.mrb[23].mxu0  ;;  %v1663_v51 = vadd.f32 %v3835_v34, %v3722_v59  ;;  %v1671_v59 = vadd.f32 %v3835_v34, %v3730_v4  ;;  %v1679_v4 = vadd.f32 %v3835_v34, %v3738_v12  ;;  %v1687_v12 = vadd.f32 %v3835_v34, %v3746_v19 }
 0x18d   : > { %v2945_v19 = vadd.f32 %v3835_v34, %v3752_v25 }
 0x191   : > { %v3816_v61 = vpop.f32.mrb[56].mxu1  ;;  %v3818_v62 = vpop.f32.mrb[24].mxu0 }
 0x192   : > { %v1741_v3 = vpop.f32.mrb[57].mxu1  ;;  %v1902_v5 = vpop.f32.mrb[25].mxu0 }
 0x193   : > { %v3820_v6 = vpop.f32.mrb[58].mxu1  ;;  %v3822_v7 = vpop.f32.mrb[26].mxu0 }
 0x194   : > { %v1744_v11 = vpop.f32.mrb[59].mxu1  ;;  %v1905_v13 = vpop.f32.mrb[27].mxu0 }
 0x199   : > { %v3824_v14 = vpop.f32.mrb[60].mxu1  ;;  %v3826_v15 = vpop.f32.mrb[28].mxu0 }
 0x19a   : > { %v1749_v1 = vpop.f32.mrb[61].mxu1  ;;  %v1910_v20 = vpop.f32.mrb[29].mxu0 }
 0x19b   : > { %v3828_v21 = vpop.f32.mrb[62].mxu1  ;;  %v3830_v22 = vpop.f32.mrb[30].mxu0 }
 0x19c   : > { %v1752_v29 = vpop.f32.mrb[63].mxu1  ;;  %v1913_v30 = vpop.f32.mrb[31].mxu0 }
 0x1a1   : > { %v3839_v42 = vpop.f32.mrb[64].mxu1  ;;  %v1916_v44 = vpop.f32.mrb[32].mxu0 }
 0x1a2   : > { %v3843_v52 = vadd.f32 %v1916_v44, %v1628_v36  ;;  %v1757_v58 = vpop.f32.mrb[65].mxu1  ;;  %v1918_v60 = vpop.f32.mrb[33].mxu0 }
 0x1a3   : > { %v3845_v3 = vpop.f32.mrb[66].mxu1  ;;  %v1919_v5 = vpop.f32.mrb[34].mxu0 }
 0x1a4   : > { %v3847_v11 = vadd.f32 %v1919_v5, %v1631_v50  ;;  %v1760_v13 = vpop.f32.mrb[67].mxu1  ;;  %v1921_v1 = vpop.f32.mrb[35].mxu0 }
 0x1a9   : > { %v3851_v20 = vpop.f32.mrb[68].mxu1  ;;  %v1924_v29 = vpop.f32.mrb[36].mxu0 }
 0x1aa   : > { %4252 = vst [vmem:[#allocation2_spill] sm:$0xff] %v3851_v20  ;;  %v3855_v30 = vadd.f32 %v1924_v29, %v1636_v23  ;;  %v1765_v36 = vpop.f32.mrb[69].mxu1  ;;  %v1926_v44 = vpop.f32.mrb[37].mxu0 }
 0x1ab   : > { %v3857_v58 = vpop.f32.mrb[70].mxu1  ;;  %v1927_v60 = vpop.f32.mrb[38].mxu0 }
 0x1ac   : > { %4253 = vst [vmem:[#allocation3_spill] sm:$0xff] %v3857_v58  ;;  %v3859_v50 = vadd.f32 %v1927_v60, %v1639_v27  ;;  %v1768_v5 = vpop.f32.mrb[71].mxu1  ;;  %v1929_v13 = vpop.f32.mrb[39].mxu0 }
 0x1b1   : > { %v3863_v1 = vpop.f32.mrb[72].mxu1  ;;  %v1932_v20 = vpop.f32.mrb[40].mxu0 }
 0x1b2   : > { %4254 = vst [vmem:[#allocation4_spill] sm:$0xff] %v3863_v1  ;;  %v3867_v23 = vadd.f32 %v1932_v20, %v1644_v31  ;;  %v1773_v29 = vpop.f32.mrb[73].mxu1  ;;  %v1934_v36 = vpop.f32.mrb[41].mxu0 }
 0x1b3   : > { %v3869_v44 = vpop.f32.mrb[74].mxu1  ;;  %v1935_v58 = vpop.f32.mrb[42].mxu0 }
 0x1b4   : > { %4255 = vst [vmem:[#allocation5_spill] sm:$0xff] %v3869_v44  ;;  %v3871_v27 = vadd.f32 %v1935_v58, %v1647_v35  ;;  %v1776_v60 = vpop.f32.mrb[75].mxu1  ;;  %v1937_v5 = vpop.f32.mrb[43].mxu0 }
 0x1b9   : > { %v3875_v13 = vpop.f32.mrb[76].mxu1  ;;  %v1940_v1 = vpop.f32.mrb[44].mxu0 }
 0x1ba   : > { %4256 = vst [vmem:[#allocation6_spill] sm:$0xff] %v3875_v13  ;;  %v3879_v20 = vadd.f32 %v1940_v1, %v1652_v39  ;;  %v1781_v31 = vpop.f32.mrb[77].mxu1  ;;  %v1942_v29 = vpop.f32.mrb[45].mxu0 }
 0x1bb   : > { %v3881_v36 = vpop.f32.mrb[78].mxu1  ;;  %v1943_v44 = vpop.f32.mrb[46].mxu0 }
 0x1bc   : > { %4257 = vst [vmem:[#allocation7_spill] sm:$0xff] %v3881_v36  ;;  %v3883_v58 = vadd.f32 %v1943_v44, %v1655_v43  ;;  %v1784_v35 = vpop.f32.mrb[79].mxu1  ;;  %v1945_v60 = vpop.f32.mrb[47].mxu0 }
 0x1c1   : > { %v3887_v5 = vpop.f32.mrb[80].mxu1  ;;  %v1948_v13 = vpop.f32.mrb[48].mxu0 }
 0x1c2   : > { %4258 = vst [vmem:[#allocation8_spill] sm:$0xff] %v3887_v5  ;;  %v3891_v1 = vadd.f32 %v1948_v13, %v1660_v47  ;;  %v1789_v39 = vpop.f32.mrb[81].mxu1  ;;  %v1950_v31 = vpop.f32.mrb[49].mxu0 }
 0x1c3   : > { %v3893_v29 = vpop.f32.mrb[82].mxu1  ;;  %v1951_v36 = vpop.f32.mrb[50].mxu0 }
 0x1c4   : > { %4259 = vst [vmem:[#allocation9_spill] sm:$0xff] %v3893_v29  ;;  %v3895_v44 = vadd.f32 %v1951_v36, %v1663_v51  ;;  %v1792_v43 = vpop.f32.mrb[83].mxu1  ;;  %v1953_v35 = vpop.f32.mrb[51].mxu0 }
 0x1c9   : > { %v3899_v60 = vpop.f32.mrb[84].mxu1  ;;  %v1956_v5 = vpop.f32.mrb[52].mxu0 }
 0x1ca   : > { %4260 = vst [vmem:[#allocation10_spill] sm:$0xff] %v3899_v60  ;;  %v3903_v13 = vadd.f32 %v1956_v5, %v1668_v55  ;;  %v1797_v47 = vpop.f32.mrb[85].mxu1  ;;  %v1958_v39 = vpop.f32.mrb[53].mxu0 }
 0x1cb   : > { %v3905_v31 = vpop.f32.mrb[86].mxu1  ;;  %v1959_v29 = vpop.f32.mrb[54].mxu0 }
 0x1cc   : > { %4261 = vst [vmem:[#allocation11_spill] sm:$0xff] %v3905_v31  ;;  %v3907_v36 = vadd.f32 %v1959_v29, %v1671_v59  ;;  %v1800_v51 = vpop.f32.mrb[87].mxu1  ;;  %v1961_v43 = vpop.f32.mrb[55].mxu0 }
 0x1d1   : > { %v3911_v35 = vpop.f32.mrb[88].mxu1  ;;  %v1964_v60 = vpop.f32.mrb[56].mxu0 }
 0x1d2   : > { %4262 = vst [vmem:[#allocation12_spill] sm:$0xff] %v3911_v35  ;;  %v3915_v5 = vadd.f32 %v1964_v60, %v1676_v63  ;;  %v1805_v55 = vpop.f32.mrb[89].mxu1  ;;  %v1966_v47 = vpop.f32.mrb[57].mxu0 }
 0x1d3   : > { %v3917_v39 = vpop.f32.mrb[90].mxu1  ;;  %v1967_v31 = vpop.f32.mrb[58].mxu0 }
 0x1d4   : > { %4263 = vst [vmem:[#allocation13_spill] sm:$0xff] %v3917_v39  ;;  %v3919_v29 = vadd.f32 %v1967_v31, %v1679_v4  ;;  %v1808_v59 = vpop.f32.mrb[91].mxu1  ;;  %v1969_v51 = vpop.f32.mrb[59].mxu0 }
 0x1d9   : > { %v3923_v43 = vpop.f32.mrb[92].mxu1  ;;  %v1972_v35 = vpop.f32.mrb[60].mxu0 }
 0x1da   : > { %4264 = vst [vmem:[#allocation14_spill] sm:$0xff] %v3923_v43  ;;  %v3927_v60 = vadd.f32 %v1972_v35, %v1684_v8  ;;  %v1813_v63 = vpop.f32.mrb[93].mxu1  ;;  %v1974_v55 = vpop.f32.mrb[61].mxu0  ;;  %v2947_v43 = vadd.f32 %v3835_v34, %v3764_v41  ;;  %v2946_v41 = vadd.f32 %v3835_v34, %v3758_v33 }
 0x1db   : > { %v3929_v47 = vpop.f32.mrb[94].mxu1  ;;  %v1975_v31 = vpop.f32.mrb[62].mxu0  ;;  %v1695_v63 = vadd.f32 %v3835_v34, %v3756_v32 }
 0x1dc   : > { %4265 = vst [vmem:[#allocation15_spill] sm:$0xff] %v3929_v47  ;;  %v3931_v4 = vadd.f32 %v1975_v31, %v1687_v12  ;;  %v1816_v59 = vpop.f32.mrb[95].mxu1  ;;  %v1977_v51 = vpop.f32.mrb[63].mxu0  ;;  %v2948_v12 = vadd.f32 %v3835_v34, %v3770_v49 }
 0x1e1   : > { %v1980_v35 = vpop.f32.mrb[64].mxu0  ;;  %v2851_v8 = vpop.f32.mrb[96].mxu1 }
 0x1e2   : > { %v3944_v55 = vadd.f32 %v1980_v35, %v1692_v16  ;;  %v2150_v31 = vadd.f32 %v2947_v43, %v2851_v8  ;;  %v1982_v59 = vpop.f32.mrb[65].mxu0  ;;  %v2141_v24 = vpop.f32.mrb[97].mxu1 }
 0x1e3   : > { %v2142_v25 = vadd.f32 %v2945_v19, %v2141_v24  ;;  %v1983_v32 = vpop.f32.mrb[66].mxu0  ;;  %v2852_v49 = vpop.f32.mrb[98].mxu1  ;;  %v1700_v19 = vadd.f32 %v3835_v34, %v3762_v40  ;;  %v2951_v24 = vadd.f32 %v3835_v34, %v3788_v10 }
 0x1e4   : > { %v2398_v51 = vmax.f32 %v2150_v31, 0.0  ;;  %v3953_v43 = vadd.f32 %v1983_v32, %v1695_v63  ;;  %v2153_v16 = vadd.f32 %v2948_v12, %v2852_v49  ;;  %v1985_v35 = vpop.f32.mrb[67].mxu0  ;;  %v2144_v8 = vpop.f32.mrb[99].mxu1  ;;  %v2949_v63 = vadd.f32 %v3835_v34, %v3776_v57 }
 0x1e5   : > { %v2396_v33 = vmax.f32 %v2142_v25, 0.0  ;;  %v2145_v59 = vadd.f32 %v2946_v41, %v2144_v8  ;;  %v1703_v41 = vadd.f32 %v3835_v34, %v3768_v48  ;;  %v2952_v25 = vadd.f32 %v3835_v34, %v3794_v18 }
 0x1e6   : > { %2463 = vst.msk [vmem:[%s3951_s30 + $0x10] sm:$0xff] %vm2460_vm0, %v2398_v51  ;;  %v2399_v47 = vmax.f32 %v2153_v16, 0.0  ;;  %v2950_v57 = vadd.f32 %v3835_v34, %v3782_v2  ;;  %v1708_v2 = vadd.f32 %v3835_v34, %v3774_v56 }
 0x1e7   : > { %2461 = vst.msk [vmem:[%s3951_s30] sm:$0xff] %vm2460_vm0, %v2396_v33  ;;  %v2397_v39 = vmax.f32 %v2145_v59, 0.0 }
 0x1e8   : > { %2464 = vst.msk [vmem:[%s3951_s30 + $0x18] sm:$0xff] %vm2460_vm0, %v2399_v47 }
 0x1e9   : > { %2462 = vst.msk [vmem:[%s3951_s30 + $0x8] sm:$0xff] %vm2460_vm0, %v2397_v39  ;;  %v1988_v12 = vpop.f32.mrb[68].mxu0  ;;  %v2855_v31 = vpop.f32.mrb[100].mxu1 }
 0x1ea   : > { %v3973_v40 = vadd.f32 %v1988_v12, %v1700_v19  ;;  %v2166_v32 = vadd.f32 %v2951_v24, %v2855_v31  ;;  %v1990_v10 = vpop.f32.mrb[69].mxu0  ;;  %v2157_v47 = vpop.f32.mrb[101].mxu1  ;;  %v2953_v12 = vadd.f32 %v3835_v34, %v3800_v28  ;;  %v2954_v28 = vadd.f32 %v3835_v34, %v3806_v38 }
 0x1eb   : > { %v2158_v49 = vadd.f32 %v2949_v63, %v2157_v47  ;;  %v1991_v39 = vpop.f32.mrb[70].mxu0  ;;  %v2856_v51 = vpop.f32.mrb[102].mxu1  ;;  %v2955_v63 = vadd.f32 %v3835_v34, %v3810_v46  ;;  %v1716_v38 = vadd.f32 %v3835_v34, %v3786_v9 }
 0x1ec   : > { %v2402_v16 = vmax.f32 %v2166_v32, 0.0  ;;  %v3977_v48 = vadd.f32 %v1991_v39, %v1703_v41  ;;  %v2169_v35 = vadd.f32 %v2952_v25, %v2856_v51  ;;  %v1993_v18 = vpop.f32.mrb[71].mxu0  ;;  %v2160_v8 = vpop.f32.mrb[103].mxu1  ;;  %v1711_v25 = vadd.f32 %v3835_v34, %v3780_v0 }
 0x1ed   : > { %v2400_v33 = vmax.f32 %v2158_v49, 0.0  ;;  %v2161_v59 = vadd.f32 %v2950_v57, %v2160_v8  ;;  %v2956_v32 = vadd.f32 %v3835_v34, %v3814_v54 }
 0x1ee   : > { %2467 = vst.msk [vmem:[%s3951_s30 + $0x30] sm:$0xff] %vm2460_vm0, %v2402_v16  ;;  %v2403_v19 = vmax.f32 %v2169_v35, 0.0 }
 0x1ef   : > { %2465 = vst.msk [vmem:[%s3951_s30 + $0x20] sm:$0xff] %vm2460_vm0, %v2400_v33  ;;  %v2401_v24 = vmax.f32 %v2161_v59, 0.0 }
 0x1f0   : > { %2468 = vst.msk [vmem:[%s3951_s30 + $0x38] sm:$0xff] %vm2460_vm0, %v2403_v19  ;;  %v2959_v19 = vadd.f32 %v3835_v34, %v3826_v15 }
 0x1f1   : > { %2466 = vst.msk [vmem:[%s3951_s30 + $0x28] sm:$0xff] %vm2460_vm0, %v2401_v24  ;;  %v1996_v31 = vpop.f32.mrb[72].mxu0  ;;  %v2859_v41 = vpop.f32.mrb[104].mxu1  ;;  %v2957_v24 = vadd.f32 %v3835_v34, %v3818_v62  ;;  %v2958_v62 = vadd.f32 %v3835_v34, %v3822_v7  ;;  %v1724_v7 = vadd.f32 %v3835_v34, %v3798_v26 }
 0x1f2   : > { %v3997_v56 = vadd.f32 %v1996_v31, %v1708_v2  ;;  %v2182_v10 = vadd.f32 %v2955_v63, %v2859_v41  ;;  %v1998_v46 = vpop.f32.mrb[73].mxu0  ;;  %v2173_v47 = vpop.f32.mrb[105].mxu1  ;;  %v2960_v31 = vadd.f32 %v3835_v34, %v3830_v22 }
 0x1f3   : > { %v2174_v57 = vadd.f32 %v2953_v12, %v2173_v47  ;;  %v1999_v49 = vpop.f32.mrb[74].mxu0  ;;  %v2860_v39 = vpop.f32.mrb[106].mxu1  ;;  %v1719_v12 = vadd.f32 %v3835_v34, %v3792_v17 }
 0x1f4   : > { %v2406_v51 = vmax.f32 %v2182_v10, 0.0  ;;  %v4001_v0 = vadd.f32 %v1999_v49, %v1711_v25  ;;  %v2185_v16 = vadd.f32 %v2956_v32, %v2860_v39  ;;  %v2001_v54 = vpop.f32.mrb[75].mxu0  ;;  %v2176_v35 = vpop.f32.mrb[107].mxu1 }
 0x1f5   : > { %v2404_v18 = vmax.f32 %v2174_v57, 0.0  ;;  %v2177_v8 = vadd.f32 %v2954_v28, %v2176_v35 }
 0x1f6   : > { %2471 = vst.msk [vmem:[%s3951_s30 + $0x50] sm:$0xff] %vm2460_vm0, %v2406_v51  ;;  %v2407_v33 = vmax.f32 %v2185_v16, 0.0 }
 0x1f7   : > { %2469 = vst.msk [vmem:[%s3951_s30 + $0x40] sm:$0xff] %vm2460_vm0, %v2404_v18  ;;  %v2405_v59 = vmax.f32 %v2177_v8, 0.0  ;;  %v1727_v18 = vadd.f32 %v3835_v34, %v3804_v37 }
 0x1f8   : > { %2472 = vst.msk [vmem:[%s3951_s30 + $0x58] sm:$0xff] %vm2460_vm0, %v2407_v33 }
 0x1f9   : > { %2470 = vst.msk [vmem:[%s3951_s30 + $0x48] sm:$0xff] %vm2460_vm0, %v2405_v59  ;;  %v2004_v2 = vpop.f32.mrb[76].mxu0  ;;  %v2863_v63 = vpop.f32.mrb[108].mxu1 }
 0x1fa   : > { %v4021_v9 = vadd.f32 %v2004_v2, %v1716_v38  ;;  %v2198_v41 = vadd.f32 %v2959_v19, %v2863_v63  ;;  %v2006_v15 = vpop.f32.mrb[77].mxu0  ;;  %v2189_v25 = vpop.f32.mrb[109].mxu1 }
 0x1fb   : > { %v2190_v32 = vadd.f32 %v2957_v24, %v2189_v25  ;;  %v2007_v10 = vpop.f32.mrb[78].mxu0  ;;  %v2864_v46 = vpop.f32.mrb[110].mxu1 }
 0x1fc   : > { %v2410_v47 = vmax.f32 %v2198_v41, 0.0  ;;  %v4025_v17 = vadd.f32 %v2007_v10, %v1719_v12  ;;  %v2201_v28 = vadd.f32 %v2960_v31, %v2864_v46  ;;  %v2009_v22 = vpop.f32.mrb[79].mxu0  ;;  %v2192_v57 = vpop.f32.mrb[111].mxu1 }
 0x1fd   : > { %v2408_v49 = vmax.f32 %v2190_v32, 0.0  ;;  %v2193_v39 = vadd.f32 %v2958_v62, %v2192_v57  ;;  %v1735_v32 = vadd.f32 %v3835_v34, %v3812_v53 }
 0x1fe   : > { %2475 = vst.msk [vmem:[%s3951_s30 + $0x70] sm:$0xff] %vm2460_vm0, %v2410_v47  ;;  %v2411_v51 = vmax.f32 %v2201_v28, 0.0 }
 0x1ff   : > { %2473 = vst.msk [vmem:[%s3951_s30 + $0x60] sm:$0xff] %vm2460_vm0, %v2408_v49  ;;  %v2409_v16 = vmax.f32 %v2193_v39, 0.0 }
 0x200   : > { %2476 = vst.msk [vmem:[%s3951_s30 + $0x78] sm:$0xff] %vm2460_vm0, %v2411_v51 }
 0x201   : > { %2474 = vst.msk [vmem:[%s3951_s30 + $0x68] sm:$0xff] %vm2460_vm0, %v2409_v16  ;;  %v2012_v54 = vpop.f32.mrb[80].mxu0  ;;  %v2867_v35 = vpop.f32.mrb[112].mxu1 }
 0x202   : > { %v4039_v8 = vadd.f32 %v2012_v54, %v1724_v7  ;;  %v2214_v33 = vadd.f32 %v2867_v35, %v3855_v30  ;;  %v2014_v59 = vpop.f32.mrb[81].mxu0  ;;  %v2205_v38 = vpop.f32.mrb[113].mxu1 }
 0x203   : > { %v2206_v26 = vadd.f32 %v2205_v38, %v3843_v52  ;;  %v2015_v19 = vpop.f32.mrb[82].mxu0  ;;  %v2868_v24 = vpop.f32.mrb[114].mxu1  ;;  %v1732_v52 = vadd.f32 %v3835_v34, %v3808_v45 }
 0x204   : > { %v2414_v2 = vmax.f32 %v2214_v33, 0.0  ;;  %v4043_v63 = vadd.f32 %v2015_v19, %v1727_v18  ;;  %v2217_v12 = vadd.f32 %v2868_v24, %v3859_v50  ;;  %v2017_v31 = vpop.f32.mrb[83].mxu0  ;;  %v2208_v37 = vpop.f32.mrb[115].mxu1  ;;  %v1743_v18 = vadd.f32 %v3835_v34, %v3820_v6 }
 0x205   : > { %v2412_v41 = vmax.f32 %v2206_v26, 0.0  ;;  %v2209_v15 = vadd.f32 %v2208_v37, %v3847_v11 }
 0x206   : > { %2479 = vst.msk [vmem:[%s3951_s30 + $0x90] sm:$0xff] %vm2460_vm0, %v2414_v2  ;;  %v2415_v30 = vmax.f32 %v2217_v12, 0.0 }
 0x207   : > { %2477 = vst.msk [vmem:[%s3951_s30 + $0x80] sm:$0xff] %vm2460_vm0, %v2412_v41  ;;  %v2413_v25 = vmax.f32 %v2209_v15, 0.0 }
 0x208   : > { %2480 = vst.msk [vmem:[%s3951_s30 + $0x98] sm:$0xff] %vm2460_vm0, %v2415_v30 }
 0x209   : > { %2478 = vst.msk [vmem:[%s3951_s30 + $0x88] sm:$0xff] %vm2460_vm0, %v2413_v25  ;;  %v2020_v62 = vpop.f32.mrb[84].mxu0  ;;  %v2871_v50 = vpop.f32.mrb[116].mxu1  ;;  %v1751_v25 = vadd.f32 %v3835_v34, %v3828_v21 }
 0x20a   : > { %v4059_v11 = vadd.f32 %v2020_v62, %v1732_v52  ;;  %v2230_v10 = vadd.f32 %v2871_v50, %v3879_v20  ;;  %v2022_v46 = vpop.f32.mrb[85].mxu0  ;;  %v2221_v47 = vpop.f32.mrb[117].mxu1 }
 0x20b   : > { %v2222_v45 = vadd.f32 %v2221_v47, %v3867_v23  ;;  %v2023_v28 = vpop.f32.mrb[86].mxu0  ;;  %v2872_v22 = vpop.f32.mrb[118].mxu1  ;;  %v1740_v23 = vadd.f32 %v3835_v34, %v3816_v61 }
 0x20c   : > { %v2418_v57 = vmax.f32 %v2230_v10, 0.0  ;;  %v4063_v49 = vadd.f32 %v2023_v28, %v1735_v32  ;;  %v2233_v39 = vadd.f32 %v2872_v22, %v3883_v58  ;;  %v2025_v51 = vpop.f32.mrb[87].mxu0  ;;  %v2224_v53 = vpop.f32.mrb[119].mxu1 }
 0x20d   : > { %v2416_v16 = vmax.f32 %v2222_v45, 0.0  ;;  %v2225_v7 = vadd.f32 %v2224_v53, %v3871_v27  ;;  %v1759_v53 = vadd.f32 %v3835_v34, %v3845_v3 }
 0x20e   : > { %2483 = vst.msk [vmem:[%s3951_s30 + $0xb0] sm:$0xff] %vm2460_vm0, %v2418_v57  ;;  %v2419_v20 = vmax.f32 %v2233_v39, 0.0 }
 0x20f   : > { %2481 = vst.msk [vmem:[%s3951_s30 + $0xa0] sm:$0xff] %vm2460_vm0, %v2416_v16  ;;  %v2417_v54 = vmax.f32 %v2225_v7, 0.0 }
 0x210   : > { %2484 = vst.msk [vmem:[%s3951_s30 + $0xb8] sm:$0xff] %vm2460_vm0, %v2419_v20 }
 0x211   : > { %2482 = vst.msk [vmem:[%s3951_s30 + $0xa8] sm:$0xff] %vm2460_vm0, %v2417_v54  ;;  %v2028_v35 = vpop.f32.mrb[88].mxu0  ;;  %v2875_v58 = vpop.f32.mrb[120].mxu1 }
 0x212   : > { %v4079_v27 = vadd.f32 %v2028_v35, %v1740_v23  ;;  %v2246_v33 = vadd.f32 %v2875_v58, %v3903_v13  ;;  %v2030_v59 = vpop.f32.mrb[89].mxu0  ;;  %v2237_v38 = vpop.f32.mrb[121].mxu1 }
 0x213   : > { %v2238_v61 = vadd.f32 %v2237_v38, %v3891_v1  ;;  %v2031_v26 = vpop.f32.mrb[90].mxu0  ;;  %v2876_v19 = vpop.f32.mrb[122].mxu1  ;;  %v1748_v1 = vadd.f32 %v3835_v34, %v3824_v14 }
 0x214   : > { %v2422_v24 = vmax.f32 %v2246_v33, 0.0  ;;  %v4083_v2 = vadd.f32 %v2031_v26, %v1743_v18  ;;  %v2249_v12 = vadd.f32 %v2876_v19, %v3907_v36  ;;  %v2033_v31 = vpop.f32.mrb[91].mxu0  ;;  %v2240_v6 = vpop.f32.mrb[123].mxu1 }
 0x215   : > { %v2420_v37 = vmax.f32 %v2238_v61, 0.0  ;;  %v2241_v41 = vadd.f32 %v2240_v6, %v3895_v44 }
 0x216   : > { %2487 = vst.msk [vmem:[%s3951_s30 + $0xd0] sm:$0xff] %vm2460_vm0, %v2422_v24  ;;  %v2423_v13 = vmax.f32 %v2249_v12, 0.0  ;;  %v4267_v24 = vld [vmem:[#allocation3_spill] sm:$0xff] }
 0x217   : > { %2485 = vst.msk [vmem:[%s3951_s30 + $0xc0] sm:$0xff] %vm2460_vm0, %v2420_v37  ;;  %v2421_v15 = vmax.f32 %v2241_v41, 0.0  ;;  %v1767_v12 = vadd.f32 %v3835_v34, %v4267_v24 }
 0x218   : > { %2488 = vst.msk [vmem:[%s3951_s30 + $0xd8] sm:$0xff] %vm2460_vm0, %v2423_v13 }
 0x219   : > { %2486 = vst.msk [vmem:[%s3951_s30 + $0xc8] sm:$0xff] %vm2460_vm0, %v2421_v15  ;;  %v2036_v30 = vpop.f32.mrb[92].mxu0  ;;  %v2879_v36 = vpop.f32.mrb[124].mxu1 }
 0x21a   : > { %v4099_v44 = vadd.f32 %v2036_v30, %v1748_v1  ;;  %v2262_v52 = vadd.f32 %v2879_v36, %v3927_v60  ;;  %v2038_v62 = vpop.f32.mrb[93].mxu0  ;;  %v2253_v50 = vpop.f32.mrb[125].mxu1 }
 0x21b   : > { %v2254_v14 = vadd.f32 %v2253_v50, %v3915_v5  ;;  %v2039_v32 = vpop.f32.mrb[94].mxu0  ;;  %v2880_v10 = vpop.f32.mrb[126].mxu1  ;;  %v1756_v5 = vadd.f32 %v3835_v34, %v3839_v42 }
 0x21c   : > { %v2426_v46 = vmax.f32 %v2262_v52, 0.0  ;;  %v4103_v47 = vadd.f32 %v2039_v32, %v1751_v25  ;;  %v2265_v45 = vadd.f32 %v2880_v10, %v3931_v4  ;;  %v2041_v28 = vpop.f32.mrb[95].mxu0  ;;  %v2256_v21 = vpop.f32.mrb[127].mxu1 }
 0x21d   : > { %v2424_v22 = vmax.f32 %v2254_v14, 0.0  ;;  %v2257_v57 = vadd.f32 %v2256_v21, %v3919_v29 }
 0x21e   : > { %2491 = vst.msk [vmem:[%s3951_s30 + $0xf0] sm:$0xff] %vm2460_vm0, %v2426_v46  ;;  %v2427_v60 = vmax.f32 %v2265_v45, 0.0  ;;  %v4269_v46 = vld [vmem:[#allocation5_spill] sm:$0xff] }
 0x21f   : > { %2489 = vst.msk [vmem:[%s3951_s30 + $0xe0] sm:$0xff] %vm2460_vm0, %v2424_v22  ;;  %v2425_v39 = vmax.f32 %v2257_v57, 0.0  ;;  %v1775_v45 = vadd.f32 %v3835_v34, %v4269_v46 }
 0x220   : > { %2492 = vst.msk [vmem:[%s3951_s30 + $0xf8] sm:$0xff] %vm2460_vm0, %v2427_v60 }
 0x221   : > { %2490 = vst.msk [vmem:[%s3951_s30 + $0xe8] sm:$0xff] %vm2460_vm0, %v2425_v39  ;;  %v2044_v51 = vpop.f32.mrb[96].mxu0  ;;  %v2883_v4 = vpop.f32.mrb[128].mxu1 }
 0x222   : > { %v4119_v29 = vadd.f32 %v2044_v51, %v1756_v5  ;;  %v2278_v16 = vadd.f32 %v2883_v4, %v3973_v40  ;;  %v2046_v7 = vpop.f32.mrb[97].mxu0  ;;  %v2269_v20 = vpop.f32.mrb[129].mxu1 }
 0x223   : > { %v2270_v42 = vadd.f32 %v2269_v20, %v3944_v55  ;;  %v2047_v54 = vpop.f32.mrb[98].mxu0  ;;  %v2884_v23 = vpop.f32.mrb[130].mxu1  ;;  %v4266_v55 = vld [vmem:[#allocation2_spill] sm:$0xff] }
 0x224   : > { %v2430_v35 = vmax.f32 %v2278_v16, 0.0  ;;  %v4123_v58 = vadd.f32 %v2047_v54, %v1759_v53  ;;  %v2281_v18 = vadd.f32 %v2884_v23, %v3977_v48  ;;  %v2049_v33 = vpop.f32.mrb[99].mxu0  ;;  %v2272_v3 = vpop.f32.mrb[131].mxu1  ;;  %v1764_v26 = vadd.f32 %v3835_v34, %v4266_v55 }
 0x225   : > { %v2428_v59 = vmax.f32 %v2270_v42, 0.0  ;;  %v2273_v38 = vadd.f32 %v2272_v3, %v3953_v43 }
 0x226   : > { %2495 = vst.msk [vmem:[%s3951_s30 + $0x110] sm:$0xff] %vm2460_vm0, %v2430_v35  ;;  %v2431_v40 = vmax.f32 %v2281_v18, 0.0  ;;  %v4271_v35 = vld [vmem:[#allocation7_spill] sm:$0xff] }
 0x227   : > { %2493 = vst.msk [vmem:[%s3951_s30 + $0x100] sm:$0xff] %vm2460_vm0, %v2428_v59  ;;  %v2429_v61 = vmax.f32 %v2273_v38, 0.0  ;;  %v1783_v18 = vadd.f32 %v3835_v34, %v4271_v35 }
 0x228   : > { %2496 = vst.msk [vmem:[%s3951_s30 + $0x118] sm:$0xff] %vm2460_vm0, %v2431_v40 }
 0x229   : > { %2494 = vst.msk [vmem:[%s3951_s30 + $0x108] sm:$0xff] %vm2460_vm0, %v2429_v61  ;;  %v2052_v19 = vpop.f32.mrb[100].mxu0  ;;  %v2887_v48 = vpop.f32.mrb[132].mxu1 }
 0x22a   : > { %v4139_v43 = vadd.f32 %v2052_v19, %v1764_v26  ;;  %v2294_v31 = vadd.f32 %v2887_v48, %v4021_v9  ;;  %v2054_v6 = vpop.f32.mrb[101].mxu0  ;;  %v2285_v37 = vpop.f32.mrb[133].mxu1 }
 0x22b   : > { %v2286_v41 = vadd.f32 %v2285_v37, %v3997_v56  ;;  %v2055_v13 = vpop.f32.mrb[102].mxu0  ;;  %v2888_v15 = vpop.f32.mrb[134].mxu1  ;;  %v4268_v56 = vld [vmem:[#allocation4_spill] sm:$0xff] }
 0x22c   : > { %v2434_v1 = vmax.f32 %v2294_v31, 0.0  ;;  %v4143_v30 = vadd.f32 %v2055_v13, %v1767_v12  ;;  %v2297_v36 = vadd.f32 %v2888_v15, %v4025_v17  ;;  %v2057_v25 = vpop.f32.mrb[103].mxu0  ;;  %v2288_v52 = vpop.f32.mrb[135].mxu1  ;;  %v1772_v32 = vadd.f32 %v3835_v34, %v4268_v56  ;;  %v4272_v37 = vld [vmem:[#allocation8_spill] sm:$0xff]  ;;  %v4273_v13 = vld [vmem:[#allocation9_spill] sm:$0xff] }
 0x22d   : > { %v2432_v62 = vmax.f32 %v2286_v41, 0.0  ;;  %v2289_v50 = vadd.f32 %v2288_v52, %v4001_v0  ;;  %v1791_v15 = vadd.f32 %v3835_v34, %v4273_v13 }
 0x22e   : > { %2499 = vst.msk [vmem:[%s3951_s30 + $0x130] sm:$0xff] %vm2460_vm0, %v2434_v1  ;;  %v2435_v9 = vmax.f32 %v2297_v36, 0.0 }
 0x22f   : > { %2497 = vst.msk [vmem:[%s3951_s30 + $0x120] sm:$0xff] %vm2460_vm0, %v2432_v62  ;;  %v2433_v14 = vmax.f32 %v2289_v50, 0.0 }
 0x230   : > { %2500 = vst.msk [vmem:[%s3951_s30 + $0x138] sm:$0xff] %vm2460_vm0, %v2435_v9 }
 0x231   : > { %2498 = vst.msk [vmem:[%s3951_s30 + $0x128] sm:$0xff] %vm2460_vm0, %v2433_v14  ;;  %v2060_v10 = vpop.f32.mrb[104].mxu0  ;;  %v2891_v17 = vpop.f32.mrb[136].mxu1 }
 0x232   : > { %v4159_v0 = vadd.f32 %v2060_v10, %v1772_v32  ;;  %v2310_v28 = vadd.f32 %v2891_v17, %v4059_v11  ;;  %v2062_v21 = vpop.f32.mrb[105].mxu0  ;;  %v2301_v22 = vpop.f32.mrb[137].mxu1 }
 0x233   : > { %v2302_v57 = vadd.f32 %v2301_v22, %v4039_v8  ;;  %v2063_v60 = vpop.f32.mrb[106].mxu0  ;;  %v2892_v39 = vpop.f32.mrb[138].mxu1  ;;  %v4270_v8 = vld [vmem:[#allocation6_spill] sm:$0xff]  ;;  %v4275_v22 = vld [vmem:[#allocation11_spill] sm:$0xff] }
 0x234   : > { %v2438_v5 = vmax.f32 %v2310_v28, 0.0  ;;  %v4163_v51 = vadd.f32 %v2063_v60, %v1775_v45  ;;  %v2313_v4 = vadd.f32 %v2892_v39, %v4063_v49  ;;  %v2065_v53 = vpop.f32.mrb[107].mxu0  ;;  %v2304_v16 = vpop.f32.mrb[139].mxu1  ;;  %v1780_v54 = vadd.f32 %v3835_v34, %v4270_v8  ;;  %v4274_v28 = vld [vmem:[#allocation10_spill] sm:$0xff] }
 0x235   : > { %v2436_v7 = vmax.f32 %v2302_v57, 0.0  ;;  %v2305_v20 = vadd.f32 %v2304_v16, %v4043_v63  ;;  %v1799_v57 = vadd.f32 %v3835_v34, %v4275_v22 }
 0x236   : > { %2503 = vst.msk [vmem:[%s3951_s30 + $0x150] sm:$0xff] %vm2460_vm0, %v2438_v5  ;;  %v2439_v11 = vmax.f32 %v2313_v4, 0.0 }
 0x237   : > { %2501 = vst.msk [vmem:[%s3951_s30 + $0x140] sm:$0xff] %vm2460_vm0, %v2436_v7  ;;  %v2437_v42 = vmax.f32 %v2305_v20, 0.0 }
 0x238   : > { %2504 = vst.msk [vmem:[%s3951_s30 + $0x158] sm:$0xff] %vm2460_vm0, %v2439_v11 }
 0x239   : > { %2502 = vst.msk [vmem:[%s3951_s30 + $0x148] sm:$0xff] %vm2460_vm0, %v2437_v42  ;;  %v2068_v23 = vpop.f32.mrb[108].mxu0  ;;  %v2895_v49 = vpop.f32.mrb[140].mxu1 }
 0x23a   : > { %v2069_v63 = vadd.f32 %v2068_v23, %v1780_v54  ;;  %v2326_v33 = vadd.f32 %v2895_v49, %v4099_v44  ;;  %v2070_v3 = vpop.f32.mrb[109].mxu0  ;;  %v2317_v59 = vpop.f32.mrb[141].mxu1 }
 0x23b   : > { %v2318_v38 = vadd.f32 %v2317_v59, %v4079_v27  ;;  %v2071_v40 = vpop.f32.mrb[110].mxu0  ;;  %v2896_v61 = vpop.f32.mrb[142].mxu1  ;;  %v1788_v27 = vadd.f32 %v3835_v34, %v4272_v37  ;;  %v4277_v3 = vld [vmem:[#allocation13_spill] sm:$0xff] }
 0x23c   : > { %v2442_v55 = vmax.f32 %v2326_v33, 0.0  ;;  %v2072_v26 = vadd.f32 %v2071_v40, %v1783_v18  ;;  %v2329_v19 = vadd.f32 %v2896_v61, %v4103_v47  ;;  %v2073_v48 = vpop.f32.mrb[111].mxu0  ;;  %v2320_v24 = vpop.f32.mrb[143].mxu1  ;;  %v4276_v18 = vld [vmem:[#allocation12_spill] sm:$0xff]  ;;  %v1807_v59 = vadd.f32 %v3835_v34, %v4277_v3 }
 0x23d   : > { %v2440_v12 = vmax.f32 %v2318_v38, 0.0  ;;  %v2321_v31 = vadd.f32 %v2320_v24, %v4083_v2 }
 0x23e   : > { %2507 = vst.msk [vmem:[%s3951_s30 + $0x170] sm:$0xff] %vm2460_vm0, %v2442_v55  ;;  %v2443_v44 = vmax.f32 %v2329_v19, 0.0 }
 0x23f   : > { %2505 = vst.msk [vmem:[%s3951_s30 + $0x160] sm:$0xff] %vm2460_vm0, %v2440_v12  ;;  %v2441_v6 = vmax.f32 %v2321_v31, 0.0 }
 0x240   : > { %2508 = vst.msk [vmem:[%s3951_s30 + $0x178] sm:$0xff] %vm2460_vm0, %v2443_v44 }
 0x241   : > { %2506 = vst.msk [vmem:[%s3951_s30 + $0x168] sm:$0xff] %vm2460_vm0, %v2441_v6  ;;  %v2076_v41 = vpop.f32.mrb[112].mxu0  ;;  %v2899_v47 = vpop.f32.mrb[144].mxu1 }
 0x242   : > { %v2077_v2 = vadd.f32 %v2076_v41, %v1788_v27  ;;  %v2342_v1 = vadd.f32 %v2899_v47, %v4139_v43  ;;  %v2078_v36 = vpop.f32.mrb[113].mxu0  ;;  %v2333_v25 = vpop.f32.mrb[145].mxu1  ;;  %v4278_v47 = vld [vmem:[#allocation14_spill] sm:$0xff] }
 0x243   : > { %v2334_v52 = vadd.f32 %v2333_v25, %v4119_v29  ;;  %v2079_v62 = vpop.f32.mrb[114].mxu0  ;;  %v2900_v50 = vpop.f32.mrb[146].mxu1  ;;  %v1796_v29 = vadd.f32 %v3835_v34, %v4274_v28  ;;  %v1812_v13 = vadd.f32 %v3835_v34, %v4278_v47 }
 0x244   : > { %v2446_v9 = vmax.f32 %v2342_v1, 0.0  ;;  %v2080_v14 = vadd.f32 %v2079_v62, %v1791_v15  ;;  %v2345_v56 = vadd.f32 %v2900_v50, %v4143_v30  ;;  %v2081_v32 = vpop.f32.mrb[115].mxu0  ;;  %v2336_v10 = vpop.f32.mrb[147].mxu1  ;;  %v4279_v1 = vld [vmem:[#allocation15_spill] sm:$0xff] }
 0x245   : > { %v2444_v17 = vmax.f32 %v2334_v52, 0.0  ;;  %v2337_v46 = vadd.f32 %v2336_v10, %v4123_v58  ;;  %v1815_v36 = vadd.f32 %v3835_v34, %v4279_v1 }
 0x246   : > { %2511 = vst.msk [vmem:[%s3951_s30 + $0x190] sm:$0xff] %vm2460_vm0, %v2446_v9  ;;  %v2447_v43 = vmax.f32 %v2345_v56, 0.0 }
 0x247   : > { %2509 = vst.msk [vmem:[%s3951_s30 + $0x180] sm:$0xff] %vm2460_vm0, %v2444_v17  ;;  %v2445_v45 = vmax.f32 %v2337_v46, 0.0 }
 0x248   : > { %2512 = vst.msk [vmem:[%s3951_s30 + $0x198] sm:$0xff] %vm2460_vm0, %v2447_v43 }
 0x249   : > { %2510 = vst.msk [vmem:[%s3951_s30 + $0x188] sm:$0xff] %vm2460_vm0, %v2445_v45  ;;  %v2084_v21 = vpop.f32.mrb[116].mxu0  ;;  %v2903_v30 = vpop.f32.mrb[148].mxu1 }
 0x24a   : > { %v2085_v58 = vadd.f32 %v2084_v21, %v1796_v29  ;;  %v2358_v60 = vadd.f32 %v2903_v30, %v2069_v63  ;;  %v2086_v39 = vpop.f32.mrb[117].mxu0  ;;  %v2349_v5 = vpop.f32.mrb[149].mxu1 }
 0x24b   : > { %v2350_v4 = vadd.f32 %v2349_v5, %v4159_v0  ;;  %v2087_v53 = vpop.f32.mrb[118].mxu0  ;;  %v2904_v16 = vpop.f32.mrb[150].mxu1  ;;  %v1804_v0 = vadd.f32 %v3835_v34, %v4276_v18 }
 0x24c   : > { %v2450_v7 = vmax.f32 %v2358_v60, 0.0  ;;  %v2088_v20 = vadd.f32 %v2087_v53, %v1799_v57  ;;  %v2361_v11 = vadd.f32 %v2904_v16, %v2072_v26  ;;  %v2089_v42 = vpop.f32.mrb[119].mxu0  ;;  %v2352_v8 = vpop.f32.mrb[151].mxu1 }
 0x24d   : > { %v2448_v54 = vmax.f32 %v2350_v4, 0.0  ;;  %v2353_v23 = vadd.f32 %v2352_v8, %v4163_v51 }
 0x24e   : > { %2515 = vst.msk [vmem:[%s3951_s30 + $0x1b0] sm:$0xff] %vm2460_vm0, %v2450_v7  ;;  %v2451_v49 = vmax.f32 %v2361_v11, 0.0 }
 0x24f   : > { %2513 = vst.msk [vmem:[%s3951_s30 + $0x1a0] sm:$0xff] %vm2460_vm0, %v2448_v54  ;;  %v2449_v35 = vmax.f32 %v2353_v23, 0.0 }
 0x250   : > { %2516 = vst.msk [vmem:[%s3951_s30 + $0x1b8] sm:$0xff] %vm2460_vm0, %v2451_v49 }
 0x251   : > { %2514 = vst.msk [vmem:[%s3951_s30 + $0x1a8] sm:$0xff] %vm2460_vm0, %v2449_v35  ;;  %v2092_v63 = vpop.f32.mrb[120].mxu0  ;;  %v2907_v33 = vpop.f32.mrb[152].mxu1 }
 0x252   : > { %v2093_v51 = vadd.f32 %v2092_v63, %v1804_v0  ;;  %v2374_v38 = vadd.f32 %v2907_v33, %v2085_v58  ;;  %v2094_v40 = vpop.f32.mrb[121].mxu0  ;;  %v2365_v61 = vpop.f32.mrb[153].mxu1 }
 0x253   : > { %v2366_v55 = vadd.f32 %v2365_v61, %v2077_v2  ;;  %v2095_v26 = vpop.f32.mrb[122].mxu0  ;;  %v2908_v19 = vpop.f32.mrb[154].mxu1 }
 0x254   : > { %v2454_v48 = vmax.f32 %v2374_v38, 0.0  ;;  %v2096_v24 = vadd.f32 %v2095_v26, %v1807_v59  ;;  %v2377_v12 = vadd.f32 %v2908_v19, %v2088_v20  ;;  %v2097_v31 = vpop.f32.mrb[123].mxu0  ;;  %v2368_v44 = vpop.f32.mrb[155].mxu1 }
 0x255   : > { %v2452_v6 = vmax.f32 %v2366_v55, 0.0  ;;  %v2369_v37 = vadd.f32 %v2368_v44, %v2080_v14 }
 0x256   : > { %2519 = vst.msk [vmem:[%s3951_s30 + $0x1d0] sm:$0xff] %vm2460_vm0, %v2454_v48  ;;  %v2455_v27 = vmax.f32 %v2377_v12, 0.0 }
 0x257   : > { %2517 = vst.msk [vmem:[%s3951_s30 + $0x1c0] sm:$0xff] %vm2460_vm0, %v2452_v6  ;;  %v2453_v41 = vmax.f32 %v2369_v37, 0.0 }
 0x258   : > { %2520 = vst.msk [vmem:[%s3951_s30 + $0x1d8] sm:$0xff] %vm2460_vm0, %v2455_v27 }
 0x259   : > { %2518 = vst.msk [vmem:[%s3951_s30 + $0x1c8] sm:$0xff] %vm2460_vm0, %v2453_v41  ;;  %v2100_v15 = vpop.f32.mrb[124].mxu0  ;;  %v2911_v2 = vpop.f32.mrb[156].mxu1 }
 0x25a   : > { %v2101_v25 = vadd.f32 %v2100_v15, %v1812_v13  ;;  %v2102_v52 = vpop.f32.mrb[125].mxu0  ;;  %v2381_v62 = vpop.f32.mrb[157].mxu1 }
 0x25b   : > { %v2382_v50 = vadd.f32 %v2381_v62, %v2093_v51  ;;  %v2103_v9 = vpop.f32.mrb[126].mxu0  ;;  %v2912_v14 = vpop.f32.mrb[158].mxu1 }
 0x25c   : > { %v2390_v56 = vadd.f32 %v2911_v2, %v2101_v25  ;;  %v2104_v32 = vadd.f32 %v2103_v9, %v1815_v36  ;;  %v2105_v10 = vpop.f32.mrb[127].mxu0  ;;  %v2384_v17 = vpop.f32.mrb[159].mxu1 }
 0x25d   : > { %v2456_v46 = vmax.f32 %v2382_v50, 0.0  ;;  %v2385_v43 = vadd.f32 %v2384_v17, %v2096_v24 }
 0x25e   : > { %v2458_v45 = vmax.f32 %v2390_v56, 0.0  ;;  %v2393_v28 = vadd.f32 %v2912_v14, %v2104_v32 }
 0x25f   : > { %2521 = vst.msk [vmem:[%s3951_s30 + $0x1e0] sm:$0xff] %vm2460_vm0, %v2456_v46  ;;  %v2457_v34 = vmax.f32 %v2385_v43, 0.0 }
 0x260   : > { %2523 = vst.msk [vmem:[%s3951_s30 + $0x1f0] sm:$0xff] %vm2460_vm0, %v2458_v45  ;;  %v2459_v29 = vmax.f32 %v2393_v28, 0.0 }
 0x261   : > { %2522 = vst.msk [vmem:[%s3951_s30 + $0x1e8] sm:$0xff] %vm2460_vm0, %v2457_v34 }
 0x262   : > { %2524 = vst.msk [vmem:[%s3951_s30 + $0x1f8] sm:$0xff] %vm2460_vm0, %v2459_v29 }
 0x263 PF: > { %s13_s12 = sadd.s32 1, %s3369_s12  }
 0x264   : > { %p10_p4 = scmp.ge.s32.totalorder %s13_s12, 4  }
 0x266   :  { %12 = sbr.rel (!%p10_p4) target bundleno = 1 (0x1), region = 62 }

// kernel: cis_resnet_forward.11
= control target key start
LH: loop header
LB: loop body
LE: loop exit
PB: predicated region body
PF: predicated region fallthrough
CT: control target
= control target key end

     0   :  { %s3589_s15 = smov 0   ;;  %s4535_s0 = inlined_call_operand.vmem [shape: bf16[1024,640], index: 0, kind: input, shape index: {}]   ;;  %s4536_s1 = inlined_call_operand.vmem [shape: bf16[640,64], index: 1, kind: input, shape index: {}]   ;;  %s4537_s2 = inlined_call_operand.vmem [shape: f32[1,64], index: 2, kind: input, shape index: {}]   ;;  %s4538_s3 = inlined_call_operand.vmem [shape: f32[1024,64], index: 3, kind: input, shape index: {}]   ;;  %s4539_s4 = inlined_call_operand.vmem [shape: f32[1024,64], index: 4, kind: output, shape index: {}]  }
   0x1 LB: > { %s2770_s16 = sadd.s32 4294967295, %s3561_s15   ;;  %p2774_p0 = scmp.ge.s32.totalorder %s3561_s15, 1  ;;  %s3561_s15 = sphi %s3589_s15, %s14_s15  }
   0x2   : > { %p175_p1 = scmp.lt.s32.totalorder %s3561_s15, 3 }
   0x4   : > { %p176_p2 = pnand %p2774_p0, %p175_p1 }
   0x6   : > { %179 = sbr.rel (%p176_p2) target bundleno = 613 (0x265), region = 36 }
   0xd   : > { %v3290_v0 = vld [vmem:[%s4536_s1] sm:$0xff]   ;;  %v3563_v1 = vmov 0   ;;  %s2775_s19 = sshll.u32 %s2770_s16, 6  ;;  %v3291_v2 = vld [vmem:[%s4536_s1 + $0x8] sm:$0xff]   ;;  %v3292_v3 = vld [vmem:[%s4536_s1 + $0x10] sm:$0xff]   ;;  %vm2637_vm0 = vcmask 523264  }
   0xe   : > { %1578 = vmatprep.subr.bf16.mxu0 %v3563_v1  ;;  %3104 = vmatprep.subr.bf16.mxu1 %v3563_v1  ;;  %p208_p3 = scmp.lt.s32.totalorder %s2775_s19, 127  ;;  %v3293_v4 = vld [vmem:[%s4536_s1 + $0x18] sm:$0xff]   ;;  %v3294_v5 = vld [vmem:[%s4536_s1 + $0x20] sm:$0xff]   ;;  %v3295_v7 = vld [vmem:[%s4536_s1 + $0x28] sm:$0xff]  }
   0xf   : > { %1579 = vmatpush1.bf16.msra.mxu0 %v3290_v0  ;;  %3120 = vmatpush1.bf16.msra.mxu1 %v3290_v0  ;;  %v3296_v9 = vld [vmem:[%s4536_s1 + $0x30] sm:$0xff]   ;;  %v3297_v10 = vld [vmem:[%s4536_s1 + $0x38] sm:$0xff]   ;;  %v3298_v11 = vld [vmem:[%s4536_s1 + $0x40] sm:$0xff]  }
  0x10   : > { %1580 = vmatprep.subr.bf16.mxu0 %v3563_v1  ;;  %3105 = vmatprep.subr.bf16.mxu1 %v3563_v1  ;;  %s4579_s19 = smov (!%p208_p3, %s2775_s19), 127  ;;  %v3299_v12 = vld [vmem:[%s4536_s1 + $0x48] sm:$0xff]   ;;  %v3300_v13 = vld [vmem:[%s4536_s1 + $0x50] sm:$0xff]   ;;  %v3301_v14 = vld [vmem:[%s4536_s1 + $0x58] sm:$0xff]  }
  0x11   : > { %s3280_s26 = smul.u32 20, %s4579_s19  ;;  %v3302_v15 = vld [vmem:[%s4536_s1 + $0x60] sm:$0xff]   ;;  %v3303_v16 = vld [vmem:[%s4536_s1 + $0x68] sm:$0xff]   ;;  %v3304_v17 = vld [vmem:[%s4536_s1 + $0x70] sm:$0xff]   ;;  %s2778_s8 = sshll.u32 %s4579_s19, 3 }
  0x12   : > { %v3305_v18 = vld [vmem:[%s4536_s1 + $0x78] sm:$0xff]   ;;  %v3313_v19 = vld [vmem:[%s4536_s1 + $0x100] sm:$0xff]   ;;  %v3338_v25 = vld [vmem:[%s4536_s1 + $0x108] sm:$0xff]   ;;  %s4136_s11 = scalar_lea.vmem %s4538_s3, %s2778_s8  ;;  %s4163_s14 = scalar_lea.vmem %s4539_s4, %s2778_s8 }
  0x13   : > { %1581 = vmatpush1.bf16.msra.mxu0 %v3291_v2  ;;  %3121 = vmatpush1.bf16.msra.mxu1 %v3291_v2  ;;  %s3626_s5 = scalar_lea.vmem %s4535_s0, %s3280_s26  ;;  %v3312_v22 = vld [vmem:[%s4536_s1 + $0x80] sm:$0xff]   ;;  %v3314_v26 = vld [vmem:[%s4536_s1 + $0x88] sm:$0xff]   ;;  %v3363_v27 = vld [vmem:[%s4536_s1 + $0x110] sm:$0xff]  }
  0x14   : > { %1582 = vmatprep.subr.bf16.mxu0 %v3563_v1  ;;  %3106 = vmatprep.subr.bf16.mxu1 %v3563_v1  ;;  %v3308_v6 = vld [vmem:[%s3626_s5 + $0x4] ss:$20 sps:$4 sm:$0xff]   ;;  %v3306_v20 = vld [vmem:[%s3626_s5] ss:$20 sps:$4 sm:$0xff]   ;;  %v3319_v28 = vld [vmem:[%s3626_s5 + $0x28] ss:$20 sps:$4 sm:$0xff]  }
  0x15   : > { %v3311_v8 = vld [vmem:[%s3626_s5 + $0x144] ss:$20 sps:$4 sm:$0xff]   ;;  %1610 = vmatprep.mubr.bf16.mxu0 %v3308_v6  ;;  %v3309_v21 = vld [vmem:[%s3626_s5 + $0x140] ss:$20 sps:$4 sm:$0xff]   ;;  %v3320_v29 = vld [vmem:[%s3626_s5 + $0x168] ss:$20 sps:$4 sm:$0xff]  }
  0x16   : > { %1674 = vmatprep.mubr.bf16.mxu1 %v3311_v8  ;;  %v3315_v23 = vld [vmem:[%s3626_s5 + $0x2c] ss:$20 sps:$4 sm:$0xff]   ;;  %v3321_v30 = vld [vmem:[%s4536_s1 + $0x90] sm:$0xff]   ;;  %v3385_v33 = vld [vmem:[%s4536_s1 + $0x118] sm:$0xff]  }
  0x17   : > { %1583 = vmatpush1.bf16.msra.mxu0 %v3292_v3  ;;  %3122 = vmatpush1.bf16.msra.mxu1 %v3292_v3  ;;  %v3317_v24 = vld [vmem:[%s3626_s5 + $0x16c] ss:$20 sps:$4 sm:$0xff]   ;;  %v3323_v31 = vld [vmem:[%s3626_s5 + $0x54] ss:$20 sps:$4 sm:$0xff]   ;;  %v3322_v34 = vld [vmem:[%s4536_s1 + $0x98] sm:$0xff]  }
  0x18   : > { %1584 = vmatprep.subr.bf16.mxu0 %v3563_v1  ;;  %3107 = vmatprep.subr.bf16.mxu1 %v3563_v1  ;;  %v3325_v32 = vld [vmem:[%s3626_s5 + $0x194] ss:$20 sps:$4 sm:$0xff]   ;;  %v3327_v35 = vld [vmem:[%s3626_s5 + $0x50] ss:$20 sps:$4 sm:$0xff]   ;;  %v3335_v43 = vld [vmem:[%s3626_s5 + $0x78] ss:$20 sps:$4 sm:$0xff]  }
  0x19   : > { %v3328_v36 = vld [vmem:[%s3626_s5 + $0x190] ss:$20 sps:$4 sm:$0xff]   ;;  %v3330_v41 = vld [vmem:[%s4536_s1 + $0xa8] sm:$0xff]   ;;  %v3339_v49 = vld [vmem:[%s4536_s1 + $0xb8] sm:$0xff]  }
  0x1a   : > { %v3329_v37 = vld [vmem:[%s4536_s1 + $0xa0] sm:$0xff]   ;;  %v3331_v38 = vld [vmem:[%s3626_s5 + $0x7c] ss:$20 sps:$4 sm:$0xff]   ;;  %v3423_v42 = vld [vmem:[%s4536_s1 + $0x128] sm:$0xff]  }
  0x1b   : > { %1585 = vmatpush1.bf16.msra.mxu0 %v3293_v4  ;;  %3123 = vmatpush1.bf16.msra.mxu1 %v3293_v4  ;;  %v3333_v39 = vld [vmem:[%s3626_s5 + $0x1bc] ss:$20 sps:$4 sm:$0xff]   ;;  %v3404_v40 = vld [vmem:[%s4536_s1 + $0x120] sm:$0xff]   ;;  %v3336_v44 = vld [vmem:[%s3626_s5 + $0x1b8] ss:$20 sps:$4 sm:$0xff]  }
  0x1c   : > { %1586 = vmatprep.subr.bf16.mxu0 %v3563_v1  ;;  %3108 = vmatprep.subr.bf16.mxu1 %v3563_v1  ;;  %v3337_v45 = vld [vmem:[%s4536_s1 + $0xb0] sm:$0xff]   ;;  %v3340_v46 = vld [vmem:[%s3626_s5 + $0xa4] ss:$20 sps:$4 sm:$0xff]   ;;  %v3348_v53 = vld [vmem:[%s3626_s5 + $0xcc] ss:$20 sps:$4 sm:$0xff]  }
  0x1d   : > { %v3342_v47 = vld [vmem:[%s3626_s5 + $0x1e4] ss:$20 sps:$4 sm:$0xff]   ;;  %v3442_v48 = vld [vmem:[%s4536_s1 + $0x130] sm:$0xff]   ;;  %v3350_v54 = vld [vmem:[%s3626_s5 + $0x20c] ss:$20 sps:$4 sm:$0xff]  }
  0x1e   : > { %v3344_v50 = vld [vmem:[%s3626_s5 + $0xa0] ss:$20 sps:$4 sm:$0xff]   ;;  %v3347_v55 = vld [vmem:[%s4536_s1 + $0xc8] sm:$0xff]   ;;  %v3461_v61 = vld [vmem:[%s4536_s1 + $0x138] sm:$0xff]  }
  0x1f   : > { %1587 = vmatpush1.bf16.msra.mxu0 %v3294_v5  ;;  %3124 = vmatpush1.bf16.msra.mxu1 %v3294_v5  ;;  %v3345_v51 = vld [vmem:[%s3626_s5 + $0x1e0] ss:$20 sps:$4 sm:$0xff]   ;;  %v3352_v56 = vld [vmem:[%s3626_s5 + $0xc8] ss:$20 sps:$4 sm:$0xff]   ;;  %v3360_v63 = vld [vmem:[%s3626_s5 + $0xf0] ss:$20 sps:$4 sm:$0xff]  }
  0x20   : > { %1588 = vmatprep.subr.bf16.mxu0 %v3563_v1  ;;  %3109 = vmatprep.subr.bf16.mxu1 %v3563_v1  ;;  %v3346_v52 = vld [vmem:[%s4536_s1 + $0xc0] sm:$0xff]   ;;  %v3353_v57 = vld [vmem:[%s3626_s5 + $0x208] ss:$20 sps:$4 sm:$0xff]   ;;  %v3354_v58 = vld [vmem:[%s4536_s1 + $0xd0] sm:$0xff]  }
  0x21   : > { %v3356_v59 = vld [vmem:[%s3626_s5 + $0xf4] ss:$20 sps:$4 sm:$0xff]   ;;  %v3355_v62 = vld [vmem:[%s4536_s1 + $0xd8] sm:$0xff]   ;;  %v3361_v0 = vld [vmem:[%s3626_s5 + $0x230] ss:$20 sps:$4 sm:$0xff]  }
  0x22   : > { %v3358_v60 = vld [vmem:[%s3626_s5 + $0x234] ss:$20 sps:$4 sm:$0xff]   ;;  %v3362_v2 = vld [vmem:[%s4536_s1 + $0xe0] sm:$0xff]   ;;  %v3365_v3 = vld [vmem:[%s3626_s5 + $0x11c] ss:$20 sps:$4 sm:$0xff]  }
  0x23   : > { %1589 = vmatpush1.bf16.msra.mxu0 %v3295_v7  ;;  %3125 = vmatpush1.bf16.msra.mxu1 %v3295_v7  ;;  %v3367_v4 = vld [vmem:[%s3626_s5 + $0x25c] ss:$20 sps:$4 sm:$0xff]   ;;  %v3364_v5 = vld [vmem:[%s4536_s1 + $0xe8] sm:$0xff]  }
  0x24   : > { %1590 = vmatprep.subr.bf16.mxu0 %v3563_v1  ;;  %3110 = vmatprep.subr.bf16.mxu1 %v3563_v1  ;;  %v3369_v6 = vld [vmem:[%s3626_s5 + $0x118] ss:$20 sps:$4 sm:$0xff]   ;;  %v3371_v8 = vld [vmem:[%s4536_s1 + $0xf0] sm:$0xff]  }
  0x25   : > { %v3370_v7 = vld [vmem:[%s3626_s5 + $0x258] ss:$20 sps:$4 sm:$0xff]  }
  0x27   : > { %1591 = vmatpush1.bf16.msra.mxu0 %v3296_v9  ;;  %3126 = vmatpush1.bf16.msra.mxu1 %v3296_v9  ;;  %v3373_v9 = vld [vmem:[%s3626_s5 + $0x284] ss:$20 sps:$4 sm:$0xff]  }
  0x28   : > { %1592 = vmatprep.subr.bf16.mxu0 %v3563_v1  ;;  %3111 = vmatprep.subr.bf16.mxu1 %v3563_v1 }
  0x2b   : > { %1593 = vmatpush1.bf16.msra.mxu0 %v3297_v10  ;;  %3127 = vmatpush1.bf16.msra.mxu1 %v3297_v10  ;;  %v3377_v10 = vld [vmem:[%s3626_s5 + $0xc] ss:$20 sps:$4 sm:$0xff]  }
  0x2c   : > { %1594 = vmatprep.subr.bf16.mxu0 %v3563_v1  ;;  %3112 = vmatprep.subr.bf16.mxu1 %v3563_v1 }
  0x2f   : > { %1595 = vmatpush1.bf16.msra.mxu0 %v3298_v11  ;;  %3128 = vmatpush1.bf16.msra.mxu1 %v3298_v11  ;;  %v3372_v11 = vld [vmem:[%s4536_s1 + $0xf8] sm:$0xff]  }
  0x30   : > { %1596 = vmatprep.subr.bf16.mxu0 %v3563_v1  ;;  %3113 = vmatprep.subr.bf16.mxu1 %v3563_v1 }
  0x33   : > { %1597 = vmatpush1.bf16.msra.mxu0 %v3299_v12  ;;  %3129 = vmatpush1.bf16.msra.mxu1 %v3299_v12  ;;  %v3375_v12 = vld [vmem:[%s3626_s5 + $0x8] ss:$20 sps:$4 sm:$0xff]  }
  0x34   : > { %1598 = vmatprep.subr.bf16.mxu0 %v3563_v1  ;;  %3114 = vmatprep.subr.bf16.mxu1 %v3563_v1 }
  0x37   : > { %1599 = vmatpush1.bf16.msra.mxu0 %v3300_v13  ;;  %3130 = vmatpush1.bf16.msra.mxu1 %v3300_v13  ;;  %v3378_v13 = vld [vmem:[%s3626_s5 + $0x280] ss:$20 sps:$4 sm:$0xff]  }
  0x38   : > { %1600 = vmatprep.subr.bf16.mxu0 %v3563_v1  ;;  %3115 = vmatprep.subr.bf16.mxu1 %v3563_v1 }
  0x3b   : > { %1601 = vmatpush1.bf16.msra.mxu0 %v3301_v14  ;;  %3131 = vmatpush1.bf16.msra.mxu1 %v3301_v14  ;;  %v3379_v14 = vld [vmem:[%s3626_s5 + $0x2ac] ss:$20 sps:$4 sm:$0xff]  }
  0x3c   : > { %1602 = vmatprep.subr.bf16.mxu0 %v3563_v1  ;;  %3116 = vmatprep.subr.bf16.mxu1 %v3563_v1 }
  0x3f   : > { %1603 = vmatpush1.bf16.msra.mxu0 %v3302_v15  ;;  %3132 = vmatpush1.bf16.msra.mxu1 %v3302_v15  ;;  %v3381_v15 = vld [vmem:[%s3626_s5 + $0x34] ss:$20 sps:$4 sm:$0xff]  }
  0x40   : > { %1604 = vmatprep.subr.bf16.mxu0 %v3563_v1  ;;  %3117 = vmatprep.subr.bf16.mxu1 %v3563_v1 }
  0x43   : > { %1605 = vmatpush1.bf16.msra.mxu0 %v3303_v16  ;;  %3133 = vmatpush1.bf16.msra.mxu1 %v3303_v16  ;;  %v3383_v16 = vld [vmem:[%s3626_s5 + $0x2a8] ss:$20 sps:$4 sm:$0xff]  }
  0x44   : > { %1606 = vmatprep.subr.bf16.mxu0 %v3563_v1  ;;  %3118 = vmatprep.subr.bf16.mxu1 %v3563_v1 }
  0x47   : > { %1607 = vmatpush1.bf16.msra.mxu0 %v3304_v17  ;;  %3134 = vmatpush1.bf16.msra.mxu1 %v3304_v17  ;;  %v3384_v17 = vld [vmem:[%s3626_s5 + $0x30] ss:$20 sps:$4 sm:$0xff]  }
  0x48   : > { %1608 = vmatprep.subr.bf16.mxu0 %v3563_v1  ;;  %3119 = vmatprep.subr.bf16.mxu1 %v3563_v1 }
  0x4b   : > { %1609 = vmatpush1.bf16.msra.mxu0 %v3305_v18  ;;  %3135 = vmatpush1.bf16.msra.mxu1 %v3305_v18  ;;  %v3386_v18 = vld [vmem:[%s3626_s5 + $0x2d4] ss:$20 sps:$4 sm:$0xff]  }
  0x4c   : > { %1867 = vmatprep.subr.bf16.mxu0 %v3563_v1  ;;  %3024 = vmatprep.subr.bf16.mxu1 %v3313_v19 }
  0x4e   : > { %1611 = vmatmul.mubr.bf16.vlgmr.msra.gmra.mrb[0].mxu0 %v3306_v20  ;;  %1675 = vmatmul.mubr.bf16.vlgmr.msra.gmra.mrb[0].mxu1 %v3309_v21  ;;  %v3391_v20 = vld [vmem:[%s3626_s5 + $0x58] ss:$20 sps:$4 sm:$0xff]   ;;  %v3392_v21 = vld [vmem:[%s3626_s5 + $0x2fc] ss:$20 sps:$4 sm:$0xff]  }
  0x4f   : > { %1868 = vmatpush1.bf16.msra.mxu0 %v3312_v22  ;;  %3025 = vmatpush3.bf16.msra.mxu1 %v3313_v19  ;;  %v3390_v19 = vld [vmem:[%s3626_s5 + $0x2d0] ss:$20 sps:$4 sm:$0xff]  }
  0x50   : > { %1869 = vmatprep.subr.bf16.mxu0 %v3563_v1  ;;  %1618 = vmatprep.mubr.bf16.mxu0 %v3315_v23  ;;  %v3394_v22 = vld [vmem:[%s3626_s5 + $0x84] ss:$20 sps:$4 sm:$0xff]  }
  0x51   : > { %1682 = vmatprep.mubr.bf16.mxu1 %v3317_v24  ;;  %3026 = vmatprep.subr.bf16.mxu1 %v3338_v25  ;;  %v3396_v23 = vld [vmem:[%s3626_s5 + $0x2f8] ss:$20 sps:$4 sm:$0xff]   ;;  %v3397_v24 = vld [vmem:[%s3626_s5 + $0x80] ss:$20 sps:$4 sm:$0xff]  }
  0x53   : > { %1870 = vmatpush1.bf16.msra.mxu0 %v3314_v26  ;;  %3027 = vmatpush3.bf16.msra.mxu1 %v3338_v25  ;;  %v3398_v25 = vld [vmem:[%s3626_s5 + $0x324] ss:$20 sps:$4 sm:$0xff]   ;;  %v3400_v26 = vld [vmem:[%s3626_s5 + $0xac] ss:$20 sps:$4 sm:$0xff]  }
  0x54   : > { %1871 = vmatprep.subr.bf16.mxu0 %v3563_v1  ;;  %3028 = vmatprep.subr.bf16.mxu1 %v3363_v27 }
  0x56   : > { %1619 = vmatmul.mubr.bf16.gmra.mrb[4].mxu0 %v3319_v28  ;;  %1683 = vmatmul.mubr.bf16.gmra.mrb[4].mxu1 %v3320_v29  ;;  %v3403_v28 = vld [vmem:[%s3626_s5 + $0xa8] ss:$20 sps:$4 sm:$0xff]   ;;  %v3405_v29 = vld [vmem:[%s3626_s5 + $0x34c] ss:$20 sps:$4 sm:$0xff]  }
  0x57   : > { %1872 = vmatpush1.bf16.msra.mxu0 %v3321_v30  ;;  %1626 = vmatprep.mubr.bf16.mxu0 %v3323_v31  ;;  %v3407_v30 = vld [vmem:[%s3626_s5 + $0xd4] ss:$20 sps:$4 sm:$0xff]  }
  0x58   : > { %1873 = vmatprep.subr.bf16.mxu0 %v3563_v1  ;;  %1690 = vmatprep.mubr.bf16.mxu1 %v3325_v32  ;;  %v3409_v31 = vld [vmem:[%s3626_s5 + $0x348] ss:$20 sps:$4 sm:$0xff]   ;;  %v3410_v32 = vld [vmem:[%s3626_s5 + $0xd0] ss:$20 sps:$4 sm:$0xff]  }
  0x59   : > { %3029 = vmatpush3.bf16.msra.mxu1 %v3363_v27  ;;  %v3402_v27 = vld [vmem:[%s3626_s5 + $0x320] ss:$20 sps:$4 sm:$0xff]  }
  0x5a   : > { %3030 = vmatprep.subr.bf16.mxu1 %v3385_v33 }
  0x5b   : > { %1874 = vmatpush1.bf16.msra.mxu0 %v3322_v34  ;;  %v3413_v34 = vld [vmem:[%s3626_s5 + $0xfc] ss:$20 sps:$4 sm:$0xff]  }
  0x5c   : > { %1875 = vmatprep.subr.bf16.mxu0 %v3563_v1 }
  0x5d   : > { %3031 = vmatpush3.bf16.msra.mxu1 %v3385_v33  ;;  %v3411_v33 = vld [vmem:[%s3626_s5 + $0x374] ss:$20 sps:$4 sm:$0xff]  }
  0x5e   : > { %1627 = vmatmul.mubr.bf16.gmra.mrb[8].mxu0 %v3327_v35  ;;  %1691 = vmatmul.mubr.bf16.gmra.mrb[8].mxu1 %v3328_v36  ;;  %v3415_v35 = vld [vmem:[%s3626_s5 + $0x370] ss:$20 sps:$4 sm:$0xff]   ;;  %v3416_v36 = vld [vmem:[%s3626_s5 + $0xf8] ss:$20 sps:$4 sm:$0xff]  }
  0x5f   : > { %1876 = vmatpush1.bf16.msra.mxu0 %v3329_v37  ;;  %1634 = vmatprep.mubr.bf16.mxu0 %v3331_v38  ;;  %v3417_v37 = vld [vmem:[%s3626_s5 + $0x39c] ss:$20 sps:$4 sm:$0xff]   ;;  %v3419_v38 = vld [vmem:[%s3626_s5 + $0x124] ss:$20 sps:$4 sm:$0xff]  }
  0x60   : > { %1877 = vmatprep.subr.bf16.mxu0 %v3563_v1  ;;  %1698 = vmatprep.mubr.bf16.mxu1 %v3333_v39  ;;  %v3421_v39 = vld [vmem:[%s3626_s5 + $0x398] ss:$20 sps:$4 sm:$0xff]  }
  0x61   : > { %3032 = vmatprep.subr.bf16.mxu1 %v3404_v40 }
  0x62   : > { %3033 = vmatpush3.bf16.msra.mxu1 %v3404_v40  ;;  %v3422_v40 = vld [vmem:[%s3626_s5 + $0x120] ss:$20 sps:$4 sm:$0xff]  }
  0x63   : > { %1878 = vmatpush1.bf16.msra.mxu0 %v3330_v41  ;;  %3034 = vmatprep.subr.bf16.mxu1 %v3423_v42  ;;  %v3424_v41 = vld [vmem:[%s3626_s5 + $0x3c4] ss:$20 sps:$4 sm:$0xff]  }
  0x64   : > { %1879 = vmatprep.subr.bf16.mxu0 %v3563_v1 }
  0x66   : > { %1635 = vmatmul.mubr.bf16.gmra.mrb[12].mxu0 %v3335_v43  ;;  %1699 = vmatmul.mubr.bf16.gmra.mrb[12].mxu1 %v3336_v44  ;;  %v3428_v43 = vld [vmem:[%s3626_s5 + $0x3c0] ss:$20 sps:$4 sm:$0xff]   ;;  %v3429_v44 = vld [vmem:[%s3626_s5 + $0x148] ss:$20 sps:$4 sm:$0xff]  }
  0x67   : > { %1880 = vmatpush1.bf16.msra.mxu0 %v3337_v45  ;;  %1642 = vmatprep.mubr.bf16.mxu0 %v3340_v46  ;;  %v3430_v45 = vld [vmem:[%s3626_s5 + $0x3ec] ss:$20 sps:$4 sm:$0xff]   ;;  %v3432_v46 = vld [vmem:[%s3626_s5 + $0x174] ss:$20 sps:$4 sm:$0xff]  }
  0x68   : > { %1881 = vmatprep.subr.bf16.mxu0 %v3563_v1  ;;  %1706 = vmatprep.mubr.bf16.mxu1 %v3342_v47  ;;  %v3434_v47 = vld [vmem:[%s3626_s5 + $0x3e8] ss:$20 sps:$4 sm:$0xff]  }
  0x69   : > { %3035 = vmatpush3.bf16.msra.mxu1 %v3423_v42  ;;  %v3426_v42 = vld [vmem:[%s3626_s5 + $0x14c] ss:$20 sps:$4 sm:$0xff]  }
  0x6a   : > { %3036 = vmatprep.subr.bf16.mxu1 %v3442_v48 }
  0x6b   : > { %1882 = vmatpush1.bf16.msra.mxu0 %v3339_v49  ;;  %v3436_v49 = vld [vmem:[%s3626_s5 + $0x414] ss:$20 sps:$4 sm:$0xff]  }
  0x6c   : > { %1883 = vmatprep.subr.bf16.mxu0 %v3563_v1 }
  0x6d   : > { %3037 = vmatpush3.bf16.msra.mxu1 %v3442_v48  ;;  %v3435_v48 = vld [vmem:[%s3626_s5 + $0x170] ss:$20 sps:$4 sm:$0xff]  }
  0x6e   : > { %1643 = vmatmul.mubr.bf16.gmra.mrb[16].mxu0 %v3344_v50  ;;  %1707 = vmatmul.mubr.bf16.gmra.mrb[16].mxu1 %v3345_v51  ;;  %v3438_v50 = vld [vmem:[%s3626_s5 + $0x19c] ss:$20 sps:$4 sm:$0xff]  }
  0x6f   : > { %1884 = vmatpush1.bf16.msra.mxu0 %v3346_v52  ;;  %1650 = vmatprep.mubr.bf16.mxu0 %v3348_v53  ;;  %v3440_v51 = vld [vmem:[%s3626_s5 + $0x410] ss:$20 sps:$4 sm:$0xff]   ;;  %v3441_v52 = vld [vmem:[%s3626_s5 + $0x198] ss:$20 sps:$4 sm:$0xff]  }
  0x70   : > { %1885 = vmatprep.subr.bf16.mxu0 %v3563_v1  ;;  %1714 = vmatprep.mubr.bf16.mxu1 %v3350_v54  ;;  %v3443_v53 = vld [vmem:[%s3626_s5 + $0x43c] ss:$20 sps:$4 sm:$0xff]   ;;  %v3445_v54 = vld [vmem:[%s3626_s5 + $0x1c4] ss:$20 sps:$4 sm:$0xff]  }
  0x71   : > { %3038 = vmatprep.subr.bf16.mxu1 %v3461_v61 }
  0x72   : > { %3039 = vmatpush3.bf16.msra.mxu1 %v3461_v61  ;;  %v3455_v61 = vld [vmem:[%s3626_s5 + $0x48c] ss:$20 sps:$4 sm:$0xff]  }
  0x73   : > { %1886 = vmatpush1.bf16.msra.mxu0 %v3347_v55  ;;  %v3447_v55 = vld [vmem:[%s3626_s5 + $0x438] ss:$20 sps:$4 sm:$0xff]  }
  0x74   : > { %1887 = vmatprep.subr.bf16.mxu0 %v3563_v1 }
  0x76   : > { %1651 = vmatmul.mubr.bf16.gmra.mrb[20].mxu0 %v3352_v56  ;;  %1715 = vmatmul.mubr.bf16.gmra.mrb[20].mxu1 %v3353_v57  ;;  %v3448_v56 = vld [vmem:[%s3626_s5 + $0x1c0] ss:$20 sps:$4 sm:$0xff]   ;;  %v3449_v57 = vld [vmem:[%s3626_s5 + $0x464] ss:$20 sps:$4 sm:$0xff]  }
  0x77   : > { %1888 = vmatpush1.bf16.msra.mxu0 %v3354_v58  ;;  %1658 = vmatprep.mubr.bf16.mxu0 %v3356_v59  ;;  %v3451_v58 = vld [vmem:[%s3626_s5 + $0x1ec] ss:$20 sps:$4 sm:$0xff]  }
  0x78   : > { %1889 = vmatprep.subr.bf16.mxu0 %v3563_v1  ;;  %1722 = vmatprep.mubr.bf16.mxu1 %v3358_v60  ;;  %v3453_v59 = vld [vmem:[%s3626_s5 + $0x460] ss:$20 sps:$4 sm:$0xff]   ;;  %v3454_v60 = vld [vmem:[%s3626_s5 + $0x1e8] ss:$20 sps:$4 sm:$0xff]  }
  0x7b   : > { %1890 = vmatpush1.bf16.msra.mxu0 %v3355_v62  ;;  %v3457_v62 = vld [vmem:[%s3626_s5 + $0x214] ss:$20 sps:$4 sm:$0xff]  }
  0x7c   : > { %1891 = vmatprep.subr.bf16.mxu0 %v3563_v1 }
  0x7e   : > { %1659 = vmatmul.mubr.bf16.gmra.mrb[24].mxu0 %v3360_v63  ;;  %1723 = vmatmul.mubr.bf16.gmra.mrb[24].mxu1 %v3361_v0  ;;  %v3459_v63 = vld [vmem:[%s3626_s5 + $0x488] ss:$20 sps:$4 sm:$0xff]   ;;  %v3460_v0 = vld [vmem:[%s3626_s5 + $0x210] ss:$20 sps:$4 sm:$0xff]  }
  0x7f   : > { %1892 = vmatpush1.bf16.msra.mxu0 %v3362_v2  ;;  %1666 = vmatprep.mubr.bf16.mxu0 %v3365_v3  ;;  %v3462_v2 = vld [vmem:[%s3626_s5 + $0x4b4] ss:$20 sps:$4 sm:$0xff]   ;;  %v3464_v3 = vld [vmem:[%s3626_s5 + $0x23c] ss:$20 sps:$4 sm:$0xff]  }
  0x80   : > { %1893 = vmatprep.subr.bf16.mxu0 %v3563_v1  ;;  %1730 = vmatprep.mubr.bf16.mxu1 %v3367_v4  ;;  %v3466_v4 = vld [vmem:[%s3626_s5 + $0x4b0] ss:$20 sps:$4 sm:$0xff]  }
  0x83   : > { %1894 = vmatpush1.bf16.msra.mxu0 %v3364_v5  ;;  %v3467_v5 = vld [vmem:[%s3626_s5 + $0x238] ss:$20 sps:$4 sm:$0xff]  }
  0x84   : > { %1895 = vmatprep.subr.bf16.mxu0 %v3563_v1 }
  0x86   : > { %1667 = vmatmul.mubr.bf16.gmra.mrb[28].mxu0 %v3369_v6  ;;  %1731 = vmatmul.mubr.bf16.gmra.mrb[28].mxu1 %v3370_v7  ;;  %v3468_v6 = vld [vmem:[%s3626_s5 + $0x4dc] ss:$20 sps:$4 sm:$0xff]   ;;  %v3470_v7 = vld [vmem:[%s3626_s5 + $0x264] ss:$20 sps:$4 sm:$0xff]  }
  0x87   : > { %1896 = vmatpush1.bf16.msra.mxu0 %v3371_v8  ;;  %1738 = vmatprep.mubr.bf16.mxu1 %v3373_v9  ;;  %v3472_v8 = vld [vmem:[%s3626_s5 + $0x4d8] ss:$20 sps:$4 sm:$0xff]   ;;  %v3473_v9 = vld [vmem:[%s3626_s5 + $0x260] ss:$20 sps:$4 sm:$0xff]  }
  0x88   : > { %1897 = vmatprep.subr.bf16.mxu0 %v3563_v1  ;;  %1899 = vmatprep.mubr.bf16.mxu0 %v3377_v10  ;;  %v3388_v1 = vld [vmem:[%s3626_s5 + $0x5c] ss:$20 sps:$4 sm:$0xff]   ;;  %v3474_v10 = vld [vmem:[%s3626_s5 + $0x28c] ss:$20 sps:$4 sm:$0xff]  }
  0x8b   : > { %1898 = vmatpush1.bf16.msra.mxu0 %v3372_v11  ;;  %v3476_v11 = vld [vmem:[%s3626_s5 + $0x10] ss:$20 sps:$4 sm:$0xff]  }
  0x8e   : > { %1739 = vmatmul.mubr.bf16.gmra.mrb[32].mxu1 %v3378_v13  ;;  %1900 = vmatmul.mubr.bf16.vlgmr.msra.gmra.mrb[0].mxu0 %v3375_v12  ;;  %v3477_v12 = vld [vmem:[%s3626_s5 + $0x288] ss:$20 sps:$4 sm:$0xff]   ;;  %v3478_v13 = vld [vmem:[%s3626_s5 + $0x38] ss:$20 sps:$4 sm:$0xff]  }
  0x8f   : > { %1746 = vmatprep.mubr.bf16.mxu1 %v3379_v14  ;;  %1907 = vmatprep.mubr.bf16.mxu0 %v3381_v15  ;;  %v3479_v14 = vld [vmem:[%s3626_s5 + $0x2b4] ss:$20 sps:$4 sm:$0xff]  }
  0x90   : > { %v3481_v15 = vld [vmem:[%s3626_s5 + $0x60] ss:$20 sps:$4 sm:$0xff]  }
  0x96   : > { %1747 = vmatmul.mubr.bf16.gmra.mrb[36].mxu1 %v3383_v16  ;;  %1908 = vmatmul.mubr.bf16.gmra.mrb[4].mxu0 %v3384_v17  ;;  %v3482_v16 = vld [vmem:[%s3626_s5 + $0x2b0] ss:$20 sps:$4 sm:$0xff]   ;;  %v3483_v17 = vld [vmem:[%s3626_s5 + $0x88] ss:$20 sps:$4 sm:$0xff]  }
  0x97   : > { %1754 = vmatprep.mubr.bf16.mxu1 %v3386_v18  ;;  %1915 = vmatprep.mubr.bf16.mxu0 %v3388_v1  ;;  %v3484_v18 = vld [vmem:[%s3626_s5 + $0x2dc] ss:$20 sps:$4 sm:$0xff]  }
  0x98   : > { %v3486_v1 = vld [vmem:[%s3626_s5 + $0xb0] ss:$20 sps:$4 sm:$0xff]  }
  0x9e   : > { %1755 = vmatmul.mubr.bf16.gmra.mrb[40].mxu1 %v3390_v19  ;;  %1916 = vmatmul.mubr.bf16.gmra.mrb[8].mxu0 %v3391_v20  ;;  %v3487_v19 = vld [vmem:[%s3626_s5 + $0x2d8] ss:$20 sps:$4 sm:$0xff]  }
  0x9f   : > { %1762 = vmatprep.mubr.bf16.mxu1 %v3392_v21  ;;  %1923 = vmatprep.mubr.bf16.mxu0 %v3394_v22  ;;  %v3488_v20 = vld [vmem:[%s3626_s5 + $0xd8] ss:$20 sps:$4 sm:$0xff]   ;;  %v3491_v22 = vld [vmem:[%s3626_s5 + $0x100] ss:$20 sps:$4 sm:$0xff]  }
  0xa0   : > { %v3489_v21 = vld [vmem:[%s3626_s5 + $0x304] ss:$20 sps:$4 sm:$0xff]  }
  0xa6   : > { %1763 = vmatmul.mubr.bf16.gmra.mrb[44].mxu1 %v3396_v23  ;;  %1924 = vmatmul.mubr.bf16.gmra.mrb[12].mxu0 %v3397_v24 }
  0xa7   : > { %1770 = vmatprep.mubr.bf16.mxu1 %v3398_v25  ;;  %1931 = vmatprep.mubr.bf16.mxu0 %v3400_v26  ;;  %v3492_v25 = vld [vmem:[%s3626_s5 + $0x300] ss:$20 sps:$4 sm:$0xff]   ;;  %v3493_v26 = vld [vmem:[%s3626_s5 + $0x128] ss:$20 sps:$4 sm:$0xff]  }
  0xae   : > { %1771 = vmatmul.mubr.bf16.gmra.mrb[48].mxu1 %v3402_v27  ;;  %1932 = vmatmul.mubr.bf16.gmra.mrb[16].mxu0 %v3403_v28  ;;  %v3494_v28 = vld [vmem:[%s3626_s5 + $0x32c] ss:$20 sps:$4 sm:$0xff]  }
  0xaf   : > { %1778 = vmatprep.mubr.bf16.mxu1 %v3405_v29  ;;  %1939 = vmatprep.mubr.bf16.mxu0 %v3407_v30  ;;  %v3496_v29 = vld [vmem:[%s3626_s5 + $0x150] ss:$20 sps:$4 sm:$0xff]  }
  0xb6   : > { %1779 = vmatmul.mubr.bf16.gmra.mrb[52].mxu1 %v3409_v31  ;;  %1940 = vmatmul.mubr.bf16.gmra.mrb[20].mxu0 %v3410_v32 }
  0xb7   : > { %1786 = vmatprep.mubr.bf16.mxu1 %v3411_v33  ;;  %1947 = vmatprep.mubr.bf16.mxu0 %v3413_v34  ;;  %v3497_v33 = vld [vmem:[%s3626_s5 + $0x328] ss:$20 sps:$4 sm:$0xff]   ;;  %v3498_v34 = vld [vmem:[%s3626_s5 + $0x178] ss:$20 sps:$4 sm:$0xff]  }
  0xbe   : > { %1787 = vmatmul.mubr.bf16.gmra.mrb[56].mxu1 %v3415_v35  ;;  %1948 = vmatmul.mubr.bf16.gmra.mrb[24].mxu0 %v3416_v36  ;;  %v3499_v36 = vld [vmem:[%s3626_s5 + $0x354] ss:$20 sps:$4 sm:$0xff]  }
  0xbf   : > { %1794 = vmatprep.mubr.bf16.mxu1 %v3417_v37  ;;  %1955 = vmatprep.mubr.bf16.mxu0 %v3419_v38  ;;  %v3501_v37 = vld [vmem:[%s3626_s5 + $0x1a0] ss:$20 sps:$4 sm:$0xff]  }
  0xc6   : > { %1795 = vmatmul.mubr.bf16.gmra.mrb[60].mxu1 %v3421_v39  ;;  %1956 = vmatmul.mubr.bf16.gmra.mrb[28].mxu0 %v3422_v40 }
  0xc7   : > { %1802 = vmatprep.mubr.bf16.mxu1 %v3424_v41  ;;  %1963 = vmatprep.mubr.bf16.mxu0 %v3426_v42  ;;  %v3502_v41 = vld [vmem:[%s3626_s5 + $0x350] ss:$20 sps:$4 sm:$0xff]   ;;  %v3503_v42 = vld [vmem:[%s3626_s5 + $0x1c8] ss:$20 sps:$4 sm:$0xff]  }
  0xce   : > { %1803 = vmatmul.mubr.bf16.gmra.mrb[64].mxu1 %v3428_v43  ;;  %1964 = vmatmul.mubr.bf16.gmra.mrb[32].mxu0 %v3429_v44  ;;  %v3504_v44 = vld [vmem:[%s3626_s5 + $0x37c] ss:$20 sps:$4 sm:$0xff]  }
  0xcf   : > { %1810 = vmatprep.mubr.bf16.mxu1 %v3430_v45  ;;  %1971 = vmatprep.mubr.bf16.mxu0 %v3432_v46  ;;  %v3506_v45 = vld [vmem:[%s3626_s5 + $0x1f0] ss:$20 sps:$4 sm:$0xff]  }
  0xd6   : > { %1811 = vmatmul.mubr.bf16.gmra.mrb[68].mxu1 %v3434_v47  ;;  %1972 = vmatmul.mubr.bf16.gmra.mrb[36].mxu0 %v3435_v48 }
  0xd7   : > { %1818 = vmatprep.mubr.bf16.mxu1 %v3436_v49  ;;  %1979 = vmatprep.mubr.bf16.mxu0 %v3438_v50  ;;  %v3507_v49 = vld [vmem:[%s3626_s5 + $0x378] ss:$20 sps:$4 sm:$0xff]  }
  0xd8   : > { %v3508_v50 = vld [vmem:[%s3626_s5 + $0x218] ss:$20 sps:$4 sm:$0xff]  }
  0xde   : > { %1819 = vmatmul.mubr.bf16.gmra.mrb[72].mxu1 %v3440_v51  ;;  %1980 = vmatmul.mubr.bf16.gmra.mrb[40].mxu0 %v3441_v52  ;;  %v3509_v52 = vld [vmem:[%s3626_s5 + $0x3a4] ss:$20 sps:$4 sm:$0xff]  }
  0xdf   : > { %1826 = vmatprep.mubr.bf16.mxu1 %v3443_v53  ;;  %1987 = vmatprep.mubr.bf16.mxu0 %v3445_v54  ;;  %v3511_v53 = vld [vmem:[%s3626_s5 + $0x240] ss:$20 sps:$4 sm:$0xff]  }
  0xe6   : > { %1827 = vmatmul.mubr.bf16.gmra.mrb[76].mxu1 %v3447_v55  ;;  %1988 = vmatmul.mubr.bf16.gmra.mrb[44].mxu0 %v3448_v56 }
  0xe7   : > { %1834 = vmatprep.mubr.bf16.mxu1 %v3449_v57  ;;  %1995 = vmatprep.mubr.bf16.mxu0 %v3451_v58  ;;  %v3512_v57 = vld [vmem:[%s3626_s5 + $0x3a0] ss:$20 sps:$4 sm:$0xff]   ;;  %v3513_v58 = vld [vmem:[%s3626_s5 + $0x268] ss:$20 sps:$4 sm:$0xff]  }
  0xee   : > { %1835 = vmatmul.mubr.bf16.gmra.mrb[80].mxu1 %v3453_v59  ;;  %1996 = vmatmul.mubr.bf16.gmra.mrb[48].mxu0 %v3454_v60  ;;  %v3514_v60 = vld [vmem:[%s3626_s5 + $0x3cc] ss:$20 sps:$4 sm:$0xff]  }
  0xef   : > { %1842 = vmatprep.mubr.bf16.mxu1 %v3455_v61  ;;  %2003 = vmatprep.mubr.bf16.mxu0 %v3457_v62  ;;  %v3516_v61 = vld [vmem:[%s3626_s5 + $0x290] ss:$20 sps:$4 sm:$0xff]  }
  0xf6   : > { %1843 = vmatmul.mubr.bf16.gmra.mrb[84].mxu1 %v3459_v63  ;;  %2004 = vmatmul.mubr.bf16.gmra.mrb[52].mxu0 %v3460_v0 }
  0xf7   : > { %1850 = vmatprep.mubr.bf16.mxu1 %v3462_v2  ;;  %2011 = vmatprep.mubr.bf16.mxu0 %v3464_v3  ;;  %v3517_v2 = vld [vmem:[%s3626_s5 + $0x3c8] ss:$20 sps:$4 sm:$0xff]   ;;  %v3518_v3 = vld [vmem:[%s3626_s5 + $0x2b8] ss:$20 sps:$4 sm:$0xff]  }
  0xfe   : > { %1851 = vmatmul.mubr.bf16.gmra.mrb[88].mxu1 %v3466_v4  ;;  %2012 = vmatmul.mubr.bf16.gmra.mrb[56].mxu0 %v3467_v5  ;;  %v3519_v5 = vld [vmem:[%s3626_s5 + $0x3f4] ss:$20 sps:$4 sm:$0xff]  }
  0xff   : > { %1858 = vmatprep.mubr.bf16.mxu1 %v3468_v6  ;;  %2019 = vmatprep.mubr.bf16.mxu0 %v3470_v7  ;;  %v3521_v6 = vld [vmem:[%s3626_s5 + $0x2e0] ss:$20 sps:$4 sm:$0xff]  }
 0x106   : > { %1859 = vmatmul.mubr.bf16.gmra.mrb[92].mxu1 %v3472_v8  ;;  %2020 = vmatmul.mubr.bf16.gmra.mrb[60].mxu0 %v3473_v9 }
 0x107   : > { %2027 = vmatprep.mubr.bf16.mxu0 %v3474_v10  ;;  %3040 = vmatprep.mubr.bf16.mxu1 %v3476_v11  ;;  %v3522_v10 = vld [vmem:[%s3626_s5 + $0x3f0] ss:$20 sps:$4 sm:$0xff]   ;;  %v3523_v11 = vld [vmem:[%s3626_s5 + $0x308] ss:$20 sps:$4 sm:$0xff]  }
 0x10e   : > { %2028 = vmatmul.mubr.bf16.gmra.mrb[64].mxu0 %v3477_v12  ;;  %3041 = vmatmul.mubr.bf16.vlgmr.msra.gmra.mrb[96].mxu1 %v3478_v13  ;;  %v3524_v13 = vld [vmem:[%s3626_s5 + $0x41c] ss:$20 sps:$4 sm:$0xff]  }
 0x10f   : > { %2035 = vmatprep.mubr.bf16.mxu0 %v3479_v14  ;;  %3044 = vmatprep.mubr.bf16.mxu1 %v3481_v15  ;;  %v3526_v14 = vld [vmem:[%s3626_s5 + $0x330] ss:$20 sps:$4 sm:$0xff]  }
 0x116   : > { %2036 = vmatmul.mubr.bf16.gmra.mrb[68].mxu0 %v3482_v16  ;;  %3045 = vmatmul.mubr.bf16.gmra.mrb[100].mxu1 %v3483_v17 }
 0x117   : > { %2043 = vmatprep.mubr.bf16.mxu0 %v3484_v18  ;;  %3048 = vmatprep.mubr.bf16.mxu1 %v3486_v1  ;;  %v3527_v18 = vld [vmem:[%s3626_s5 + $0x418] ss:$20 sps:$4 sm:$0xff]  }
 0x118   : > { %v3528_v1 = vld [vmem:[%s3626_s5 + $0x358] ss:$20 sps:$4 sm:$0xff]  }
 0x11e   : > { %2044 = vmatmul.mubr.bf16.gmra.mrb[72].mxu0 %v3487_v19  ;;  %3049 = vmatmul.mubr.bf16.gmra.mrb[104].mxu1 %v3488_v20  ;;  %v3529_v20 = vld [vmem:[%s3626_s5 + $0x444] ss:$20 sps:$4 sm:$0xff]  }
 0x11f   : > { %2051 = vmatprep.mubr.bf16.mxu0 %v3489_v21  ;;  %3052 = vmatprep.mubr.bf16.mxu1 %v3491_v22  ;;  %v3531_v21 = vld [vmem:[%s3626_s5 + $0x380] ss:$20 sps:$4 sm:$0xff]  }
 0x121   : > { %v3883_v23 = vpop.f32.mrb[0].mxu1 }
 0x122   : > { %v1678_v24 = vpop.f32.mrb[1].mxu1 }
 0x123   : > { %v3887_v27 = vpop.f32.mrb[2].mxu1 }
 0x124   : > { %v1681_v30 = vpop.f32.mrb[3].mxu1 }
 0x125   : > { %v3533_v30 = vld [vmem:[%s3626_s5 + $0x3a8] ss:$20 sps:$4 sm:$0xff]  }
 0x126   : > { %2052 = vmatmul.mubr.bf16.gmra.mrb[76].mxu0 %v3492_v25  ;;  %3053 = vmatmul.mubr.bf16.gmra.mrb[108].mxu1 %v3493_v26 }
 0x127   : > { %2059 = vmatprep.mubr.bf16.mxu0 %v3494_v28  ;;  %3056 = vmatprep.mubr.bf16.mxu1 %v3496_v29  ;;  %v3532_v29 = vld [vmem:[%s3626_s5 + $0x440] ss:$20 sps:$4 sm:$0xff]  }
 0x129   : > { %v3891_v31 = vpop.f32.mrb[4].mxu1 }
 0x12a   : > { %v1686_v32 = vpop.f32.mrb[5].mxu1 }
 0x12b   : > { %v3895_v35 = vpop.f32.mrb[6].mxu1 }
 0x12c   : > { %v1689_v38 = vpop.f32.mrb[7].mxu1 }
 0x12e   : > { %2060 = vmatmul.mubr.bf16.gmra.mrb[80].mxu0 %v3497_v33  ;;  %3057 = vmatmul.mubr.bf16.gmra.mrb[112].mxu1 %v3498_v34  ;;  %v3534_v34 = vld [vmem:[%s3626_s5 + $0x46c] ss:$20 sps:$4 sm:$0xff]  }
 0x12f   : > { %2067 = vmatprep.mubr.bf16.mxu0 %v3499_v36  ;;  %3060 = vmatprep.mubr.bf16.mxu1 %v3501_v37  ;;  %v3536_v36 = vld [vmem:[%s3626_s5 + $0x3d0] ss:$20 sps:$4 sm:$0xff]  }
 0x131   : > { %v3899_v39 = vpop.f32.mrb[8].mxu1 }
 0x132   : > { %v1694_v40 = vpop.f32.mrb[9].mxu1 }
 0x133   : > { %v3903_v43 = vpop.f32.mrb[10].mxu1 }
 0x134   : > { %v1697_v46 = vpop.f32.mrb[11].mxu1 }
 0x135   : > { %v3538_v46 = vld [vmem:[%s3626_s5 + $0x3f8] ss:$20 sps:$4 sm:$0xff]  }
 0x136   : > { %2068 = vmatmul.mubr.bf16.gmra.mrb[84].mxu0 %v3502_v41  ;;  %3061 = vmatmul.mubr.bf16.gmra.mrb[116].mxu1 %v3503_v42 }
 0x137   : > { %2075 = vmatprep.mubr.bf16.mxu0 %v3504_v44  ;;  %3064 = vmatprep.mubr.bf16.mxu1 %v3506_v45  ;;  %v3537_v45 = vld [vmem:[%s3626_s5 + $0x468] ss:$20 sps:$4 sm:$0xff]  }
 0x139   : > { %v3907_v47 = vpop.f32.mrb[12].mxu1 }
 0x13a   : > { %v1702_v48 = vpop.f32.mrb[13].mxu1 }
 0x13b   : > { %v3911_v51 = vpop.f32.mrb[14].mxu1 }
 0x13c   : > { %v1705_v54 = vpop.f32.mrb[15].mxu1 }
 0x13e   : > { %2076 = vmatmul.mubr.bf16.gmra.mrb[88].mxu0 %v3507_v49  ;;  %3065 = vmatmul.mubr.bf16.gmra.mrb[120].mxu1 %v3508_v50  ;;  %v3539_v50 = vld [vmem:[%s3626_s5 + $0x494] ss:$20 sps:$4 sm:$0xff]  }
 0x13f   : > { %2083 = vmatprep.mubr.bf16.mxu0 %v3509_v52  ;;  %3068 = vmatprep.mubr.bf16.mxu1 %v3511_v53  ;;  %v3541_v52 = vld [vmem:[%s3626_s5 + $0x420] ss:$20 sps:$4 sm:$0xff]  }
 0x141   : > { %v3915_v55 = vpop.f32.mrb[16].mxu1 }
 0x142   : > { %v1710_v56 = vpop.f32.mrb[17].mxu1 }
 0x143   : > { %v3919_v59 = vpop.f32.mrb[18].mxu1 }
 0x144   : > { %v1713_v62 = vpop.f32.mrb[19].mxu1 }
 0x145   : > { %v3543_v62 = vld [vmem:[%s3626_s5 + $0x448] ss:$20 sps:$4 sm:$0xff]  }
 0x146   : > { %2084 = vmatmul.mubr.bf16.gmra.mrb[92].mxu0 %v3512_v57  ;;  %3069 = vmatmul.mubr.bf16.gmra.mrb[124].mxu1 %v3513_v58 }
 0x147   : > { %2091 = vmatprep.mubr.bf16.mxu0 %v3514_v60  ;;  %3072 = vmatprep.mubr.bf16.mxu1 %v3516_v61  ;;  %v3542_v61 = vld [vmem:[%s3626_s5 + $0x490] ss:$20 sps:$4 sm:$0xff]  }
 0x149   : > { %v3923_v63 = vpop.f32.mrb[20].mxu1 }
 0x14a   : > { %v1718_v0 = vpop.f32.mrb[21].mxu1 }
 0x14b   : > { %v3927_v4 = vpop.f32.mrb[22].mxu1 }
 0x14c   : > { %v1721_v7 = vpop.f32.mrb[23].mxu1 }
 0x14e   : > { %2092 = vmatmul.mubr.bf16.gmra.mrb[96].mxu0 %v3517_v2  ;;  %3073 = vmatmul.mubr.bf16.gmra.mrb[128].mxu1 %v3518_v3  ;;  %v3544_v3 = vld [vmem:[%s3626_s5 + $0x4bc] ss:$20 sps:$4 sm:$0xff]  }
 0x14f   : > { %2099 = vmatprep.mubr.bf16.mxu0 %v3519_v5  ;;  %3076 = vmatprep.mubr.bf16.mxu1 %v3521_v6  ;;  %v3546_v5 = vld [vmem:[%s3626_s5 + $0x470] ss:$20 sps:$4 sm:$0xff]  }
 0x151   : > { %v3931_v8 = vpop.f32.mrb[24].mxu1 }
 0x152   : > { %v1726_v9 = vpop.f32.mrb[25].mxu1 }
 0x153   : > { %v3935_v12 = vpop.f32.mrb[26].mxu1 }
 0x154   : > { %v1729_v15 = vpop.f32.mrb[27].mxu1 }
 0x155   : > { %v3548_v15 = vld [vmem:[%s3626_s5 + $0x498] ss:$20 sps:$4 sm:$0xff]  }
 0x156   : > { %2100 = vmatmul.mubr.bf16.gmra.mrb[100].mxu0 %v3522_v10  ;;  %3077 = vmatmul.mubr.bf16.gmra.mrb[132].mxu1 %v3523_v11 }
 0x157   : > { %2107 = vmatprep.mubr.bf16.mxu0 %v3524_v13  ;;  %3080 = vmatprep.mubr.bf16.mxu1 %v3526_v14  ;;  %v3547_v14 = vld [vmem:[%s3626_s5 + $0x4b8] ss:$20 sps:$4 sm:$0xff]  }
 0x159   : > { %v3939_v16 = vpop.f32.mrb[28].mxu1 }
 0x15a   : > { %v1734_v17 = vpop.f32.mrb[29].mxu1 }
 0x15b   : > { %v3943_v19 = vpop.f32.mrb[30].mxu1 }
 0x15c   : > { %v1737_v22 = vpop.f32.mrb[31].mxu1 }
 0x15e   : > { %2108 = vmatmul.mubr.bf16.gmra.mrb[104].mxu0 %v3527_v18  ;;  %3081 = vmatmul.mubr.bf16.gmra.mrb[136].mxu1 %v3528_v1  ;;  %v3549_v1 = vld [vmem:[%s3626_s5 + $0x4e4] ss:$20 sps:$4 sm:$0xff]  }
 0x15f   : > { %2115 = vmatprep.mubr.bf16.mxu0 %v3529_v20  ;;  %3084 = vmatprep.mubr.bf16.mxu1 %v3531_v21  ;;  %v3551_v20 = vld [vmem:[%s3626_s5 + $0x4c0] ss:$20 sps:$4 sm:$0xff]  }
 0x161   : > { %v3947_v24 = vpop.f32.mrb[32].mxu1  ;;  %v3949_v25 = vpop.f32.mrb[0].mxu0 }
 0x162   : > { %v1742_v26 = vpop.f32.mrb[33].mxu1  ;;  %v1903_v28 = vpop.f32.mrb[1].mxu0 }
 0x163   : > { %v3953_v32 = vpop.f32.mrb[34].mxu1  ;;  %v3955_v33 = vpop.f32.mrb[2].mxu0 }
 0x164   : > { %v1745_v37 = vpop.f32.mrb[35].mxu1  ;;  %v1906_v38 = vpop.f32.mrb[3].mxu0 }
 0x166   : > { %2116 = vmatmul.mubr.bf16.gmra.mrb[108].mxu0 %v3532_v29  ;;  %3085 = vmatmul.mubr.bf16.gmra.mrb[140].mxu1 %v3533_v30 }
 0x167   : > { %2123 = vmatprep.mubr.bf16.mxu0 %v3534_v34  ;;  %3088 = vmatprep.mubr.bf16.mxu1 %v3536_v36  ;;  %v3552_v34 = vld [vmem:[%s3626_s5 + $0x4e0] ss:$20 sps:$4 sm:$0xff]   ;;  %v3553_v36 = vld [vmem:[%s3626_s5 + $0x4e8] ss:$20 sps:$4 sm:$0xff]  }
 0x169   : > { %v3959_v40 = vpop.f32.mrb[36].mxu1  ;;  %v3961_v41 = vpop.f32.mrb[4].mxu0 }
 0x16a   : > { %v1750_v42 = vpop.f32.mrb[37].mxu1  ;;  %v1911_v44 = vpop.f32.mrb[5].mxu0 }
 0x16b   : > { %v3965_v48 = vpop.f32.mrb[38].mxu1  ;;  %v3967_v49 = vpop.f32.mrb[6].mxu0 }
 0x16c   : > { %v1753_v53 = vpop.f32.mrb[39].mxu1  ;;  %v1914_v54 = vpop.f32.mrb[7].mxu0 }
 0x16e   : > { %2124 = vmatmul.mubr.bf16.gmra.mrb[112].mxu0 %v3537_v45  ;;  %3089 = vmatmul.mubr.bf16.gmra.mrb[144].mxu1 %v3538_v46 }
 0x16f   : > { %2131 = vmatprep.mubr.bf16.mxu0 %v3539_v50  ;;  %3092 = vmatprep.mubr.bf16.mxu1 %v3541_v52 }
 0x171   : > { %v3971_v56 = vpop.f32.mrb[40].mxu1  ;;  %v3973_v57 = vpop.f32.mrb[8].mxu0 }
 0x172   : > { %v1758_v58 = vpop.f32.mrb[41].mxu1  ;;  %v1919_v60 = vpop.f32.mrb[9].mxu0 }
 0x173   : > { %v3977_v0 = vpop.f32.mrb[42].mxu1  ;;  %v3979_v2 = vpop.f32.mrb[10].mxu0 }
 0x174   : > { %v1761_v6 = vpop.f32.mrb[43].mxu1  ;;  %v1922_v7 = vpop.f32.mrb[11].mxu0 }
 0x176   : > { %2132 = vmatmul.mubr.bf16.gmra.mrb[116].mxu0 %v3542_v61  ;;  %3093 = vmatmul.mubr.bf16.gmra.mrb[148].mxu1 %v3543_v62 }
 0x177   : > { %2139 = vmatprep.mubr.bf16.mxu0 %v3544_v3  ;;  %3096 = vmatprep.mubr.bf16.mxu1 %v3546_v5 }
 0x179   : > { %v3983_v9 = vpop.f32.mrb[44].mxu1  ;;  %v3985_v10 = vpop.f32.mrb[12].mxu0 }
 0x17a   : > { %v1766_v11 = vpop.f32.mrb[45].mxu1  ;;  %v1927_v13 = vpop.f32.mrb[13].mxu0 }
 0x17b   : > { %v3989_v17 = vpop.f32.mrb[46].mxu1  ;;  %v3991_v18 = vpop.f32.mrb[14].mxu0 }
 0x17c   : > { %v1769_v21 = vpop.f32.mrb[47].mxu1  ;;  %v1930_v22 = vpop.f32.mrb[15].mxu0 }
 0x17e   : > { %2140 = vmatmul.mubr.bf16.gmra.mrb[120].mxu0 %v3547_v14  ;;  %3097 = vmatmul.mubr.bf16.gmra.mrb[152].mxu1 %v3548_v15 }
 0x17f   : > { %2147 = vmatprep.mubr.bf16.mxu0 %v3549_v1  ;;  %3100 = vmatprep.mubr.bf16.mxu1 %v3551_v20 }
 0x181   : > { %v3995_v26 = vpop.f32.mrb[48].mxu1  ;;  %v3997_v28 = vpop.f32.mrb[16].mxu0 }
 0x182   : > { %v1774_v29 = vpop.f32.mrb[49].mxu1  ;;  %v1935_v30 = vpop.f32.mrb[17].mxu0 }
 0x183   : > { %v4001_v37 = vpop.f32.mrb[50].mxu1  ;;  %v4003_v38 = vpop.f32.mrb[18].mxu0 }
 0x184   : > { %v1777_v42 = vpop.f32.mrb[51].mxu1  ;;  %v1938_v44 = vpop.f32.mrb[19].mxu0 }
 0x186   : > { %2148 = vmatmul.mubr.bf16.gmra.mrb[124].mxu0 %v3552_v34  ;;  %3101 = vmatmul.mubr.bf16.gmra.mrb[156].mxu1 %v3553_v36  ;;  %v4032_v34 = vld [vmem:[%s4537_s2] ss:$0 sm:$0xff] }
 0x187   : > { %v1677_v36 = vadd.f32 %v4032_v34, %v3883_v23  ;;  %v1685_v23 = vadd.f32 %v4032_v34, %v3891_v31  ;;  %v1693_v31 = vadd.f32 %v4032_v34, %v3899_v39  ;;  %v1701_v39 = vadd.f32 %v4032_v34, %v3907_v47 }
 0x188   : > { %v1709_v47 = vadd.f32 %v4032_v34, %v3915_v55  ;;  %v1717_v55 = vadd.f32 %v4032_v34, %v3923_v63  ;;  %v1725_v63 = vadd.f32 %v4032_v34, %v3931_v8  ;;  %v1733_v8 = vadd.f32 %v4032_v34, %v3939_v16 }
 0x189   : > { %v4005_v45 = vpop.f32.mrb[52].mxu1  ;;  %v4007_v46 = vpop.f32.mrb[20].mxu0  ;;  %v1741_v16 = vadd.f32 %v4032_v34, %v3947_v24 }
 0x18a   : > { %v1782_v50 = vpop.f32.mrb[53].mxu1  ;;  %v1943_v52 = vpop.f32.mrb[21].mxu0 }
 0x18b   : > { %v4009_v53 = vpop.f32.mrb[54].mxu1  ;;  %v4011_v54 = vpop.f32.mrb[22].mxu0  ;;  %v1680_v50 = vadd.f32 %v4032_v34, %v3887_v27  ;;  %v1688_v27 = vadd.f32 %v4032_v34, %v3895_v35  ;;  %v1696_v35 = vadd.f32 %v4032_v34, %v3903_v43  ;;  %v1704_v43 = vadd.f32 %v4032_v34, %v3911_v51 }
 0x18c   : > { %v1785_v58 = vpop.f32.mrb[55].mxu1  ;;  %v1946_v60 = vpop.f32.mrb[23].mxu0  ;;  %v1712_v51 = vadd.f32 %v4032_v34, %v3919_v59  ;;  %v1720_v59 = vadd.f32 %v4032_v34, %v3927_v4  ;;  %v1728_v4 = vadd.f32 %v4032_v34, %v3935_v12  ;;  %v1736_v12 = vadd.f32 %v4032_v34, %v3943_v19 }
 0x18d   : > { %v3138_v19 = vadd.f32 %v4032_v34, %v3961_v41 }
 0x191   : > { %v4013_v61 = vpop.f32.mrb[56].mxu1  ;;  %v4015_v62 = vpop.f32.mrb[24].mxu0 }
 0x192   : > { %v1790_v3 = vpop.f32.mrb[57].mxu1  ;;  %v1951_v5 = vpop.f32.mrb[25].mxu0 }
 0x193   : > { %v4017_v6 = vpop.f32.mrb[58].mxu1  ;;  %v4019_v7 = vpop.f32.mrb[26].mxu0 }
 0x194   : > { %v1793_v11 = vpop.f32.mrb[59].mxu1  ;;  %v1954_v13 = vpop.f32.mrb[27].mxu0 }
 0x199   : > { %v4021_v14 = vpop.f32.mrb[60].mxu1  ;;  %v4023_v15 = vpop.f32.mrb[28].mxu0 }
 0x19a   : > { %v1798_v1 = vpop.f32.mrb[61].mxu1  ;;  %v1959_v20 = vpop.f32.mrb[29].mxu0 }
 0x19b   : > { %v4025_v21 = vpop.f32.mrb[62].mxu1  ;;  %v4027_v22 = vpop.f32.mrb[30].mxu0 }
 0x19c   : > { %v1801_v29 = vpop.f32.mrb[63].mxu1  ;;  %v1962_v30 = vpop.f32.mrb[31].mxu0 }
 0x1a1   : > { %v4036_v42 = vpop.f32.mrb[64].mxu1  ;;  %v1965_v44 = vpop.f32.mrb[32].mxu0 }
 0x1a2   : > { %4540 = vst [vmem:[#allocation2_spill] sm:$0xff] %v4036_v42  ;;  %v4040_v52 = vadd.f32 %v1965_v44, %v1677_v36  ;;  %v1806_v58 = vpop.f32.mrb[65].mxu1  ;;  %v1967_v60 = vpop.f32.mrb[33].mxu0  ;;  %v2448_v42 = vld [vmem:[%s4136_s11 + $0x18] sm:$0xff] }
 0x1a3   : > { %v4042_v3 = vpop.f32.mrb[66].mxu1  ;;  %v1968_v5 = vpop.f32.mrb[34].mxu0 }
 0x1a4   : > { %4541 = vst [vmem:[#allocation3_spill] sm:$0xff] %v4042_v3  ;;  %v4044_v11 = vadd.f32 %v1968_v5, %v1680_v50  ;;  %v1809_v13 = vpop.f32.mrb[67].mxu1  ;;  %v1970_v1 = vpop.f32.mrb[35].mxu0 }
 0x1a9   : > { %v4048_v20 = vpop.f32.mrb[68].mxu1  ;;  %v1973_v29 = vpop.f32.mrb[36].mxu0 }
 0x1aa   : > { %4542 = vst [vmem:[#allocation4_spill] sm:$0xff] %v4048_v20  ;;  %v4052_v30 = vadd.f32 %v1973_v29, %v1685_v23  ;;  %v1814_v36 = vpop.f32.mrb[69].mxu1  ;;  %v1975_v44 = vpop.f32.mrb[37].mxu0 }
 0x1ab   : > { %v4054_v58 = vpop.f32.mrb[70].mxu1  ;;  %v1976_v60 = vpop.f32.mrb[38].mxu0 }
 0x1ac   : > { %4543 = vst [vmem:[#allocation5_spill] sm:$0xff] %v4054_v58  ;;  %v4056_v50 = vadd.f32 %v1976_v60, %v1688_v27  ;;  %v1817_v5 = vpop.f32.mrb[71].mxu1  ;;  %v1978_v13 = vpop.f32.mrb[39].mxu0 }
 0x1b1   : > { %v4060_v1 = vpop.f32.mrb[72].mxu1  ;;  %v1981_v20 = vpop.f32.mrb[40].mxu0 }
 0x1b2   : > { %4544 = vst [vmem:[#allocation6_spill] sm:$0xff] %v4060_v1  ;;  %v4064_v23 = vadd.f32 %v1981_v20, %v1693_v31  ;;  %v1822_v29 = vpop.f32.mrb[73].mxu1  ;;  %v1983_v36 = vpop.f32.mrb[41].mxu0 }
 0x1b3   : > { %v4066_v44 = vpop.f32.mrb[74].mxu1  ;;  %v1984_v58 = vpop.f32.mrb[42].mxu0 }
 0x1b4   : > { %4545 = vst [vmem:[#allocation7_spill] sm:$0xff] %v4066_v44  ;;  %v4068_v27 = vadd.f32 %v1984_v58, %v1696_v35  ;;  %v1825_v60 = vpop.f32.mrb[75].mxu1  ;;  %v1986_v5 = vpop.f32.mrb[43].mxu0 }
 0x1b9   : > { %v4072_v13 = vpop.f32.mrb[76].mxu1  ;;  %v1989_v1 = vpop.f32.mrb[44].mxu0 }
 0x1ba   : > { %4546 = vst [vmem:[#allocation8_spill] sm:$0xff] %v4072_v13  ;;  %v4076_v20 = vadd.f32 %v1989_v1, %v1701_v39  ;;  %v1830_v31 = vpop.f32.mrb[77].mxu1  ;;  %v1991_v29 = vpop.f32.mrb[45].mxu0 }
 0x1bb   : > { %v4078_v36 = vpop.f32.mrb[78].mxu1  ;;  %v1992_v44 = vpop.f32.mrb[46].mxu0 }
 0x1bc   : > { %4547 = vst [vmem:[#allocation9_spill] sm:$0xff] %v4078_v36  ;;  %v4080_v58 = vadd.f32 %v1992_v44, %v1704_v43  ;;  %v1833_v35 = vpop.f32.mrb[79].mxu1  ;;  %v1994_v60 = vpop.f32.mrb[47].mxu0 }
 0x1c1   : > { %v4084_v5 = vpop.f32.mrb[80].mxu1  ;;  %v1997_v13 = vpop.f32.mrb[48].mxu0 }
 0x1c2   : > { %4548 = vst [vmem:[#allocation10_spill] sm:$0xff] %v4084_v5  ;;  %v4088_v1 = vadd.f32 %v1997_v13, %v1709_v47  ;;  %v1838_v39 = vpop.f32.mrb[81].mxu1  ;;  %v1999_v31 = vpop.f32.mrb[49].mxu0 }
 0x1c3   : > { %v4090_v29 = vpop.f32.mrb[82].mxu1  ;;  %v2000_v36 = vpop.f32.mrb[50].mxu0 }
 0x1c4   : > { %4549 = vst [vmem:[#allocation11_spill] sm:$0xff] %v4090_v29  ;;  %v4092_v44 = vadd.f32 %v2000_v36, %v1712_v51  ;;  %v1841_v43 = vpop.f32.mrb[83].mxu1  ;;  %v2002_v35 = vpop.f32.mrb[51].mxu0 }
 0x1c9   : > { %v4096_v60 = vpop.f32.mrb[84].mxu1  ;;  %v2005_v5 = vpop.f32.mrb[52].mxu0 }
 0x1ca   : > { %4550 = vst [vmem:[#allocation12_spill] sm:$0xff] %v4096_v60  ;;  %v4100_v13 = vadd.f32 %v2005_v5, %v1717_v55  ;;  %v1846_v47 = vpop.f32.mrb[85].mxu1  ;;  %v2007_v39 = vpop.f32.mrb[53].mxu0 }
 0x1cb   : > { %v4102_v31 = vpop.f32.mrb[86].mxu1  ;;  %v2008_v29 = vpop.f32.mrb[54].mxu0 }
 0x1cc   : > { %4551 = vst [vmem:[#allocation13_spill] sm:$0xff] %v4102_v31  ;;  %v4104_v36 = vadd.f32 %v2008_v29, %v1720_v59  ;;  %v1849_v51 = vpop.f32.mrb[87].mxu1  ;;  %v2010_v43 = vpop.f32.mrb[55].mxu0 }
 0x1d1   : > { %v4108_v35 = vpop.f32.mrb[88].mxu1  ;;  %v2013_v60 = vpop.f32.mrb[56].mxu0 }
 0x1d2   : > { %4552 = vst [vmem:[#allocation14_spill] sm:$0xff] %v4108_v35  ;;  %v4112_v5 = vadd.f32 %v2013_v60, %v1725_v63  ;;  %v1854_v55 = vpop.f32.mrb[89].mxu1  ;;  %v2015_v47 = vpop.f32.mrb[57].mxu0 }
 0x1d3   : > { %v4114_v39 = vpop.f32.mrb[90].mxu1  ;;  %v2016_v29 = vpop.f32.mrb[58].mxu0 }
 0x1d4   : > { %4553 = vst [vmem:[#allocation15_spill] sm:$0xff] %v4112_v5  ;;  %4554 = vst [vmem:[#allocation16_spill] sm:$0xff] %v4114_v39  ;;  %v4116_v59 = vadd.f32 %v2016_v29, %v1728_v4  ;;  %v1857_v51 = vpop.f32.mrb[91].mxu1  ;;  %v2018_v43 = vpop.f32.mrb[59].mxu0 }
 0x1d6   : > { %4555 = vst [vmem:[#allocation17_spill] sm:$0xff] %v4116_v59 }
 0x1d9   : > { %v4120_v35 = vpop.f32.mrb[92].mxu1  ;;  %v2021_v31 = vpop.f32.mrb[60].mxu0 }
 0x1da   : > { %4556 = vst [vmem:[#allocation18_spill] sm:$0xff] %v4120_v35  ;;  %v4124_v60 = vadd.f32 %v2021_v31, %v1733_v8  ;;  %v1862_v63 = vpop.f32.mrb[93].mxu1  ;;  %v2023_v55 = vpop.f32.mrb[61].mxu0  ;;  %v3136_v31 = vadd.f32 %v4032_v34, %v3949_v25  ;;  %v3137_v25 = vadd.f32 %v4032_v34, %v3955_v33 }
 0x1db   : > { %v4126_v47 = vpop.f32.mrb[94].mxu1  ;;  %v2024_v4 = vpop.f32.mrb[62].mxu0  ;;  %v2447_v63 = vld [vmem:[%s4136_s11 + $0x10] sm:$0xff]  ;;  %v1744_v55 = vadd.f32 %v4032_v34, %v3953_v32 }
 0x1dc   : > { %4557 = vst [vmem:[#allocation19_spill] sm:$0xff] %v4126_v47  ;;  %v4129_v29 = vadd.f32 %v2024_v4, %v1736_v12  ;;  %v1865_v51 = vpop.f32.mrb[95].mxu1  ;;  %v2026_v43 = vpop.f32.mrb[63].mxu0  ;;  %v3139_v4 = vadd.f32 %v4032_v34, %v3967_v49  ;;  %v2445_v47 = vld [vmem:[%s4136_s11] sm:$0xff] }
 0x1de   : > { %4558 = vst [vmem:[#allocation20_spill] sm:$0xff] %v4129_v29 }
 0x1e1   : > { %v2029_v8 = vpop.f32.mrb[64].mxu0  ;;  %v3042_v12 = vpop.f32.mrb[96].mxu1 }
 0x1e2   : > { %v4149_v51 = vadd.f32 %v2029_v8, %v1741_v16  ;;  %v2199_v24 = vadd.f32 %v3138_v19, %v3042_v12  ;;  %v2031_v43 = vpop.f32.mrb[65].mxu0  ;;  %v2190_v41 = vpop.f32.mrb[97].mxu1  ;;  %v2446_v16 = vld [vmem:[%s4136_s11 + $0x8] sm:$0xff]  ;;  %v1749_v12 = vadd.f32 %v4032_v34, %v3959_v40  ;;  %v1752_v40 = vadd.f32 %v4032_v34, %v3965_v48 }
 0x1e3   : > { %v2191_v35 = vadd.f32 %v3136_v31, %v2190_v41  ;;  %v2032_v39 = vpop.f32.mrb[66].mxu0  ;;  %v3043_v3 = vpop.f32.mrb[98].mxu1  ;;  %v2449_v43 = vld [vmem:[%s4136_s11 + $0x20] sm:$0xff]  ;;  %v3141_v41 = vadd.f32 %v4032_v34, %v3979_v2 }
 0x1e4   : > { %v2511_v59 = vadd.f32 %v2447_v63, %v2199_v24  ;;  %v4155_v32 = vadd.f32 %v2032_v39, %v1744_v55  ;;  %v2202_v29 = vadd.f32 %v3139_v4, %v3043_v3  ;;  %v2034_v49 = vpop.f32.mrb[67].mxu0  ;;  %v2193_v5 = vpop.f32.mrb[99].mxu1  ;;  %v3142_v63 = vadd.f32 %v4032_v34, %v3985_v10 }
 0x1e5   : > { %v2509_v33 = vadd.f32 %v2445_v47, %v2191_v35  ;;  %v2194_v19 = vadd.f32 %v3137_v25, %v2193_v5  ;;  %v3140_v35 = vadd.f32 %v4032_v34, %v3973_v57  ;;  %v2451_v47 = vld [vmem:[%s4136_s11 + $0x30] sm:$0xff]  ;;  %v3143_v10 = vadd.f32 %v4032_v34, %v3991_v18 }
 0x1e6   : > { %v2575_v31 = vmax.f32 %v2511_v59, 0.0  ;;  %v2512_v39 = vadd.f32 %v2448_v42, %v2202_v29 }
 0x1e7   : > { %v2573_v8 = vmax.f32 %v2509_v33, 0.0  ;;  %v2510_v3 = vadd.f32 %v2446_v16, %v2194_v19  ;;  %v2452_v16 = vld [vmem:[%s4136_s11 + $0x38] sm:$0xff] }
 0x1e8   : > { %2640 = vst.msk [vmem:[%s4163_s14 + $0x10] sm:$0xff] %vm2637_vm0, %v2575_v31  ;;  %v2576_v55 = vmax.f32 %v2512_v39, 0.0 }
 0x1e9   : > { %2638 = vst.msk [vmem:[%s4163_s14] sm:$0xff] %vm2637_vm0, %v2573_v8  ;;  %v2574_v5 = vmax.f32 %v2510_v3, 0.0  ;;  %v2037_v42 = vpop.f32.mrb[68].mxu0  ;;  %v3046_v59 = vpop.f32.mrb[100].mxu1  ;;  %v2450_v8 = vld [vmem:[%s4136_s11 + $0x28] sm:$0xff] }
 0x1ea   : > { %2641 = vst.msk [vmem:[%s4163_s14 + $0x18] sm:$0xff] %vm2637_vm0, %v2576_v55  ;;  %v4182_v29 = vadd.f32 %v2037_v42, %v1749_v12  ;;  %v2215_v4 = vadd.f32 %v3142_v63, %v3046_v59  ;;  %v2039_v57 = vpop.f32.mrb[69].mxu0  ;;  %v2206_v24 = vpop.f32.mrb[101].mxu1  ;;  %v3146_v42 = vadd.f32 %v4032_v34, %v4007_v46  ;;  %v3147_v46 = vadd.f32 %v4032_v34, %v4011_v54 }
 0x1eb   : > { %2639 = vst.msk [vmem:[%s4163_s14 + $0x8] sm:$0xff] %vm2637_vm0, %v2574_v5  ;;  %v2207_v25 = vadd.f32 %v3140_v35, %v2206_v24  ;;  %v2040_v49 = vpop.f32.mrb[70].mxu0  ;;  %v3047_v48 = vpop.f32.mrb[102].mxu1  ;;  %v1757_v5 = vadd.f32 %v4032_v34, %v3971_v56  ;;  %v2455_v57 = vld [vmem:[%s4136_s11 + $0x50] sm:$0xff]  ;;  %v1760_v56 = vadd.f32 %v4032_v34, %v3977_v0 }
 0x1ec   : > { %v2515_v18 = vadd.f32 %v2451_v47, %v2215_v4  ;;  %v4190_v33 = vadd.f32 %v2040_v49, %v1752_v40  ;;  %v2218_v19 = vadd.f32 %v3143_v10, %v3047_v48  ;;  %v2042_v31 = vpop.f32.mrb[71].mxu0  ;;  %v2209_v39 = vpop.f32.mrb[103].mxu1  ;;  %v3144_v47 = vadd.f32 %v4032_v34, %v3997_v28 }
 0x1ed   : > { %v2513_v3 = vadd.f32 %v2449_v43, %v2207_v25  ;;  %v2210_v12 = vadd.f32 %v3141_v41, %v2209_v39  ;;  %v2453_v25 = vld [vmem:[%s4136_s11 + $0x40] sm:$0xff]  ;;  %v3145_v49 = vadd.f32 %v4032_v34, %v4003_v38 }
 0x1ee   : > { %v2579_v63 = vmax.f32 %v2515_v18, 0.0  ;;  %v2516_v2 = vadd.f32 %v2452_v16, %v2218_v19  ;;  %v2456_v18 = vld [vmem:[%s4136_s11 + $0x58] sm:$0xff] }
 0x1ef   : > { %v2577_v55 = vmax.f32 %v2513_v3, 0.0  ;;  %v2514_v35 = vadd.f32 %v2450_v8, %v2210_v12  ;;  %v2454_v3 = vld [vmem:[%s4136_s11 + $0x48] sm:$0xff] }
 0x1f0   : > { %2644 = vst.msk [vmem:[%s4163_s14 + $0x30] sm:$0xff] %vm2637_vm0, %v2579_v63  ;;  %v2580_v59 = vmax.f32 %v2516_v2, 0.0 }
 0x1f1   : > { %2642 = vst.msk [vmem:[%s4163_s14 + $0x20] sm:$0xff] %vm2637_vm0, %v2577_v55  ;;  %v2578_v40 = vmax.f32 %v2514_v35, 0.0  ;;  %v2045_v10 = vpop.f32.mrb[72].mxu0  ;;  %v3050_v4 = vpop.f32.mrb[104].mxu1 }
 0x1f2   : > { %2645 = vst.msk [vmem:[%s4163_s14 + $0x38] sm:$0xff] %vm2637_vm0, %v2580_v59  ;;  %v4210_v24 = vadd.f32 %v2045_v10, %v1757_v5  ;;  %v2231_v43 = vadd.f32 %v3146_v42, %v3050_v4  ;;  %v2047_v28 = vpop.f32.mrb[73].mxu0  ;;  %v2222_v41 = vpop.f32.mrb[105].mxu1  ;;  %v1765_v5 = vadd.f32 %v4032_v34, %v3983_v9  ;;  %v3150_v42 = vadd.f32 %v4032_v34, %v4023_v15 }
 0x1f3   : > { %2643 = vst.msk [vmem:[%s4163_s14 + $0x28] sm:$0xff] %vm2637_vm0, %v2578_v40  ;;  %v2223_v48 = vadd.f32 %v3144_v47, %v2222_v41  ;;  %v2048_v16 = vpop.f32.mrb[74].mxu0  ;;  %v3051_v0 = vpop.f32.mrb[106].mxu1  ;;  %v3148_v47 = vadd.f32 %v4032_v34, %v4015_v62  ;;  %v1768_v9 = vadd.f32 %v4032_v34, %v3989_v17  ;;  %v3151_v15 = vadd.f32 %v4032_v34, %v4027_v22  ;;  %v2457_v28 = vld [vmem:[%s4136_s11 + $0x60] sm:$0xff] }
 0x1f4   : > { %v2519_v54 = vadd.f32 %v2455_v57, %v2231_v43  ;;  %v4218_v19 = vadd.f32 %v2048_v16, %v1760_v56  ;;  %v2234_v31 = vadd.f32 %v3147_v46, %v3051_v0  ;;  %v2050_v39 = vpop.f32.mrb[75].mxu0  ;;  %v2225_v8 = vpop.f32.mrb[107].mxu1  ;;  %v2459_v57 = vld [vmem:[%s4136_s11 + $0x70] sm:$0xff]  ;;  %v3149_v41 = vadd.f32 %v4032_v34, %v4019_v7 }
 0x1f5   : > { %v2517_v12 = vadd.f32 %v2453_v25, %v2223_v48  ;;  %v2226_v63 = vadd.f32 %v3145_v49, %v2225_v8  ;;  %v2460_v48 = vld [vmem:[%s4136_s11 + $0x78] sm:$0xff] }
 0x1f6   : > { %v2583_v2 = vmax.f32 %v2519_v54, 0.0  ;;  %v2520_v38 = vadd.f32 %v2456_v18, %v2234_v31  ;;  %v2458_v31 = vld [vmem:[%s4136_s11 + $0x68] sm:$0xff] }
 0x1f7   : > { %v2581_v55 = vmax.f32 %v2517_v12, 0.0  ;;  %v2518_v35 = vadd.f32 %v2454_v3, %v2226_v63 }
 0x1f8   : > { %2648 = vst.msk [vmem:[%s4163_s14 + $0x50] sm:$0xff] %vm2637_vm0, %v2583_v2  ;;  %v2584_v59 = vmax.f32 %v2520_v38, 0.0  ;;  %v1773_v2 = vadd.f32 %v4032_v34, %v3995_v26 }
 0x1f9   : > { %2646 = vst.msk [vmem:[%s4163_s14 + $0x40] sm:$0xff] %vm2637_vm0, %v2581_v55  ;;  %v2582_v40 = vmax.f32 %v2518_v35, 0.0  ;;  %v2053_v10 = vpop.f32.mrb[76].mxu0  ;;  %v3054_v4 = vpop.f32.mrb[108].mxu1 }
 0x1fa   : > { %2649 = vst.msk [vmem:[%s4163_s14 + $0x58] sm:$0xff] %vm2637_vm0, %v2584_v59  ;;  %v4238_v56 = vadd.f32 %v2053_v10, %v1765_v5  ;;  %v2247_v46 = vadd.f32 %v3150_v42, %v3054_v4  ;;  %v2055_v62 = vpop.f32.mrb[77].mxu0  ;;  %v2238_v43 = vpop.f32.mrb[109].mxu1  ;;  %v2463_v42 = vld [vmem:[%s4136_s11 + $0x90] sm:$0xff]  ;;  %v1776_v59 = vadd.f32 %v4032_v34, %v4001_v37  ;;  %v2461_v4 = vld [vmem:[%s4136_s11 + $0x80] sm:$0xff] }
 0x1fb   : > { %2647 = vst.msk [vmem:[%s4163_s14 + $0x48] sm:$0xff] %vm2637_vm0, %v2582_v40  ;;  %v2239_v25 = vadd.f32 %v3148_v47, %v2238_v43  ;;  %v2056_v49 = vpop.f32.mrb[78].mxu0  ;;  %v3055_v17 = vpop.f32.mrb[110].mxu1 }
 0x1fc   : > { %v2523_v22 = vadd.f32 %v2459_v57, %v2247_v46  ;;  %v4246_v16 = vadd.f32 %v2056_v49, %v1768_v9  ;;  %v2250_v0 = vadd.f32 %v3151_v15, %v3055_v17  ;;  %v2058_v18 = vpop.f32.mrb[79].mxu0  ;;  %v2241_v54 = vpop.f32.mrb[111].mxu1  ;;  %v2464_v46 = vld [vmem:[%s4136_s11 + $0x98] sm:$0xff] }
 0x1fd   : > { %v2521_v39 = vadd.f32 %v2457_v28, %v2239_v25  ;;  %v2242_v8 = vadd.f32 %v3149_v41, %v2241_v54  ;;  %v2462_v41 = vld [vmem:[%s4136_s11 + $0x88] sm:$0xff] }
 0x1fe   : > { %v2587_v7 = vmax.f32 %v2523_v22, 0.0  ;;  %v2524_v3 = vadd.f32 %v2460_v48, %v2250_v0  ;;  %v1781_v0 = vadd.f32 %v4032_v34, %v4005_v45 }
 0x1ff   : > { %v2585_v12 = vmax.f32 %v2521_v39, 0.0  ;;  %v2522_v63 = vadd.f32 %v2458_v31, %v2242_v8  ;;  %v2467_v39 = vld [vmem:[%s4136_s11 + $0xb0] sm:$0xff] }
 0x200   : > { %2652 = vst.msk [vmem:[%s4163_s14 + $0x70] sm:$0xff] %vm2637_vm0, %v2587_v7  ;;  %v2588_v38 = vmax.f32 %v2524_v3, 0.0 }
 0x201   : > { %2650 = vst.msk [vmem:[%s4163_s14 + $0x60] sm:$0xff] %vm2637_vm0, %v2585_v12  ;;  %v2586_v55 = vmax.f32 %v2522_v63, 0.0  ;;  %v2061_v35 = vpop.f32.mrb[80].mxu0  ;;  %v3058_v5 = vpop.f32.mrb[112].mxu1  ;;  %v2465_v12 = vld [vmem:[%s4136_s11 + $0xa0] sm:$0xff] }
 0x202   : > { %2653 = vst.msk [vmem:[%s4163_s14 + $0x78] sm:$0xff] %vm2637_vm0, %v2588_v38  ;;  %v4260_v47 = vadd.f32 %v2061_v35, %v1773_v2  ;;  %v2263_v26 = vadd.f32 %v3058_v5, %v4052_v30  ;;  %v2063_v40 = vpop.f32.mrb[81].mxu0  ;;  %v2254_v10 = vpop.f32.mrb[113].mxu1 }
 0x203   : > { %2651 = vst.msk [vmem:[%s4163_s14 + $0x68] sm:$0xff] %vm2637_vm0, %v2586_v55  ;;  %v2255_v57 = vadd.f32 %v2254_v10, %v4040_v52  ;;  %v2064_v9 = vpop.f32.mrb[82].mxu0  ;;  %v3059_v15 = vpop.f32.mrb[114].mxu1  ;;  %v2468_v55 = vld [vmem:[%s4136_s11 + $0xb8] sm:$0xff] }
 0x204   : > { %v2527_v37 = vadd.f32 %v2463_v42, %v2263_v26  ;;  %v4268_v62 = vadd.f32 %v2064_v9, %v1776_v59  ;;  %v2266_v43 = vadd.f32 %v3059_v15, %v4056_v50  ;;  %v2066_v28 = vpop.f32.mrb[83].mxu0  ;;  %v2257_v30 = vpop.f32.mrb[115].mxu1  ;;  %v2466_v59 = vld [vmem:[%s4136_s11 + $0xa8] sm:$0xff]  ;;  %v1789_v9 = vadd.f32 %v4032_v34, %v4013_v61 }
 0x205   : > { %v2525_v25 = vadd.f32 %v2461_v4, %v2255_v57  ;;  %v2258_v49 = vadd.f32 %v2257_v30, %v4044_v11  ;;  %v1784_v11 = vadd.f32 %v4032_v34, %v4009_v53 }
 0x206   : > { %v2591_v17 = vmax.f32 %v2527_v37, 0.0  ;;  %v2528_v52 = vadd.f32 %v2464_v46, %v2266_v43  ;;  %v2471_v43 = vld [vmem:[%s4136_s11 + $0xd0] sm:$0xff] }
 0x207   : > { %v2589_v48 = vmax.f32 %v2525_v25, 0.0  ;;  %v2526_v22 = vadd.f32 %v2462_v41, %v2258_v49  ;;  %v2469_v25 = vld [vmem:[%s4136_s11 + $0xc0] sm:$0xff] }
 0x208   : > { %2656 = vst.msk [vmem:[%s4163_s14 + $0x90] sm:$0xff] %vm2637_vm0, %v2591_v17  ;;  %v2592_v50 = vmax.f32 %v2528_v52, 0.0 }
 0x209   : > { %2654 = vst.msk [vmem:[%s4163_s14 + $0x80] sm:$0xff] %vm2637_vm0, %v2589_v48  ;;  %v2590_v18 = vmax.f32 %v2526_v22, 0.0  ;;  %v2069_v54 = vpop.f32.mrb[84].mxu0  ;;  %v3062_v31 = vpop.f32.mrb[116].mxu1  ;;  %v2472_v48 = vld [vmem:[%s4136_s11 + $0xd8] sm:$0xff] }
 0x20a   : > { %2657 = vst.msk [vmem:[%s4163_s14 + $0x98] sm:$0xff] %vm2637_vm0, %v2592_v50  ;;  %v4284_v8 = vadd.f32 %v2069_v54, %v1781_v0  ;;  %v2279_v45 = vadd.f32 %v3062_v31, %v4076_v20  ;;  %v2071_v7 = vpop.f32.mrb[85].mxu0  ;;  %v2270_v3 = vpop.f32.mrb[117].mxu1 }
 0x20b   : > { %2655 = vst.msk [vmem:[%s4163_s14 + $0x88] sm:$0xff] %vm2637_vm0, %v2590_v18  ;;  %v2271_v63 = vadd.f32 %v2270_v3, %v4064_v23  ;;  %v2072_v2 = vpop.f32.mrb[86].mxu0  ;;  %v3063_v38 = vpop.f32.mrb[118].mxu1  ;;  %v2470_v18 = vld [vmem:[%s4136_s11 + $0xc8] sm:$0xff]  ;;  %v1797_v7 = vadd.f32 %v4032_v34, %v4021_v14 }
 0x20c   : > { %v2531_v53 = vadd.f32 %v2467_v39, %v2279_v45  ;;  %v4292_v35 = vadd.f32 %v2072_v2, %v1784_v11  ;;  %v2282_v5 = vadd.f32 %v3063_v38, %v4080_v58  ;;  %v2074_v42 = vpop.f32.mrb[87].mxu0  ;;  %v2273_v20 = vpop.f32.mrb[119].mxu1  ;;  %v2475_v2 = vld [vmem:[%s4136_s11 + $0xf0] sm:$0xff] }
 0x20d   : > { %v2529_v26 = vadd.f32 %v2465_v12, %v2271_v63  ;;  %v2274_v40 = vadd.f32 %v2273_v20, %v4068_v27  ;;  %v1792_v27 = vadd.f32 %v4032_v34, %v4017_v6  ;;  %v4559_v42 = vld [vmem:[#allocation15_spill] sm:$0xff] }
 0x20e   : > { %v2595_v10 = vmax.f32 %v2531_v53, 0.0  ;;  %v2532_v23 = vadd.f32 %v2468_v55, %v2282_v5  ;;  %v2473_v5 = vld [vmem:[%s4136_s11 + $0xe0] sm:$0xff] }
 0x20f   : > { %v2593_v4 = vmax.f32 %v2529_v26, 0.0  ;;  %v2530_v57 = vadd.f32 %v2466_v59, %v2274_v40  ;;  %v2476_v40 = vld [vmem:[%s4136_s11 + $0xf8] sm:$0xff] }
 0x210   : > { %2660 = vst.msk [vmem:[%s4163_s14 + $0xb0] sm:$0xff] %vm2637_vm0, %v2595_v10  ;;  %v2596_v58 = vmax.f32 %v2532_v23, 0.0  ;;  %v4560_v23 = vld [vmem:[#allocation20_spill] sm:$0xff] }
 0x211   : > { %2658 = vst.msk [vmem:[%s4163_s14 + $0xa0] sm:$0xff] %vm2637_vm0, %v2593_v4  ;;  %v2594_v15 = vmax.f32 %v2530_v57, 0.0  ;;  %v2077_v46 = vpop.f32.mrb[88].mxu0  ;;  %v3066_v37 = vpop.f32.mrb[120].mxu1 }
 0x212   : > { %2661 = vst.msk [vmem:[%s4163_s14 + $0xb8] sm:$0xff] %vm2637_vm0, %v2596_v58  ;;  %v4308_v28 = vadd.f32 %v2077_v46, %v1789_v9  ;;  %v2295_v61 = vadd.f32 %v3066_v37, %v4100_v13  ;;  %v2079_v30 = vpop.f32.mrb[89].mxu0  ;;  %v2286_v41 = vpop.f32.mrb[121].mxu1  ;;  %v2474_v9 = vld [vmem:[%s4136_s11 + $0xe8] sm:$0xff] }
 0x213   : > { %2659 = vst.msk [vmem:[%s4163_s14 + $0xa8] sm:$0xff] %vm2637_vm0, %v2594_v15  ;;  %v2287_v49 = vadd.f32 %v2286_v41, %v4088_v1  ;;  %v2080_v17 = vpop.f32.mrb[90].mxu0  ;;  %v3067_v52 = vpop.f32.mrb[122].mxu1  ;;  %v4561_v15 = vld [vmem:[#allocation17_spill] sm:$0xff]  ;;  %v4562_v30 = vld [vmem:[#allocation2_spill] sm:$0xff] }
 0x214   : > { %v2535_v6 = vadd.f32 %v2471_v43, %v2295_v61  ;;  %v4316_v22 = vadd.f32 %v2080_v17, %v1792_v27  ;;  %v2298_v0 = vadd.f32 %v3067_v52, %v4104_v36  ;;  %v2082_v50 = vpop.f32.mrb[91].mxu0  ;;  %v2289_v13 = vpop.f32.mrb[123].mxu1  ;;  %v1805_v41 = vadd.f32 %v4032_v34, %v4562_v30 }
 0x215   : > { %v2533_v54 = vadd.f32 %v2469_v25, %v2287_v49  ;;  %v2290_v31 = vadd.f32 %v2289_v13, %v4092_v44  ;;  %v1800_v44 = vadd.f32 %v4032_v34, %v4025_v21 }
 0x216   : > { %v2599_v39 = vmax.f32 %v2535_v6, 0.0  ;;  %v2536_v1 = vadd.f32 %v2472_v48, %v2298_v0  ;;  %v2479_v48 = vld [vmem:[%s4136_s11 + $0x110] sm:$0xff]  ;;  %v4563_v6 = vld [vmem:[#allocation3_spill] sm:$0xff] }
 0x217   : > { %v2597_v11 = vmax.f32 %v2533_v54, 0.0  ;;  %v2534_v45 = vadd.f32 %v2470_v18, %v2290_v31  ;;  %v1808_v0 = vadd.f32 %v4032_v34, %v4563_v6  ;;  %v2477_v31 = vld [vmem:[%s4136_s11 + $0x100] sm:$0xff] }
 0x218   : > { %2664 = vst.msk [vmem:[%s4163_s14 + $0xd0] sm:$0xff] %vm2637_vm0, %v2599_v39  ;;  %v2600_v36 = vmax.f32 %v2536_v1, 0.0  ;;  %v4566_v6 = vld [vmem:[#allocation6_spill] sm:$0xff] }
 0x219   : > { %2662 = vst.msk [vmem:[%s4163_s14 + $0xc0] sm:$0xff] %vm2637_vm0, %v2597_v11  ;;  %v2598_v3 = vmax.f32 %v2534_v45, 0.0  ;;  %v2085_v12 = vpop.f32.mrb[92].mxu0  ;;  %v3070_v63 = vpop.f32.mrb[124].mxu1  ;;  %v2480_v45 = vld [vmem:[%s4136_s11 + $0x118] sm:$0xff] }
 0x21a   : > { %2665 = vst.msk [vmem:[%s4163_s14 + $0xd8] sm:$0xff] %vm2637_vm0, %v2600_v36  ;;  %v4332_v38 = vadd.f32 %v2085_v12, %v1797_v7  ;;  %v2311_v14 = vadd.f32 %v3070_v63, %v4124_v60  ;;  %v2087_v55 = vpop.f32.mrb[93].mxu0  ;;  %v2302_v53 = vpop.f32.mrb[125].mxu1  ;;  %v2478_v63 = vld [vmem:[%s4136_s11 + $0x108] sm:$0xff] }
 0x21b   : > { %2663 = vst.msk [vmem:[%s4163_s14 + $0xc8] sm:$0xff] %vm2637_vm0, %v2598_v3  ;;  %v2303_v20 = vadd.f32 %v2302_v53, %v4559_v42  ;;  %v2088_v59 = vpop.f32.mrb[94].mxu0  ;;  %v3071_v26 = vpop.f32.mrb[126].mxu1 }
 0x21c   : > { %v2539_v21 = vadd.f32 %v2475_v2, %v2311_v14  ;;  %v4340_v10 = vadd.f32 %v2088_v59, %v1800_v44  ;;  %v2314_v4 = vadd.f32 %v3071_v26, %v4560_v23  ;;  %v2090_v57 = vpop.f32.mrb[95].mxu0  ;;  %v2305_v60 = vpop.f32.mrb[127].mxu1 }
 0x21d   : > { %v2537_v58 = vadd.f32 %v2473_v5, %v2303_v20  ;;  %v2306_v46 = vadd.f32 %v2305_v60, %v4561_v15  ;;  %v4564_v5 = vld [vmem:[#allocation4_spill] sm:$0xff] }
 0x21e   : > { %v2603_v37 = vmax.f32 %v2539_v21, 0.0  ;;  %v2540_v43 = vadd.f32 %v2476_v40, %v2314_v4  ;;  %v1813_v42 = vadd.f32 %v4032_v34, %v4564_v5  ;;  %v2483_v40 = vld [vmem:[%s4136_s11 + $0x130] sm:$0xff] }
 0x21f   : > { %v2601_v27 = vmax.f32 %v2537_v58, 0.0  ;;  %v2538_v61 = vadd.f32 %v2474_v9, %v2306_v46  ;;  %v2481_v9 = vld [vmem:[%s4136_s11 + $0x120] sm:$0xff] }
 0x220   : > { %2668 = vst.msk [vmem:[%s4163_s14 + $0xf0] sm:$0xff] %vm2637_vm0, %v2603_v37  ;;  %v2604_v25 = vmax.f32 %v2540_v43, 0.0  ;;  %v2484_v37 = vld [vmem:[%s4136_s11 + $0x138] sm:$0xff] }
 0x221   : > { %2666 = vst.msk [vmem:[%s4163_s14 + $0xe0] sm:$0xff] %vm2637_vm0, %v2601_v27  ;;  %v2602_v49 = vmax.f32 %v2538_v61, 0.0  ;;  %v2093_v17 = vpop.f32.mrb[96].mxu0  ;;  %v3074_v52 = vpop.f32.mrb[128].mxu1 }
 0x222   : > { %2669 = vst.msk [vmem:[%s4163_s14 + $0xf8] sm:$0xff] %vm2637_vm0, %v2604_v25  ;;  %v4356_v50 = vadd.f32 %v2093_v17, %v1805_v41  ;;  %v2327_v13 = vadd.f32 %v3074_v52, %v4182_v29  ;;  %v2095_v18 = vpop.f32.mrb[97].mxu0  ;;  %v2318_v54 = vpop.f32.mrb[129].mxu1  ;;  %v2482_v41 = vld [vmem:[%s4136_s11 + $0x128] sm:$0xff] }
 0x223   : > { %2667 = vst.msk [vmem:[%s4163_s14 + $0xe8] sm:$0xff] %vm2637_vm0, %v2602_v49  ;;  %v2319_v39 = vadd.f32 %v2318_v54, %v4149_v51  ;;  %v2096_v1 = vpop.f32.mrb[98].mxu0  ;;  %v3075_v11 = vpop.f32.mrb[130].mxu1 }
 0x224   : > { %v2543_v7 = vadd.f32 %v2479_v48, %v2327_v13  ;;  %v4364_v36 = vadd.f32 %v2096_v1, %v1808_v0  ;;  %v2330_v3 = vadd.f32 %v3075_v11, %v4190_v33  ;;  %v2098_v12 = vpop.f32.mrb[99].mxu0  ;;  %v2321_v29 = vpop.f32.mrb[131].mxu1  ;;  %v1821_v0 = vadd.f32 %v4032_v34, %v4566_v6 }
 0x225   : > { %v2541_v2 = vadd.f32 %v2477_v31, %v2319_v39  ;;  %v2322_v44 = vadd.f32 %v2321_v29, %v4155_v32  ;;  %v4565_v32 = vld [vmem:[#allocation5_spill] sm:$0xff]  ;;  %v2487_v31 = vld [vmem:[%s4136_s11 + $0x150] sm:$0xff] }
 0x226   : > { %v2607_v14 = vmax.f32 %v2543_v7, 0.0  ;;  %v2544_v51 = vadd.f32 %v2480_v45, %v2330_v3  ;;  %v1816_v21 = vadd.f32 %v4032_v34, %v4565_v32  ;;  %v2485_v3 = vld [vmem:[%s4136_s11 + $0x140] sm:$0xff] }
 0x227   : > { %v2605_v55 = vmax.f32 %v2541_v2, 0.0  ;;  %v2542_v53 = vadd.f32 %v2478_v63, %v2322_v44  ;;  %v2488_v2 = vld [vmem:[%s4136_s11 + $0x158] sm:$0xff] }
 0x228   : > { %2672 = vst.msk [vmem:[%s4163_s14 + $0x110] sm:$0xff] %vm2637_vm0, %v2607_v14  ;;  %v2608_v33 = vmax.f32 %v2544_v51, 0.0 }
 0x229   : > { %2670 = vst.msk [vmem:[%s4163_s14 + $0x100] sm:$0xff] %vm2637_vm0, %v2605_v55  ;;  %v2606_v20 = vmax.f32 %v2542_v53, 0.0  ;;  %v2101_v59 = vpop.f32.mrb[100].mxu0  ;;  %v3078_v26 = vpop.f32.mrb[132].mxu1  ;;  %v2486_v53 = vld [vmem:[%s4136_s11 + $0x148] sm:$0xff] }
 0x22a   : > { %2673 = vst.msk [vmem:[%s4163_s14 + $0x118] sm:$0xff] %vm2637_vm0, %v2608_v33  ;;  %v4380_v23 = vadd.f32 %v2101_v59, %v1813_v42  ;;  %v2343_v4 = vadd.f32 %v3078_v26, %v4238_v56  ;;  %v2103_v57 = vpop.f32.mrb[101].mxu0  ;;  %v2334_v60 = vpop.f32.mrb[133].mxu1  ;;  %v4568_v26 = vld [vmem:[#allocation8_spill] sm:$0xff] }
 0x22b   : > { %2671 = vst.msk [vmem:[%s4163_s14 + $0x108] sm:$0xff] %vm2637_vm0, %v2606_v20  ;;  %v2335_v58 = vadd.f32 %v2334_v60, %v4210_v24  ;;  %v2104_v15 = vpop.f32.mrb[102].mxu0  ;;  %v3079_v46 = vpop.f32.mrb[134].mxu1  ;;  %v2491_v57 = vld [vmem:[%s4136_s11 + $0x170] sm:$0xff] }
 0x22c   : > { %v2547_v43 = vadd.f32 %v2483_v40, %v2343_v4  ;;  %v4388_v27 = vadd.f32 %v2104_v15, %v1816_v21  ;;  %v2346_v61 = vadd.f32 %v3079_v46, %v4246_v16  ;;  %v2106_v30 = vpop.f32.mrb[103].mxu0  ;;  %v2337_v56 = vpop.f32.mrb[135].mxu1  ;;  %v1829_v40 = vadd.f32 %v4032_v34, %v4568_v26  ;;  %v4468_v26 = vld [vmem:[%s4537_s2] ss:$0 sm:$0xff] }
 0x22d   : > { %v2545_v25 = vadd.f32 %v2481_v9, %v2335_v58  ;;  %v2338_v49 = vadd.f32 %v2337_v56, %v4218_v19  ;;  %v4567_v19 = vld [vmem:[#allocation7_spill] sm:$0xff]  ;;  %v2492_v56 = vld [vmem:[%s4136_s11 + $0x178] sm:$0xff] }
 0x22e   : > { %v2611_v17 = vmax.f32 %v2547_v43, 0.0  ;;  %v2548_v24 = vadd.f32 %v2484_v37, %v2346_v61  ;;  %v1824_v39 = vadd.f32 %v4032_v34, %v4567_v19  ;;  %v2489_v37 = vld [vmem:[%s4136_s11 + $0x160] sm:$0xff] }
 0x22f   : > { %v2609_v52 = vmax.f32 %v2545_v25, 0.0  ;;  %v2546_v48 = vadd.f32 %v2482_v41, %v2338_v49 }
 0x230   : > { %2676 = vst.msk [vmem:[%s4163_s14 + $0x130] sm:$0xff] %vm2637_vm0, %v2611_v17  ;;  %v2612_v16 = vmax.f32 %v2548_v24, 0.0  ;;  %v2490_v24 = vld [vmem:[%s4136_s11 + $0x168] sm:$0xff] }
 0x231   : > { %2674 = vst.msk [vmem:[%s4163_s14 + $0x120] sm:$0xff] %vm2637_vm0, %v2609_v52  ;;  %v2610_v13 = vmax.f32 %v2546_v48, 0.0  ;;  %v2109_v18 = vpop.f32.mrb[104].mxu0  ;;  %v3082_v54 = vpop.f32.mrb[136].mxu1 }
 0x232   : > { %2677 = vst.msk [vmem:[%s4163_s14 + $0x138] sm:$0xff] %vm2637_vm0, %v2612_v16  ;;  %v4404_v1 = vadd.f32 %v2109_v18, %v1821_v0  ;;  %v2359_v11 = vadd.f32 %v3082_v54, %v4284_v8  ;;  %v2111_v45 = vpop.f32.mrb[105].mxu0  ;;  %v2350_v7 = vpop.f32.mrb[137].mxu1 }
 0x233   : > { %2675 = vst.msk [vmem:[%s4163_s14 + $0x128] sm:$0xff] %vm2637_vm0, %v2610_v13  ;;  %v2351_v12 = vadd.f32 %v2350_v7, %v4260_v47  ;;  %v2112_v29 = vpop.f32.mrb[106].mxu0  ;;  %v3083_v63 = vpop.f32.mrb[138].mxu1  ;;  %v4570_v13 = vld [vmem:[#allocation10_spill] sm:$0xff] }
 0x234   : > { %v2551_v44 = vadd.f32 %v2487_v31, %v2359_v11  ;;  %v4412_v14 = vadd.f32 %v2112_v29, %v1824_v39  ;;  %v2362_v51 = vadd.f32 %v3083_v63, %v4292_v35  ;;  %v2114_v55 = vpop.f32.mrb[107].mxu0  ;;  %v2353_v8 = vpop.f32.mrb[139].mxu1  ;;  %v1837_v18 = vadd.f32 %v4032_v34, %v4570_v13  ;;  %v2495_v39 = vld [vmem:[%s4136_s11 + $0x190] sm:$0xff]  ;;  %v2493_v29 = vld [vmem:[%s4136_s11 + $0x180] sm:$0xff] }
 0x235   : > { %v2549_v5 = vadd.f32 %v2485_v3, %v2351_v12  ;;  %v2354_v42 = vadd.f32 %v2353_v8, %v4268_v62  ;;  %v4569_v62 = vld [vmem:[#allocation9_spill] sm:$0xff] }
 0x236   : > { %v2615_v33 = vmax.f32 %v2551_v44, 0.0  ;;  %v2552_v47 = vadd.f32 %v2488_v2, %v2362_v51  ;;  %v1832_v60 = vadd.f32 %v4032_v34, %v4569_v62  ;;  %v2496_v51 = vld [vmem:[%s4136_s11 + $0x198] sm:$0xff] }
 0x237   : > { %v2613_v20 = vmax.f32 %v2549_v5, 0.0  ;;  %v2550_v59 = vadd.f32 %v2486_v53, %v2354_v42 }
 0x238   : > { %2680 = vst.msk [vmem:[%s4163_s14 + $0x150] sm:$0xff] %vm2637_vm0, %v2615_v33  ;;  %v2616_v35 = vmax.f32 %v2552_v47, 0.0 }
 0x239   : > { %2678 = vst.msk [vmem:[%s4163_s14 + $0x140] sm:$0xff] %vm2637_vm0, %v2613_v20  ;;  %v2614_v32 = vmax.f32 %v2550_v59, 0.0  ;;  %v2117_v21 = vpop.f32.mrb[108].mxu0  ;;  %v3086_v4 = vpop.f32.mrb[140].mxu1 }
 0x23a   : > { %2681 = vst.msk [vmem:[%s4163_s14 + $0x158] sm:$0xff] %vm2637_vm0, %v2616_v35  ;;  %v4428_v9 = vadd.f32 %v2117_v21, %v1829_v40  ;;  %v2375_v58 = vadd.f32 %v3086_v4, %v4332_v38  ;;  %v2119_v15 = vpop.f32.mrb[109].mxu0  ;;  %v2366_v46 = vpop.f32.mrb[141].mxu1  ;;  %v4572_v40 = vld [vmem:[#allocation12_spill] sm:$0xff] }
 0x23b   : > { %2679 = vst.msk [vmem:[%s4163_s14 + $0x148] sm:$0xff] %vm2637_vm0, %v2614_v32  ;;  %v2367_v43 = vadd.f32 %v2366_v46, %v4308_v28  ;;  %v2120_v61 = vpop.f32.mrb[110].mxu0  ;;  %v3087_v30 = vpop.f32.mrb[142].mxu1  ;;  %v2499_v4 = vld [vmem:[%s4136_s11 + $0x1b0] sm:$0xff] }
 0x23c   : > { %v2555_v41 = vadd.f32 %v2491_v57, %v2375_v58  ;;  %v4436_v25 = vadd.f32 %v2120_v61, %v1832_v60  ;;  %v2378_v49 = vadd.f32 %v3087_v30, %v4340_v10  ;;  %v2122_v17 = vpop.f32.mrb[111].mxu0  ;;  %v2369_v38 = vpop.f32.mrb[143].mxu1  ;;  %v4573_v57 = vld [vmem:[#allocation13_spill] sm:$0xff] }
 0x23d   : > { %v2553_v52 = vadd.f32 %v2489_v37, %v2367_v43  ;;  %v2370_v48 = vadd.f32 %v2369_v38, %v4316_v22  ;;  %v4571_v22 = vld [vmem:[#allocation11_spill] sm:$0xff]  ;;  %v1848_v62 = vadd.f32 %v4468_v26, %v4573_v57  ;;  %v2497_v37 = vld [vmem:[%s4136_s11 + $0x1a0] sm:$0xff] }
 0x23e   : > { %v2619_v6 = vmax.f32 %v2555_v41, 0.0  ;;  %v2556_v28 = vadd.f32 %v2492_v56, %v2378_v49  ;;  %v1840_v11 = vadd.f32 %v4032_v34, %v4571_v22  ;;  %v2500_v56 = vld [vmem:[%s4136_s11 + $0x1b8] sm:$0xff] }
 0x23f   : > { %v2617_v0 = vmax.f32 %v2553_v52, 0.0  ;;  %v2554_v16 = vadd.f32 %v2490_v24, %v2370_v48 }
 0x240   : > { %2684 = vst.msk [vmem:[%s4163_s14 + $0x170] sm:$0xff] %vm2637_vm0, %v2619_v6  ;;  %v2620_v10 = vmax.f32 %v2556_v28, 0.0 }
 0x241   : > { %2682 = vst.msk [vmem:[%s4163_s14 + $0x160] sm:$0xff] %vm2637_vm0, %v2617_v0  ;;  %v2618_v54 = vmax.f32 %v2554_v16, 0.0  ;;  %v2125_v31 = vpop.f32.mrb[112].mxu0  ;;  %v3090_v19 = vpop.f32.mrb[144].mxu1  ;;  %v4574_v16 = vld [vmem:[#allocation14_spill] sm:$0xff] }
 0x242   : > { %2685 = vst.msk [vmem:[%s4163_s14 + $0x178] sm:$0xff] %vm2637_vm0, %v2620_v10  ;;  %v4452_v45 = vadd.f32 %v2125_v31, %v1837_v18  ;;  %v2391_v7 = vadd.f32 %v3090_v19, %v4380_v23  ;;  %v2127_v3 = vpop.f32.mrb[113].mxu0  ;;  %v2382_v12 = vpop.f32.mrb[145].mxu1  ;;  %v2494_v23 = vld [vmem:[%s4136_s11 + $0x188] sm:$0xff]  ;;  %v1853_v13 = vadd.f32 %v4468_v26, %v4574_v16  ;;  %v2503_v31 = vld [vmem:[%s4136_s11 + $0x1d0] sm:$0xff] }
 0x243   : > { %2683 = vst.msk [vmem:[%s4163_s14 + $0x168] sm:$0xff] %vm2637_vm0, %v2618_v54  ;;  %v2383_v63 = vadd.f32 %v2382_v12, %v4356_v50  ;;  %v2128_v2 = vpop.f32.mrb[114].mxu0  ;;  %v3091_v44 = vpop.f32.mrb[146].mxu1  ;;  %v2501_v3 = vld [vmem:[%s4136_s11 + $0x1c0] sm:$0xff] }
 0x244   : > { %v2559_v55 = vadd.f32 %v2495_v39, %v2391_v7  ;;  %v4460_v34 = vadd.f32 %v2128_v2, %v1840_v11  ;;  %v2394_v8 = vadd.f32 %v3091_v44, %v4388_v27  ;;  %v2130_v53 = vpop.f32.mrb[115].mxu0  ;;  %v2385_v5 = vpop.f32.mrb[147].mxu1  ;;  %v1845_v27 = vadd.f32 %v4468_v26, %v4572_v40  ;;  %v2504_v2 = vld [vmem:[%s4136_s11 + $0x1d8] sm:$0xff] }
 0x245   : > { %v2557_v42 = vadd.f32 %v2493_v29, %v2383_v63  ;;  %v2386_v33 = vadd.f32 %v2385_v5, %v4364_v36  ;;  %v2502_v5 = vld [vmem:[%s4136_s11 + $0x1c8] sm:$0xff] }
 0x246   : > { %v2623_v47 = vmax.f32 %v2559_v55, 0.0  ;;  %v2560_v50 = vadd.f32 %v2496_v51, %v2394_v8 }
 0x247   : > { %v2621_v20 = vmax.f32 %v2557_v42, 0.0  ;;  %v2558_v59 = vadd.f32 %v2494_v23, %v2386_v33 }
 0x248   : > { %2688 = vst.msk [vmem:[%s4163_s14 + $0x190] sm:$0xff] %vm2637_vm0, %v2623_v47  ;;  %v2624_v35 = vmax.f32 %v2560_v50, 0.0 }
 0x249   : > { %2686 = vst.msk [vmem:[%s4163_s14 + $0x180] sm:$0xff] %vm2637_vm0, %v2621_v20  ;;  %v2622_v36 = vmax.f32 %v2558_v59, 0.0  ;;  %v2133_v32 = vpop.f32.mrb[116].mxu0  ;;  %v3094_v21 = vpop.f32.mrb[148].mxu1  ;;  %v4576_v20 = vld [vmem:[#allocation18_spill] sm:$0xff] }
 0x24a   : > { %2689 = vst.msk [vmem:[%s4163_s14 + $0x198] sm:$0xff] %vm2637_vm0, %v2624_v35  ;;  %v2134_v60 = vadd.f32 %v2133_v32, %v1845_v27  ;;  %v2407_v58 = vadd.f32 %v3094_v21, %v4428_v9  ;;  %v2135_v15 = vpop.f32.mrb[117].mxu0  ;;  %v2398_v46 = vpop.f32.mrb[149].mxu1  ;;  %v2498_v9 = vld [vmem:[%s4136_s11 + $0x1a8] sm:$0xff]  ;;  %v1861_v59 = vadd.f32 %v4468_v26, %v4576_v20 }
 0x24b   : > { %2687 = vst.msk [vmem:[%s4163_s14 + $0x188] sm:$0xff] %vm2637_vm0, %v2622_v36  ;;  %v2399_v43 = vadd.f32 %v2398_v46, %v4404_v1  ;;  %v2136_v61 = vpop.f32.mrb[118].mxu0  ;;  %v3095_v30 = vpop.f32.mrb[150].mxu1  ;;  %v4577_v32 = vld [vmem:[#allocation19_spill] sm:$0xff] }
 0x24c   : > { %v2563_v41 = vadd.f32 %v2499_v4, %v2407_v58  ;;  %v2137_v49 = vadd.f32 %v2136_v61, %v1848_v62  ;;  %v2410_v17 = vadd.f32 %v3095_v30, %v4436_v25  ;;  %v2138_v38 = vpop.f32.mrb[119].mxu0  ;;  %v2401_v24 = vpop.f32.mrb[151].mxu1  ;;  %v2505_v62 = vld [vmem:[%s4136_s11 + $0x1e0] sm:$0xff]  ;;  %v2506_v30 = vld [vmem:[%s4136_s11 + $0x1e8] sm:$0xff] }
 0x24d   : > { %v2561_v52 = vadd.f32 %v2497_v37, %v2399_v43  ;;  %v2402_v48 = vadd.f32 %v2401_v24, %v4412_v14  ;;  %v4575_v14 = vld [vmem:[#allocation16_spill] sm:$0xff] }
 0x24e   : > { %v2627_v6 = vmax.f32 %v2563_v41, 0.0  ;;  %v2564_v28 = vadd.f32 %v2500_v56, %v2410_v17  ;;  %v1856_v19 = vadd.f32 %v4468_v26, %v4575_v14  ;;  %v2508_v41 = vld [vmem:[%s4136_s11 + $0x1f8] sm:$0xff] }
 0x24f   : > { %v2625_v1 = vmax.f32 %v2561_v52, 0.0  ;;  %v2562_v0 = vadd.f32 %v2498_v9, %v2402_v48 }
 0x250   : > { %2692 = vst.msk [vmem:[%s4163_s14 + $0x1b0] sm:$0xff] %vm2637_vm0, %v2627_v6  ;;  %v2628_v25 = vmax.f32 %v2564_v28, 0.0 }
 0x251   : > { %2690 = vst.msk [vmem:[%s4163_s14 + $0x1a0] sm:$0xff] %vm2637_vm0, %v2625_v1  ;;  %v2626_v18 = vmax.f32 %v2562_v0, 0.0  ;;  %v2141_v10 = vpop.f32.mrb[120].mxu0  ;;  %v3098_v54 = vpop.f32.mrb[152].mxu1 }
 0x252   : > { %2693 = vst.msk [vmem:[%s4163_s14 + $0x1b8] sm:$0xff] %vm2637_vm0, %v2628_v25  ;;  %v2142_v39 = vadd.f32 %v2141_v10, %v1853_v13  ;;  %v2423_v22 = vadd.f32 %v3098_v54, %v2134_v60  ;;  %v2143_v11 = vpop.f32.mrb[121].mxu0  ;;  %v2414_v7 = vpop.f32.mrb[153].mxu1  ;;  %v2507_v60 = vld [vmem:[%s4136_s11 + $0x1f0] sm:$0xff] }
 0x253   : > { %2691 = vst.msk [vmem:[%s4163_s14 + $0x1a8] sm:$0xff] %vm2637_vm0, %v2626_v18  ;;  %v2415_v12 = vadd.f32 %v2414_v7, %v4452_v45  ;;  %v2144_v29 = vpop.f32.mrb[122].mxu0  ;;  %v3099_v63 = vpop.f32.mrb[154].mxu1 }
 0x254   : > { %v2567_v44 = vadd.f32 %v2503_v31, %v2423_v22  ;;  %v2145_v51 = vadd.f32 %v2144_v29, %v1856_v19  ;;  %v2426_v55 = vadd.f32 %v3099_v63, %v2137_v49  ;;  %v2146_v8 = vpop.f32.mrb[123].mxu0  ;;  %v2417_v53 = vpop.f32.mrb[155].mxu1 }
 0x255   : > { %v2565_v23 = vadd.f32 %v2501_v3, %v2415_v12  ;;  %v2418_v42 = vadd.f32 %v2417_v53, %v4460_v34  ;;  %v1864_v34 = vadd.f32 %v4468_v26, %v4577_v32 }
 0x256   : > { %v2631_v33 = vmax.f32 %v2567_v44, 0.0  ;;  %v2568_v47 = vadd.f32 %v2504_v2, %v2426_v55 }
 0x257   : > { %v2629_v45 = vmax.f32 %v2565_v23, 0.0  ;;  %v2566_v50 = vadd.f32 %v2502_v5, %v2418_v42 }
 0x258   : > { %2696 = vst.msk [vmem:[%s4163_s14 + $0x1d0] sm:$0xff] %vm2637_vm0, %v2631_v33  ;;  %v2632_v40 = vmax.f32 %v2568_v47, 0.0 }
 0x259   : > { %2694 = vst.msk [vmem:[%s4163_s14 + $0x1c0] sm:$0xff] %vm2637_vm0, %v2629_v45  ;;  %v2630_v27 = vmax.f32 %v2566_v50, 0.0  ;;  %v2149_v35 = vpop.f32.mrb[124].mxu0  ;;  %v3102_v36 = vpop.f32.mrb[156].mxu1 }
 0x25a   : > { %2697 = vst.msk [vmem:[%s4163_s14 + $0x1d8] sm:$0xff] %vm2637_vm0, %v2632_v40  ;;  %v2150_v21 = vadd.f32 %v2149_v35, %v1861_v59  ;;  %v2151_v4 = vpop.f32.mrb[125].mxu0  ;;  %v2430_v57 = vpop.f32.mrb[157].mxu1 }
 0x25b   : > { %2695 = vst.msk [vmem:[%s4163_s14 + $0x1c8] sm:$0xff] %vm2637_vm0, %v2630_v27  ;;  %v2431_v58 = vadd.f32 %v2430_v57, %v2142_v39  ;;  %v2152_v15 = vpop.f32.mrb[126].mxu0  ;;  %v3103_v46 = vpop.f32.mrb[158].mxu1 }
 0x25c   : > { %v2439_v37 = vadd.f32 %v3102_v36, %v2150_v21  ;;  %v2153_v43 = vadd.f32 %v2152_v15, %v1864_v34  ;;  %v2154_v61 = vpop.f32.mrb[127].mxu0  ;;  %v2433_v26 = vpop.f32.mrb[159].mxu1 }
 0x25d   : > { %v2569_v56 = vadd.f32 %v2505_v62, %v2431_v58  ;;  %v2434_v49 = vadd.f32 %v2433_v26, %v2145_v51 }
 0x25e   : > { %v2571_v17 = vadd.f32 %v2507_v60, %v2439_v37  ;;  %v2442_v38 = vadd.f32 %v3103_v46, %v2153_v43 }
 0x25f   : > { %v2633_v24 = vmax.f32 %v2569_v56, 0.0  ;;  %v2570_v9 = vadd.f32 %v2506_v30, %v2434_v49 }
 0x260   : > { %v2635_v52 = vmax.f32 %v2571_v17, 0.0  ;;  %v2572_v48 = vadd.f32 %v2508_v41, %v2442_v38 }
 0x261   : > { %2698 = vst.msk [vmem:[%s4163_s14 + $0x1e0] sm:$0xff] %vm2637_vm0, %v2633_v24  ;;  %v2634_v6 = vmax.f32 %v2570_v9, 0.0 }
 0x262   : > { %2700 = vst.msk [vmem:[%s4163_s14 + $0x1f0] sm:$0xff] %vm2637_vm0, %v2635_v52  ;;  %v2636_v28 = vmax.f32 %v2572_v48, 0.0 }
 0x263   : > { %2699 = vst.msk [vmem:[%s4163_s14 + $0x1e8] sm:$0xff] %vm2637_vm0, %v2634_v6 }
 0x264   : > { %2701 = vst.msk [vmem:[%s4163_s14 + $0x1f8] sm:$0xff] %vm2637_vm0, %v2636_v28 }
 0x265 PF: > { %s14_s15 = sadd.s32 1, %s3561_s15  }
 0x266   : > { %p11_p4 = scmp.ge.s32.totalorder %s14_s15, 4  }
 0x268   :  { %13 = sbr.rel (!%p11_p4) target bundleno = 1 (0x1), region = 69 }

// kernel: cis_resnet_forward.14
= control target key start
LH: loop header
LB: loop body
LE: loop exit
PB: predicated region body
PF: predicated region fallthrough
CT: control target
= control target key end

     0   :  { %s3664_s12 = smov 0   ;;  %s4489_s0 = inlined_call_operand.vmem [shape: bf16[512,1152], index: 0, kind: input, shape index: {}]   ;;  %s4490_s1 = inlined_call_operand.vmem [shape: bf16[1152,64], index: 1, kind: input, shape index: {}]   ;;  %s4491_s2 = inlined_call_operand.vmem [shape: f32[1,64], index: 2, kind: input, shape index: {}]   ;;  %s4492_s3 = inlined_call_operand.vmem [shape: f32[512,64], index: 3, kind: output, shape index: {}]  }
   0x1 LB: > { %s2583_s13 = sadd.s32 4294967295, %s3642_s12   ;;  %p2587_p0 = scmp.ge.s32.totalorder %s3642_s12, 1  ;;  %s3642_s12 = sphi %s3664_s12, %s13_s12  }
   0x2   : > { %p139_p1 = scmp.lt.s32.totalorder %s3642_s12, 3 }
   0x4   : > { %p140_p2 = pnand %p2587_p0, %p139_p1 }
   0x5   : > { %v3356_v0 = vld [vmem:[%s4490_s1 + $0x40] sm:$0xff] (!%p140_p2)   ;;  %s2588_s16 = sshll.u32 (!%p140_p2), %s2583_s13, 5  ;;  %v3358_v2 = vld [vmem:[%s4490_s1 + $0x48] sm:$0xff] (!%p140_p2)   ;;  %v3360_v4 = vld [vmem:[%s4490_s1 + $0x50] sm:$0xff] (!%p140_p2)   ;;  %vm2494_vm0 = vcmask (!%p140_p2), 523264  }
   0x6   : > { %143 = sbr.rel (%p140_p2) target bundleno = 542 (0x21e), region = 32  ;;  %v3357_v1 = vld [vmem:[%s4490_s1] sm:$0xff] (!%p140_p2)   ;;  %2811 = vmatprep.subr.bf16.mxu0 (!%p140_p2), %v3356_v0  ;;  %3331 = vmatprep.subr.bf16.mxu1 (!%p140_p2), %v3356_v0  ;;  %p165_p3 = scmp.lt.s32.totalorder (!%p140_p2), %s2588_s16, 63  ;;  %v3359_v3 = vld [vmem:[%s4490_s1 + $0x8] sm:$0xff] (!%p140_p2)   ;;  %v3361_v5 = vld [vmem:[%s4490_s1 + $0x10] sm:$0xff] (!%p140_p2)  }
   0x7   : > { %2812 = vmatpush3.bf16.msra.mxu0 (!%p140_p2), %v3357_v1  ;;  %3339 = vmatpush3.bf16.msra.mxu1 (!%p140_p2), %v3357_v1  ;;  %v3362_v6 = vld [vmem:[%s4490_s1 + $0x58] sm:$0xff] (!%p140_p2)   ;;  %v3364_v8 = vld [vmem:[%s4490_s1 + $0x60] sm:$0xff] (!%p140_p2)   ;;  %v3366_v10 = vld [vmem:[%s4490_s1 + $0x68] sm:$0xff] (!%p140_p2)  }
   0x8   : > { %2813 = vmatprep.subr.bf16.mxu0 (!%p140_p2), %v3358_v2  ;;  %3332 = vmatprep.subr.bf16.mxu1 (!%p140_p2), %v3358_v2  ;;  %v3363_v7 = vld [vmem:[%s4490_s1 + $0x18] sm:$0xff] (!%p140_p2)   ;;  %v3365_v9 = vld [vmem:[%s4490_s1 + $0x20] sm:$0xff] (!%p140_p2)   ;;  %v3367_v13 = vld [vmem:[%s4490_s1 + $0x28] sm:$0xff] (!%p140_p2)  }
   0x9   : > { %v3368_v14 = vld [vmem:[%s4490_s1 + $0x70] sm:$0xff] (!%p140_p2)   ;;  %v3370_v16 = vld [vmem:[%s4490_s1 + $0x78] sm:$0xff] (!%p140_p2)   ;;  %v3378_v18 = vld [vmem:[%s4490_s1 + $0xc0] sm:$0xff] (!%p140_p2)  }
   0xa   : > { %v3369_v15 = vld [vmem:[%s4490_s1 + $0x30] sm:$0xff] (!%p140_p2)   ;;  %v3371_v17 = vld [vmem:[%s4490_s1 + $0x38] sm:$0xff] (!%p140_p2)   ;;  %v3381_v21 = vld [vmem:[%s4490_s1 + $0x140] sm:$0xff] (!%p140_p2)  }
   0xb   : > { %2814 = vmatpush3.bf16.msra.mxu0 (!%p140_p2), %v3359_v3  ;;  %3340 = vmatpush3.bf16.msra.mxu1 (!%p140_p2), %v3359_v3  ;;  %v3379_v22 = vld [vmem:[%s4490_s1 + $0x80] sm:$0xff] (!%p140_p2)   ;;  %v3380_v23 = vld [vmem:[%s4490_s1 + $0xc8] sm:$0xff] (!%p140_p2)   ;;  %v3390_v31 = vld [vmem:[%s4490_s1 + $0xd0] sm:$0xff] (!%p140_p2)  }
   0xc   : > { %2815 = vmatprep.subr.bf16.mxu0 (!%p140_p2), %v3360_v4  ;;  %3333 = vmatprep.subr.bf16.mxu1 (!%p140_p2), %v3360_v4  ;;  %v3383_v24 = vld [vmem:[%s4490_s1 + $0x100] sm:$0xff] (!%p140_p2)   ;;  %v3382_v27 = vld [vmem:[%s4490_s1 + $0x88] sm:$0xff] (!%p140_p2)   ;;  %v3391_v32 = vld [vmem:[%s4490_s1 + $0x90] sm:$0xff] (!%p140_p2)  }
   0xd   : > { %s4494_s16 = smov (!%p165_p3, %s2588_s16), 63  ;;  %v3401_v28 = vld [vmem:[%s4490_s1 + $0x148] sm:$0xff]   ;;  %v3392_v34 = vld [vmem:[%s4490_s1 + $0xd8] sm:$0xff]   ;;  %v3400_v40 = vld [vmem:[%s4490_s1 + $0xe0] sm:$0xff]  }
   0xe   : > { %s3347_s29 = smul.u32 36, %s4494_s16  ;;  %v3403_v33 = vld [vmem:[%s4490_s1 + $0x108] sm:$0xff]   ;;  %v3393_v37 = vld [vmem:[%s4490_s1 + $0x98] sm:$0xff]   ;;  %v3402_v41 = vld [vmem:[%s4490_s1 + $0xa0] sm:$0xff]  }
   0xf   : > { %2816 = vmatpush3.bf16.msra.mxu0 %v3361_v5  ;;  %3341 = vmatpush3.bf16.msra.mxu1 %v3361_v5  ;;  %v3404_v42 = vld [vmem:[%s4490_s1 + $0xe8] sm:$0xff]   ;;  %v3415_v43 = vld [vmem:[%s4490_s1 + $0x150] sm:$0xff]   ;;  %v3414_v52 = vld [vmem:[%s4490_s1 + $0xf8] sm:$0xff]  }
  0x10   : > { %2817 = vmatprep.subr.bf16.mxu0 %v3362_v6  ;;  %3334 = vmatprep.subr.bf16.mxu1 %v3362_v6  ;;  %s3705_s9 = scalar_lea.vmem %s4489_s0, %s3347_s29  ;;  %v3417_v46 = vld [vmem:[%s4490_s1 + $0x110] sm:$0xff]   ;;  %v3405_v47 = vld [vmem:[%s4490_s1 + $0xa8] sm:$0xff]   ;;  %v3432_v55 = vld [vmem:[%s4490_s1 + $0x158] sm:$0xff]  }
  0x11   : > { %v3374_v11 = vld [vmem:[%s3705_s9 + $0x4] ss:$36 sps:$4 sm:$0xff]   ;;  %v3384_v25 = vld [vmem:[%s3705_s9 + $0x4c] ss:$36 sps:$4 sm:$0xff]   ;;  %v3394_v35 = vld [vmem:[%s3705_s9 + $0x94] ss:$36 sps:$4 sm:$0xff]  }
  0x12   : > { %v3377_v12 = vld [vmem:[%s3705_s9 + $0x364] ss:$36 sps:$4 sm:$0xff]   ;;  %1689 = vmatprep.mubr.bf16.mxu0 %v3374_v11  ;;  %v3386_v26 = vld [vmem:[%s3705_s9 + $0x3ac] ss:$36 sps:$4 sm:$0xff]   ;;  %v3396_v36 = vld [vmem:[%s3705_s9 + $0x3f4] ss:$36 sps:$4 sm:$0xff]  }
  0x13   : > { %2818 = vmatpush3.bf16.msra.mxu0 %v3363_v7  ;;  %3342 = vmatpush3.bf16.msra.mxu1 %v3363_v7  ;;  %v3372_v19 = vld [vmem:[%s3705_s9] ss:$36 sps:$4 sm:$0xff]   ;;  %v3388_v29 = vld [vmem:[%s3705_s9 + $0x48] ss:$36 sps:$4 sm:$0xff]   ;;  %v3398_v38 = vld [vmem:[%s3705_s9 + $0x90] ss:$36 sps:$4 sm:$0xff]  }
  0x14   : > { %2819 = vmatprep.subr.bf16.mxu0 %v3364_v8  ;;  %3335 = vmatprep.subr.bf16.mxu1 %v3364_v8  ;;  %v3375_v20 = vld [vmem:[%s3705_s9 + $0x360] ss:$36 sps:$4 sm:$0xff]   ;;  %v3389_v30 = vld [vmem:[%s3705_s9 + $0x3a8] ss:$36 sps:$4 sm:$0xff]   ;;  %v3399_v39 = vld [vmem:[%s3705_s9 + $0x3f0] ss:$36 sps:$4 sm:$0xff]  }
  0x15   : > { %1785 = vmatprep.mubr.bf16.mxu1 %v3377_v12  ;;  %v3406_v44 = vld [vmem:[%s3705_s9 + $0xdc] ss:$36 sps:$4 sm:$0xff]   ;;  %v3412_v48 = vld [vmem:[%s4490_s1 + $0xf0] sm:$0xff]   ;;  %v3418_v53 = vld [vmem:[%s3705_s9 + $0x124] ss:$36 sps:$4 sm:$0xff]  }
  0x16   : > { %v3408_v45 = vld [vmem:[%s3705_s9 + $0x43c] ss:$36 sps:$4 sm:$0xff]   ;;  %v3413_v51 = vld [vmem:[%s4490_s1 + $0xb0] sm:$0xff]   ;;  %v3420_v58 = vld [vmem:[%s3705_s9 + $0x8] ss:$36 sps:$4 sm:$0xff]  }
  0x17   : > { %2820 = vmatpush3.bf16.msra.mxu0 %v3365_v9  ;;  %3343 = vmatpush3.bf16.msra.mxu1 %v3365_v9  ;;  %v3410_v49 = vld [vmem:[%s3705_s9 + $0xd8] ss:$36 sps:$4 sm:$0xff]   ;;  %v3422_v54 = vld [vmem:[%s3705_s9 + $0xc] ss:$36 sps:$4 sm:$0xff]   ;;  %v3423_v59 = vld [vmem:[%s3705_s9 + $0x120] ss:$36 sps:$4 sm:$0xff]  }
  0x18   : > { %2821 = vmatprep.subr.bf16.mxu0 %v3366_v10  ;;  %3336 = vmatprep.subr.bf16.mxu1 %v3366_v10  ;;  %v3411_v50 = vld [vmem:[%s3705_s9 + $0x438] ss:$36 sps:$4 sm:$0xff]   ;;  %v3424_v60 = vld [vmem:[%s4490_s1 + $0x1c0] sm:$0xff]   ;;  %v3426_v62 = vld [vmem:[%s3705_s9 + $0x16c] ss:$36 sps:$4 sm:$0xff]  }
  0x19   : > { %v3433_v56 = vld [vmem:[%s4490_s1 + $0x118] sm:$0xff]   ;;  %v3425_v61 = vld [vmem:[%s4490_s1 + $0x180] sm:$0xff]   ;;  %v3440_v1 = vld [vmem:[%s4490_s1 + $0x1c8] sm:$0xff]  }
  0x1a   : > { %v3416_v57 = vld [vmem:[%s4490_s1 + $0xb8] sm:$0xff]   ;;  %v3442_v0 = vld [vmem:[%s4490_s1 + $0x160] sm:$0xff]   ;;  %v3441_v3 = vld [vmem:[%s4490_s1 + $0x188] sm:$0xff]  }
  0x1b   : > { %2822 = vmatpush3.bf16.msra.mxu0 %v3367_v13  ;;  %3344 = vmatpush3.bf16.msra.mxu1 %v3367_v13  ;;  %v3428_v63 = vld [vmem:[%s3705_s9 + $0x54] ss:$36 sps:$4 sm:$0xff]   ;;  %v3443_v2 = vld [vmem:[%s4490_s1 + $0x120] sm:$0xff]   ;;  %v3430_v4 = vld [vmem:[%s3705_s9 + $0x168] ss:$36 sps:$4 sm:$0xff]  }
  0x1c   : > { %2823 = vmatprep.subr.bf16.mxu0 %v3368_v14  ;;  %3337 = vmatprep.subr.bf16.mxu1 %v3368_v14  ;;  %v3431_v5 = vld [vmem:[%s3705_s9 + $0x50] ss:$36 sps:$4 sm:$0xff]   ;;  %v3436_v7 = vld [vmem:[%s3705_s9 + $0x9c] ss:$36 sps:$4 sm:$0xff]   ;;  %v3456_v8 = vld [vmem:[%s4490_s1 + $0x168] sm:$0xff]  }
  0x1d   : > { %v3434_v6 = vld [vmem:[%s3705_s9 + $0x1b4] ss:$36 sps:$4 sm:$0xff]   ;;  %v3458_v10 = vld [vmem:[%s4490_s1 + $0x128] sm:$0xff]   ;;  %v3444_v14 = vld [vmem:[%s3705_s9 + $0x1fc] ss:$36 sps:$4 sm:$0xff]  }
  0x1e   : > { %v3457_v9 = vld [vmem:[%s4490_s1 + $0x1d0] sm:$0xff]   ;;  %v3439_v13 = vld [vmem:[%s3705_s9 + $0x98] ss:$36 sps:$4 sm:$0xff]  }
  0x1f   : > { %2824 = vmatpush3.bf16.msra.mxu0 %v3369_v15  ;;  %3345 = vmatpush3.bf16.msra.mxu1 %v3369_v15  ;;  %v3459_v11 = vld [vmem:[%s4490_s1 + $0x190] sm:$0xff]  }
  0x20   : > { %2825 = vmatprep.subr.bf16.mxu0 %v3370_v16  ;;  %3338 = vmatprep.subr.bf16.mxu1 %v3370_v16  ;;  %v3438_v12 = vld [vmem:[%s3705_s9 + $0x1b0] ss:$36 sps:$4 sm:$0xff]  }
  0x21   : > { %v3466_v15 = vld [vmem:[%s4490_s1 + $0x170] sm:$0xff]  }
  0x22   : > { %v3467_v16 = vld [vmem:[%s4490_s1 + $0x130] sm:$0xff]  }
  0x23   : > { %2826 = vmatpush3.bf16.msra.mxu0 %v3371_v17  ;;  %3346 = vmatpush3.bf16.msra.mxu1 %v3371_v17  ;;  %v3446_v17 = vld [vmem:[%s3705_s9 + $0xe4] ss:$36 sps:$4 sm:$0xff]  }
  0x24   : > { %2923 = vmatprep.subr.bf16.mxu1 %v3378_v18  ;;  %3035 = vmatprep.subr.bf16.mxu0 %v3381_v21  ;;  %v3474_v18 = vld [vmem:[%s4490_s1 + $0x1d8] sm:$0xff]   ;;  %v3449_v21 = vld [vmem:[%s3705_s9 + $0xe0] ss:$36 sps:$4 sm:$0xff]  }
  0x26   : > { %1690 = vmatmul.mubr.bf16.vlgmr.msra.gmra.mrb[0].mxu0 %v3372_v19  ;;  %1786 = vmatmul.mubr.bf16.vlgmr.msra.gmra.mrb[0].mxu1 %v3375_v20  ;;  %v3475_v19 = vld [vmem:[%s4490_s1 + $0x198] sm:$0xff]  }
  0x27   : > { %2924 = vmatpush3.bf16.msra.mxu1 %v3379_v22  ;;  %3036 = vmatpush3.bf16.msra.mxu0 %v3383_v24  ;;  %v3448_v20 = vld [vmem:[%s3705_s9 + $0x1f8] ss:$36 sps:$4 sm:$0xff]   ;;  %v3450_v22 = vld [vmem:[%s3705_s9 + $0x244] ss:$36 sps:$4 sm:$0xff]  }
  0x28   : > { %2925 = vmatprep.subr.bf16.mxu1 %v3380_v23  ;;  %1697 = vmatprep.mubr.bf16.mxu0 %v3384_v25  ;;  %v3452_v23 = vld [vmem:[%s3705_s9 + $0x12c] ss:$36 sps:$4 sm:$0xff]   ;;  %v3482_v24 = vld [vmem:[%s4490_s1 + $0x178] sm:$0xff]  }
  0x29   : > { %1793 = vmatprep.mubr.bf16.mxu1 %v3386_v26  ;;  %3037 = vmatprep.subr.bf16.mxu0 %v3401_v28  ;;  %v3483_v25 = vld [vmem:[%s4490_s1 + $0x138] sm:$0xff]   ;;  %v3490_v26 = vld [vmem:[%s4490_s1 + $0x1e0] sm:$0xff]  }
  0x2a   : > { %v3491_v28 = vld [vmem:[%s4490_s1 + $0x1a0] sm:$0xff]  }
  0x2b   : > { %2926 = vmatpush3.bf16.msra.mxu1 %v3382_v27  ;;  %3038 = vmatpush3.bf16.msra.mxu0 %v3403_v33  ;;  %v3454_v27 = vld [vmem:[%s3705_s9 + $0x240] ss:$36 sps:$4 sm:$0xff]   ;;  %v3505_v33 = vld [vmem:[%s4490_s1 + $0x1e8] sm:$0xff]  }
  0x2c   : > { %2927 = vmatprep.subr.bf16.mxu1 %v3390_v31  ;;  %3039 = vmatprep.subr.bf16.mxu0 %v3415_v43  ;;  %v3460_v31 = vld [vmem:[%s3705_s9 + $0x28c] ss:$36 sps:$4 sm:$0xff]   ;;  %v3476_v43 = vld [vmem:[%s3705_s9 + $0x31c] ss:$36 sps:$4 sm:$0xff]  }
  0x2e   : > { %1698 = vmatmul.mubr.bf16.gmra.mrb[4].mxu0 %v3388_v29  ;;  %1794 = vmatmul.mubr.bf16.gmra.mrb[4].mxu1 %v3389_v30  ;;  %v3492_v29 = vld [vmem:[%s4490_s1 + $0x200] sm:$0xff]   ;;  %v3455_v30 = vld [vmem:[%s3705_s9 + $0x128] ss:$36 sps:$4 sm:$0xff]  }
  0x2f   : > { %2928 = vmatpush3.bf16.msra.mxu1 %v3391_v32  ;;  %1705 = vmatprep.mubr.bf16.mxu0 %v3394_v35  ;;  %v3462_v32 = vld [vmem:[%s3705_s9 + $0x174] ss:$36 sps:$4 sm:$0xff]   ;;  %v3506_v35 = vld [vmem:[%s4490_s1 + $0x1a8] sm:$0xff]  }
  0x30   : > { %2929 = vmatprep.subr.bf16.mxu1 %v3392_v34  ;;  %1801 = vmatprep.mubr.bf16.mxu1 %v3396_v36  ;;  %v3464_v34 = vld [vmem:[%s3705_s9 + $0x288] ss:$36 sps:$4 sm:$0xff]   ;;  %v3465_v36 = vld [vmem:[%s3705_s9 + $0x170] ss:$36 sps:$4 sm:$0xff]  }
  0x31   : > { %3040 = vmatpush3.bf16.msra.mxu0 %v3417_v46  ;;  %v3481_v46 = vld [vmem:[%s3705_s9 + $0x200] ss:$36 sps:$4 sm:$0xff]  }
  0x32   : > { %3041 = vmatprep.subr.bf16.mxu0 %v3432_v55  ;;  %v3507_v55 = vld [vmem:[%s4490_s1 + $0x208] sm:$0xff]  }
  0x33   : > { %2930 = vmatpush3.bf16.msra.mxu1 %v3393_v37  ;;  %v3468_v37 = vld [vmem:[%s3705_s9 + $0x2d4] ss:$36 sps:$4 sm:$0xff]  }
  0x34   : > { %2931 = vmatprep.subr.bf16.mxu1 %v3400_v40  ;;  %v3473_v40 = vld [vmem:[%s3705_s9 + $0x1b8] ss:$36 sps:$4 sm:$0xff]  }
  0x35   : > { %3042 = vmatpush3.bf16.msra.mxu0 %v3433_v56  ;;  %v3522_v56 = vld [vmem:[%s4490_s1 + $0x210] sm:$0xff]  }
  0x36   : > { %1706 = vmatmul.mubr.bf16.gmra.mrb[8].mxu0 %v3398_v38  ;;  %1802 = vmatmul.mubr.bf16.gmra.mrb[8].mxu1 %v3399_v39  ;;  %v3470_v38 = vld [vmem:[%s3705_s9 + $0x1bc] ss:$36 sps:$4 sm:$0xff]   ;;  %v3472_v39 = vld [vmem:[%s3705_s9 + $0x2d0] ss:$36 sps:$4 sm:$0xff]  }
  0x37   : > { %2932 = vmatpush3.bf16.msra.mxu1 %v3402_v41  ;;  %1713 = vmatprep.mubr.bf16.mxu0 %v3406_v44  ;;  %v3520_v41 = vld [vmem:[%s4490_s1 + $0x1f0] sm:$0xff]   ;;  %v3478_v44 = vld [vmem:[%s3705_s9 + $0x204] ss:$36 sps:$4 sm:$0xff]  }
  0x38   : > { %2933 = vmatprep.subr.bf16.mxu1 %v3404_v42  ;;  %1809 = vmatprep.mubr.bf16.mxu1 %v3408_v45  ;;  %v3521_v42 = vld [vmem:[%s4490_s1 + $0x1b0] sm:$0xff]   ;;  %v3480_v45 = vld [vmem:[%s3705_s9 + $0x318] ss:$36 sps:$4 sm:$0xff]  }
  0x39   : > { %3043 = vmatprep.subr.bf16.mxu0 %v3442_v0  ;;  %v3504_v0 = vld [vmem:[%s3705_s9 + $0xa0] ss:$36 sps:$4 sm:$0xff]  }
  0x3a   : > { %3044 = vmatpush3.bf16.msra.mxu0 %v3443_v2  ;;  %v3510_v2 = vld [vmem:[%s3705_s9 + $0xec] ss:$36 sps:$4 sm:$0xff]  }
  0x3b   : > { %2934 = vmatpush3.bf16.msra.mxu1 %v3405_v47  ;;  %3045 = vmatprep.subr.bf16.mxu0 %v3456_v8  ;;  %v3535_v47 = vld [vmem:[%s4490_s1 + $0x1f8] sm:$0xff]  }
  0x3c   : > { %2935 = vmatprep.subr.bf16.mxu1 %v3412_v48  ;;  %v3536_v48 = vld [vmem:[%s4490_s1 + $0x1b8] sm:$0xff]  }
  0x3d   : > { %v3516_v8 = vld [vmem:[%s3705_s9 + $0x134] ss:$36 sps:$4 sm:$0xff]  }
  0x3e   : > { %1714 = vmatmul.mubr.bf16.gmra.mrb[12].mxu0 %v3410_v49  ;;  %1810 = vmatmul.mubr.bf16.gmra.mrb[12].mxu1 %v3411_v50  ;;  %v3484_v49 = vld [vmem:[%s3705_s9 + $0x24c] ss:$36 sps:$4 sm:$0xff]   ;;  %v3488_v50 = vld [vmem:[%s3705_s9 + $0x14] ss:$36 sps:$4 sm:$0xff]  }
  0x3f   : > { %2936 = vmatpush3.bf16.msra.mxu1 %v3413_v51  ;;  %1721 = vmatprep.mubr.bf16.mxu0 %v3418_v53  ;;  %v3486_v51 = vld [vmem:[%s3705_s9 + $0x10] ss:$36 sps:$4 sm:$0xff]  }
  0x40   : > { %2937 = vmatprep.subr.bf16.mxu1 %v3414_v52  ;;  %1850 = vmatprep.mubr.bf16.mxu1 %v3422_v54  ;;  %v3489_v52 = vld [vmem:[%s3705_s9 + $0x248] ss:$36 sps:$4 sm:$0xff]   ;;  %v3493_v53 = vld [vmem:[%s3705_s9 + $0x294] ss:$36 sps:$4 sm:$0xff]   ;;  %v3495_v54 = vld [vmem:[%s3705_s9 + $0x5c] ss:$36 sps:$4 sm:$0xff]  }
  0x41   : > { %3046 = vmatpush3.bf16.msra.mxu0 %v3458_v10  ;;  %v3518_v10 = vld [vmem:[%s3705_s9 + $0x368] ss:$36 sps:$4 sm:$0xff]  }
  0x42   : > { %3047 = vmatprep.subr.bf16.mxu0 %v3466_v15  ;;  %v3528_v15 = vld [vmem:[%s3705_s9 + $0x178] ss:$36 sps:$4 sm:$0xff]  }
  0x43   : > { %2938 = vmatpush3.bf16.msra.mxu1 %v3416_v57  ;;  %v3497_v57 = vld [vmem:[%s3705_s9 + $0x290] ss:$36 sps:$4 sm:$0xff]  }
  0x44   : > { %3147 = vmatprep.subr.bf16.mxu1 %v3424_v60  ;;  %v3501_v60 = vld [vmem:[%s3705_s9 + $0xa4] ss:$36 sps:$4 sm:$0xff]  }
  0x45   : > { %3048 = vmatpush3.bf16.msra.mxu0 %v3467_v16  ;;  %v3529_v16 = vld [vmem:[%s3705_s9 + $0x3fc] ss:$36 sps:$4 sm:$0xff]  }
  0x46   : > { %1722 = vmatmul.mubr.bf16.gmra.mrb[16].mxu0 %v3423_v59  ;;  %1851 = vmatmul.mubr.bf16.vlgmr.msra.gmra.mrb[16].mxu1 %v3420_v58  ;;  %v3498_v58 = vld [vmem:[%s3705_s9 + $0x58] ss:$36 sps:$4 sm:$0xff]  }
  0x47   : > { %3148 = vmatpush3.bf16.msra.mxu1 %v3425_v61  ;;  %1729 = vmatprep.mubr.bf16.mxu0 %v3426_v62  ;;  %v3499_v59 = vld [vmem:[%s3705_s9 + $0x2dc] ss:$36 sps:$4 sm:$0xff]  }
  0x48   : > { %1858 = vmatprep.mubr.bf16.mxu1 %v3428_v63  ;;  %3149 = vmatprep.subr.bf16.mxu1 %v3440_v1  ;;  %v3537_v61 = vld [vmem:[%s4490_s1 + $0x218] sm:$0xff]   ;;  %v3550_v62 = vld [vmem:[%s4490_s1 + $0x220] sm:$0xff]  }
  0x49   : > { %3049 = vmatprep.subr.bf16.mxu0 %v3482_v24  ;;  %v3503_v63 = vld [vmem:[%s3705_s9 + $0x2d8] ss:$36 sps:$4 sm:$0xff]   ;;  %v3508_v1 = vld [vmem:[%s3705_s9 + $0x324] ss:$36 sps:$4 sm:$0xff]  }
  0x4a   : > { %3050 = vmatpush3.bf16.msra.mxu0 %v3483_v25  ;;  %v3544_v24 = vld [vmem:[%s3705_s9 + $0x254] ss:$36 sps:$4 sm:$0xff]   ;;  %v3548_v25 = vld [vmem:[%s3705_s9 + $0x1c] ss:$36 sps:$4 sm:$0xff]  }
  0x4b   : > { %3150 = vmatpush3.bf16.msra.mxu1 %v3441_v3  ;;  %3283 = vmatprep.subr.bf16.mxu0 %v3492_v29  ;;  %v3563_v3 = vld [vmem:[%s4490_s1 + $0x228] sm:$0xff]  }
  0x4c   : > { %3151 = vmatprep.subr.bf16.mxu1 %v3457_v9  ;;  %v3589_v9 = vld [vmem:[%s4490_s1 + $0x238] sm:$0xff]  }
  0x4e   : > { %1730 = vmatmul.mubr.bf16.gmra.mrb[20].mxu0 %v3430_v4  ;;  %1859 = vmatmul.mubr.bf16.gmra.mrb[20].mxu1 %v3431_v5  ;;  %v3512_v4 = vld [vmem:[%s3705_s9 + $0x320] ss:$36 sps:$4 sm:$0xff]   ;;  %v3513_v5 = vld [vmem:[%s3705_s9 + $0xe8] ss:$36 sps:$4 sm:$0xff]  }
  0x4f   : > { %1737 = vmatprep.mubr.bf16.mxu0 %v3434_v6  ;;  %1866 = vmatprep.mubr.bf16.mxu1 %v3436_v7  ;;  %v3576_v6 = vld [vmem:[%s4490_s1 + $0x230] sm:$0xff]  }
  0x50   : > { %3152 = vmatpush3.bf16.msra.mxu1 %v3459_v11  ;;  %v3514_v7 = vld [vmem:[%s3705_s9 + $0x36c] ss:$36 sps:$4 sm:$0xff]  }
  0x51   : > { %3153 = vmatprep.subr.bf16.mxu1 %v3474_v18  ;;  %v3519_v11 = vld [vmem:[%s3705_s9 + $0x130] ss:$36 sps:$4 sm:$0xff]   ;;  %v3533_v18 = vld [vmem:[%s3705_s9 + $0x3f8] ss:$36 sps:$4 sm:$0xff]  }
  0x54   : > { %3154 = vmatpush3.bf16.msra.mxu1 %v3475_v19  ;;  %v3534_v19 = vld [vmem:[%s3705_s9 + $0x1c0] ss:$36 sps:$4 sm:$0xff]  }
  0x55   : > { %3155 = vmatprep.subr.bf16.mxu1 %v3490_v26  ;;  %v3546_v26 = vld [vmem:[%s3705_s9 + $0x18] ss:$36 sps:$4 sm:$0xff]  }
  0x56   : > { %1738 = vmatmul.mubr.bf16.gmra.mrb[24].mxu0 %v3438_v12  ;;  %1867 = vmatmul.mubr.bf16.gmra.mrb[24].mxu1 %v3439_v13  ;;  %v3523_v12 = vld [vmem:[%s3705_s9 + $0x3b4] ss:$36 sps:$4 sm:$0xff]   ;;  %v3525_v13 = vld [vmem:[%s3705_s9 + $0x17c] ss:$36 sps:$4 sm:$0xff]  }
  0x57   : > { %1745 = vmatprep.mubr.bf16.mxu0 %v3444_v14  ;;  %1874 = vmatprep.mubr.bf16.mxu1 %v3446_v17  ;;  %v3527_v14 = vld [vmem:[%s3705_s9 + $0x3b0] ss:$36 sps:$4 sm:$0xff]   ;;  %v3531_v17 = vld [vmem:[%s3705_s9 + $0x1c4] ss:$36 sps:$4 sm:$0xff]  }
  0x58   : > { %3156 = vmatpush3.bf16.msra.mxu1 %v3491_v28  ;;  %v3551_v28 = vld [vmem:[%s3705_s9 + $0x29c] ss:$36 sps:$4 sm:$0xff]  }
  0x59   : > { %3157 = vmatprep.subr.bf16.mxu1 %v3505_v33  ;;  %v3559_v33 = vld [vmem:[%s3705_s9 + $0xac] ss:$36 sps:$4 sm:$0xff]  }
  0x5c   : > { %3158 = vmatpush3.bf16.msra.mxu1 %v3506_v35  ;;  %v3562_v35 = vld [vmem:[%s3705_s9 + $0xa8] ss:$36 sps:$4 sm:$0xff]  }
  0x5d   : > { %3159 = vmatprep.subr.bf16.mxu1 %v3520_v41  ;;  %v3572_v41 = vld [vmem:[%s3705_s9 + $0x13c] ss:$36 sps:$4 sm:$0xff]  }
  0x5e   : > { %1746 = vmatmul.mubr.bf16.gmra.mrb[28].mxu0 %v3448_v20  ;;  %1875 = vmatmul.mubr.bf16.gmra.mrb[28].mxu1 %v3449_v21  ;;  %v3538_v20 = vld [vmem:[%s3705_s9 + $0x444] ss:$36 sps:$4 sm:$0xff]   ;;  %v3540_v21 = vld [vmem:[%s3705_s9 + $0x20c] ss:$36 sps:$4 sm:$0xff]  }
  0x5f   : > { %1753 = vmatprep.mubr.bf16.mxu0 %v3450_v22  ;;  %1882 = vmatprep.mubr.bf16.mxu1 %v3452_v23  ;;  %v3542_v22 = vld [vmem:[%s3705_s9 + $0x440] ss:$36 sps:$4 sm:$0xff]   ;;  %v3543_v23 = vld [vmem:[%s3705_s9 + $0x208] ss:$36 sps:$4 sm:$0xff]  }
  0x60   : > { %3160 = vmatpush3.bf16.msra.mxu1 %v3521_v42  ;;  %v3574_v42 = vld [vmem:[%s3705_s9 + $0x370] ss:$36 sps:$4 sm:$0xff]  }
  0x61   : > { %3161 = vmatprep.subr.bf16.mxu1 %v3535_v47  ;;  %v3582_v47 = vld [vmem:[%s3705_s9 + $0x180] ss:$36 sps:$4 sm:$0xff]  }
  0x64   : > { %3162 = vmatpush3.bf16.msra.mxu1 %v3536_v48  ;;  %v3583_v48 = vld [vmem:[%s3705_s9 + $0x404] ss:$36 sps:$4 sm:$0xff]  }
  0x66   : > { %1754 = vmatmul.mubr.bf16.gmra.mrb[32].mxu0 %v3454_v27  ;;  %1883 = vmatmul.mubr.bf16.gmra.mrb[32].mxu1 %v3455_v30  ;;  %v3549_v27 = vld [vmem:[%s3705_s9 + $0x250] ss:$36 sps:$4 sm:$0xff]   ;;  %v3555_v30 = vld [vmem:[%s3705_s9 + $0x298] ss:$36 sps:$4 sm:$0xff]  }
  0x67   : > { %1761 = vmatprep.mubr.bf16.mxu0 %v3460_v31  ;;  %1890 = vmatprep.mubr.bf16.mxu1 %v3462_v32  ;;  %v3556_v31 = vld [vmem:[%s3705_s9 + $0x60] ss:$36 sps:$4 sm:$0xff]  }
  0x68   : > { %v3557_v32 = vld [vmem:[%s3705_s9 + $0x2e4] ss:$36 sps:$4 sm:$0xff]  }
  0x6e   : > { %1762 = vmatmul.mubr.bf16.gmra.mrb[36].mxu0 %v3464_v34  ;;  %1891 = vmatmul.mubr.bf16.gmra.mrb[36].mxu1 %v3465_v36  ;;  %v3561_v34 = vld [vmem:[%s3705_s9 + $0x2e0] ss:$36 sps:$4 sm:$0xff]   ;;  %v3564_v36 = vld [vmem:[%s3705_s9 + $0x32c] ss:$36 sps:$4 sm:$0xff]  }
  0x6f   : > { %1769 = vmatprep.mubr.bf16.mxu0 %v3468_v37  ;;  %1898 = vmatprep.mubr.bf16.mxu1 %v3470_v38  ;;  %v3566_v37 = vld [vmem:[%s3705_s9 + $0xf4] ss:$36 sps:$4 sm:$0xff]   ;;  %v3568_v38 = vld [vmem:[%s3705_s9 + $0x328] ss:$36 sps:$4 sm:$0xff]  }
  0x76   : > { %1770 = vmatmul.mubr.bf16.gmra.mrb[40].mxu0 %v3472_v39  ;;  %1899 = vmatmul.mubr.bf16.gmra.mrb[40].mxu1 %v3473_v40  ;;  %v3569_v39 = vld [vmem:[%s3705_s9 + $0xf0] ss:$36 sps:$4 sm:$0xff]  }
  0x77   : > { %1777 = vmatprep.mubr.bf16.mxu0 %v3476_v43  ;;  %1906 = vmatprep.mubr.bf16.mxu1 %v3478_v44  ;;  %v3570_v40 = vld [vmem:[%s3705_s9 + $0x374] ss:$36 sps:$4 sm:$0xff]   ;;  %v3577_v44 = vld [vmem:[%s3705_s9 + $0x3bc] ss:$36 sps:$4 sm:$0xff]  }
  0x78   : > { %v3575_v43 = vld [vmem:[%s3705_s9 + $0x138] ss:$36 sps:$4 sm:$0xff]  }
  0x7e   : > { %1778 = vmatmul.mubr.bf16.gmra.mrb[44].mxu0 %v3480_v45  ;;  %1907 = vmatmul.mubr.bf16.gmra.mrb[44].mxu1 %v3481_v46  ;;  %v3579_v45 = vld [vmem:[%s3705_s9 + $0x184] ss:$36 sps:$4 sm:$0xff]   ;;  %v3581_v46 = vld [vmem:[%s3705_s9 + $0x3b8] ss:$36 sps:$4 sm:$0xff]  }
  0x7f   : > { %1914 = vmatprep.mubr.bf16.mxu1 %v3484_v49  ;;  %2011 = vmatprep.mubr.bf16.mxu0 %v3488_v50  ;;  %v3585_v49 = vld [vmem:[%s3705_s9 + $0x1cc] ss:$36 sps:$4 sm:$0xff]   ;;  %v3587_v50 = vld [vmem:[%s3705_s9 + $0x400] ss:$36 sps:$4 sm:$0xff]  }
  0x86   : > { %1915 = vmatmul.mubr.bf16.gmra.mrb[48].mxu1 %v3489_v52  ;;  %2012 = vmatmul.mubr.bf16.vlgmr.msra.gmra.mrb[48].mxu0 %v3486_v51  ;;  %v3588_v51 = vld [vmem:[%s3705_s9 + $0x1c8] ss:$36 sps:$4 sm:$0xff]  }
  0x87   : > { %3284 = vmatpush3.bf16.msra.mxu0 %v3492_v29  ;;  %1922 = vmatprep.mubr.bf16.mxu1 %v3493_v53  ;;  %v3553_v29 = vld [vmem:[%s3705_s9 + $0x64] ss:$36 sps:$4 sm:$0xff]   ;;  %v3590_v52 = vld [vmem:[%s3705_s9 + $0x44c] ss:$36 sps:$4 sm:$0xff]   ;;  %v3592_v53 = vld [vmem:[%s3705_s9 + $0x214] ss:$36 sps:$4 sm:$0xff]  }
  0x88   : > { %2019 = vmatprep.mubr.bf16.mxu0 %v3495_v54  ;;  %3285 = vmatprep.subr.bf16.mxu0 %v3507_v55 }
  0x8b   : > { %3286 = vmatpush3.bf16.msra.mxu0 %v3507_v55 }
  0x8c   : > { %3287 = vmatprep.subr.bf16.mxu0 %v3522_v56 }
  0x8e   : > { %1923 = vmatmul.mubr.bf16.gmra.mrb[52].mxu1 %v3497_v57  ;;  %2020 = vmatmul.mubr.bf16.gmra.mrb[52].mxu0 %v3498_v58  ;;  %v3594_v58 = vld [vmem:[%s3705_s9 + $0x448] ss:$36 sps:$4 sm:$0xff]  }
  0x8f   : > { %1930 = vmatprep.mubr.bf16.mxu1 %v3499_v59  ;;  %2027 = vmatprep.mubr.bf16.mxu0 %v3501_v60  ;;  %v3595_v59 = vld [vmem:[%s3705_s9 + $0x210] ss:$36 sps:$4 sm:$0xff]  }
  0x90   : > { %3288 = vmatpush3.bf16.msra.mxu0 %v3522_v56 }
  0x91   : > { %3289 = vmatprep.subr.bf16.mxu0 %v3537_v61 }
  0x94   : > { %3290 = vmatpush3.bf16.msra.mxu0 %v3537_v61 }
  0x95   : > { %3291 = vmatprep.subr.bf16.mxu0 %v3550_v62 }
  0x96   : > { %1931 = vmatmul.mubr.bf16.gmra.mrb[56].mxu1 %v3503_v63  ;;  %2028 = vmatmul.mubr.bf16.gmra.mrb[56].mxu0 %v3504_v0  ;;  %v3596_v0 = vld [vmem:[%s3705_s9 + $0x25c] ss:$36 sps:$4 sm:$0xff]  }
  0x97   : > { %1938 = vmatprep.mubr.bf16.mxu1 %v3508_v1  ;;  %2035 = vmatprep.mubr.bf16.mxu0 %v3510_v2  ;;  %v3598_v1 = vld [vmem:[%s3705_s9 + $0x20] ss:$36 sps:$4 sm:$0xff]  }
  0x98   : > { %3292 = vmatpush3.bf16.msra.mxu0 %v3550_v62 }
  0x99   : > { %3293 = vmatprep.subr.bf16.mxu0 %v3563_v3 }
  0x9c   : > { %3294 = vmatpush3.bf16.msra.mxu0 %v3563_v3 }
  0x9d   : > { %3295 = vmatprep.subr.bf16.mxu0 %v3576_v6 }
  0x9e   : > { %1939 = vmatmul.mubr.bf16.gmra.mrb[60].mxu1 %v3512_v4  ;;  %2036 = vmatmul.mubr.bf16.gmra.mrb[60].mxu0 %v3513_v5 }
  0x9f   : > { %1946 = vmatprep.mubr.bf16.mxu1 %v3514_v7  ;;  %2043 = vmatprep.mubr.bf16.mxu0 %v3516_v8 }
  0xa0   : > { %3296 = vmatpush3.bf16.msra.mxu0 %v3576_v6 }
  0xa1   : > { %3297 = vmatprep.subr.bf16.mxu0 %v3589_v9 }
  0xa4   : > { %3298 = vmatpush3.bf16.msra.mxu0 %v3589_v9 }
  0xa6   : > { %1947 = vmatmul.mubr.bf16.gmra.mrb[64].mxu1 %v3518_v10  ;;  %2044 = vmatmul.mubr.bf16.gmra.mrb[64].mxu0 %v3519_v11  ;;  %v3599_v10 = vld [vmem:[%s3705_s9 + $0x258] ss:$36 sps:$4 sm:$0xff]   ;;  %v3600_v11 = vld [vmem:[%s3705_s9 + $0x68] ss:$36 sps:$4 sm:$0xff]  }
  0xa7   : > { %1954 = vmatprep.mubr.bf16.mxu1 %v3523_v12  ;;  %2051 = vmatprep.mubr.bf16.mxu0 %v3525_v13 }
  0xae   : > { %1955 = vmatmul.mubr.bf16.gmra.mrb[68].mxu1 %v3527_v14  ;;  %2052 = vmatmul.mubr.bf16.gmra.mrb[68].mxu0 %v3528_v15 }
  0xaf   : > { %1962 = vmatprep.mubr.bf16.mxu1 %v3529_v16  ;;  %2059 = vmatprep.mubr.bf16.mxu0 %v3531_v17  ;;  %v3601_v16 = vld [vmem:[%s3705_s9 + $0x2a4] ss:$36 sps:$4 sm:$0xff]   ;;  %v3603_v17 = vld [vmem:[%s3705_s9 + $0xb0] ss:$36 sps:$4 sm:$0xff]  }
  0xb6   : > { %1963 = vmatmul.mubr.bf16.gmra.mrb[72].mxu1 %v3533_v18  ;;  %2060 = vmatmul.mubr.bf16.gmra.mrb[72].mxu0 %v3534_v19 }
  0xb7   : > { %1970 = vmatprep.mubr.bf16.mxu1 %v3538_v20  ;;  %2067 = vmatprep.mubr.bf16.mxu0 %v3540_v21 }
  0xbe   : > { %1971 = vmatmul.mubr.bf16.gmra.mrb[76].mxu1 %v3542_v22  ;;  %2068 = vmatmul.mubr.bf16.gmra.mrb[76].mxu0 %v3543_v23 }
  0xbf   : > { %2075 = vmatprep.mubr.bf16.mxu0 %v3544_v24  ;;  %2172 = vmatprep.mubr.bf16.mxu1 %v3548_v25 }
  0xc6   : > { %2076 = vmatmul.mubr.bf16.gmra.mrb[80].mxu0 %v3549_v27  ;;  %2173 = vmatmul.mubr.bf16.vlgmr.msra.gmra.mrb[80].mxu1 %v3546_v26  ;;  %v3604_v26 = vld [vmem:[%s3705_s9 + $0x2a0] ss:$36 sps:$4 sm:$0xff]   ;;  %v3605_v27 = vld [vmem:[%s3705_s9 + $0xf8] ss:$36 sps:$4 sm:$0xff]  }
  0xc7   : > { %2083 = vmatprep.mubr.bf16.mxu0 %v3551_v28  ;;  %2180 = vmatprep.mubr.bf16.mxu1 %v3553_v29 }
  0xce   : > { %2084 = vmatmul.mubr.bf16.gmra.mrb[84].mxu0 %v3555_v30  ;;  %2181 = vmatmul.mubr.bf16.gmra.mrb[84].mxu1 %v3556_v31 }
  0xcf   : > { %2091 = vmatprep.mubr.bf16.mxu0 %v3557_v32  ;;  %2188 = vmatprep.mubr.bf16.mxu1 %v3559_v33  ;;  %v3606_v32 = vld [vmem:[%s3705_s9 + $0x2ec] ss:$36 sps:$4 sm:$0xff]   ;;  %v3608_v33 = vld [vmem:[%s3705_s9 + $0x140] ss:$36 sps:$4 sm:$0xff]  }
  0xd6   : > { %2092 = vmatmul.mubr.bf16.gmra.mrb[88].mxu0 %v3561_v34  ;;  %2189 = vmatmul.mubr.bf16.gmra.mrb[88].mxu1 %v3562_v35 }
  0xd7   : > { %2099 = vmatprep.mubr.bf16.mxu0 %v3564_v36  ;;  %2196 = vmatprep.mubr.bf16.mxu1 %v3566_v37 }
  0xde   : > { %2100 = vmatmul.mubr.bf16.gmra.mrb[92].mxu0 %v3568_v38  ;;  %2197 = vmatmul.mubr.bf16.gmra.mrb[92].mxu1 %v3569_v39 }
  0xdf   : > { %2107 = vmatprep.mubr.bf16.mxu0 %v3570_v40  ;;  %2204 = vmatprep.mubr.bf16.mxu1 %v3572_v41 }
  0xe6   : > { %2108 = vmatmul.mubr.bf16.gmra.mrb[96].mxu0 %v3574_v42  ;;  %2205 = vmatmul.mubr.bf16.gmra.mrb[96].mxu1 %v3575_v43  ;;  %v3609_v42 = vld [vmem:[%s3705_s9 + $0x2e8] ss:$36 sps:$4 sm:$0xff]  }
  0xe7   : > { %2115 = vmatprep.mubr.bf16.mxu0 %v3577_v44  ;;  %2212 = vmatprep.mubr.bf16.mxu1 %v3579_v45  ;;  %v3610_v43 = vld [vmem:[%s3705_s9 + $0x188] ss:$36 sps:$4 sm:$0xff]  }
  0xee   : > { %2116 = vmatmul.mubr.bf16.gmra.mrb[100].mxu0 %v3581_v46  ;;  %2213 = vmatmul.mubr.bf16.gmra.mrb[100].mxu1 %v3582_v47 }
  0xef   : > { %2123 = vmatprep.mubr.bf16.mxu0 %v3583_v48  ;;  %2220 = vmatprep.mubr.bf16.mxu1 %v3585_v49  ;;  %v3611_v48 = vld [vmem:[%s3705_s9 + $0x334] ss:$36 sps:$4 sm:$0xff]  }
  0xf0   : > { %v3613_v49 = vld [vmem:[%s3705_s9 + $0x1d0] ss:$36 sps:$4 sm:$0xff]  }
  0xf6   : > { %2124 = vmatmul.mubr.bf16.gmra.mrb[104].mxu0 %v3587_v50  ;;  %2221 = vmatmul.mubr.bf16.gmra.mrb[104].mxu1 %v3588_v51 }
  0xf7   : > { %2131 = vmatprep.mubr.bf16.mxu0 %v3590_v52  ;;  %2228 = vmatprep.mubr.bf16.mxu1 %v3592_v53 }
  0xf9   : > { %v2899_v54 = vpop.f32.mrb[0].mxu1  ;;  %v2827_v55 = vpop.f32.mrb[0].mxu0 }
  0xfa   : > { %v2900_v56 = vpop.f32.mrb[1].mxu1  ;;  %v2828_v57 = vpop.f32.mrb[1].mxu0 }
  0xfb   : > { %v4008_v60 = vadd.f32 %v2900_v56, %v2899_v54  ;;  %v2902_v61 = vpop.f32.mrb[2].mxu1  ;;  %v4010_v62 = vadd.f32 %v2828_v57, %v2827_v55  ;;  %v2830_v63 = vpop.f32.mrb[2].mxu0  ;;  %v4057_v54 = vld [vmem:[%s4491_s2] ss:$0 sm:$0xff] }
  0xfc   : > { %v2903_v2 = vpop.f32.mrb[3].mxu1  ;;  %v2831_v3 = vpop.f32.mrb[3].mxu0 }
  0xfd   : > { %v4014_v4 = vadd.f32 %v2903_v2, %v2902_v61  ;;  %v4016_v5 = vadd.f32 %v2831_v3, %v2830_v63  ;;  %v3615_v61 = vld [vmem:[%s3705_s9 + $0x218] ss:$36 sps:$4 sm:$0xff]   ;;  %v1692_v63 = vadd.f32 %v4010_v62, %v4057_v54 }
  0xfe   : > { %2132 = vmatmul.mubr.bf16.gmra.mrb[108].mxu0 %v3594_v58  ;;  %2229 = vmatmul.mubr.bf16.gmra.mrb[108].mxu1 %v3595_v59  ;;  %v3614_v59 = vld [vmem:[%s3705_s9 + $0x330] ss:$36 sps:$4 sm:$0xff]  }
  0xff   : > { %2236 = vmatprep.mubr.bf16.mxu1 %v3596_v0  ;;  %3299 = vmatprep.mubr.bf16.mxu0 %v3598_v1 }
 0x101   : > { %v2905_v6 = vpop.f32.mrb[4].mxu1  ;;  %v2833_v7 = vpop.f32.mrb[4].mxu0 }
 0x102   : > { %v2906_v8 = vpop.f32.mrb[5].mxu1  ;;  %v2834_v9 = vpop.f32.mrb[5].mxu0 }
 0x103   : > { %v4020_v12 = vadd.f32 %v2906_v8, %v2905_v6  ;;  %v2908_v13 = vpop.f32.mrb[6].mxu1  ;;  %v4022_v14 = vadd.f32 %v2834_v9, %v2833_v7  ;;  %v2836_v15 = vpop.f32.mrb[6].mxu0  ;;  %v3616_v6 = vld [vmem:[%s3705_s9 + $0x37c] ss:$36 sps:$4 sm:$0xff]  }
 0x104   : > { %v2909_v18 = vpop.f32.mrb[7].mxu1  ;;  %v2837_v19 = vpop.f32.mrb[7].mxu0  ;;  %v3618_v7 = vld [vmem:[%s3705_s9 + $0x260] ss:$36 sps:$4 sm:$0xff]  }
 0x105   : > { %v4026_v20 = vadd.f32 %v2909_v18, %v2908_v13  ;;  %v4028_v21 = vadd.f32 %v2837_v19, %v2836_v15 }
 0x106   : > { %2237 = vmatmul.mubr.bf16.gmra.mrb[112].mxu1 %v3599_v10  ;;  %3300 = vmatmul.mubr.bf16.vlgmr.msra.gmra.mrb[112].mxu0 %v3600_v11  ;;  %v1695_v10 = vadd.f32 %v4016_v5, %v4057_v54  ;;  %v1700_v5 = vadd.f32 %v4022_v14, %v4057_v54 }
 0x107   : > { %2244 = vmatprep.mubr.bf16.mxu1 %v3601_v16  ;;  %3303 = vmatprep.mubr.bf16.mxu0 %v3603_v17 }
 0x109   : > { %v2911_v22 = vpop.f32.mrb[8].mxu1  ;;  %v2839_v23 = vpop.f32.mrb[8].mxu0 }
 0x10a   : > { %v2912_v24 = vpop.f32.mrb[9].mxu1  ;;  %v2840_v25 = vpop.f32.mrb[9].mxu0 }
 0x10b   : > { %v4032_v28 = vadd.f32 %v2912_v24, %v2911_v22  ;;  %v2914_v29 = vpop.f32.mrb[10].mxu1  ;;  %v4034_v30 = vadd.f32 %v2840_v25, %v2839_v23  ;;  %v2842_v31 = vpop.f32.mrb[10].mxu0  ;;  %v3619_v22 = vld [vmem:[%s3705_s9 + $0x378] ss:$36 sps:$4 sm:$0xff]   ;;  %v3620_v23 = vld [vmem:[%s3705_s9 + $0x2a8] ss:$36 sps:$4 sm:$0xff]  }
 0x10c   : > { %v2915_v34 = vpop.f32.mrb[11].mxu1  ;;  %v2843_v35 = vpop.f32.mrb[11].mxu0 }
 0x10d   : > { %v4038_v36 = vadd.f32 %v2915_v34, %v2914_v29  ;;  %v4040_v37 = vadd.f32 %v2843_v35, %v2842_v31  ;;  %v3621_v29 = vld [vmem:[%s3705_s9 + $0x3c4] ss:$36 sps:$4 sm:$0xff]   ;;  %v3623_v31 = vld [vmem:[%s3705_s9 + $0x2f0] ss:$36 sps:$4 sm:$0xff]   ;;  %v1703_v34 = vadd.f32 %v4028_v21, %v4057_v54  ;;  %v1708_v21 = vadd.f32 %v4034_v30, %v4057_v54 }
 0x10e   : > { %2245 = vmatmul.mubr.bf16.gmra.mrb[116].mxu1 %v3604_v26  ;;  %3304 = vmatmul.mubr.bf16.gmra.mrb[116].mxu0 %v3605_v27 }
 0x10f   : > { %2252 = vmatprep.mubr.bf16.mxu1 %v3606_v32  ;;  %3307 = vmatprep.mubr.bf16.mxu0 %v3608_v33 }
 0x111   : > { %v2917_v38 = vpop.f32.mrb[12].mxu1  ;;  %v2845_v39 = vpop.f32.mrb[12].mxu0 }
 0x112   : > { %v2918_v40 = vpop.f32.mrb[13].mxu1  ;;  %v2846_v41 = vpop.f32.mrb[13].mxu0 }
 0x113   : > { %v4044_v44 = vadd.f32 %v2918_v40, %v2917_v38  ;;  %v2920_v45 = vpop.f32.mrb[14].mxu1  ;;  %v4046_v46 = vadd.f32 %v2846_v41, %v2845_v39  ;;  %v2848_v47 = vpop.f32.mrb[14].mxu0 }
 0x114   : > { %v2921_v50 = vpop.f32.mrb[15].mxu1  ;;  %v2849_v51 = vpop.f32.mrb[15].mxu0 }
 0x115   : > { %v4050_v52 = vadd.f32 %v2921_v50, %v2920_v45  ;;  %v4052_v53 = vadd.f32 %v2849_v51, %v2848_v47  ;;  %v3624_v45 = vld [vmem:[%s3705_s9 + $0x3c0] ss:$36 sps:$4 sm:$0xff]   ;;  %v3625_v47 = vld [vmem:[%s3705_s9 + $0x338] ss:$36 sps:$4 sm:$0xff]  }
 0x116   : > { %2253 = vmatmul.mubr.bf16.gmra.mrb[120].mxu1 %v3609_v42  ;;  %3308 = vmatmul.mubr.bf16.gmra.mrb[120].mxu0 %v3610_v43 }
 0x117   : > { %2260 = vmatprep.mubr.bf16.mxu1 %v3611_v48  ;;  %3311 = vmatprep.mubr.bf16.mxu0 %v3613_v49 }
 0x119   : > { %v2939_v55 = vpop.f32.mrb[16].mxu1  ;;  %v2851_v56 = vpop.f32.mrb[16].mxu0 }
 0x11a   : > { %v2940_v57 = vpop.f32.mrb[17].mxu1  ;;  %v2852_v58 = vpop.f32.mrb[17].mxu0 }
 0x11b   : > { %v2941_v0 = vadd.f32 %v2940_v57, %v2939_v55  ;;  %v2942_v1 = vpop.f32.mrb[18].mxu1  ;;  %v4063_v2 = vadd.f32 %v2852_v58, %v2851_v56  ;;  %v2854_v3 = vpop.f32.mrb[18].mxu0  ;;  %v3626_v55 = vld [vmem:[%s3705_s9 + $0x40c] ss:$36 sps:$4 sm:$0xff]   ;;  %v3628_v56 = vld [vmem:[%s3705_s9 + $0x380] ss:$36 sps:$4 sm:$0xff]  }
 0x11c   : > { %v2943_v8 = vpop.f32.mrb[19].mxu1  ;;  %v2855_v9 = vpop.f32.mrb[19].mxu0 }
 0x11d   : > { %v4069_v11 = vadd.f32 %v2941_v0, %v1692_v63  ;;  %v2944_v13 = vadd.f32 %v2943_v8, %v2942_v1  ;;  %v4071_v15 = vadd.f32 %v2855_v9, %v2854_v3  ;;  %v3629_v8 = vld [vmem:[%s3705_s9 + $0x408] ss:$36 sps:$4 sm:$0xff]  }
 0x11e   : > { %2261 = vmatmul.mubr.bf16.gmra.mrb[124].mxu1 %v3614_v59  ;;  %3312 = vmatmul.mubr.bf16.gmra.mrb[124].mxu0 %v3615_v61  ;;  %v1711_v59 = vadd.f32 %v4040_v37, %v4057_v54  ;;  %v3630_v9 = vld [vmem:[%s3705_s9 + $0x3c8] ss:$36 sps:$4 sm:$0xff]   ;;  %v1716_v37 = vadd.f32 %v4046_v46, %v4057_v54 }
 0x11f   : > { %v4073_v62 = vadd.f32 %v2944_v13, %v1695_v10  ;;  %2268 = vmatprep.mubr.bf16.mxu1 %v3616_v6  ;;  %3315 = vmatprep.mubr.bf16.mxu0 %v3618_v7 }
 0x121   : > { %v2945_v16 = vpop.f32.mrb[20].mxu1  ;;  %v2857_v17 = vpop.f32.mrb[20].mxu0 }
 0x122   : > { %v2946_v18 = vpop.f32.mrb[21].mxu1  ;;  %v2858_v19 = vpop.f32.mrb[21].mxu0 }
 0x123   : > { %v2947_v24 = vadd.f32 %v2946_v18, %v2945_v16  ;;  %v2948_v25 = vpop.f32.mrb[22].mxu1  ;;  %v4079_v26 = vadd.f32 %v2858_v19, %v2857_v17  ;;  %v2860_v27 = vpop.f32.mrb[22].mxu0  ;;  %v3631_v18 = vld [vmem:[%s3705_s9 + $0x454] ss:$36 sps:$4 sm:$0xff]  }
 0x124   : > { %v2949_v32 = vpop.f32.mrb[23].mxu1  ;;  %v2861_v33 = vpop.f32.mrb[23].mxu0  ;;  %v3633_v19 = vld [vmem:[%s3705_s9 + $0x410] ss:$36 sps:$4 sm:$0xff]  }
 0x125   : > { %v4085_v35 = vadd.f32 %v2947_v24, %v1700_v5  ;;  %v2950_v38 = vadd.f32 %v2949_v32, %v2948_v25  ;;  %v4087_v39 = vadd.f32 %v2861_v33, %v2860_v27  ;;  %v1719_v5 = vadd.f32 %v4052_v53, %v4057_v54 }
 0x126   : > { %2269 = vmatmul.mubr.bf16.gmra.mrb[128].mxu1 %v3619_v22  ;;  %3316 = vmatmul.mubr.bf16.gmra.mrb[128].mxu0 %v3620_v23  ;;  %v1724_v53 = vadd.f32 %v4063_v2, %v4057_v54 }
 0x127   : > { %v4089_v14 = vadd.f32 %v2950_v38, %v1703_v34  ;;  %2276 = vmatprep.mubr.bf16.mxu1 %v3621_v29  ;;  %3319 = vmatprep.mubr.bf16.mxu0 %v3623_v31  ;;  %v3634_v34 = vld [vmem:[%s3705_s9 + $0x450] ss:$36 sps:$4 sm:$0xff]   ;;  %v3635_v38 = vld [vmem:[%s3705_s9 + $0x458] ss:$36 sps:$4 sm:$0xff]   ;;  %s2591_s9 = sshll.u32 %s4494_s16, 3 }
 0x128   : > { %s4380_s22 = scalar_lea.vmem %s4492_s3, %s2591_s9 }
 0x129   : > { %v2951_v40 = vpop.f32.mrb[24].mxu1  ;;  %v2863_v41 = vpop.f32.mrb[24].mxu0 }
 0x12a   : > { %v2952_v42 = vpop.f32.mrb[25].mxu1  ;;  %v2864_v43 = vpop.f32.mrb[25].mxu0 }
 0x12b   : > { %v2953_v48 = vadd.f32 %v2952_v42, %v2951_v40  ;;  %v2954_v49 = vpop.f32.mrb[26].mxu1  ;;  %v4095_v50 = vadd.f32 %v2864_v43, %v2863_v41  ;;  %v2866_v51 = vpop.f32.mrb[26].mxu0 }
 0x12c   : > { %v2955_v57 = vpop.f32.mrb[27].mxu1  ;;  %v2867_v58 = vpop.f32.mrb[27].mxu0 }
 0x12d   : > { %v4101_v61 = vadd.f32 %v2953_v48, %v1708_v21  ;;  %v2956_v63 = vadd.f32 %v2955_v57, %v2954_v49  ;;  %v4103_v0 = vadd.f32 %v2867_v58, %v2866_v51  ;;  %v1727_v21 = vadd.f32 %v4071_v15, %v4057_v54 }
 0x12e   : > { %2277 = vmatmul.mubr.bf16.gmra.mrb[132].mxu1 %v3624_v45  ;;  %3320 = vmatmul.mubr.bf16.gmra.mrb[132].mxu0 %v3625_v47 }
 0x12f   : > { %v4105_v30 = vadd.f32 %v2956_v63, %v1711_v59  ;;  %2284 = vmatprep.mubr.bf16.mxu1 %v3626_v55  ;;  %3323 = vmatprep.mubr.bf16.mxu0 %v3628_v56  ;;  %v1732_v59 = vadd.f32 %v4079_v26, %v4057_v54 }
 0x131   : > { %v2957_v1 = vpop.f32.mrb[28].mxu1  ;;  %v2869_v3 = vpop.f32.mrb[28].mxu0 }
 0x132   : > { %v2958_v6 = vpop.f32.mrb[29].mxu1  ;;  %v2870_v7 = vpop.f32.mrb[29].mxu0 }
 0x133   : > { %v2959_v10 = vadd.f32 %v2958_v6, %v2957_v1  ;;  %v2960_v13 = vpop.f32.mrb[30].mxu1  ;;  %v4111_v16 = vadd.f32 %v2870_v7, %v2869_v3  ;;  %v2872_v17 = vpop.f32.mrb[30].mxu0 }
 0x134   : > { %v2961_v22 = vpop.f32.mrb[31].mxu1  ;;  %v2873_v23 = vpop.f32.mrb[31].mxu0 }
 0x135   : > { %v4117_v24 = vadd.f32 %v2959_v10, %v1716_v37  ;;  %v2962_v25 = vadd.f32 %v2961_v22, %v2960_v13  ;;  %v4119_v27 = vadd.f32 %v2873_v23, %v2872_v17  ;;  %v1740_v22 = vadd.f32 %v4095_v50, %v4057_v54 }
 0x136   : > { %2285 = vmatmul.mubr.bf16.gmra.mrb[136].mxu1 %v3629_v8  ;;  %3324 = vmatmul.mubr.bf16.gmra.mrb[136].mxu0 %v3630_v9  ;;  %v1735_v8 = vadd.f32 %v4087_v39, %v4057_v54 }
 0x137   : > { %v4121_v46 = vadd.f32 %v2962_v25, %v1719_v5  ;;  %2292 = vmatprep.mubr.bf16.mxu1 %v3631_v18  ;;  %3327 = vmatprep.mubr.bf16.mxu0 %v3633_v19 }
 0x139   : > { %v2963_v29 = vpop.f32.mrb[32].mxu1  ;;  %v2875_v31 = vpop.f32.mrb[32].mxu0 }
 0x13a   : > { %v2964_v32 = vpop.f32.mrb[33].mxu1  ;;  %v2876_v33 = vpop.f32.mrb[33].mxu0 }
 0x13b   : > { %v2965_v40 = vadd.f32 %v2964_v32, %v2963_v29  ;;  %v2966_v41 = vpop.f32.mrb[34].mxu1  ;;  %v4127_v42 = vadd.f32 %v2876_v33, %v2875_v31  ;;  %v2878_v43 = vpop.f32.mrb[34].mxu0  ;;  %v1743_v32 = vadd.f32 %v4103_v0, %v4057_v54 }
 0x13c   : > { %v2967_v45 = vpop.f32.mrb[35].mxu1  ;;  %v2879_v47 = vpop.f32.mrb[35].mxu0 }
 0x13d   : > { %v4131_v48 = vadd.f32 %v2965_v40, %v1724_v53  ;;  %v2968_v49 = vadd.f32 %v2967_v45, %v2966_v41  ;;  %v2880_v51 = vadd.f32 %v2879_v47, %v2878_v43  ;;  %v1748_v45 = vadd.f32 %v4111_v16, %v4057_v54 }
 0x13e   : > { %2293 = vmatmul.mubr.bf16.gmra.mrb[140].mxu1 %v3634_v34  ;;  %3328 = vmatmul.mubr.bf16.gmra.mrb[140].mxu0 %v3635_v38 }
 0x13f   : > { %v4133_v55 = vadd.f32 %v2968_v49, %v1727_v21 }
 0x141   : > { %v2969_v56 = vpop.f32.mrb[36].mxu1  ;;  %v2881_v2 = vpop.f32.mrb[36].mxu0 }
 0x142   : > { %v2970_v57 = vpop.f32.mrb[37].mxu1  ;;  %v2882_v58 = vpop.f32.mrb[37].mxu0 }
 0x143   : > { %v2971_v63 = vadd.f32 %v2970_v57, %v2969_v56  ;;  %v2972_v1 = vpop.f32.mrb[38].mxu1  ;;  %v4137_v3 = vadd.f32 %v2882_v58, %v2881_v2  ;;  %v2884_v15 = vpop.f32.mrb[38].mxu0  ;;  %v1751_v57 = vadd.f32 %v4119_v27, %v4057_v54  ;;  %v1759_v27 = vadd.f32 %v2880_v51, %v4057_v54 }
 0x144   : > { %v2973_v6 = vpop.f32.mrb[39].mxu1  ;;  %v2885_v7 = vpop.f32.mrb[39].mxu0 }
 0x145   : > { %v4141_v9 = vadd.f32 %v2971_v63, %v1732_v59  ;;  %v2974_v37 = vadd.f32 %v2973_v6, %v2972_v1  ;;  %v2886_v10 = vadd.f32 %v2885_v7, %v2884_v15  ;;  %v1764_v51 = vadd.f32 %v4137_v3, %v4057_v54 }
 0x147   : > { %v4143_v13 = vadd.f32 %v2974_v37, %v1735_v8  ;;  %v1756_v8 = vadd.f32 %v4127_v42, %v4057_v54 }
 0x149   : > { %v2975_v17 = vpop.f32.mrb[40].mxu1  ;;  %v2887_v18 = vpop.f32.mrb[40].mxu0 }
 0x14a   : > { %v2976_v19 = vpop.f32.mrb[41].mxu1  ;;  %v2888_v26 = vpop.f32.mrb[41].mxu0 }
 0x14b   : > { %v2977_v23 = vadd.f32 %v2976_v19, %v2975_v17  ;;  %v2978_v5 = vpop.f32.mrb[42].mxu1  ;;  %v4147_v25 = vadd.f32 %v2888_v26, %v2887_v18  ;;  %v2890_v29 = vpop.f32.mrb[42].mxu0 }
 0x14c   : > { %v2979_v31 = vpop.f32.mrb[43].mxu1  ;;  %v2891_v39 = vpop.f32.mrb[43].mxu0 }
 0x14d   : > { %v4151_v33 = vadd.f32 %v2977_v23, %v1740_v22  ;;  %v2980_v34 = vadd.f32 %v2979_v31, %v2978_v5  ;;  %v4153_v38 = vadd.f32 %v2891_v39, %v2890_v29 }
 0x14f   : > { %v4155_v53 = vadd.f32 %v2980_v34, %v1743_v32 }
 0x151   : > { %v2981_v40 = vpop.f32.mrb[44].mxu1  ;;  %v2893_v41 = vpop.f32.mrb[44].mxu0 }
 0x152   : > { %v2982_v50 = vpop.f32.mrb[45].mxu1  ;;  %v2894_v43 = vpop.f32.mrb[45].mxu0 }
 0x153   : > { %v2983_v47 = vadd.f32 %v2982_v50, %v2981_v40  ;;  %v2984_v21 = vpop.f32.mrb[46].mxu1  ;;  %v4159_v49 = vadd.f32 %v2894_v43, %v2893_v41  ;;  %v2896_v56 = vpop.f32.mrb[46].mxu0 }
 0x154   : > { %v2985_v0 = vpop.f32.mrb[47].mxu1  ;;  %v2897_v2 = vpop.f32.mrb[47].mxu0 }
 0x155   : > { %v4163_v58 = vadd.f32 %v2983_v47, %v1748_v45  ;;  %v2986_v59 = vadd.f32 %v2985_v0, %v2984_v21  ;;  %v4165_v63 = vadd.f32 %v2897_v2, %v2896_v56 }
 0x157   : > { %v4167_v1 = vadd.f32 %v2986_v59, %v1751_v57 }
 0x159   : > { %v2987_v15 = vpop.f32.mrb[48].mxu1  ;;  %v3051_v6 = vpop.f32.mrb[48].mxu0 }
 0x15a   : > { %v2988_v16 = vpop.f32.mrb[49].mxu1  ;;  %v3052_v7 = vpop.f32.mrb[49].mxu0 }
 0x15b   : > { %v2989_v37 = vadd.f32 %v2988_v16, %v2987_v15  ;;  %v3053_v17 = vadd.f32 %v3052_v7, %v3051_v6  ;;  %v2990_v18 = vpop.f32.mrb[50].mxu1  ;;  %v3054_v19 = vpop.f32.mrb[50].mxu0 }
 0x15c   : > { %v2991_v26 = vpop.f32.mrb[51].mxu1  ;;  %v3055_v22 = vpop.f32.mrb[51].mxu0 }
 0x15d   : > { %v4172_v23 = vadd.f32 %v2989_v37, %v1756_v8  ;;  %v4175_v5 = vadd.f32 %v3053_v17, %v4069_v11  ;;  %v2992_v29 = vadd.f32 %v2991_v26, %v2990_v18  ;;  %v3056_v31 = vadd.f32 %v3055_v22, %v3054_v19 }
 0x15e   : > { %v1767_v11 = vadd.f32 %v2886_v10, %v4057_v54  ;;  %v1772_v10 = vadd.f32 %v4147_v25, %v4057_v54 }
 0x15f   : > { %v4177_v39 = vadd.f32 %v2992_v29, %v1759_v27  ;;  %v4180_v32 = vadd.f32 %v3056_v31, %v4073_v62 }
 0x161   : > { %v2993_v42 = vpop.f32.mrb[52].mxu1  ;;  %v3057_v34 = vpop.f32.mrb[52].mxu0 }
 0x162   : > { %v2994_v40 = vpop.f32.mrb[53].mxu1  ;;  %v3058_v41 = vpop.f32.mrb[53].mxu0 }
 0x163   : > { %v2995_v50 = vadd.f32 %v2994_v40, %v2993_v42  ;;  %v3059_v43 = vadd.f32 %v3058_v41, %v3057_v34  ;;  %v2996_v45 = vpop.f32.mrb[54].mxu1  ;;  %v3060_v47 = vpop.f32.mrb[54].mxu0 }
 0x164   : > { %v2997_v21 = vpop.f32.mrb[55].mxu1  ;;  %v3061_v56 = vpop.f32.mrb[55].mxu0 }
 0x165   : > { %v4185_v0 = vadd.f32 %v2995_v50, %v1764_v51  ;;  %v4188_v62 = vadd.f32 %v3059_v43, %v4085_v35  ;;  %v2998_v2 = vadd.f32 %v2997_v21, %v2996_v45  ;;  %v3062_v57 = vadd.f32 %v3061_v56, %v3060_v47 }
 0x166   : > { %v1775_v35 = vadd.f32 %v4153_v38, %v4057_v54  ;;  %v1780_v38 = vadd.f32 %v4159_v49, %v4057_v54 }
 0x167   : > { %v4190_v59 = vadd.f32 %v2998_v2, %v1767_v11  ;;  %v4193_v15 = vadd.f32 %v3062_v57, %v4089_v14 }
 0x169   : > { %v2999_v3 = vpop.f32.mrb[56].mxu1  ;;  %v3063_v6 = vpop.f32.mrb[56].mxu0 }
 0x16a   : > { %v3000_v16 = vpop.f32.mrb[57].mxu1  ;;  %v3064_v7 = vpop.f32.mrb[57].mxu0 }
 0x16b   : > { %v3001_v8 = vadd.f32 %v3000_v16, %v2999_v3  ;;  %v3065_v37 = vadd.f32 %v3064_v7, %v3063_v6  ;;  %v3002_v17 = vpop.f32.mrb[58].mxu1  ;;  %v3066_v18 = vpop.f32.mrb[58].mxu0 }
 0x16c   : > { %v3003_v19 = vpop.f32.mrb[59].mxu1  ;;  %v3067_v27 = vpop.f32.mrb[59].mxu0 }
 0x16d   : > { %v4199_v26 = vadd.f32 %v3001_v8, %v1772_v10  ;;  %v4202_v14 = vadd.f32 %v3065_v37, %v4101_v61  ;;  %v3004_v22 = vadd.f32 %v3003_v19, %v3002_v17  ;;  %v3068_v29 = vadd.f32 %v3067_v27, %v3066_v18 }
 0x16e   : > { %v1783_v61 = vadd.f32 %v4165_v63, %v4057_v54  ;;  %v1788_v63 = vadd.f32 %v4008_v60, %v4057_v54 }
 0x16f   : > { %v4204_v31 = vadd.f32 %v3004_v22, %v1775_v35  ;;  %v4207_v25 = vadd.f32 %v3068_v29, %v4105_v30 }
 0x171   : > { %v3005_v42 = vpop.f32.mrb[60].mxu1  ;;  %v3069_v34 = vpop.f32.mrb[60].mxu0 }
 0x172   : > { %v3006_v40 = vpop.f32.mrb[61].mxu1  ;;  %v3070_v41 = vpop.f32.mrb[61].mxu0 }
 0x173   : > { %v3007_v51 = vadd.f32 %v3006_v40, %v3005_v42  ;;  %v3071_v50 = vadd.f32 %v3070_v41, %v3069_v34  ;;  %v3008_v43 = vpop.f32.mrb[62].mxu1  ;;  %v3072_v45 = vpop.f32.mrb[62].mxu0 }
 0x174   : > { %v3009_v47 = vpop.f32.mrb[63].mxu1  ;;  %v3073_v11 = vpop.f32.mrb[63].mxu0 }
 0x175   : > { %v4213_v21 = vadd.f32 %v3007_v51, %v1780_v38  ;;  %v4216_v30 = vadd.f32 %v3071_v50, %v4117_v24  ;;  %v3010_v56 = vadd.f32 %v3009_v47, %v3008_v43  ;;  %v3074_v2 = vadd.f32 %v3073_v11, %v3072_v45 }
 0x176   : > { %v1791_v24 = vadd.f32 %v4014_v4, %v4057_v54  ;;  %v1796_v4 = vadd.f32 %v4020_v12, %v4057_v54 }
 0x177   : > { %v4218_v57 = vadd.f32 %v3010_v56, %v1783_v61  ;;  %v4221_v49 = vadd.f32 %v3074_v2, %v4121_v46 }
 0x179   : > { %v3011_v3 = vpop.f32.mrb[64].mxu1  ;;  %v3075_v6 = vpop.f32.mrb[64].mxu0 }
 0x17a   : > { %v3012_v16 = vpop.f32.mrb[65].mxu1  ;;  %v3076_v7 = vpop.f32.mrb[65].mxu0 }
 0x17b   : > { %v3013_v10 = vadd.f32 %v3012_v16, %v3011_v3  ;;  %v3077_v8 = vadd.f32 %v3076_v7, %v3075_v6  ;;  %v3014_v37 = vpop.f32.mrb[66].mxu1  ;;  %v3078_v17 = vpop.f32.mrb[66].mxu0 }
 0x17c   : > { %v3015_v18 = vpop.f32.mrb[67].mxu1  ;;  %v3079_v35 = vpop.f32.mrb[67].mxu0 }
 0x17d   : > { %v4227_v19 = vadd.f32 %v3013_v10, %v1788_v63  ;;  %v4230_v46 = vadd.f32 %v3077_v8, %v4131_v48  ;;  %v3016_v27 = vadd.f32 %v3015_v18, %v3014_v37  ;;  %v3080_v22 = vadd.f32 %v3079_v35, %v3078_v17 }
 0x17e   : > { %v1799_v48 = vadd.f32 %v4026_v20, %v4057_v54  ;;  %v1804_v20 = vadd.f32 %v4032_v28, %v4057_v54 }
 0x17f   : > { %v4232_v29 = vadd.f32 %v3016_v27, %v1791_v24  ;;  %v4235_v60 = vadd.f32 %v3080_v22, %v4133_v55 }
 0x181   : > { %v3017_v42 = vpop.f32.mrb[68].mxu1  ;;  %v3081_v34 = vpop.f32.mrb[68].mxu0 }
 0x182   : > { %v3018_v40 = vpop.f32.mrb[69].mxu1  ;;  %v3082_v41 = vpop.f32.mrb[69].mxu0 }
 0x183   : > { %v3019_v38 = vadd.f32 %v3018_v40, %v3017_v42  ;;  %v3083_v51 = vadd.f32 %v3082_v41, %v3081_v34  ;;  %v3020_v50 = vpop.f32.mrb[70].mxu1  ;;  %v3084_v43 = vpop.f32.mrb[70].mxu0 }
 0x184   : > { %v3021_v45 = vpop.f32.mrb[71].mxu1  ;;  %v3085_v61 = vpop.f32.mrb[71].mxu0 }
 0x185   : > { %v4241_v47 = vadd.f32 %v3019_v38, %v1796_v4  ;;  %v4244_v55 = vadd.f32 %v3083_v51, %v4141_v9  ;;  %v3022_v11 = vadd.f32 %v3021_v45, %v3020_v50  ;;  %v3086_v56 = vadd.f32 %v3085_v61, %v3084_v43 }
 0x186   : > { %v1807_v9 = vadd.f32 %v4038_v36, %v4057_v54  ;;  %v1812_v36 = vadd.f32 %v4044_v44, %v4057_v54 }
 0x187   : > { %v4246_v2 = vadd.f32 %v3022_v11, %v1799_v48  ;;  %v4249_v12 = vadd.f32 %v3086_v56, %v4143_v13 }
 0x189   : > { %v3023_v3 = vpop.f32.mrb[72].mxu1  ;;  %v3087_v6 = vpop.f32.mrb[72].mxu0 }
 0x18a   : > { %v3024_v16 = vpop.f32.mrb[73].mxu1  ;;  %v3088_v7 = vpop.f32.mrb[73].mxu0 }
 0x18b   : > { %v3025_v63 = vadd.f32 %v3024_v16, %v3023_v3  ;;  %v3089_v10 = vadd.f32 %v3088_v7, %v3087_v6  ;;  %v3026_v8 = vpop.f32.mrb[74].mxu1  ;;  %v3090_v37 = vpop.f32.mrb[74].mxu0 }
 0x18c   : > { %v3027_v17 = vpop.f32.mrb[75].mxu1  ;;  %v3091_v24 = vpop.f32.mrb[75].mxu0 }
 0x18d   : > { %v4255_v18 = vadd.f32 %v3025_v63, %v1804_v20  ;;  %v4258_v13 = vadd.f32 %v3089_v10, %v4151_v33  ;;  %v3028_v35 = vadd.f32 %v3027_v17, %v3026_v8  ;;  %v3092_v27 = vadd.f32 %v3091_v24, %v3090_v37 }
 0x18e   : > { %v1815_v33 = vadd.f32 %v4050_v52, %v4057_v54 }
 0x18f   : > { %v4260_v22 = vadd.f32 %v3028_v35, %v1807_v9  ;;  %v4263_v28 = vadd.f32 %v3092_v27, %v4155_v53 }
 0x191   : > { %v3029_v42 = vpop.f32.mrb[76].mxu1  ;;  %v3093_v34 = vpop.f32.mrb[76].mxu0 }
 0x192   : > { %v3030_v40 = vpop.f32.mrb[77].mxu1  ;;  %v3094_v41 = vpop.f32.mrb[77].mxu0 }
 0x193   : > { %v3031_v4 = vadd.f32 %v3030_v40, %v3029_v42  ;;  %v3095_v38 = vadd.f32 %v3094_v41, %v3093_v34  ;;  %v3032_v51 = vpop.f32.mrb[78].mxu1  ;;  %v3096_v50 = vpop.f32.mrb[78].mxu0 }
 0x194   : > { %v3033_v43 = vpop.f32.mrb[79].mxu1  ;;  %v3097_v48 = vpop.f32.mrb[79].mxu0 }
 0x195   : > { %v4269_v45 = vadd.f32 %v3031_v4, %v1812_v36  ;;  %v4272_v53 = vadd.f32 %v3095_v38, %v4163_v58  ;;  %v3034_v61 = vadd.f32 %v3033_v43, %v3032_v51  ;;  %v3098_v11 = vadd.f32 %v3097_v48, %v3096_v50 }
 0x197   : > { %v4274_v56 = vadd.f32 %v3034_v61, %v1815_v33  ;;  %v4277_v44 = vadd.f32 %v3098_v11, %v4167_v1 }
 0x199   : > { %v3099_v3 = vpop.f32.mrb[80].mxu0  ;;  %v3163_v6 = vpop.f32.mrb[80].mxu1 }
 0x19a   : > { %v3100_v16 = vpop.f32.mrb[81].mxu0  ;;  %v3164_v7 = vpop.f32.mrb[81].mxu1 }
 0x19b   : > { %v3101_v20 = vadd.f32 %v3100_v16, %v3099_v3  ;;  %v3165_v52 = vadd.f32 %v3164_v7, %v3163_v6  ;;  %v3102_v54 = vpop.f32.mrb[82].mxu0  ;;  %v3166_v63 = vpop.f32.mrb[82].mxu1 }
 0x19c   : > { %v3103_v10 = vpop.f32.mrb[83].mxu0  ;;  %v3167_v8 = vpop.f32.mrb[83].mxu1 }
 0x19d   : > { %v4280_v58 = vadd.f32 %v3101_v20, %v4172_v23  ;;  %v3104_v37 = vadd.f32 %v3103_v10, %v3102_v54  ;;  %v3168_v9 = vadd.f32 %v3167_v8, %v3166_v63  ;;  %v4283_v17 = vadd.f32 %v3165_v52, %v4175_v5 }
 0x19f   : > { %v4286_v1 = vadd.f32 %v3104_v37, %v4177_v39  ;;  %v4289_v24 = vadd.f32 %v3168_v9, %v4180_v32 }
 0x1a1   : > { %v3105_v35 = vpop.f32.mrb[84].mxu0  ;;  %v3169_v27 = vpop.f32.mrb[84].mxu1 }
 0x1a2   : > { %v3106_v42 = vpop.f32.mrb[85].mxu0  ;;  %v3170_v34 = vpop.f32.mrb[85].mxu1 }
 0x1a3   : > { %v3107_v40 = vadd.f32 %v3106_v42, %v3105_v35  ;;  %v3171_v41 = vadd.f32 %v3170_v34, %v3169_v27  ;;  %v3108_v36 = vpop.f32.mrb[86].mxu0  ;;  %v3172_v23 = vpop.f32.mrb[86].mxu1 }
 0x1a4   : > { %v3109_v4 = vpop.f32.mrb[87].mxu0  ;;  %v3173_v38 = vpop.f32.mrb[87].mxu1 }
 0x1a5   : > { %v4292_v51 = vadd.f32 %v3107_v40, %v4185_v0  ;;  %v3110_v5 = vadd.f32 %v3109_v4, %v3108_v36  ;;  %v3174_v50 = vadd.f32 %v3173_v38, %v3172_v23  ;;  %v4295_v39 = vadd.f32 %v3171_v41, %v4188_v62 }
 0x1a7   : > { %v4298_v32 = vadd.f32 %v3110_v5, %v4190_v59  ;;  %v4301_v33 = vadd.f32 %v3174_v50, %v4193_v15 }
 0x1a9   : > { %v3111_v43 = vpop.f32.mrb[88].mxu0  ;;  %v3175_v48 = vpop.f32.mrb[88].mxu1 }
 0x1aa   : > { %v3112_v61 = vpop.f32.mrb[89].mxu0  ;;  %v3176_v11 = vpop.f32.mrb[89].mxu1 }
 0x1ab   : > { %v3113_v3 = vadd.f32 %v3112_v61, %v3111_v43  ;;  %v3177_v6 = vadd.f32 %v3176_v11, %v3175_v48  ;;  %v3114_v16 = vpop.f32.mrb[90].mxu0  ;;  %v3178_v0 = vpop.f32.mrb[90].mxu1 }
 0x1ac   : > { %v3115_v7 = vpop.f32.mrb[91].mxu0  ;;  %v3179_v20 = vpop.f32.mrb[91].mxu1 }
 0x1ad   : > { %v4304_v52 = vadd.f32 %v3113_v3, %v4199_v26  ;;  %v3116_v62 = vadd.f32 %v3115_v7, %v3114_v16  ;;  %v3180_v54 = vadd.f32 %v3179_v20, %v3178_v0  ;;  %v4307_v59 = vadd.f32 %v3177_v6, %v4202_v14 }
 0x1af   : > { %v4310_v15 = vadd.f32 %v3116_v62, %v4204_v31  ;;  %v4313_v63 = vadd.f32 %v3180_v54, %v4207_v25 }
 0x1b1   : > { %v3117_v10 = vpop.f32.mrb[92].mxu0  ;;  %v3181_v8 = vpop.f32.mrb[92].mxu1 }
 0x1b2   : > { %v3118_v37 = vpop.f32.mrb[93].mxu0  ;;  %v3182_v9 = vpop.f32.mrb[93].mxu1 }
 0x1b3   : > { %v3119_v35 = vadd.f32 %v3118_v37, %v3117_v10  ;;  %v3183_v27 = vadd.f32 %v3182_v9, %v3181_v8  ;;  %v3120_v42 = vpop.f32.mrb[94].mxu0  ;;  %v3184_v26 = vpop.f32.mrb[94].mxu1 }
 0x1b4   : > { %v3121_v34 = vpop.f32.mrb[95].mxu0  ;;  %v3185_v40 = vpop.f32.mrb[95].mxu1 }
 0x1b5   : > { %v4316_v41 = vadd.f32 %v3119_v35, %v4213_v21  ;;  %v3122_v14 = vadd.f32 %v3121_v34, %v3120_v42  ;;  %v3186_v36 = vadd.f32 %v3185_v40, %v3184_v26  ;;  %v4319_v31 = vadd.f32 %v3183_v27, %v4216_v30 }
 0x1b7   : > { %v4322_v25 = vadd.f32 %v3122_v14, %v4218_v57  ;;  %v4325_v23 = vadd.f32 %v3186_v36, %v4221_v49 }
 0x1b9   : > { %v3123_v4 = vpop.f32.mrb[96].mxu0  ;;  %v3187_v38 = vpop.f32.mrb[96].mxu1 }
 0x1ba   : > { %v3124_v5 = vpop.f32.mrb[97].mxu0  ;;  %v3188_v50 = vpop.f32.mrb[97].mxu1 }
 0x1bb   : > { %v3125_v43 = vadd.f32 %v3124_v5, %v3123_v4  ;;  %v3189_v48 = vadd.f32 %v3188_v50, %v3187_v38  ;;  %v3126_v61 = vpop.f32.mrb[98].mxu0  ;;  %v3190_v21 = vpop.f32.mrb[98].mxu1 }
 0x1bc   : > { %v3127_v11 = vpop.f32.mrb[99].mxu0  ;;  %v3191_v3 = vpop.f32.mrb[99].mxu1 }
 0x1bd   : > { %v4328_v6 = vadd.f32 %v3125_v43, %v4227_v19  ;;  %v3128_v30 = vadd.f32 %v3127_v11, %v3126_v61  ;;  %v3192_v16 = vadd.f32 %v3191_v3, %v3190_v21  ;;  %v4331_v57 = vadd.f32 %v3189_v48, %v4230_v46 }
 0x1bf   : > { %v4334_v49 = vadd.f32 %v3128_v30, %v4232_v29  ;;  %v4337_v0 = vadd.f32 %v3192_v16, %v4235_v60 }
 0x1c1   : > { %v3129_v7 = vpop.f32.mrb[100].mxu0  ;;  %v3193_v20 = vpop.f32.mrb[100].mxu1 }
 0x1c2   : > { %v3130_v62 = vpop.f32.mrb[101].mxu0  ;;  %v3194_v54 = vpop.f32.mrb[101].mxu1 }
 0x1c3   : > { %v3131_v10 = vadd.f32 %v3130_v62, %v3129_v7  ;;  %v3195_v8 = vadd.f32 %v3194_v54, %v3193_v20  ;;  %v3132_v37 = vpop.f32.mrb[102].mxu0  ;;  %v3196_v19 = vpop.f32.mrb[102].mxu1 }
 0x1c4   : > { %v3133_v9 = vpop.f32.mrb[103].mxu0  ;;  %v3197_v35 = vpop.f32.mrb[103].mxu1 }
 0x1c5   : > { %v4340_v27 = vadd.f32 %v3131_v10, %v4241_v47  ;;  %v3134_v46 = vadd.f32 %v3133_v9, %v3132_v37  ;;  %v3198_v42 = vadd.f32 %v3197_v35, %v3196_v19  ;;  %v4343_v29 = vadd.f32 %v3195_v8, %v4244_v55 }
 0x1c7   : > { %v4346_v60 = vadd.f32 %v3134_v46, %v4246_v2  ;;  %v4349_v26 = vadd.f32 %v3198_v42, %v4249_v12 }
 0x1c9   : > { %v3135_v34 = vpop.f32.mrb[104].mxu0  ;;  %v3199_v40 = vpop.f32.mrb[104].mxu1 }
 0x1ca   : > { %v3136_v14 = vpop.f32.mrb[105].mxu0  ;;  %v3200_v36 = vpop.f32.mrb[105].mxu1 }
 0x1cb   : > { %v3137_v4 = vadd.f32 %v3136_v14, %v3135_v34  ;;  %v3201_v38 = vadd.f32 %v3200_v36, %v3199_v40  ;;  %v3138_v5 = vpop.f32.mrb[106].mxu0  ;;  %v3202_v47 = vpop.f32.mrb[106].mxu1 }
 0x1cc   : > { %v3139_v50 = vpop.f32.mrb[107].mxu0  ;;  %v3203_v43 = vpop.f32.mrb[107].mxu1 }
 0x1cd   : > { %v4352_v48 = vadd.f32 %v3137_v4, %v4255_v18  ;;  %v3140_v55 = vadd.f32 %v3139_v50, %v3138_v5  ;;  %v3204_v61 = vadd.f32 %v3203_v43, %v3202_v47  ;;  %v4355_v2 = vadd.f32 %v3201_v38, %v4258_v13 }
 0x1cf   : > { %v4358_v12 = vadd.f32 %v3140_v55, %v4260_v22  ;;  %v4361_v21 = vadd.f32 %v3204_v61, %v4263_v28 }
 0x1d1   : > { %v3141_v11 = vpop.f32.mrb[108].mxu0  ;;  %v3205_v3 = vpop.f32.mrb[108].mxu1 }
 0x1d2   : > { %v3142_v30 = vpop.f32.mrb[109].mxu0  ;;  %v3206_v16 = vpop.f32.mrb[109].mxu1 }
 0x1d3   : > { %v3143_v7 = vadd.f32 %v3142_v30, %v3141_v11  ;;  %v3207_v20 = vadd.f32 %v3206_v16, %v3205_v3  ;;  %v3144_v18 = vpop.f32.mrb[110].mxu0  ;;  %v3208_v62 = vpop.f32.mrb[110].mxu1 }
 0x1d4   : > { %v3145_v54 = vpop.f32.mrb[111].mxu0  ;;  %v3209_v10 = vpop.f32.mrb[111].mxu1 }
 0x1d5   : > { %v4364_v13 = vadd.f32 %v3143_v7, %v4269_v45  ;;  %v3146_v8 = vadd.f32 %v3145_v54, %v3144_v18  ;;  %v3210_v22 = vadd.f32 %v3209_v10, %v3208_v62  ;;  %v4367_v37 = vadd.f32 %v3207_v20, %v4272_v53 }
 0x1d7   : > { %v4370_v28 = vadd.f32 %v3146_v8, %v4274_v56  ;;  %v4373_v19 = vadd.f32 %v3210_v22, %v4277_v44 }
 0x1d9   : > { %v3211_v9 = vpop.f32.mrb[112].mxu1  ;;  %v3301_v35 = vpop.f32.mrb[112].mxu0 }
 0x1da   : > { %v2344_v46 = vadd.f32 %v3301_v35, %v4295_v39  ;;  %v3212_v42 = vpop.f32.mrb[113].mxu1  ;;  %v2335_v34 = vpop.f32.mrb[113].mxu0 }
 0x1db   : > { %v3213_v45 = vadd.f32 %v3212_v42, %v3211_v9  ;;  %v2336_v53 = vadd.f32 %v2335_v34, %v4283_v17  ;;  %v3214_v56 = vpop.f32.mrb[114].mxu1  ;;  %v3302_v44 = vpop.f32.mrb[114].mxu0 }
 0x1dc   : > { %v2464_v40 = vmax.f32 %v2344_v46, 0.0  ;;  %v2347_v39 = vadd.f32 %v3302_v44, %v4301_v33  ;;  %v3215_v14 = vpop.f32.mrb[115].mxu1  ;;  %v2338_v36 = vpop.f32.mrb[115].mxu0 }
 0x1dd   : > { %v2462_v4 = vmax.f32 %v2336_v53, 0.0  ;;  %v3216_v38 = vadd.f32 %v3215_v14, %v3214_v56  ;;  %v2339_v5 = vadd.f32 %v2338_v36, %v4289_v24  ;;  %v4386_v47 = vadd.f32 %v3213_v45, %v4280_v58 }
 0x1de   : > { %2497 = vst.msk [vmem:[%s4380_s22 + $0x10] sm:$0xff] %vm2494_vm0, %v2464_v40  ;;  %v2465_v50 = vmax.f32 %v2347_v39, 0.0 }
 0x1df   : > { %2495 = vst.msk [vmem:[%s4380_s22] sm:$0xff] %vm2494_vm0, %v2462_v4  ;;  %v2463_v17 = vmax.f32 %v2339_v5, 0.0  ;;  %v4393_v43 = vadd.f32 %v3216_v38, %v4286_v1 }
 0x1e0   : > { %2498 = vst.msk [vmem:[%s4380_s22 + $0x18] sm:$0xff] %vm2494_vm0, %v2465_v50 }
 0x1e1   : > { %2496 = vst.msk [vmem:[%s4380_s22 + $0x8] sm:$0xff] %vm2494_vm0, %v2463_v17  ;;  %v3217_v33 = vpop.f32.mrb[116].mxu1  ;;  %v3305_v55 = vpop.f32.mrb[116].mxu0 }
 0x1e2   : > { %v2360_v24 = vadd.f32 %v3305_v55, %v4319_v31  ;;  %v3218_v58 = vpop.f32.mrb[117].mxu1  ;;  %v2351_v61 = vpop.f32.mrb[117].mxu0 }
 0x1e3   : > { %v3219_v11 = vadd.f32 %v3218_v58, %v3217_v33  ;;  %v2352_v3 = vadd.f32 %v2351_v61, %v4307_v59  ;;  %v3220_v30 = vpop.f32.mrb[118].mxu1  ;;  %v3306_v1 = vpop.f32.mrb[118].mxu0 }
 0x1e4   : > { %v2468_v16 = vmax.f32 %v2360_v24, 0.0  ;;  %v2363_v7 = vadd.f32 %v3306_v1, %v4325_v23  ;;  %v3221_v20 = vpop.f32.mrb[119].mxu1  ;;  %v2354_v18 = vpop.f32.mrb[119].mxu0 }
 0x1e5   : > { %v2466_v62 = vmax.f32 %v2352_v3, 0.0  ;;  %v3222_v54 = vadd.f32 %v3221_v20, %v3220_v30  ;;  %v2355_v10 = vadd.f32 %v2354_v18, %v4313_v63  ;;  %v2247_v31 = vadd.f32 %v3219_v11, %v4292_v51 }
 0x1e6   : > { %2501 = vst.msk [vmem:[%s4380_s22 + $0x30] sm:$0xff] %vm2494_vm0, %v2468_v16  ;;  %v2469_v8 = vmax.f32 %v2363_v7, 0.0 }
 0x1e7   : > { %2499 = vst.msk [vmem:[%s4380_s22 + $0x20] sm:$0xff] %vm2494_vm0, %v2466_v62  ;;  %v2467_v59 = vmax.f32 %v2355_v10, 0.0  ;;  %v2250_v22 = vadd.f32 %v3222_v54, %v4298_v32 }
 0x1e8   : > { %2502 = vst.msk [vmem:[%s4380_s22 + $0x38] sm:$0xff] %vm2494_vm0, %v2469_v8 }
 0x1e9   : > { %2500 = vst.msk [vmem:[%s4380_s22 + $0x28] sm:$0xff] %vm2494_vm0, %v2467_v59  ;;  %v3223_v23 = vpop.f32.mrb[120].mxu1  ;;  %v3309_v9 = vpop.f32.mrb[120].mxu0 }
 0x1ea   : > { %v2376_v35 = vadd.f32 %v3309_v9, %v4343_v29  ;;  %v3224_v63 = vpop.f32.mrb[121].mxu1  ;;  %v2367_v51 = vpop.f32.mrb[121].mxu0 }
 0x1eb   : > { %v3225_v46 = vadd.f32 %v3224_v63, %v3223_v23  ;;  %v2368_v42 = vadd.f32 %v2367_v51, %v4331_v57  ;;  %v3226_v34 = vpop.f32.mrb[122].mxu1  ;;  %v3310_v45 = vpop.f32.mrb[122].mxu0 }
 0x1ec   : > { %v2472_v32 = vmax.f32 %v2376_v35, 0.0  ;;  %v2379_v53 = vadd.f32 %v3310_v45, %v4349_v26  ;;  %v3227_v56 = vpop.f32.mrb[123].mxu1  ;;  %v2370_v44 = vpop.f32.mrb[123].mxu0 }
 0x1ed   : > { %v2470_v40 = vmax.f32 %v2368_v42, 0.0  ;;  %v3228_v39 = vadd.f32 %v3227_v56, %v3226_v34  ;;  %v2371_v14 = vadd.f32 %v2370_v44, %v4337_v0  ;;  %v2255_v29 = vadd.f32 %v3225_v46, %v4304_v52 }
 0x1ee   : > { %2505 = vst.msk [vmem:[%s4380_s22 + $0x50] sm:$0xff] %vm2494_vm0, %v2472_v32  ;;  %v2473_v36 = vmax.f32 %v2379_v53, 0.0 }
 0x1ef   : > { %2503 = vst.msk [vmem:[%s4380_s22 + $0x40] sm:$0xff] %vm2494_vm0, %v2470_v40  ;;  %v2471_v57 = vmax.f32 %v2371_v14, 0.0  ;;  %v4423_v4 = vadd.f32 %v3228_v39, %v4310_v15 }
 0x1f0   : > { %2506 = vst.msk [vmem:[%s4380_s22 + $0x58] sm:$0xff] %vm2494_vm0, %v2473_v36 }
 0x1f1   : > { %2504 = vst.msk [vmem:[%s4380_s22 + $0x48] sm:$0xff] %vm2494_vm0, %v2471_v57  ;;  %v3229_v26 = vpop.f32.mrb[124].mxu1  ;;  %v3313_v38 = vpop.f32.mrb[124].mxu0 }
 0x1f2   : > { %v2392_v0 = vadd.f32 %v3313_v38, %v4367_v37  ;;  %v3230_v5 = vpop.f32.mrb[125].mxu1  ;;  %v2383_v52 = vpop.f32.mrb[125].mxu0 }
 0x1f3   : > { %v3231_v50 = vadd.f32 %v3230_v5, %v3229_v26  ;;  %v2384_v17 = vadd.f32 %v2383_v52, %v4355_v2  ;;  %v3232_v33 = vpop.f32.mrb[126].mxu1  ;;  %v3314_v15 = vpop.f32.mrb[126].mxu0 }
 0x1f4   : > { %v2476_v55 = vmax.f32 %v2392_v0, 0.0  ;;  %v2395_v24 = vadd.f32 %v3314_v15, %v4373_v19  ;;  %v3233_v58 = vpop.f32.mrb[127].mxu1  ;;  %v2386_v61 = vpop.f32.mrb[127].mxu0 }
 0x1f5   : > { %v2474_v11 = vmax.f32 %v2384_v17, 0.0  ;;  %v3234_v3 = vadd.f32 %v3233_v58, %v3232_v33  ;;  %v2387_v30 = vadd.f32 %v2386_v61, %v4361_v21  ;;  %v2263_v37 = vadd.f32 %v3231_v50, %v4316_v41 }
 0x1f6   : > { %2509 = vst.msk [vmem:[%s4380_s22 + $0x70] sm:$0xff] %vm2494_vm0, %v2476_v55  ;;  %v2477_v1 = vmax.f32 %v2395_v24, 0.0 }
 0x1f7   : > { %2507 = vst.msk [vmem:[%s4380_s22 + $0x60] sm:$0xff] %vm2494_vm0, %v2474_v11  ;;  %v2475_v2 = vmax.f32 %v2387_v30, 0.0  ;;  %v2266_v16 = vadd.f32 %v3234_v3, %v4322_v25 }
 0x1f8   : > { %2510 = vst.msk [vmem:[%s4380_s22 + $0x78] sm:$0xff] %vm2494_vm0, %v2477_v1 }
 0x1f9   : > { %2508 = vst.msk [vmem:[%s4380_s22 + $0x68] sm:$0xff] %vm2494_vm0, %v2475_v2  ;;  %v3235_v19 = vpop.f32.mrb[128].mxu1  ;;  %v3317_v7 = vpop.f32.mrb[128].mxu0 }
 0x1fa   : > { %v2408_v20 = vadd.f32 %v3317_v7, %v2247_v31  ;;  %v3236_v18 = vpop.f32.mrb[129].mxu1  ;;  %v2399_v21 = vpop.f32.mrb[129].mxu0 }
 0x1fb   : > { %v3237_v41 = vadd.f32 %v3236_v18, %v3235_v19  ;;  %v2400_v62 = vadd.f32 %v2399_v21, %v4386_v47  ;;  %v3238_v54 = vpop.f32.mrb[130].mxu1  ;;  %v3318_v10 = vpop.f32.mrb[130].mxu0 }
 0x1fc   : > { %v2480_v8 = vmax.f32 %v2408_v20, 0.0  ;;  %v2411_v25 = vadd.f32 %v3318_v10, %v2250_v22  ;;  %v3239_v59 = vpop.f32.mrb[131].mxu1  ;;  %v2402_v23 = vpop.f32.mrb[131].mxu0 }
 0x1fd   : > { %v2478_v9 = vmax.f32 %v2400_v62, 0.0  ;;  %v3240_v35 = vadd.f32 %v3239_v59, %v3238_v54  ;;  %v2403_v63 = vadd.f32 %v2402_v23, %v4393_v43  ;;  %v2271_v31 = vadd.f32 %v3237_v41, %v4328_v6 }
 0x1fe   : > { %2513 = vst.msk [vmem:[%s4380_s22 + $0x90] sm:$0xff] %vm2494_vm0, %v2480_v8  ;;  %v2481_v51 = vmax.f32 %v2411_v25, 0.0 }
 0x1ff   : > { %2511 = vst.msk [vmem:[%s4380_s22 + $0x80] sm:$0xff] %vm2494_vm0, %v2478_v9  ;;  %v2479_v47 = vmax.f32 %v2403_v63, 0.0  ;;  %v2274_v46 = vadd.f32 %v3240_v35, %v4334_v49 }
 0x200   : > { %2514 = vst.msk [vmem:[%s4380_s22 + $0x98] sm:$0xff] %vm2494_vm0, %v2481_v51 }
 0x201   : > { %2512 = vst.msk [vmem:[%s4380_s22 + $0x88] sm:$0xff] %vm2494_vm0, %v2479_v47  ;;  %v3241_v22 = vpop.f32.mrb[132].mxu1  ;;  %v3321_v42 = vpop.f32.mrb[132].mxu0 }
 0x202   : > { %v2424_v34 = vadd.f32 %v3321_v42, %v2263_v37  ;;  %v3242_v45 = vpop.f32.mrb[133].mxu1  ;;  %v2415_v43 = vpop.f32.mrb[133].mxu0 }
 0x203   : > { %v3243_v6 = vadd.f32 %v3242_v45, %v3241_v22  ;;  %v2416_v32 = vadd.f32 %v2415_v43, %v2255_v29  ;;  %v3244_v53 = vpop.f32.mrb[134].mxu1  ;;  %v3322_v56 = vpop.f32.mrb[134].mxu0 }
 0x204   : > { %v2484_v44 = vmax.f32 %v2424_v34, 0.0  ;;  %v2427_v40 = vadd.f32 %v3322_v56, %v2266_v16  ;;  %v3245_v49 = vpop.f32.mrb[135].mxu1  ;;  %v2418_v39 = vpop.f32.mrb[135].mxu0 }
 0x205   : > { %v2482_v14 = vmax.f32 %v2416_v32, 0.0  ;;  %v3246_v36 = vadd.f32 %v3245_v49, %v3244_v53  ;;  %v2419_v57 = vadd.f32 %v2418_v39, %v4423_v4  ;;  %v2279_v26 = vadd.f32 %v3243_v6, %v4340_v27 }
 0x206   : > { %2517 = vst.msk [vmem:[%s4380_s22 + $0xb0] sm:$0xff] %vm2494_vm0, %v2484_v44  ;;  %v2485_v38 = vmax.f32 %v2427_v40, 0.0 }
 0x207   : > { %2515 = vst.msk [vmem:[%s4380_s22 + $0xa0] sm:$0xff] %vm2494_vm0, %v2482_v14  ;;  %v2483_v29 = vmax.f32 %v2419_v57, 0.0  ;;  %v2282_v0 = vadd.f32 %v3246_v36, %v4346_v60 }
 0x208   : > { %2518 = vst.msk [vmem:[%s4380_s22 + $0xb8] sm:$0xff] %vm2494_vm0, %v2485_v38 }
 0x209   : > { %2516 = vst.msk [vmem:[%s4380_s22 + $0xa8] sm:$0xff] %vm2494_vm0, %v2483_v29  ;;  %v3247_v5 = vpop.f32.mrb[136].mxu1  ;;  %v3325_v52 = vpop.f32.mrb[136].mxu0 }
 0x20a   : > { %v2440_v50 = vadd.f32 %v3325_v52, %v2279_v26  ;;  %v3248_v17 = vpop.f32.mrb[137].mxu1  ;;  %v2431_v4 = vpop.f32.mrb[137].mxu0 }
 0x20b   : > { %v3249_v27 = vadd.f32 %v3248_v17, %v3247_v5  ;;  %v2432_v33 = vadd.f32 %v2431_v4, %v2271_v31  ;;  %v3250_v15 = vpop.f32.mrb[138].mxu1  ;;  %v3326_v55 = vpop.f32.mrb[138].mxu0 }
 0x20c   : > { %v2488_v24 = vmax.f32 %v2440_v50, 0.0  ;;  %v2443_v58 = vadd.f32 %v3326_v55, %v2282_v0  ;;  %v3251_v60 = vpop.f32.mrb[139].mxu1  ;;  %v2434_v61 = vpop.f32.mrb[139].mxu0 }
 0x20d   : > { %v2486_v11 = vmax.f32 %v2432_v33, 0.0  ;;  %v3252_v3 = vadd.f32 %v3251_v60, %v3250_v15  ;;  %v2435_v30 = vadd.f32 %v2434_v61, %v2274_v46  ;;  %v2287_v37 = vadd.f32 %v3249_v27, %v4352_v48 }
 0x20e   : > { %2521 = vst.msk [vmem:[%s4380_s22 + $0xd0] sm:$0xff] %vm2494_vm0, %v2488_v24  ;;  %v2489_v1 = vmax.f32 %v2443_v58, 0.0 }
 0x20f   : > { %2519 = vst.msk [vmem:[%s4380_s22 + $0xc0] sm:$0xff] %vm2494_vm0, %v2486_v11  ;;  %v2487_v2 = vmax.f32 %v2435_v30, 0.0  ;;  %v2290_v16 = vadd.f32 %v3252_v3, %v4358_v12 }
 0x210   : > { %2522 = vst.msk [vmem:[%s4380_s22 + $0xd8] sm:$0xff] %vm2494_vm0, %v2489_v1 }
 0x211   : > { %2520 = vst.msk [vmem:[%s4380_s22 + $0xc8] sm:$0xff] %vm2494_vm0, %v2487_v2  ;;  %v3253_v19 = vpop.f32.mrb[140].mxu1  ;;  %v3329_v7 = vpop.f32.mrb[140].mxu0 }
 0x212   : > { %v3254_v20 = vpop.f32.mrb[141].mxu1  ;;  %v2447_v18 = vpop.f32.mrb[141].mxu0 }
 0x213   : > { %v3255_v21 = vadd.f32 %v3254_v20, %v3253_v19  ;;  %v2448_v48 = vadd.f32 %v2447_v18, %v2287_v37  ;;  %v3256_v41 = vpop.f32.mrb[142].mxu1  ;;  %v3330_v62 = vpop.f32.mrb[142].mxu0 }
 0x214   : > { %v3257_v54 = vpop.f32.mrb[143].mxu1  ;;  %v2450_v10 = vpop.f32.mrb[143].mxu0 }
 0x215   : > { %v2295_v12 = vadd.f32 %v3255_v21, %v4364_v13  ;;  %v2490_v8 = vmax.f32 %v2448_v48, 0.0  ;;  %v3258_v25 = vadd.f32 %v3257_v54, %v3256_v41  ;;  %v2451_v59 = vadd.f32 %v2450_v10, %v2290_v16 }
 0x217   : > { %v2456_v23 = vadd.f32 %v3329_v7, %v2295_v12  ;;  %2523 = vst.msk [vmem:[%s4380_s22 + $0xe0] sm:$0xff] %vm2494_vm0, %v2490_v8  ;;  %v2298_v9 = vadd.f32 %v3258_v25, %v4370_v28  ;;  %v2491_v35 = vmax.f32 %v2451_v59, 0.0 }
 0x219   : > { %v2492_v63 = vmax.f32 %v2456_v23, 0.0  ;;  %v2459_v31 = vadd.f32 %v3330_v62, %v2298_v9  ;;  %2524 = vst.msk [vmem:[%s4380_s22 + $0xe8] sm:$0xff] %vm2494_vm0, %v2491_v35 }
 0x21b   : > { %2525 = vst.msk [vmem:[%s4380_s22 + $0xf0] sm:$0xff] %vm2494_vm0, %v2492_v63  ;;  %v2493_v51 = vmax.f32 %v2459_v31, 0.0 }
 0x21d   : > { %2526 = vst.msk [vmem:[%s4380_s22 + $0xf8] sm:$0xff] %vm2494_vm0, %v2493_v51 }
 0x21e PF: > { %s13_s12 = sadd.s32 1, %s3642_s12  }
 0x21f   : > { %p10_p4 = scmp.ge.s32.totalorder %s13_s12, 4  }
 0x221   :  { %12 = sbr.rel (!%p10_p4) target bundleno = 1 (0x1), region = 62 }

// kernel: cis_resnet_forward.15
= control target key start
LH: loop header
LB: loop body
LE: loop exit
PB: predicated region body
PF: predicated region fallthrough
CT: control target
= control target key end

     0   :  { %v205_v27 = vlaneseq  ;;  %v1548_v35 = vmov 1966171168   ;;  %vm1550_vm0 = vmmov 0   ;;  %s1916_s0 = inlined_call_operand.vmem [shape: bf16[2,1344], index: 0, kind: input, shape index: {}]   ;;  %s1917_s1 = inlined_call_operand.vmem [shape: bf16[1344,128], index: 1, kind: input, shape index: {}]   ;;  %s1918_s2 = inlined_call_operand.vmem [shape: f32[1,128], index: 2, kind: input, shape index: {}]   ;;  %s1919_s3 = inlined_call_operand.vmem [shape: bf16[128,2], index: 3, kind: input, shape index: {}]   ;;  %s1920_s4 = inlined_call_operand.vmem [shape: f32[1,2], index: 4, kind: input, shape index: {}]   ;;  %s1921_s5 = inlined_call_operand.hbm [shape: f32[2,2], index: 5, kind: output, shape index: {}]  }
   0x1   :  { %v1427_v0 = vld [vmem:[%s1917_s1 + $0x40] sm:$0xff]   ;;  %v1431_v4 = vld [vmem:[%s1917_s1 + $0x48] sm:$0xff]   ;;  %v1435_v8 = vld [vmem:[%s1917_s1 + $0x50] sm:$0xff]   ;;  %v203_v36 = vunpack.c.l.s4 %v1548_v35 }
   0x2   :  { %v1428_v1 = vld [vmem:[%s1917_s1] sm:$0xff]   ;;  %1267 = vmatprep.subr.bf16.mxu0 %v1427_v0  ;;  %v1432_v5 = vld [vmem:[%s1917_s1 + $0x8] sm:$0xff]   ;;  %v1436_v9 = vld [vmem:[%s1917_s1 + $0x10] sm:$0xff]   ;;  %v206_v32 = vshrl.u32 %v205_v27, 7 }
   0x3   :  { %v1429_v2 = vld [vmem:[%s1917_s1 + $0xc0] sm:$0xff]   ;;  %1268 = vmatpush3.bf16.msra.mxu0 %v1428_v1  ;;  %v1433_v6 = vld [vmem:[%s1917_s1 + $0xc8] sm:$0xff]   ;;  %v1437_v10 = vld [vmem:[%s1917_s1 + $0xd0] sm:$0xff]   ;;  %v204_v39 = vunpack.c.0.s8 %v203_v36 }
   0x4   :  { %v1430_v3 = vld [vmem:[%s1917_s1 + $0x80] sm:$0xff]   ;;  %1289 = vmatprep.subr.bf16.mxu1 %v1429_v2  ;;  %1269 = vmatprep.subr.bf16.mxu0 %v1431_v4  ;;  %v1434_v7 = vld [vmem:[%s1917_s1 + $0x88] sm:$0xff]   ;;  %v1438_v11 = vld [vmem:[%s1917_s1 + $0x90] sm:$0xff]  }
   0x5   :  { %1290 = vmatpush3.bf16.msra.mxu1 %v1430_v3  ;;  %v1439_v12 = vld [vmem:[%s1917_s1 + $0x58] sm:$0xff]   ;;  %v1443_v16 = vld [vmem:[%s1917_s1 + $0x60] sm:$0xff]   ;;  %v1447_v20 = vld [vmem:[%s1917_s1 + $0x68] sm:$0xff]   ;;  %v1687_v41 = vsub.s32 %v204_v39, %v206_v32 }
   0x6   :  { %1291 = vmatprep.subr.bf16.mxu1 %v1433_v6  ;;  %v1440_v13 = vld [vmem:[%s1917_s1 + $0x18] sm:$0xff]   ;;  %v1444_v17 = vld [vmem:[%s1917_s1 + $0x20] sm:$0xff]   ;;  %v1448_v21 = vld [vmem:[%s1917_s1 + $0x28] sm:$0xff]  }
   0x7   :  { %1270 = vmatpush3.bf16.msra.mxu0 %v1432_v5  ;;  %v1441_v14 = vld [vmem:[%s1917_s1 + $0xd8] sm:$0xff]   ;;  %v1445_v18 = vld [vmem:[%s1917_s1 + $0xe0] sm:$0xff]   ;;  %v1449_v22 = vld [vmem:[%s1917_s1 + $0xe8] sm:$0xff]  }
   0x8   :  { %1271 = vmatprep.subr.bf16.mxu0 %v1435_v8  ;;  %v1442_v15 = vld [vmem:[%s1917_s1 + $0x98] sm:$0xff]   ;;  %v1446_v19 = vld [vmem:[%s1917_s1 + $0xa0] sm:$0xff]   ;;  %v1450_v23 = vld [vmem:[%s1917_s1 + $0xa8] sm:$0xff]  }
   0x9   :  { %1292 = vmatpush3.bf16.msra.mxu1 %v1434_v7  ;;  %v1451_v24 = vld [vmem:[%s1917_s1 + $0x70] sm:$0xff]   ;;  %v1455_v29 = vld [vmem:[%s1917_s1 + $0x78] sm:$0xff]   ;;  %v22_v33 = vld [vmem:[%s1916_s0] sm:$0xff] }
   0xa   :  { %1293 = vmatprep.subr.bf16.mxu1 %v1437_v10  ;;  %v1452_v25 = vld [vmem:[%s1917_s1 + $0x30] sm:$0xff]   ;;  %v1456_v30 = vld [vmem:[%s1917_s1 + $0x38] sm:$0xff]   ;;  %v1460_v37 = vld [vmem:[%s1917_s1 + $0x140] sm:$0xff]   ;;  %v201_v38 = vcombine.high %v22_v33, %v22_v33  ;;  %v208_v42 = vrot.slane %v22_v33, %v1687_v41 }
   0xb   :  { %1272 = vmatpush3.bf16.msra.mxu0 %v1436_v9  ;;  %v1453_v26 = vld [vmem:[%s1917_s1 + $0xf0] sm:$0xff]   ;;  %v1457_v31 = vld [vmem:[%s1917_s1 + $0xf8] sm:$0xff]   ;;  %v1462_v40 = vld [vmem:[%s1917_s1 + $0x1c0] sm:$0xff]  }
   0xc   :  { %1273 = vmatprep.subr.bf16.mxu0 %v1439_v12  ;;  %v1454_v28 = vld [vmem:[%s1917_s1 + $0xb0] sm:$0xff]   ;;  %v1459_v34 = vld [vmem:[%s1917_s1 + $0xb8] sm:$0xff]   ;;  %v1691_v43 = vrot.slane %v201_v38, %v1687_v41  ;;  %v216_v44 = vcombine.high %v208_v42, %v208_v42  ;;  %v224_v45 = vrot.slane %v208_v42, %v1687_v41  ;;  %v1461_v48 = vld [vmem:[%s1917_s1 + $0x100] sm:$0xff]  }
   0xd   :  { %1294 = vmatpush3.bf16.msra.mxu1 %v1438_v11  ;;  %v1464_v51 = vld [vmem:[%s1917_s1 + $0x148] sm:$0xff]   ;;  %v1463_v53 = vld [vmem:[%s1917_s1 + $0x180] sm:$0xff]   ;;  %v1468_v57 = vld [vmem:[%s1917_s1 + $0x150] sm:$0xff]  }
   0xe   :  { %1295 = vmatprep.subr.bf16.mxu1 %v1441_v14  ;;  %v217_v46 = vcombine.high %v1691_v43, %v1691_v43  ;;  %v238_v47 = vrot.slane %v216_v44, %v1687_v41  ;;  %v246_v50 = vcombine.high %v224_v45, %v224_v45  ;;  %v1466_v54 = vld [vmem:[%s1917_s1 + $0x1c8] sm:$0xff]   ;;  %v1470_v59 = vld [vmem:[%s1917_s1 + $0x1d0] sm:$0xff]   ;;  %v1472_v61 = vld [vmem:[%s1917_s1 + $0x158] sm:$0xff]  }
   0xf   :  { %1274 = vmatpush3.bf16.msra.mxu0 %v1440_v13  ;;  %v1465_v56 = vld [vmem:[%s1917_s1 + $0x108] sm:$0xff]   ;;  %v1469_v60 = vld [vmem:[%s1917_s1 + $0x110] sm:$0xff]   ;;  %v1474_v63 = vld [vmem:[%s1917_s1 + $0x1d8] sm:$0xff]  }
  0x10   :  { %1275 = vmatprep.subr.bf16.mxu0 %v1443_v16  ;;  %v245_v49 = vrot.slane %v217_v46, %v1687_v41  ;;  %823 = vmatprep.mubr.bf16.mxu0 %v238_v47  ;;  %v248_v52 = vcombine.high %v238_v47, %v238_v47  ;;  %v1467_v58 = vld [vmem:[%s1917_s1 + $0x188] sm:$0xff]   ;;  %v1471_v62 = vld [vmem:[%s1917_s1 + $0x190] sm:$0xff]   ;;  %v1473_v0 = vld [vmem:[%s1917_s1 + $0x118] sm:$0xff]  }
  0x11   :  { %1296 = vmatpush3.bf16.msra.mxu1 %v1442_v15  ;;  %v1476_v1 = vld [vmem:[%s1917_s1 + $0x160] sm:$0xff]   ;;  %v1475_v2 = vld [vmem:[%s1917_s1 + $0x198] sm:$0xff]   ;;  %v1480_v5 = vld [vmem:[%s1917_s1 + $0x168] sm:$0xff]  }
  0x12   :  { %1297 = vmatprep.subr.bf16.mxu1 %v1445_v18  ;;  %v249_v55 = vcombine.high %v245_v49, %v245_v49  ;;  %863 = vmatprep.mubr.bf16.mxu1 %v248_v52  ;;  %v1478_v3 = vld [vmem:[%s1917_s1 + $0x1e0] sm:$0xff]   ;;  %v1482_v7 = vld [vmem:[%s1917_s1 + $0x1e8] sm:$0xff]   ;;  %v1484_v9 = vld [vmem:[%s1917_s1 + $0x170] sm:$0xff]  }
  0x13   :  { %1276 = vmatpush3.bf16.msra.mxu0 %v1444_v17  ;;  %v1477_v4 = vld [vmem:[%s1917_s1 + $0x120] sm:$0xff]   ;;  %v1481_v8 = vld [vmem:[%s1917_s1 + $0x128] sm:$0xff]   ;;  %v1486_v11 = vld [vmem:[%s1917_s1 + $0x1f0] sm:$0xff]   ;;  %v231_v17 = vrot.slane %v1691_v43, %v1687_v41 }
  0x14   :  { %1277 = vmatprep.subr.bf16.mxu0 %v1447_v20  ;;  %v1479_v6 = vld [vmem:[%s1917_s1 + $0x1a0] sm:$0xff]   ;;  %v1483_v10 = vld [vmem:[%s1917_s1 + $0x1a8] sm:$0xff]   ;;  %v1485_v12 = vld [vmem:[%s1917_s1 + $0x130] sm:$0xff]  }
  0x15   :  { %1298 = vmatpush3.bf16.msra.mxu1 %v1446_v19  ;;  %v1488_v13 = vld [vmem:[%s1917_s1 + $0x178] sm:$0xff]   ;;  %v1487_v14 = vld [vmem:[%s1917_s1 + $0x1b0] sm:$0xff]   ;;  %v1492_v18 = vld [vmem:[%s1917_s1 + $0x240] sm:$0xff]  }
  0x16   :  { %1299 = vmatprep.subr.bf16.mxu1 %v1449_v22  ;;  %v1490_v15 = vld [vmem:[%s1917_s1 + $0x1f8] sm:$0xff]   ;;  %v1493_v20 = vld [vmem:[%s1917_s1 + $0x200] sm:$0xff]   ;;  %v1494_v22 = vld [vmem:[%s1917_s1 + $0x248] sm:$0xff]  }
  0x17   :  { %1278 = vmatpush3.bf16.msra.mxu0 %v1448_v21  ;;  %v1489_v16 = vld [vmem:[%s1917_s1 + $0x138] sm:$0xff]   ;;  %v247_v21 = vcombine.high %v231_v17, %v231_v17  ;;  %v1505_v27 = vld [vmem:[%s1917_s1 + $0x288] sm:$0xff]   ;;  %v1501_v38 = vld [vmem:[%s1917_s1 + $0x220] sm:$0xff]  }
  0x18   :  { %1279 = vmatprep.subr.bf16.mxu0 %v1451_v24  ;;  %v1491_v19 = vld [vmem:[%s1917_s1 + $0x1b8] sm:$0xff]   ;;  %v1549_v24 = vmov 0.0  }
  0x19   :  { %1300 = vmatpush3.bf16.msra.mxu1 %v1450_v23  ;;  %v1502_v23 = vld [vmem:[%s1917_s1 + $0x280] sm:$0xff]   ;;  %v1499_v32 = vld [vmem:[%s1917_s1 + $0x218] sm:$0xff]  }
  0x1a   :  { %1301 = vmatprep.subr.bf16.mxu1 %v1453_v26  ;;  %v1496_v26 = vld [vmem:[%s1917_s1 + $0x250] sm:$0xff]   ;;  %v1511_v36 = vld [vmem:[%s1917_s1 + $0x298] sm:$0xff]  }
  0x1b   :  { %1280 = vmatpush3.bf16.msra.mxu0 %v1452_v25  ;;  %v1495_v25 = vld [vmem:[%s1917_s1 + $0x208] sm:$0xff]  }
  0x1c   :  { %1281 = vmatprep.subr.bf16.mxu0 %v1455_v29  ;;  %v1498_v29 = vld [vmem:[%s1917_s1 + $0x258] sm:$0xff]  }
  0x1d   :  { %1302 = vmatpush3.bf16.msra.mxu1 %v1454_v28  ;;  %v1497_v28 = vld [vmem:[%s1917_s1 + $0x210] sm:$0xff]  }
  0x1e   :  { %1303 = vmatprep.subr.bf16.mxu1 %v1457_v31  ;;  %v1172_v31 = vld.sshfl [vmem:[%s1916_s0 + $0x8] sm:$0x13 pattern:$0x75316420] }
  0x1f   :  { %1282 = vmatpush3.bf16.msra.mxu0 %v1456_v30  ;;  %v1508_v30 = vld [vmem:[%s1917_s1 + $0x290] sm:$0xff]   ;;  %v257_v33 = vcombine.high %v1172_v31, %v1172_v31 }
  0x20   :  { %1311 = vmatprep.subr.bf16.mxu0 %v1460_v37  ;;  %v264_v37 = vrot.slane %v1172_v31, %v1687_v41 }
  0x21   :  { %1304 = vmatpush3.bf16.msra.mxu1 %v1459_v34  ;;  %v1500_v34 = vld [vmem:[%s1917_s1 + $0x260] sm:$0xff]   ;;  %v271_v35 = vrot.slane %v257_v33, %v1687_v41 }
  0x22   :  { %1333 = vmatprep.subr.bf16.mxu1 %v1462_v40  ;;  %824 = vmatmul.mubr.bf16.vlgmr.msra.gmra.mrb[0].mxu0 %v224_v45 }
  0x23   :  { %1312 = vmatpush3.bf16.msra.mxu0 %v1461_v48  ;;  %903 = vmatprep.mubr.bf16.mxu0 %v245_v49 }
  0x24   :  { %864 = vmatmul.mubr.bf16.vlgmr.msra.gmra.mrb[0].mxu1 %v246_v50  ;;  %1313 = vmatprep.subr.bf16.mxu0 %v1464_v51 }
  0x25   :  { %1334 = vmatpush3.bf16.msra.mxu1 %v1463_v53  ;;  %943 = vmatprep.mubr.bf16.mxu1 %v249_v55 }
  0x26   :  { %1335 = vmatprep.subr.bf16.mxu1 %v1466_v54 }
  0x27   :  { %1314 = vmatpush3.bf16.msra.mxu0 %v1465_v56 }
  0x28   :  { %1315 = vmatprep.subr.bf16.mxu0 %v1468_v57 }
  0x29   :  { %1336 = vmatpush3.bf16.msra.mxu1 %v1467_v58 }
  0x2a   :  { %1337 = vmatprep.subr.bf16.mxu1 %v1470_v59 }
  0x2b   :  { %1316 = vmatpush3.bf16.msra.mxu0 %v1469_v60 }
  0x2c   :  { %1317 = vmatprep.subr.bf16.mxu0 %v1472_v61 }
  0x2d   :  { %1338 = vmatpush3.bf16.msra.mxu1 %v1471_v62 }
  0x2e   :  { %1339 = vmatprep.subr.bf16.mxu1 %v1474_v63 }
  0x2f   :  { %1318 = vmatpush3.bf16.msra.mxu0 %v1473_v0 }
  0x30   :  { %1319 = vmatprep.subr.bf16.mxu0 %v1476_v1 }
  0x31   :  { %1340 = vmatpush3.bf16.msra.mxu1 %v1475_v2 }
  0x32   :  { %1341 = vmatprep.subr.bf16.mxu1 %v1478_v3 }
  0x33   :  { %1320 = vmatpush3.bf16.msra.mxu0 %v1477_v4 }
  0x34   :  { %1321 = vmatprep.subr.bf16.mxu0 %v1480_v5 }
  0x35   :  { %1342 = vmatpush3.bf16.msra.mxu1 %v1479_v6 }
  0x36   :  { %1343 = vmatprep.subr.bf16.mxu1 %v1482_v7 }
  0x37   :  { %1322 = vmatpush3.bf16.msra.mxu0 %v1481_v8 }
  0x38   :  { %1323 = vmatprep.subr.bf16.mxu0 %v1484_v9 }
  0x39   :  { %1344 = vmatpush3.bf16.msra.mxu1 %v1483_v10 }
  0x3a   :  { %1345 = vmatprep.subr.bf16.mxu1 %v1486_v11 }
  0x3b   :  { %1324 = vmatpush3.bf16.msra.mxu0 %v1485_v12 }
  0x3c   :  { %1325 = vmatprep.subr.bf16.mxu0 %v1488_v13 }
  0x3d   :  { %1346 = vmatpush3.bf16.msra.mxu1 %v1487_v14 }
  0x3e   :  { %1347 = vmatprep.subr.bf16.mxu1 %v1490_v15 }
  0x3f   :  { %1326 = vmatpush3.bf16.msra.mxu0 %v1489_v16 }
  0x40   :  { %1355 = vmatprep.subr.bf16.mxu0 %v1492_v18 }
  0x41   :  { %1348 = vmatpush3.bf16.msra.mxu1 %v1491_v19 }
  0x42   :  { %904 = vmatmul.mubr.bf16.vlgmr.msra.gmra.mrb[4].mxu0 %v231_v17  ;;  %1391 = vmatprep.subr.bf16.mxu1 %v1549_v24 }
  0x43   :  { %1356 = vmatpush3.bf16.msra.mxu0 %v1493_v20  ;;  %983 = vmatprep.mubr.bf16.mxu0 %v271_v35 }
  0x44   :  { %944 = vmatmul.mubr.bf16.vlgmr.msra.gmra.mrb[4].mxu1 %v247_v21  ;;  %1357 = vmatprep.subr.bf16.mxu0 %v1494_v22 }
  0x45   :  { %1392 = vmatpush3.bf16.msra.mxu1 %v1502_v23  ;;  %1399 = vmatprep.mubr.msk.bf16.mxu1 %vm1550_vm0, %v1549_v24 }
  0x46   :  { %1393 = vmatprep.subr.bf16.mxu1 %v1549_v24 }
  0x47   :  { %1358 = vmatpush3.bf16.msra.mxu0 %v1495_v25 }
  0x48   :  { %1359 = vmatprep.subr.bf16.mxu0 %v1496_v26 }
  0x49   :  { %1394 = vmatpush3.bf16.msra.mxu1 %v1505_v27 }
  0x4a   :  { %1395 = vmatprep.subr.bf16.mxu1 %v1549_v24 }
  0x4b   :  { %1360 = vmatpush3.bf16.msra.mxu0 %v1497_v28 }
  0x4c   :  { %1361 = vmatprep.subr.bf16.mxu0 %v1498_v29 }
  0x4d   :  { %1396 = vmatpush3.bf16.msra.mxu1 %v1508_v30 }
  0x4e   :  { %1397 = vmatprep.subr.bf16.mxu1 %v1549_v24 }
  0x4f   :  { %1362 = vmatpush3.bf16.msra.mxu0 %v1499_v32 }
  0x50   :  { %10 = vsyncpa [#allocation3], 0  ;;  %1363 = vmatprep.subr.bf16.mxu0 %v1500_v34  ;;  %v1503_v39 = vld [vmem:[%s1917_s1 + $0x268] sm:$0xff]   ;;  %v272_v40 = vcombine.high %v264_v37, %v264_v37  ;;  %vm787_vm1 = vcmask 523264   ;;  %v1506_v42 = vld [vmem:[%s1917_s1 + $0x270] sm:$0xff]   ;;  %vm1144_vm2 = vcmask 9216  }
  0x51   :  { %1398 = vmatpush3.bf16.msra.mxu1 %v1511_v36  ;;  %v1504_v41 = vld [vmem:[%s1917_s1 + $0x228] sm:$0xff]   ;;  %v1507_v43 = vld [vmem:[%s1917_s1 + $0x230] sm:$0xff]   ;;  %v1509_v44 = vld [vmem:[%s1917_s1 + $0x278] sm:$0xff]  }
  0x52   :  { %1403 = vmatprep.subr.bf16.mxu1 %v1549_v24  ;;  %v1510_v45 = vld [vmem:[%s1917_s1 + $0x238] sm:$0xff]   ;;  %v1512_v46 = vld [vmem:[%s1919_s3] sm:$0xff]   ;;  %v1513_v47 = vld [vmem:[%s1919_s3 + $0x8] sm:$0xff]  }
  0x53   :  { %1364 = vmatpush3.bf16.msra.mxu0 %v1501_v38  ;;  %v1514_v48 = vld [vmem:[%s1919_s3 + $0x10] sm:$0xff]   ;;  %v1515_v49 = vld [vmem:[%s1919_s3 + $0x18] sm:$0xff]   ;;  %v1516_v50 = vld [vmem:[%s1919_s3 + $0x20] sm:$0xff]  }
  0x54   :  { %1365 = vmatprep.subr.bf16.mxu0 %v1503_v39  ;;  %1400 = vmatmul.mubr.msk.bf16.vlgmr.msra.gmra.mrb[8].mxu1 %vm787_vm1, %v272_v40  ;;  %v1517_v51 = vld [vmem:[%s1919_s3 + $0x28] sm:$0xff]   ;;  %v1518_v52 = vld [vmem:[%s1919_s3 + $0x30] sm:$0xff]   ;;  %v1519_v53 = vld [vmem:[%s1919_s3 + $0x38] sm:$0xff]  }
  0x55   :  { %1419 = vmatprep.mubr.msk.bf16.mxu1 %vm1550_vm0, %v1549_v24  ;;  %1404 = vmatpush3.bf16.msra.mxu1 %v1512_v46  ;;  %v1171_v55 = vld [vmem:[%s1918_s2] ss:$0 sm:$0xff] }
  0x56   :  { %1405 = vmatprep.subr.bf16.mxu1 %v1549_v24  ;;  %v1258_v28 = vld [vmem:[%s1920_s4] ss:$0 sm:$0xff]  ;;  %s1551_s4 = smov [#allocation2]  }
  0x57   :  { %1366 = vmatpush3.bf16.msra.mxu0 %v1504_v41  ;;  %s1163_s30 = sshll.u32 %s1551_s4, 4  ;;  %s1164_s30 = int_to_ptr.vmem [resolvable:$true] %s1163_s30 }
  0x58   :  { %1367 = vmatprep.subr.bf16.mxu0 %v1506_v42  ;;  %s1524_s6 = scalar_lea.vmem %s1164_s30, 32  ;;  %p1529_p1 = scmp.lt.s32.totalorder %s1164_s30, %s1164_s30 }
  0x59   :  { %1406 = vmatpush3.bf16.msra.mxu1 %v1513_v47  ;;  %p1525_p0 = scmp.ne.s32.totalorder %s1164_s30, %s1524_s6  ;;  %p1530_p2 = scmp.lt.s32.totalorder %s1524_s6, %s1524_s6 }
  0x5a   :  { %1407 = vmatprep.subr.bf16.mxu1 %v1549_v24 }
  0x5b   :  { %1368 = vmatpush3.bf16.msra.mxu0 %v1507_v43  ;;  %p1531_p3 = por %p1530_p2, %p1529_p1 }
  0x5c   :  { %1369 = vmatprep.subr.bf16.mxu0 %v1509_v44 }
  0x5d   :  { %1408 = vmatpush3.bf16.msra.mxu1 %v1514_v48  ;;  %p1532_p4 = pnand %p1531_p3, %p1525_p0 }
  0x5e   :  { %1409 = vmatprep.subr.bf16.mxu1 %v1549_v24 }
  0x5f   :  { %1370 = vmatpush3.bf16.msra.mxu0 %v1510_v45 }
  0x61   :  { %1410 = vmatpush3.bf16.msra.mxu1 %v1515_v49 }
  0x62   :  { %984 = vmatmul.mubr.bf16.vlgmr.msra.gmra.mrb[8].mxu0 %v264_v37  ;;  %1411 = vmatprep.subr.bf16.mxu1 %v1549_v24 }
  0x65   :  { %1412 = vmatpush3.bf16.msra.mxu1 %v1516_v50 }
  0x66   :  { %1413 = vmatprep.subr.bf16.mxu1 %v1549_v24 }
  0x69   :  { %1414 = vmatpush3.bf16.msra.mxu1 %v1517_v51 }
  0x6a   :  { %1415 = vmatprep.subr.bf16.mxu1 %v1549_v24 }
  0x6d   :  { %1416 = vmatpush3.bf16.msra.mxu1 %v1518_v52 }
  0x6e   :  { %1417 = vmatprep.subr.bf16.mxu1 %v1549_v24 }
  0x71   :  { %1418 = vmatpush3.bf16.msra.mxu1 %v1519_v53 }
  0xf5   :  { %v1283_v54 = vpop.f32.mrb[0].mxu0 }
  0xf6   :  { %v1284_v56 = vpop.f32.mrb[1].mxu0 }
  0xf7   :  { %v1285_v57 = vadd.f32 %v1284_v56, %v1283_v54  ;;  %v1286_v58 = vpop.f32.mrb[2].mxu0  ;;  %v1305_v59 = vpop.f32.mrb[0].mxu1 }
  0xf8   :  { %v1287_v60 = vpop.f32.mrb[3].mxu0  ;;  %v1306_v61 = vpop.f32.mrb[1].mxu1 }
  0xf9   :  { %v826_v62 = vadd.f32 %v1285_v57, %v1171_v55  ;;  %v1307_v63 = vadd.f32 %v1306_v61, %v1305_v59  ;;  %v1308_v0 = vpop.f32.mrb[2].mxu1 }
  0xfa   :  { %v1309_v1 = vpop.f32.mrb[3].mxu1 }
  0xfb   :  { %v866_v2 = vadd.f32 %v1307_v63, %v826_v62 }
 0x115   :  { %v1327_v3 = vpop.f32.mrb[4].mxu0 }
 0x116   :  { %v1328_v4 = vpop.f32.mrb[5].mxu0 }
 0x117   :  { %v1329_v5 = vadd.f32 %v1328_v4, %v1327_v3  ;;  %v1330_v6 = vpop.f32.mrb[6].mxu0  ;;  %v1349_v7 = vpop.f32.mrb[4].mxu1 }
 0x118   :  { %v1331_v8 = vpop.f32.mrb[7].mxu0  ;;  %v1350_v9 = vpop.f32.mrb[5].mxu1 }
 0x119   :  { %v906_v10 = vadd.f32 %v1329_v5, %v866_v2  ;;  %v1351_v11 = vadd.f32 %v1350_v9, %v1349_v7  ;;  %v1352_v12 = vpop.f32.mrb[6].mxu1 }
 0x11a   :  { %v1353_v13 = vpop.f32.mrb[7].mxu1 }
 0x11b   :  { %v946_v14 = vadd.f32 %v1351_v11, %v906_v10 }
 0x127   :  { %v1025_v15 = vpop.f32.mrb[8].mxu1 }
 0x128   :  { %v1401_v16 = vpop.f32.mrb[9].mxu1 }
 0x129   :  { %v1028_v17 = vpop.f32.mrb[10].mxu1 }
 0x12a   :  { %v1402_v18 = vpop.f32.mrb[11].mxu1 }
 0x135   :  { %v1371_v19 = vpop.f32.mrb[8].mxu0 }
 0x136   :  { %v1372_v20 = vpop.f32.mrb[9].mxu0 }
 0x137   :  { %v1373_v21 = vadd.f32 %v1372_v20, %v1371_v19  ;;  %v1374_v22 = vpop.f32.mrb[10].mxu0 }
 0x138   :  { %v1375_v23 = vpop.f32.mrb[11].mxu0 }
 0x139   :  { %v986_v24 = vadd.f32 %v1373_v21, %v946_v14 }
 0x13b   :  { %v1026_v25 = vadd.f32 %v1025_v15, %v986_v24 }
 0x13d   :  { %v1031_v26 = vmax.f32 %v1026_v25, 0.0 }
 0x13f   :  { %v1032_v27 = vpack.c.bf16 %v1031_v26, %v1031_v26 }
 0x141   :  { %1420 = vmatmul.mubr.bf16.vlgmr.msra.gmra.mrb[12].mxu1 %v1032_v27 }
 0x214   :  { %v1138_v29 = vpop.f32.mrb[12].mxu1 }
 0x215   :  { %v1139_v30 = vadd.f32 %v1258_v28, %v1138_v29  ;;  %v1421_v31 = vpop.f32.mrb[13].mxu1 }
 0x216   :  { %v1141_v32 = vpop.f32.mrb[14].mxu1 }
 0x217   :  { %v1422_v33 = vpop.f32.mrb[15].mxu1  ;;  %v1145_v34 = vsel %vm1144_vm2, %v1139_v30, -inf }
 0x218   :  { %1146 = vmax.xlane.f32.xlu0 %v1145_v34 }
 0x2a5   :  { %v1147_v35 = vpop.xlane.xlu0 %1146 }
 0x2a6   :  { %v1148_v36 = vsub.f32 %v1139_v30, %v1147_v35 }
 0x2a8   :  { %v1149_v37 = vmul.f32 1.442695, %v1148_v36 }
 0x2aa   :  { %1520 = vpow2.f32 %v1149_v37 }
 0x2b4   :  { %v1521_v38 = vpop.eup %1520 }
 0x2b5   :  { %v1151_v39 = vsel %vm1144_vm2, %v1521_v38, 0.0 }
 0x2b6   :  { %1152 = vadd.xlane.f32.xlu0 %v1151_v39 }
 0x343   :  { %v1153_v40 = vpop.xlane.xlu0 %1152 }
 0x344   :  { %1522 = vrcp.f32 %v1153_v40 }
 0x34e   :  { %v1523_v41 = vpop.eup %1522 }
 0x34f   :  { %v1155_v42 = vmul.f32 %v1523_v41, %v1521_v38 }
 0x351   :  { %1156 = vst.msk [vmem:[#allocation2] sm:$0x3] %vm1144_vm2, %v1155_v42 }
 0x352   :  { %1535 = shalt.err (!%p1532_p4)
}
 0x353   :  { %s1536_s9 = scalar_lea.hbm %s1921_s5, 32 }
 0x354   :  { %p1537_p5 = scmp.ne.s32.totalorder %s1921_s5, %s1536_s9  ;;  %p1540_p6 = scmp.lt.u32.totalorder %s1536_s9, %s1921_s5 }
 0x356   :  { %p1542_p7 = pnand %p1540_p6, %p1537_p5 }
 0x358   :  { %1545 = shalt.err (!%p1542_p7)
}
 0x359   :  { %1166 = dma.vmem_to_hbm [thread:$0]  %s1164_s30, 32, %s1921_s5, [#allocation3]  }
 0x35a   :  { %1546 = dma.done.wait [#allocation3], 32  }
 0x35b   :  { %1547 = vsyncadd [#allocation3], 4294967264 }
 0x35c   :  { %1170 = vsyncpa [#allocation3], 1 }

</bundles_post_ra>
